<compile_context>
chip_gen: v7x
topology: tpu7x:2x2x1
jax: 0.10.0
libtpu: 0.0.40
codegen_flags: <defaults>
</compile_context>

<pallas_src>
import jax
import jax.numpy as jnp
from jax import lax
from jax.experimental import pallas as pl
from jax.experimental.pallas import tpu as pltpu

BN_EPS = 1e-5

_VMEM_LIMIT_CACHE = []


def _vmem_limit_bytes():
    """Per-generation VMEM budget: ~96 MiB on v5e/v6e (128 MiB physical), 48 MiB on v7x."""
    if not _VMEM_LIMIT_CACHE:
        try:
            cap = int(pltpu.get_tpu_info().vmem_capacity_bytes)
            limit = min(cap * 3 // 4, 100 * 1024 * 1024)
        except Exception:
            limit = 64 * 1024 * 1024
        _VMEM_LIMIT_CACHE.append(int(limit))
    return _VMEM_LIMIT_CACHE[0]


# ----------------------------------------------------------------------------
# Fused per-level kernel: ConvT(2x2, s2) + concat + [Conv3x3 + BN + ReLU] x 2.
# One batch element per grid step; all intermediates stay in VMEM.
# ----------------------------------------------------------------------------
def _decoder_level_kernel(x_ref, f_ref, wt_ref, bt_ref,
                          w1_ref, s1_ref, b1_ref,
                          w2_ref, s2_ref, b2_ref,
                          o_ref, buf_ref):
    H2, Wh = o_ref.shape[1], o_ref.shape[2]      # full-res rows, packed (half) cols
    H, W = H2 // 2, Wh
    Cup = wt_ref.shape[1] // 4
    Cf2 = f_ref.shape[3]
    Cf = Cf2 // 2
    Cc2 = w1_ref.shape[0] // 9                   # 2 * Ccat (packed concat channels)
    Ccat = Cc2 // 2
    Cm2 = s1_ref.shape[1]                        # 2 * Cmid
    Co2 = s2_ref.shape[1]                        # 2 * Cout
    Cbuf = buf_ref.shape[2]
    cdt = buf_ref.dtype

    # Zero only the 1-px halo; the interior is fully overwritten below.  Done every
    # step (cheap: 2 rows + 2 cols) so scratch never carries stale data across steps
    # regardless of how the "parallel" batch axis is split across cores.
    buf_ref[0:1] = jnp.zeros((1, Wh + 2, Cbuf), cdt)
    buf_ref[H2 + 1:H2 + 2] = jnp.zeros((1, Wh + 2, Cbuf), cdt)
    buf_ref[:, 0:1] = jnp.zeros((H2 + 2, 1, Cbuf), cdt)
    buf_ref[:, Wh + 1:Wh + 2] = jnp.zeros((H2 + 2, 1, Cbuf), cdt)

    # ---- ConvTranspose2d(k=2, s=2): one fused 4-tap MXU matmul (K=Cin, N=4*Cup) ----
    y = jnp.dot(x_ref[0], wt_ref[...], preferred_element_type=jnp.float32)
    y = (y + bt_ref[0]).astype(cdt)              # (H*W, 4*Cup), lanes = (kh, kw, c)
    # kh (row-parity) interleave: leading-axis concat + leading merge only.
    up0 = y[:, 0:2 * Cup].reshape(H, W, 2 * Cup).reshape(H, 1, W, 2 * Cup)
    up1 = y[:, 2 * Cup:4 * Cup].reshape(H, W, 2 * Cup).reshape(H, 1, W, 2 * Cup)
    up = jnp.concatenate([up0, up1], axis=1).reshape(H2, Wh, 2 * Cup)

    # ---- channel concat with the skip feature, directly in VMEM --------------------
    # Packed channel order is kw*Ccat + c, with c < Cup the ConvT channels and
    # c >= Cup the skip channels (matches the packed conv1 weight row order).
    buf_ref[1:H2 + 1, 1:Wh + 1, 0:Cup] = up[:, :, 0:Cup]                   # kw=0, up
    buf_ref[1:H2 + 1, 1:Wh + 1, Ccat:Ccat + Cup] = up[:, :, Cup:2 * Cup]   # kw=1, up
    buf_ref[1:H2 + 1, 1:Wh + 1, Cup:Ccat] = f_ref[0, :, :, 0:Cf]           # kw=0, skip
    buf_ref[1:H2 + 1, 1:Wh + 1, Ccat + Cup:Cc2] = f_ref[0, :, :, Cf:Cf2]   # kw=1, skip

    def conv3x3_bn_relu(cin2, w_ref, s_ref, b_ref):
        # 9 accumulated MXU matmuls on shifted views (no materialized im2col);
        # the packed-W shift is hoisted out of the dy loop (3 shifted loads total).
        acc = jnp.zeros((H2 * Wh, w_ref.shape[1]), jnp.float32)
        for d in range(3):
            xs = buf_ref[:, d:d + Wh, 0:cin2]                   # (H2+2, Wh, cin2)
            for dy in range(3):
                patch = xs[dy:dy + H2].reshape(H2 * Wh, cin2)
                w_tap = w_ref[(dy * 3 + d) * cin2:(dy * 3 + d + 1) * cin2, :]
                acc = acc + jnp.dot(patch, w_tap, preferred_element_type=jnp.float32)
        # folded-BN + ReLU epilogue in f32 (v5e-safe)
        return jnp.maximum(acc * s_ref[0] + b_ref[0], 0.0)

    # ---- Conv3x3 #1 + BN + ReLU; the mid activation never leaves VMEM.
    # The single scratch buffer is reused: all conv1 reads complete before this store.
    y1 = conv3x3_bn_relu(Cc2, w1_ref, s1_ref, b1_ref)
    buf_ref[1:H2 + 1, 1:Wh + 1, 0:Cm2] = y1.reshape(H2, Wh, Cm2).astype(cdt)

    # ---- Conv3x3 #2 + BN + ReLU -----------------------------------------------------
    y2 = conv3x3_bn_relu(Cm2, w2_ref, s2_ref, b2_ref)
    o_ref[0] = y2.reshape(H2, Wh, Co2).astype(o_ref.dtype)


def decoder_level(x_nhwc, f_nhwc, p, vmem_limit):
    """x_nhwc: (N,H,W,Cin) bf16; f_nhwc: (N,2H,2W,Cf) bf16; p: packed level params."""
    N, H, W, Cin = x_nhwc.shape
    H2, W2 = 2 * H, 2 * W
    Wh = W
    Cup = p["wT"].shape[1] // 4
    Cf = f_nhwc.shape[3]
    Ccat = Cup + Cf
    Cm2 = p["s1"].shape[1]
    Co2 = p["s2"].shape[1]
    Cbuf = max(2 * Ccat, Cm2)
    assert p["w1"].shape[0] == 18 * Ccat and p["w2"].shape[0] == 9 * Cm2

    x_flat = x_nhwc.reshape(N, H * W, Cin)          # wrapper-side flatten: free in XLA
    f_pack = f_nhwc.reshape(N, H2, Wh, 2 * Cf)      # W-parity pack: free row-major reshape

    flops = 2 * N * (H * W * Cin * 4 * Cup
                     + H2 * Wh * 9 * (2 * Ccat) * Cm2
                     + H2 * Wh * 9 * Cm2 * Co2)
    bytes_accessed = 2 * (x_flat.size + f_pack.size + N * H2 * Wh * Co2
                          + p["wT"].size + p["w1"].size + p["w2"].size)

    out = pl.pallas_call(
        _decoder_level_kernel,
        out_shape=jax.ShapeDtypeStruct((N, H2, Wh, Co2), jnp.bfloat16),
        grid=(N,),
        in_specs=[
            pl.BlockSpec((1, H * W, Cin), lambda n: (n, 0, 0)),
            pl.BlockSpec((1, H2, Wh, 2 * Cf), lambda n: (n, 0, 0, 0)),
            pl.BlockSpec((Cin, 4 * Cup), lambda n: (0, 0)),
            pl.BlockSpec((1, 4 * Cup), lambda n: (0, 0)),
            pl.BlockSpec((18 * Ccat, Cm2), lambda n: (0, 0)),
            pl.BlockSpec((1, Cm2), lambda n: (0, 0)),
            pl.BlockSpec((1, Cm2), lambda n: (0, 0)),
            pl.BlockSpec((9 * Cm2, Co2), lambda n: (0, 0)),
            pl.BlockSpec((1, Co2), lambda n: (0, 0)),
            pl.BlockSpec((1, Co2), lambda n: (0, 0)),
        ],
        out_specs=pl.BlockSpec((1, H2, Wh, Co2), lambda n: (n, 0, 0, 0)),
        scratch_shapes=[pltpu.VMEM((H2 + 2, Wh + 2, Cbuf), jnp.bfloat16)],
        compiler_params=pltpu.CompilerParams(
            dimension_semantics=("parallel",),
            vmem_limit_bytes=vmem_limit),
        cost_estimate=pl.CostEstimate(flops=int(flops), transcendentals=0,
                                      bytes_accessed=int(bytes_accessed)),
    )(x_flat, f_pack, p["wT"], p["bT"], p["w1"], p["s1"], p["b1"],
      p["w2"], p["s2"], p["b2"])
    # Unpack the column parity from lanes back to NHWC: free row-major reshape in XLA.
    return out.reshape(N, H2, W2, Co2 // 2)


# ----------------------------------------------------------------------------
# Glue: bilinear resize, align_corners=True, NHWC (only used if the skip feature size
# differs from the upsampled x; matches torch.nn.functional.interpolate).
# ----------------------------------------------------------------------------
def bilinear_resize_align_corners_nhwc(x, H_out, W_out):
    N, H, W, C = x.shape
    if (H, W) == (H_out, W_out):
        return x
    xf = x.astype(jnp.float32)
    ys = jnp.linspace(0.0, H - 1.0, H_out) if H_out > 1 else jnp.zeros((H_out,), jnp.float32)
    xs = jnp.linspace(0.0, W - 1.0, W_out) if W_out > 1 else jnp.zeros((W_out,), jnp.float32)
    y0 = jnp.clip(jnp.floor(ys).astype(jnp.int32), 0, H - 1)
    x0 = jnp.clip(jnp.floor(xs).astype(jnp.int32), 0, W - 1)
    y1 = jnp.minimum(y0 + 1, H - 1)
    x1 = jnp.minimum(x0 + 1, W - 1)
    wy = (ys - y0.astype(jnp.float32))[None, :, None, None]
    wx = (xs - x0.astype(jnp.float32))[None, None, :, None]
    g = lambda yi, xi: xf[:, yi, :, :][:, :, xi, :]
    top = g(y0, x0) * (1 - wx) + g(y0, x1) * wx
    bot = g(y1, x0) * (1 - wx) + g(y1, x1) * wx
    return top * (1 - wy) + bot * wy


# ----------------------------------------------------------------------------
# Parameter construction (deterministic, synthetic) + packed-layout conversion.
# ----------------------------------------------------------------------------
def fold_bn(gamma, beta, mean, var):
    scale = gamma / jnp.sqrt(var + BN_EPS)
    return scale, beta - mean * scale


def pack_conv3x3_weight(w_oihw):
    """torch OIHW (Co, Ci, 3, 3) -> column-parity packed matmul weight (18*Ci, 2*Co).

    Rows are ordered (dy, d, kw, ci): d in {0,1,2} is the packed-column offset
    (full-res offsets -1/0/+1), kw the input column parity; output columns are
    (p, co) with p the output column parity.  Half the entries are structural zeros
    (~2x MACs) in exchange for an interleave-free kernel with 3x fewer shifted loads.
    """
    Co, Ci = w_oihw.shape[0], w_oihw.shape[1]
    k = jnp.transpose(w_oihw, (2, 3, 1, 0))                 # (dy, dx, ci, co)
    kp = jnp.zeros((3, 3, 2 * Ci, 2 * Co), k.dtype)
    # output parity p = 0: dx = 0,1,2 read packed (d, kw) = (0,1), (1,0), (1,1)
    kp = kp.at[:, 0, Ci:, :Co].set(k[:, 0])
    kp = kp.at[:, 1, :Ci, :Co].set(k[:, 1])
    kp = kp.at[:, 1, Ci:, :Co].set(k[:, 2])
    # output parity p = 1: dx = 0,1,2 read packed (d, kw) = (1,0), (1,1), (2,0)
    kp = kp.at[:, 1, :Ci, Co:].set(k[:, 0])
    kp = kp.at[:, 1, Ci:, Co:].set(k[:, 1])
    kp = kp.at[:, 2, :Ci, Co:].set(k[:, 2])
    return kp.reshape(18 * Ci, 2 * Co)


def init_decoder_params(channels, key):
    params, raw = [], []
    for i in range(len(channels) - 1):
        cin, cup = channels[i], channels[i + 1]
        ccat, cmid, cout = cin, cup, cup          # DoubleBlock default: middle == out
        keys = jax.random.split(key, 13)
        key = keys[-1]
        # ConvTranspose2d: torch weight (Cin, Cout, 2, 2) + bias (Cout,)
        up_w = jax.random.normal(keys[0], (cin, cup, 2, 2), jnp.float32) * 0.1
        up_b = jax.random.normal(keys[1], (cup,), jnp.float32) * 0.05
        c1 = jax.random.normal(keys[2], (cmid, ccat, 3, 3), jnp.float32) * 0.1
        g1 = 1.0 + 0.1 * jax.random.normal(keys[3], (cmid,), jnp.float32)
        be1 = 0.05 * jax.random.normal(keys[4], (cmid,), jnp.float32)
        mu1 = 0.05 * jax.random.normal(keys[5], (cmid,), jnp.float32)
        va1 = 1.0 + 0.1 * jnp.abs(jax.random.normal(keys[6], (cmid,), jnp.float32))
        c2 = jax.random.normal(keys[7], (cout, cmid, 3, 3), jnp.float32) * 0.1
        g2 = 1.0 + 0.1 * jax.random.normal(keys[8], (cout,), jnp.float32)
        be2 = 0.05 * jax.random.normal(keys[9], (cout,), jnp.float32)
        mu2 = 0.05 * jax.random.normal(keys[10], (cout,), jnp.float32)
        va2 = 1.0 + 0.1 * jnp.abs(jax.random.normal(keys[11], (cout,), jnp.float32))

        s1, b1 = fold_bn(g1, be1, mu1, va1)
        s2, b2 = fold_bn(g2, be2, mu2, va2)
        wT = jnp.transpose(up_w, (0, 2, 3, 1)).reshape(cin, 4 * cup)   # cols (kh, kw, co)
        params.append(dict(
            wT=wT.astype(jnp.bfloat16),
            bT=jnp.tile(up_b, 4).reshape(1, 4 * cup),
            w1=pack_conv3x3_weight(c1).astype(jnp.bfloat16),
            s1=jnp.tile(s1, 2).reshape(1, 2 * cmid),
            b1=jnp.tile(b1, 2).reshape(1, 2 * cmid),
            w2=pack_conv3x3_weight(c2).astype(jnp.bfloat16),
            s2=jnp.tile(s2, 2).reshape(1, 2 * cout),
            b2=jnp.tile(b2, 2).reshape(1, 2 * cout)))
        raw.append(dict(up_w=up_w, up_b=up_b,
                        c1=c1, g1=g1, be1=be1, mu1=mu1, va1=va1,
                        c2=c2, g2=g2, be2=be2, mu2=mu2, va2=va2))
    return params, raw


# ----------------------------------------------------------------------------
# Decoder forward (NCHW in / NCHW out, like the PyTorch module; eval mode).
# TODO(synk): training-mode Dropout / batch-stat BatchNorm are not implemented.
# ----------------------------------------------------------------------------
def decoder_forward(x_nchw, features_nchw, params):
    vmem_limit = _vmem_limit_bytes()
    x = jnp.transpose(x_nchw, (0, 2, 3, 1)).astype(jnp.bfloat16)           # NHWC, bf16
    feats = [jnp.transpose(f, (0, 2, 3, 1)) for f in features_nchw]        # once, pre-loop
    for i, p in enumerate(params):
        N, H, W, _ = x.shape
        f = bilinear_resize_align_corners_nhwc(feats[i], 2 * H, 2 * W)     # no-op if equal
        x = decoder_level(x, f.astype(jnp.bfloat16), p, vmem_limit)
    return jnp.transpose(x.astype(jnp.float32), (0, 3, 1, 2))              # -> NCHW


# ----------------------------------------------------------------------------
# Pure-JAX (XLA) reference, f32, for a loose end-to-end correctness check.
# ----------------------------------------------------------------------------
def _ref_conv_bn_relu(x, w_oihw, gamma, beta, mean, var):
    w = jnp.transpose(w_oihw, (2, 3, 1, 0))        # HWIO
    y = lax.conv_general_dilated(x, w, (1, 1), ((1, 1), (1, 1)),
                                 dimension_numbers=("NHWC", "HWIO", "NHWC"),
                                 precision=lax.Precision.HIGHEST)
    y = (y - mean) / jnp.sqrt(var + BN_EPS) * gamma + beta
    return jnp.maximum(y, 0.0)


def decoder_forward_reference(x_nchw, features_nchw, raw):
    x = jnp.transpose(x_nchw, (0, 2, 3, 1))
    feats = [jnp.transpose(f, (0, 2, 3, 1)) for f in features_nchw]
    for i, rp in enumerate(raw):
        N, H, W, _ = x.shape
        y = jnp.einsum("nhwi,iojk->nhjwko", x, rp["up_w"],
                       precision=lax.Precision.HIGHEST)
        x = y.reshape(N, 2 * H, 2 * W, rp["up_w"].shape[1]) + rp["up_b"]
        f = bilinear_resize_align_corners_nhwc(feats[i], 2 * H, 2 * W)
        x = jnp.concatenate([x, f.astype(jnp.float32)], axis=-1)
        x = _ref_conv_bn_relu(x, rp["c1"], rp["g1"], rp["be1"], rp["mu1"], rp["va1"])
        x = _ref_conv_bn_relu(x, rp["c2"], rp["g2"], rp["be2"], rp["mu2"], rp["va2"])
    return jnp.transpose(x, (0, 3, 1, 2))


if __name__ == "__main__":
    channels = [16, 8, 4]              # UNet-style: C_i = 2 * C_{i+1}
    N, H0, W0 = 2, 4, 4

    key = jax.random.PRNGKey(0)
    k_x, k_f0, k_f1, k_p = jax.random.split(key, 4)

    # Bottleneck input (NCHW) and skip features.  Skip i has C_i - C_{i+1} channels so
    # the channel concat yields C_i channels, as DoubleBlock expects.
    x = jax.random.normal(k_x, (N, channels[0], H0, W0), jnp.float32)
    features = [
        jax.random.normal(k_f0, (N, channels[0] - channels[1], 2 * H0, 2 * W0), jnp.float32),
        jax.random.normal(k_f1, (N, channels[1] - channels[2], 4 * H0, 4 * W0), jnp.float32),
    ]

    params, raw_params = init_decoder_params(channels, k_p)

    out = jax.block_until_ready(jax.jit(decoder_forward)(x, features, params))
    assert out.shape == (N, channels[-1], 4 * H0, 4 * W0), out.shape
    assert bool(jnp.all(jnp.isfinite(out)))

    # Loose check against the f32 XLA reference (kernel runs in bf16 end-to-end).
    ref = jax.block_until_ready(jax.jit(decoder_forward_reference)(x, features, raw_params))
    err = float(jnp.max(jnp.abs(out - ref)))
    scale = float(jnp.max(jnp.abs(ref)))
    assert err <= 0.1 * scale + 0.1, (err, scale)

    print("KERNEL_OK")
</pallas_src>

<mosaic_0001>
module attributes {stable_mosaic.version = 11 : i64} {
  func.func @_decoder_level_kernel(%arg0: i32, %arg1: memref<1x16x16xbf16, #tpu.memory_space<vmem>>, %arg2: memref<1x8x4x16xbf16, #tpu.memory_space<vmem>>, %arg3: memref<16x32xbf16, #tpu.memory_space<vmem>>, %arg4: memref<1x32xf32, #tpu.memory_space<vmem>>, %arg5: memref<288x16xbf16, #tpu.memory_space<vmem>>, %arg6: memref<1x16xf32, #tpu.memory_space<vmem>>, %arg7: memref<1x16xf32, #tpu.memory_space<vmem>>, %arg8: memref<144x16xbf16, #tpu.memory_space<vmem>>, %arg9: memref<1x16xf32, #tpu.memory_space<vmem>>, %arg10: memref<1x16xf32, #tpu.memory_space<vmem>>, %arg11: memref<1x8x4x16xbf16, #tpu.memory_space<vmem>>, %arg12: memref<10x6x32xbf16, #tpu.memory_space<vmem>>) attributes {dimension_semantics = [#tpu.dimension_semantics<parallel>], iteration_bounds = array<i64: 2>, scalar_prefetch = 0 : i64, scratch_operands = 1 : i64, tpu.core_type = #tpu.core_type<tc>, window_params = [{transform_indices = @transform_0, window_bounds = array<i64: 1, 16, 16>}, {transform_indices = @transform_1, window_bounds = array<i64: 1, 8, 4, 16>}, {pipeline_mode = #tpu.pipeline_mode<synchronous>, transform_indices = @transform_2, window_bounds = array<i64: 16, 32>}, {pipeline_mode = #tpu.pipeline_mode<synchronous>, transform_indices = @transform_3, window_bounds = array<i64: 1, 32>}, {pipeline_mode = #tpu.pipeline_mode<synchronous>, transform_indices = @transform_4, window_bounds = array<i64: 288, 16>}, {pipeline_mode = #tpu.pipeline_mode<synchronous>, transform_indices = @transform_5, window_bounds = array<i64: 1, 16>}, {pipeline_mode = #tpu.pipeline_mode<synchronous>, transform_indices = @transform_6, window_bounds = array<i64: 1, 16>}, {pipeline_mode = #tpu.pipeline_mode<synchronous>, transform_indices = @transform_7, window_bounds = array<i64: 144, 16>}, {pipeline_mode = #tpu.pipeline_mode<synchronous>, transform_indices = @transform_8, window_bounds = array<i64: 1, 16>}, {pipeline_mode = #tpu.pipeline_mode<synchronous>, transform_indices = @transform_9, window_bounds = array<i64: 1, 16>}, {transform_indices = @transform_10, window_bounds = array<i64: 1, 8, 4, 16>}]} {
    %cst = arith.constant 0.000000e+00 : bf16
    %0 = vector.broadcast %cst : bf16 to vector<1x6x32xbf16>
    %c0 = arith.constant 0 : index
    %c0_0 = arith.constant 0 : index
    %c0_1 = arith.constant 0 : index
    %1 = vector.load %arg12[%c0, %c0_0, %c0_1] : memref<10x6x32xbf16, #tpu.memory_space<vmem>>, vector<1x6x32xbf16>
    tpu.vector_store %arg12[%c0, %c0_0, %c0_1], %0 {strides = array<i32>} : memref<10x6x32xbf16, #tpu.memory_space<vmem>>, vector<1x6x32xbf16>,
    %cst_2 = arith.constant 0.000000e+00 : bf16
    %2 = vector.broadcast %cst_2 : bf16 to vector<1x6x32xbf16>
    %c9 = arith.constant 9 : index
    %c0_3 = arith.constant 0 : index
    %c0_4 = arith.constant 0 : index
    %3 = vector.load %arg12[%c9, %c0_3, %c0_4] : memref<10x6x32xbf16, #tpu.memory_space<vmem>>, vector<1x6x32xbf16>
    tpu.vector_store %arg12[%c9, %c0_3, %c0_4], %2 {strides = array<i32>} : memref<10x6x32xbf16, #tpu.memory_space<vmem>>, vector<1x6x32xbf16>,
    %cst_5 = arith.constant 0.000000e+00 : bf16
    %4 = vector.broadcast %cst_5 : bf16 to vector<10x1x32xbf16>
    %c0_6 = arith.constant 0 : index
    %c0_7 = arith.constant 0 : index
    %c0_8 = arith.constant 0 : index
    %5 = vector.load %arg12[%c0_6, %c0_7, %c0_8] : memref<10x6x32xbf16, #tpu.memory_space<vmem>>, vector<10x1x32xbf16>
    tpu.vector_store %arg12[%c0_6, %c0_7, %c0_8], %4 {strides = array<i32>} : memref<10x6x32xbf16, #tpu.memory_space<vmem>>, vector<10x1x32xbf16>,
    %cst_9 = arith.constant 0.000000e+00 : bf16
    %6 = vector.broadcast %cst_9 : bf16 to vector<10x1x32xbf16>
    %c0_10 = arith.constant 0 : index
    %c5 = arith.constant 5 : index
    %c0_11 = arith.constant 0 : index
    %7 = vector.load %arg12[%c0_10, %c5, %c0_11] : memref<10x6x32xbf16, #tpu.memory_space<vmem>>, vector<10x1x32xbf16>
    tpu.vector_store %arg12[%c0_10, %c5, %c0_11], %6 {strides = array<i32>} : memref<10x6x32xbf16, #tpu.memory_space<vmem>>, vector<10x1x32xbf16>,
    %c0_12 = arith.constant 0 : index
    %c0_13 = arith.constant 0 : index
    %c0_14 = arith.constant 0 : index
    %8 = vector.load %arg1[%c0_12, %c0_13, %c0_14] : memref<1x16x16xbf16, #tpu.memory_space<vmem>>, vector<1x16x16xbf16>
    %9 = vector.shape_cast %8 : vector<1x16x16xbf16> to vector<16x16xbf16>
    %c0_15 = arith.constant 0 : index
    %c0_16 = arith.constant 0 : index
    %10 = vector.load %arg3[%c0_15, %c0_16] : memref<16x32xbf16, #tpu.memory_space<vmem>>, vector<16x32xbf16>
    %cst_17 = arith.constant dense<0.000000e+00> : vector<16x32xf32>
    %11 = tpu.matmul %9, %10, %cst_17 {dimension_numbers = #tpu.dot_dimension_numbers<[1], [0], [0], [1], [0, 0, 1, 1], [], []>} : vector<16x16xbf16>, vector<16x32xbf16>, vector<16x32xf32> -> vector<16x32xf32>
    %c0_18 = arith.constant 0 : index
    %c0_19 = arith.constant 0 : index
    %12 = vector.load %arg4[%c0_18, %c0_19] : memref<1x32xf32, #tpu.memory_space<vmem>>, vector<1x32xf32>
    %13 = vector.shape_cast %12 : vector<1x32xf32> to vector<32xf32>
    %14 = vector.shape_cast %13 : vector<32xf32> to vector<1x32xf32>
    %15 = vector.broadcast %14 : vector<1x32xf32> to vector<16x32xf32>
    %16 = arith.addf %11, %15 : vector<16x32xf32>
    %17 = arith.truncf %16 : vector<16x32xf32> to vector<16x32xbf16>
    %18 = vector.extract_strided_slice %17 {offsets = [0, 0], sizes = [16, 16], strides = [1, 1]} : vector<16x32xbf16> to vector<16x16xbf16>
    %19 = vector.shape_cast %18 : vector<16x16xbf16> to vector<4x4x16xbf16>
    %20 = vector.shape_cast %19 : vector<4x4x16xbf16> to vector<4x1x4x16xbf16>
    %21 = vector.extract_strided_slice %17 {offsets = [0, 16], sizes = [16, 16], strides = [1, 1]} : vector<16x32xbf16> to vector<16x16xbf16>
    %22 = vector.shape_cast %21 : vector<16x16xbf16> to vector<4x4x16xbf16>
    %23 = vector.shape_cast %22 : vector<4x4x16xbf16> to vector<4x1x4x16xbf16>
    %24 = tpu.concatenate %20, %23 in 1 : vector<4x1x4x16xbf16>, vector<4x1x4x16xbf16> -> vector<4x2x4x16xbf16>
    %25 = vector.shape_cast %24 : vector<4x2x4x16xbf16> to vector<8x4x16xbf16>
    %26 = vector.extract_strided_slice %25 {offsets = [0, 0, 0], sizes = [8, 4, 8], strides = [1, 1, 1]} : vector<8x4x16xbf16> to vector<8x4x8xbf16>
    %c1 = arith.constant 1 : index
    %c1_20 = arith.constant 1 : index
    %c0_21 = arith.constant 0 : index
    %27 = vector.load %arg12[%c1, %c1_20, %c0_21] : memref<10x6x32xbf16, #tpu.memory_space<vmem>>, vector<8x4x8xbf16>
    tpu.vector_store %arg12[%c1, %c1_20, %c0_21], %26 {strides = array<i32>} : memref<10x6x32xbf16, #tpu.memory_space<vmem>>, vector<8x4x8xbf16>,
    %28 = vector.extract_strided_slice %25 {offsets = [0, 0, 8], sizes = [8, 4, 8], strides = [1, 1, 1]} : vector<8x4x16xbf16> to vector<8x4x8xbf16>
    %c1_22 = arith.constant 1 : index
    %c1_23 = arith.constant 1 : index
    %c16 = arith.constant 16 : index
    %29 = vector.load %arg12[%c1_22, %c1_23, %c16] : memref<10x6x32xbf16, #tpu.memory_space<vmem>>, vector<8x4x8xbf16>
    tpu.vector_store %arg12[%c1_22, %c1_23, %c16], %28 {strides = array<i32>} : memref<10x6x32xbf16, #tpu.memory_space<vmem>>, vector<8x4x8xbf16>,
    %c0_24 = arith.constant 0 : index
    %c0_25 = arith.constant 0 : index
    %c0_26 = arith.constant 0 : index
    %c0_27 = arith.constant 0 : index
    %30 = vector.load %arg2[%c0_24, %c0_25, %c0_26, %c0_27] : memref<1x8x4x16xbf16, #tpu.memory_space<vmem>>, vector<1x8x4x8xbf16>
    %31 = vector.shape_cast %30 : vector<1x8x4x8xbf16> to vector<8x4x8xbf16>
    %c1_28 = arith.constant 1 : index
    %c1_29 = arith.constant 1 : index
    %c8 = arith.constant 8 : index
    %32 = vector.load %arg12[%c1_28, %c1_29, %c8] : memref<10x6x32xbf16, #tpu.memory_space<vmem>>, vector<8x4x8xbf16>
    tpu.vector_store %arg12[%c1_28, %c1_29, %c8], %31 {strides = array<i32>} : memref<10x6x32xbf16, #tpu.memory_space<vmem>>, vector<8x4x8xbf16>,
    %c0_30 = arith.constant 0 : index
    %c0_31 = arith.constant 0 : index
    %c0_32 = arith.constant 0 : index
    %c8_33 = arith.constant 8 : index
    %33 = vector.load %arg2[%c0_30, %c0_31, %c0_32, %c8_33] : memref<1x8x4x16xbf16, #tpu.memory_space<vmem>>, vector<1x8x4x8xbf16>
    %34 = vector.shape_cast %33 : vector<1x8x4x8xbf16> to vector<8x4x8xbf16>
    %c1_34 = arith.constant 1 : index
    %c1_35 = arith.constant 1 : index
    %c24 = arith.constant 24 : index
    %35 = vector.load %arg12[%c1_34, %c1_35, %c24] : memref<10x6x32xbf16, #tpu.memory_space<vmem>>, vector<8x4x8xbf16>
    tpu.vector_store %arg12[%c1_34, %c1_35, %c24], %34 {strides = array<i32>} : memref<10x6x32xbf16, #tpu.memory_space<vmem>>, vector<8x4x8xbf16>,
    %cst_36 = arith.constant 0.000000e+00 : f32
    %36 = vector.broadcast %cst_36 : f32 to vector<32x16xf32>
    %c0_37 = arith.constant 0 : index
    %c0_38 = arith.constant 0 : index
    %c0_39 = arith.constant 0 : index
    %37 = vector.load %arg12[%c0_37, %c0_38, %c0_39] : memref<10x6x32xbf16, #tpu.memory_space<vmem>>, vector<10x4x32xbf16>
    %38 = vector.extract_strided_slice %37 {offsets = [0, 0, 0], sizes = [8, 4, 32], strides = [1, 1, 1]} : vector<10x4x32xbf16> to vector<8x4x32xbf16>
    %39 = vector.shape_cast %38 : vector<8x4x32xbf16> to vector<32x32xbf16>
    %c0_40 = arith.constant 0 : index
    %c0_41 = arith.constant 0 : index
    %40 = vector.load %arg5[%c0_40, %c0_41] : memref<288x16xbf16, #tpu.memory_space<vmem>>, vector<32x16xbf16>
    %cst_42 = arith.constant dense<0.000000e+00> : vector<32x16xf32>
    %41 = tpu.matmul %39, %40, %cst_42 {dimension_numbers = #tpu.dot_dimension_numbers<[1], [0], [0], [1], [0, 0, 1, 1], [], []>} : vector<32x32xbf16>, vector<32x16xbf16>, vector<32x16xf32> -> vector<32x16xf32>
    %42 = arith.addf %36, %41 : vector<32x16xf32>
    %43 = vector.extract_strided_slice %37 {offsets = [1, 0, 0], sizes = [8, 4, 32], strides = [1, 1, 1]} : vector<10x4x32xbf16> to vector<8x4x32xbf16>
    %44 = vector.shape_cast %43 : vector<8x4x32xbf16> to vector<32x32xbf16>
    %c96 = arith.constant 96 : index
    %c0_43 = arith.constant 0 : index
    %45 = vector.load %arg5[%c96, %c0_43] : memref<288x16xbf16, #tpu.memory_space<vmem>>, vector<32x16xbf16>
    %cst_44 = arith.constant dense<0.000000e+00> : vector<32x16xf32>
    %46 = tpu.matmul %44, %45, %cst_44 {dimension_numbers = #tpu.dot_dimension_numbers<[1], [0], [0], [1], [0, 0, 1, 1], [], []>} : vector<32x32xbf16>, vector<32x16xbf16>, vector<32x16xf32> -> vector<32x16xf32>
    %47 = arith.addf %42, %46 : vector<32x16xf32>
    %48 = vector.extract_strided_slice %37 {offsets = [2, 0, 0], sizes = [8, 4, 32], strides = [1, 1, 1]} : vector<10x4x32xbf16> to vector<8x4x32xbf16>
    %49 = vector.shape_cast %48 : vector<8x4x32xbf16> to vector<32x32xbf16>
    %c192 = arith.constant 192 : index
    %c0_45 = arith.constant 0 : index
    %50 = vector.load %arg5[%c192, %c0_45] : memref<288x16xbf16, #tpu.memory_space<vmem>>, vector<32x16xbf16>
    %cst_46 = arith.constant dense<0.000000e+00> : vector<32x16xf32>
    %51 = tpu.matmul %49, %50, %cst_46 {dimension_numbers = #tpu.dot_dimension_numbers<[1], [0], [0], [1], [0, 0, 1, 1], [], []>} : vector<32x32xbf16>, vector<32x16xbf16>, vector<32x16xf32> -> vector<32x16xf32>
    %52 = arith.addf %47, %51 : vector<32x16xf32>
    %c0_47 = arith.constant 0 : index
    %c1_48 = arith.constant 1 : index
    %c0_49 = arith.constant 0 : index
    %53 = vector.load %arg12[%c0_47, %c1_48, %c0_49] : memref<10x6x32xbf16, #tpu.memory_space<vmem>>, vector<10x4x32xbf16>
    %54 = vector.extract_strided_slice %53 {offsets = [0, 0, 0], sizes = [8, 4, 32], strides = [1, 1, 1]} : vector<10x4x32xbf16> to vector<8x4x32xbf16>
    %55 = vector.shape_cast %54 : vector<8x4x32xbf16> to vector<32x32xbf16>
    %c32 = arith.constant 32 : index
    %c0_50 = arith.constant 0 : index
    %56 = vector.load %arg5[%c32, %c0_50] : memref<288x16xbf16, #tpu.memory_space<vmem>>, vector<32x16xbf16>
    %cst_51 = arith.constant dense<0.000000e+00> : vector<32x16xf32>
    %57 = tpu.matmul %55, %56, %cst_51 {dimension_numbers = #tpu.dot_dimension_numbers<[1], [0], [0], [1], [0, 0, 1, 1], [], []>} : vector<32x32xbf16>, vector<32x16xbf16>, vector<32x16xf32> -> vector<32x16xf32>
    %58 = arith.addf %52, %57 : vector<32x16xf32>
    %59 = vector.extract_strided_slice %53 {offsets = [1, 0, 0], sizes = [8, 4, 32], strides = [1, 1, 1]} : vector<10x4x32xbf16> to vector<8x4x32xbf16>
    %60 = vector.shape_cast %59 : vector<8x4x32xbf16> to vector<32x32xbf16>
    %c128 = arith.constant 128 : index
    %c0_52 = arith.constant 0 : index
    %61 = vector.load %arg5[%c128, %c0_52] : memref<288x16xbf16, #tpu.memory_space<vmem>>, vector<32x16xbf16>
    %cst_53 = arith.constant dense<0.000000e+00> : vector<32x16xf32>
    %62 = tpu.matmul %60, %61, %cst_53 {dimension_numbers = #tpu.dot_dimension_numbers<[1], [0], [0], [1], [0, 0, 1, 1], [], []>} : vector<32x32xbf16>, vector<32x16xbf16>, vector<32x16xf32> -> vector<32x16xf32>
    %63 = arith.addf %58, %62 : vector<32x16xf32>
    %64 = vector.extract_strided_slice %53 {offsets = [2, 0, 0], sizes = [8, 4, 32], strides = [1, 1, 1]} : vector<10x4x32xbf16> to vector<8x4x32xbf16>
    %65 = vector.shape_cast %64 : vector<8x4x32xbf16> to vector<32x32xbf16>
    %c224 = arith.constant 224 : index
    %c0_54 = arith.constant 0 : index
    %66 = vector.load %arg5[%c224, %c0_54] : memref<288x16xbf16, #tpu.memory_space<vmem>>, vector<32x16xbf16>
    %cst_55 = arith.constant dense<0.000000e+00> : vector<32x16xf32>
    %67 = tpu.matmul %65, %66, %cst_55 {dimension_numbers = #tpu.dot_dimension_numbers<[1], [0], [0], [1], [0, 0, 1, 1], [], []>} : vector<32x32xbf16>, vector<32x16xbf16>, vector<32x16xf32> -> vector<32x16xf32>
    %68 = arith.addf %63, %67 : vector<32x16xf32>
    %c0_56 = arith.constant 0 : index
    %c2 = arith.constant 2 : index
    %c0_57 = arith.constant 0 : index
    %69 = vector.load %arg12[%c0_56, %c2, %c0_57] : memref<10x6x32xbf16, #tpu.memory_space<vmem>>, vector<10x4x32xbf16>
    %70 = vector.extract_strided_slice %69 {offsets = [0, 0, 0], sizes = [8, 4, 32], strides = [1, 1, 1]} : vector<10x4x32xbf16> to vector<8x4x32xbf16>
    %71 = vector.shape_cast %70 : vector<8x4x32xbf16> to vector<32x32xbf16>
    %c64 = arith.constant 64 : index
    %c0_58 = arith.constant 0 : index
    %72 = vector.load %arg5[%c64, %c0_58] : memref<288x16xbf16, #tpu.memory_space<vmem>>, vector<32x16xbf16>
    %cst_59 = arith.constant dense<0.000000e+00> : vector<32x16xf32>
    %73 = tpu.matmul %71, %72, %cst_59 {dimension_numbers = #tpu.dot_dimension_numbers<[1], [0], [0], [1], [0, 0, 1, 1], [], []>} : vector<32x32xbf16>, vector<32x16xbf16>, vector<32x16xf32> -> vector<32x16xf32>
    %74 = arith.addf %68, %73 : vector<32x16xf32>
    %75 = vector.extract_strided_slice %69 {offsets = [1, 0, 0], sizes = [8, 4, 32], strides = [1, 1, 1]} : vector<10x4x32xbf16> to vector<8x4x32xbf16>
    %76 = vector.shape_cast %75 : vector<8x4x32xbf16> to vector<32x32xbf16>
    %c160 = arith.constant 160 : index
    %c0_60 = arith.constant 0 : index
    %77 = vector.load %arg5[%c160, %c0_60] : memref<288x16xbf16, #tpu.memory_space<vmem>>, vector<32x16xbf16>
    %cst_61 = arith.constant dense<0.000000e+00> : vector<32x16xf32>
    %78 = tpu.matmul %76, %77, %cst_61 {dimension_numbers = #tpu.dot_dimension_numbers<[1], [0], [0], [1], [0, 0, 1, 1], [], []>} : vector<32x32xbf16>, vector<32x16xbf16>, vector<32x16xf32> -> vector<32x16xf32>
    %79 = arith.addf %74, %78 : vector<32x16xf32>
    %80 = vector.extract_strided_slice %69 {offsets = [2, 0, 0], sizes = [8, 4, 32], strides = [1, 1, 1]} : vector<10x4x32xbf16> to vector<8x4x32xbf16>
    %81 = vector.shape_cast %80 : vector<8x4x32xbf16> to vector<32x32xbf16>
    %c256 = arith.constant 256 : index
    %c0_62 = arith.constant 0 : index
    %82 = vector.load %arg5[%c256, %c0_62] : memref<288x16xbf16, #tpu.memory_space<vmem>>, vector<32x16xbf16>
    %cst_63 = arith.constant dense<0.000000e+00> : vector<32x16xf32>
    %83 = tpu.matmul %81, %82, %cst_63 {dimension_numbers = #tpu.dot_dimension_numbers<[1], [0], [0], [1], [0, 0, 1, 1], [], []>} : vector<32x32xbf16>, vector<32x16xbf16>, vector<32x16xf32> -> vector<32x16xf32>
    %84 = arith.addf %79, %83 : vector<32x16xf32>
    %c0_64 = arith.constant 0 : index
    %c0_65 = arith.constant 0 : index
    %85 = vector.load %arg6[%c0_64, %c0_65] : memref<1x16xf32, #tpu.memory_space<vmem>>, vector<1x16xf32>
    %86 = vector.shape_cast %85 : vector<1x16xf32> to vector<16xf32>
    %87 = vector.shape_cast %86 : vector<16xf32> to vector<1x16xf32>
    %88 = vector.broadcast %87 : vector<1x16xf32> to vector<32x16xf32>
    %89 = arith.mulf %84, %88 : vector<32x16xf32>
    %c0_66 = arith.constant 0 : index
    %c0_67 = arith.constant 0 : index
    %90 = vector.load %arg7[%c0_66, %c0_67] : memref<1x16xf32, #tpu.memory_space<vmem>>, vector<1x16xf32>
    %91 = vector.shape_cast %90 : vector<1x16xf32> to vector<16xf32>
    %92 = vector.shape_cast %91 : vector<16xf32> to vector<1x16xf32>
    %93 = vector.broadcast %92 : vector<1x16xf32> to vector<32x16xf32>
    %94 = arith.addf %89, %93 : vector<32x16xf32>
    %cst_68 = arith.constant 0.000000e+00 : f32
    %95 = vector.broadcast %cst_68 : f32 to vector<32x16xf32>
    %96 = arith.maximumf %94, %95 : vector<32x16xf32>
    %97 = vector.shape_cast %96 : vector<32x16xf32> to vector<8x4x16xf32>
    %98 = arith.truncf %97 : vector<8x4x16xf32> to vector<8x4x16xbf16>
    %c1_69 = arith.constant 1 : index
    %c1_70 = arith.constant 1 : index
    %c0_71 = arith.constant 0 : index
    %99 = vector.load %arg12[%c1_69, %c1_70, %c0_71] : memref<10x6x32xbf16, #tpu.memory_space<vmem>>, vector<8x4x16xbf16>
    tpu.vector_store %arg12[%c1_69, %c1_70, %c0_71], %98 {strides = array<i32>} : memref<10x6x32xbf16, #tpu.memory_space<vmem>>, vector<8x4x16xbf16>,
    %cst_72 = arith.constant 0.000000e+00 : f32
    %100 = vector.broadcast %cst_72 : f32 to vector<32x16xf32>
    %c0_73 = arith.constant 0 : index
    %c0_74 = arith.constant 0 : index
    %c0_75 = arith.constant 0 : index
    %101 = vector.load %arg12[%c0_73, %c0_74, %c0_75] : memref<10x6x32xbf16, #tpu.memory_space<vmem>>, vector<10x4x16xbf16>
    %102 = vector.extract_strided_slice %101 {offsets = [0, 0, 0], sizes = [8, 4, 16], strides = [1, 1, 1]} : vector<10x4x16xbf16> to vector<8x4x16xbf16>
    %103 = vector.shape_cast %102 : vector<8x4x16xbf16> to vector<32x16xbf16>
    %c0_76 = arith.constant 0 : index
    %c0_77 = arith.constant 0 : index
    %104 = vector.load %arg8[%c0_76, %c0_77] : memref<144x16xbf16, #tpu.memory_space<vmem>>, vector<16x16xbf16>
    %cst_78 = arith.constant dense<0.000000e+00> : vector<32x16xf32>
    %105 = tpu.matmul %103, %104, %cst_78 {dimension_numbers = #tpu.dot_dimension_numbers<[1], [0], [0], [1], [0, 0, 1, 1], [], []>} : vector<32x16xbf16>, vector<16x16xbf16>, vector<32x16xf32> -> vector<32x16xf32>
    %106 = arith.addf %100, %105 : vector<32x16xf32>
    %107 = vector.extract_strided_slice %101 {offsets = [1, 0, 0], sizes = [8, 4, 16], strides = [1, 1, 1]} : vector<10x4x16xbf16> to vector<8x4x16xbf16>
    %108 = vector.shape_cast %107 : vector<8x4x16xbf16> to vector<32x16xbf16>
    %c48 = arith.constant 48 : index
    %c0_79 = arith.constant 0 : index
    %109 = vector.load %arg8[%c48, %c0_79] : memref<144x16xbf16, #tpu.memory_space<vmem>>, vector<16x16xbf16>
    %cst_80 = arith.constant dense<0.000000e+00> : vector<32x16xf32>
    %110 = tpu.matmul %108, %109, %cst_80 {dimension_numbers = #tpu.dot_dimension_numbers<[1], [0], [0], [1], [0, 0, 1, 1], [], []>} : vector<32x16xbf16>, vector<16x16xbf16>, vector<32x16xf32> -> vector<32x16xf32>
    %111 = arith.addf %106, %110 : vector<32x16xf32>
    %112 = vector.extract_strided_slice %101 {offsets = [2, 0, 0], sizes = [8, 4, 16], strides = [1, 1, 1]} : vector<10x4x16xbf16> to vector<8x4x16xbf16>
    %113 = vector.shape_cast %112 : vector<8x4x16xbf16> to vector<32x16xbf16>
    %c96_81 = arith.constant 96 : index
    %c0_82 = arith.constant 0 : index
    %114 = vector.load %arg8[%c96_81, %c0_82] : memref<144x16xbf16, #tpu.memory_space<vmem>>, vector<16x16xbf16>
    %cst_83 = arith.constant dense<0.000000e+00> : vector<32x16xf32>
    %115 = tpu.matmul %113, %114, %cst_83 {dimension_numbers = #tpu.dot_dimension_numbers<[1], [0], [0], [1], [0, 0, 1, 1], [], []>} : vector<32x16xbf16>, vector<16x16xbf16>, vector<32x16xf32> -> vector<32x16xf32>
    %116 = arith.addf %111, %115 : vector<32x16xf32>
    %c0_84 = arith.constant 0 : index
    %c1_85 = arith.constant 1 : index
    %c0_86 = arith.constant 0 : index
    %117 = vector.load %arg12[%c0_84, %c1_85, %c0_86] : memref<10x6x32xbf16, #tpu.memory_space<vmem>>, vector<10x4x16xbf16>
    %118 = vector.extract_strided_slice %117 {offsets = [0, 0, 0], sizes = [8, 4, 16], strides = [1, 1, 1]} : vector<10x4x16xbf16> to vector<8x4x16xbf16>
    %119 = vector.shape_cast %118 : vector<8x4x16xbf16> to vector<32x16xbf16>
    %c16_87 = arith.constant 16 : index
    %c0_88 = arith.constant 0 : index
    %120 = vector.load %arg8[%c16_87, %c0_88] : memref<144x16xbf16, #tpu.memory_space<vmem>>, vector<16x16xbf16>
    %cst_89 = arith.constant dense<0.000000e+00> : vector<32x16xf32>
    %121 = tpu.matmul %119, %120, %cst_89 {dimension_numbers = #tpu.dot_dimension_numbers<[1], [0], [0], [1], [0, 0, 1, 1], [], []>} : vector<32x16xbf16>, vector<16x16xbf16>, vector<32x16xf32> -> vector<32x16xf32>
    %122 = arith.addf %116, %121 : vector<32x16xf32>
    %123 = vector.extract_strided_slice %117 {offsets = [1, 0, 0], sizes = [8, 4, 16], strides = [1, 1, 1]} : vector<10x4x16xbf16> to vector<8x4x16xbf16>
    %124 = vector.shape_cast %123 : vector<8x4x16xbf16> to vector<32x16xbf16>
    %c64_90 = arith.constant 64 : index
    %c0_91 = arith.constant 0 : index
    %125 = vector.load %arg8[%c64_90, %c0_91] : memref<144x16xbf16, #tpu.memory_space<vmem>>, vector<16x16xbf16>
    %cst_92 = arith.constant dense<0.000000e+00> : vector<32x16xf32>
    %126 = tpu.matmul %124, %125, %cst_92 {dimension_numbers = #tpu.dot_dimension_numbers<[1], [0], [0], [1], [0, 0, 1, 1], [], []>} : vector<32x16xbf16>, vector<16x16xbf16>, vector<32x16xf32> -> vector<32x16xf32>
    %127 = arith.addf %122, %126 : vector<32x16xf32>
    %128 = vector.extract_strided_slice %117 {offsets = [2, 0, 0], sizes = [8, 4, 16], strides = [1, 1, 1]} : vector<10x4x16xbf16> to vector<8x4x16xbf16>
    %129 = vector.shape_cast %128 : vector<8x4x16xbf16> to vector<32x16xbf16>
    %c112 = arith.constant 112 : index
    %c0_93 = arith.constant 0 : index
    %130 = vector.load %arg8[%c112, %c0_93] : memref<144x16xbf16, #tpu.memory_space<vmem>>, vector<16x16xbf16>
    %cst_94 = arith.constant dense<0.000000e+00> : vector<32x16xf32>
    %131 = tpu.matmul %129, %130, %cst_94 {dimension_numbers = #tpu.dot_dimension_numbers<[1], [0], [0], [1], [0, 0, 1, 1], [], []>} : vector<32x16xbf16>, vector<16x16xbf16>, vector<32x16xf32> -> vector<32x16xf32>
    %132 = arith.addf %127, %131 : vector<32x16xf32>
    %c0_95 = arith.constant 0 : index
    %c2_96 = arith.constant 2 : index
    %c0_97 = arith.constant 0 : index
    %133 = vector.load %arg12[%c0_95, %c2_96, %c0_97] : memref<10x6x32xbf16, #tpu.memory_space<vmem>>, vector<10x4x16xbf16>
    %134 = vector.extract_strided_slice %133 {offsets = [0, 0, 0], sizes = [8, 4, 16], strides = [1, 1, 1]} : vector<10x4x16xbf16> to vector<8x4x16xbf16>
    %135 = vector.shape_cast %134 : vector<8x4x16xbf16> to vector<32x16xbf16>
    %c32_98 = arith.constant 32 : index
    %c0_99 = arith.constant 0 : index
    %136 = vector.load %arg8[%c32_98, %c0_99] : memref<144x16xbf16, #tpu.memory_space<vmem>>, vector<16x16xbf16>
    %cst_100 = arith.constant dense<0.000000e+00> : vector<32x16xf32>
    %137 = tpu.matmul %135, %136, %cst_100 {dimension_numbers = #tpu.dot_dimension_numbers<[1], [0], [0], [1], [0, 0, 1, 1], [], []>} : vector<32x16xbf16>, vector<16x16xbf16>, vector<32x16xf32> -> vector<32x16xf32>
    %138 = arith.addf %132, %137 : vector<32x16xf32>
    %139 = vector.extract_strided_slice %133 {offsets = [1, 0, 0], sizes = [8, 4, 16], strides = [1, 1, 1]} : vector<10x4x16xbf16> to vector<8x4x16xbf16>
    %140 = vector.shape_cast %139 : vector<8x4x16xbf16> to vector<32x16xbf16>
    %c80 = arith.constant 80 : index
    %c0_101 = arith.constant 0 : index
    %141 = vector.load %arg8[%c80, %c0_101] : memref<144x16xbf16, #tpu.memory_space<vmem>>, vector<16x16xbf16>
    %cst_102 = arith.constant dense<0.000000e+00> : vector<32x16xf32>
    %142 = tpu.matmul %140, %141, %cst_102 {dimension_numbers = #tpu.dot_dimension_numbers<[1], [0], [0], [1], [0, 0, 1, 1], [], []>} : vector<32x16xbf16>, vector<16x16xbf16>, vector<32x16xf32> -> vector<32x16xf32>
    %143 = arith.addf %138, %142 : vector<32x16xf32>
    %144 = vector.extract_strided_slice %133 {offsets = [2, 0, 0], sizes = [8, 4, 16], strides = [1, 1, 1]} : vector<10x4x16xbf16> to vector<8x4x16xbf16>
    %145 = vector.shape_cast %144 : vector<8x4x16xbf16> to vector<32x16xbf16>
    %c128_103 = arith.constant 128 : index
    %c0_104 = arith.constant 0 : index
    %146 = vector.load %arg8[%c128_103, %c0_104] : memref<144x16xbf16, #tpu.memory_space<vmem>>, vector<16x16xbf16>
    %cst_105 = arith.constant dense<0.000000e+00> : vector<32x16xf32>
    %147 = tpu.matmul %145, %146, %cst_105 {dimension_numbers = #tpu.dot_dimension_numbers<[1], [0], [0], [1], [0, 0, 1, 1], [], []>} : vector<32x16xbf16>, vector<16x16xbf16>, vector<32x16xf32> -> vector<32x16xf32>
    %148 = arith.addf %143, %147 : vector<32x16xf32>
    %c0_106 = arith.constant 0 : index
    %c0_107 = arith.constant 0 : index
    %149 = vector.load %arg9[%c0_106, %c0_107] : memref<1x16xf32, #tpu.memory_space<vmem>>, vector<1x16xf32>
    %150 = vector.shape_cast %149 : vector<1x16xf32> to vector<16xf32>
    %151 = vector.shape_cast %150 : vector<16xf32> to vector<1x16xf32>
    %152 = vector.broadcast %151 : vector<1x16xf32> to vector<32x16xf32>
    %153 = arith.mulf %148, %152 : vector<32x16xf32>
    %c0_108 = arith.constant 0 : index
    %c0_109 = arith.constant 0 : index
    %154 = vector.load %arg10[%c0_108, %c0_109] : memref<1x16xf32, #tpu.memory_space<vmem>>, vector<1x16xf32>
    %155 = vector.shape_cast %154 : vector<1x16xf32> to vector<16xf32>
    %156 = vector.shape_cast %155 : vector<16xf32> to vector<1x16xf32>
    %157 = vector.broadcast %156 : vector<1x16xf32> to vector<32x16xf32>
    %158 = arith.addf %153, %157 : vector<32x16xf32>
    %cst_110 = arith.constant 0.000000e+00 : f32
    %159 = vector.broadcast %cst_110 : f32 to vector<32x16xf32>
    %160 = arith.maximumf %158, %159 : vector<32x16xf32>
    %161 = vector.shape_cast %160 : vector<32x16xf32> to vector<8x4x16xf32>
    %162 = arith.truncf %161 : vector<8x4x16xf32> to vector<8x4x16xbf16>
    %c0_111 = arith.constant 0 : index
    %c0_112 = arith.constant 0 : index
    %c0_113 = arith.constant 0 : index
    %c0_114 = arith.constant 0 : index
    %163 = vector.load %arg11[%c0_111, %c0_112, %c0_113, %c0_114] : memref<1x8x4x16xbf16, #tpu.memory_space<vmem>>, vector<1x8x4x16xbf16>
    %164 = vector.shape_cast %163 : vector<1x8x4x16xbf16> to vector<8x4x16xbf16>
    %165 = vector.shape_cast %162 : vector<8x4x16xbf16> to vector<1x8x4x16xbf16>
    tpu.vector_store %arg11[%c0_111, %c0_112, %c0_113, %c0_114], %165 {strides = array<i32>} : memref<1x8x4x16xbf16, #tpu.memory_space<vmem>>, vector<1x8x4x16xbf16>,
    return
  }
  func.func @transform_0(%arg0: i32) -> (i32, i32, i32) {
    %c0_i32 = arith.constant 0 : i32
    %c0_i32_0 = arith.constant 0 : i32
    %c0_i32_1 = arith.constant 0 : i32
    return %arg0, %c0_i32, %c0_i32_0 : i32, i32, i32
  }
  func.func @transform_1(%arg0: i32) -> (i32, i32, i32, i32) {
    %c0_i32 = arith.constant 0 : i32
    %c0_i32_0 = arith.constant 0 : i32
    %c0_i32_1 = arith.constant 0 : i32
    %c0_i32_2 = arith.constant 0 : i32
    return %arg0, %c0_i32, %c0_i32_0, %c0_i32_1 : i32, i32, i32, i32
  }
  func.func @transform_2(%arg0: i32) -> (i32, i32) {
    %c0_i32 = arith.constant 0 : i32
    %c0_i32_0 = arith.constant 0 : i32
    %c0_i32_1 = arith.constant 0 : i32
    return %c0_i32, %c0_i32_0 : i32, i32
  }
  func.func @transform_3(%arg0: i32) -> (i32, i32) {
    %c0_i32 = arith.constant 0 : i32
    %c0_i32_0 = arith.constant 0 : i32
    %c0_i32_1 = arith.constant 0 : i32
    return %c0_i32, %c0_i32_0 : i32, i32
  }
  func.func @transform_4(%arg0: i32) -> (i32, i32) {
    %c0_i32 = arith.constant 0 : i32
    %c0_i32_0 = arith.constant 0 : i32
    %c0_i32_1 = arith.constant 0 : i32
    return %c0_i32, %c0_i32_0 : i32, i32
  }
  func.func @transform_5(%arg0: i32) -> (i32, i32) {
    %c0_i32 = arith.constant 0 : i32
    %c0_i32_0 = arith.constant 0 : i32
    %c0_i32_1 = arith.constant 0 : i32
    return %c0_i32, %c0_i32_0 : i32, i32
  }
  func.func @transform_6(%arg0: i32) -> (i32, i32) {
    %c0_i32 = arith.constant 0 : i32
    %c0_i32_0 = arith.constant 0 : i32
    %c0_i32_1 = arith.constant 0 : i32
    return %c0_i32, %c0_i32_0 : i32, i32
  }
  func.func @transform_7(%arg0: i32) -> (i32, i32) {
    %c0_i32 = arith.constant 0 : i32
    %c0_i32_0 = arith.constant 0 : i32
    %c0_i32_1 = arith.constant 0 : i32
    return %c0_i32, %c0_i32_0 : i32, i32
  }
  func.func @transform_8(%arg0: i32) -> (i32, i32) {
    %c0_i32 = arith.constant 0 : i32
    %c0_i32_0 = arith.constant 0 : i32
    %c0_i32_1 = arith.constant 0 : i32
    return %c0_i32, %c0_i32_0 : i32, i32
  }
  func.func @transform_9(%arg0: i32) -> (i32, i32) {
    %c0_i32 = arith.constant 0 : i32
    %c0_i32_0 = arith.constant 0 : i32
    %c0_i32_1 = arith.constant 0 : i32
    return %c0_i32, %c0_i32_0 : i32, i32
  }
  func.func @transform_10(%arg0: i32) -> (i32, i32, i32, i32) {
    %c0_i32 = arith.constant 0 : i32
    %c0_i32_0 = arith.constant 0 : i32
    %c0_i32_1 = arith.constant 0 : i32
    %c0_i32_2 = arith.constant 0 : i32
    return %arg0, %c0_i32, %c0_i32_0, %c0_i32_1 : i32, i32, i32, i32
  }
}

module attributes {stable_mosaic.version = 11 : i64} {
  func.func @_decoder_level_kernel(%arg0: i32, %arg1: memref<1x64x8xbf16, #tpu.memory_space<vmem>>, %arg2: memref<1x16x8x8xbf16, #tpu.memory_space<vmem>>, %arg3: memref<8x16xbf16, #tpu.memory_space<vmem>>, %arg4: memref<1x16xf32, #tpu.memory_space<vmem>>, %arg5: memref<144x8xbf16, #tpu.memory_space<vmem>>, %arg6: memref<1x8xf32, #tpu.memory_space<vmem>>, %arg7: memref<1x8xf32, #tpu.memory_space<vmem>>, %arg8: memref<72x8xbf16, #tpu.memory_space<vmem>>, %arg9: memref<1x8xf32, #tpu.memory_space<vmem>>, %arg10: memref<1x8xf32, #tpu.memory_space<vmem>>, %arg11: memref<1x16x8x8xbf16, #tpu.memory_space<vmem>>, %arg12: memref<18x10x16xbf16, #tpu.memory_space<vmem>>) attributes {dimension_semantics = [#tpu.dimension_semantics<parallel>], iteration_bounds = array<i64: 2>, scalar_prefetch = 0 : i64, scratch_operands = 1 : i64, tpu.core_type = #tpu.core_type<tc>, window_params = [{transform_indices = @transform_0, window_bounds = array<i64: 1, 64, 8>}, {transform_indices = @transform_1, window_bounds = array<i64: 1, 16, 8, 8>}, {pipeline_mode = #tpu.pipeline_mode<synchronous>, transform_indices = @transform_2, window_bounds = array<i64: 8, 16>}, {pipeline_mode = #tpu.pipeline_mode<synchronous>, transform_indices = @transform_3, window_bounds = array<i64: 1, 16>}, {pipeline_mode = #tpu.pipeline_mode<synchronous>, transform_indices = @transform_4, window_bounds = array<i64: 144, 8>}, {pipeline_mode = #tpu.pipeline_mode<synchronous>, transform_indices = @transform_5, window_bounds = array<i64: 1, 8>}, {pipeline_mode = #tpu.pipeline_mode<synchronous>, transform_indices = @transform_6, window_bounds = array<i64: 1, 8>}, {pipeline_mode = #tpu.pipeline_mode<synchronous>, transform_indices = @transform_7, window_bounds = array<i64: 72, 8>}, {pipeline_mode = #tpu.pipeline_mode<synchronous>, transform_indices = @transform_8, window_bounds = array<i64: 1, 8>}, {pipeline_mode = #tpu.pipeline_mode<synchronous>, transform_indices = @transform_9, window_bounds = array<i64: 1, 8>}, {transform_indices = @transform_10, window_bounds = array<i64: 1, 16, 8, 8>}]} {
    %cst = arith.constant 0.000000e+00 : bf16
    %0 = vector.broadcast %cst : bf16 to vector<1x10x16xbf16>
    %c0 = arith.constant 0 : index
    %c0_0 = arith.constant 0 : index
    %c0_1 = arith.constant 0 : index
    %1 = vector.load %arg12[%c0, %c0_0, %c0_1] : memref<18x10x16xbf16, #tpu.memory_space<vmem>>, vector<1x10x16xbf16>
    tpu.vector_store %arg12[%c0, %c0_0, %c0_1], %0 {strides = array<i32>} : memref<18x10x16xbf16, #tpu.memory_space<vmem>>, vector<1x10x16xbf16>,
    %cst_2 = arith.constant 0.000000e+00 : bf16
    %2 = vector.broadcast %cst_2 : bf16 to vector<1x10x16xbf16>
    %c17 = arith.constant 17 : index
    %c0_3 = arith.constant 0 : index
    %c0_4 = arith.constant 0 : index
    %3 = vector.load %arg12[%c17, %c0_3, %c0_4] : memref<18x10x16xbf16, #tpu.memory_space<vmem>>, vector<1x10x16xbf16>
    tpu.vector_store %arg12[%c17, %c0_3, %c0_4], %2 {strides = array<i32>} : memref<18x10x16xbf16, #tpu.memory_space<vmem>>, vector<1x10x16xbf16>,
    %cst_5 = arith.constant 0.000000e+00 : bf16
    %4 = vector.broadcast %cst_5 : bf16 to vector<18x1x16xbf16>
    %c0_6 = arith.constant 0 : index
    %c0_7 = arith.constant 0 : index
    %c0_8 = arith.constant 0 : index
    %5 = vector.load %arg12[%c0_6, %c0_7, %c0_8] : memref<18x10x16xbf16, #tpu.memory_space<vmem>>, vector<18x1x16xbf16>
    tpu.vector_store %arg12[%c0_6, %c0_7, %c0_8], %4 {strides = array<i32>} : memref<18x10x16xbf16, #tpu.memory_space<vmem>>, vector<18x1x16xbf16>,
    %cst_9 = arith.constant 0.000000e+00 : bf16
    %6 = vector.broadcast %cst_9 : bf16 to vector<18x1x16xbf16>
    %c0_10 = arith.constant 0 : index
    %c9 = arith.constant 9 : index
    %c0_11 = arith.constant 0 : index
    %7 = vector.load %arg12[%c0_10, %c9, %c0_11] : memref<18x10x16xbf16, #tpu.memory_space<vmem>>, vector<18x1x16xbf16>
    tpu.vector_store %arg12[%c0_10, %c9, %c0_11], %6 {strides = array<i32>} : memref<18x10x16xbf16, #tpu.memory_space<vmem>>, vector<18x1x16xbf16>,
    %c0_12 = arith.constant 0 : index
    %c0_13 = arith.constant 0 : index
    %c0_14 = arith.constant 0 : index
    %8 = vector.load %arg1[%c0_12, %c0_13, %c0_14] : memref<1x64x8xbf16, #tpu.memory_space<vmem>>, vector<1x64x8xbf16>
    %9 = vector.shape_cast %8 : vector<1x64x8xbf16> to vector<64x8xbf16>
    %c0_15 = arith.constant 0 : index
    %c0_16 = arith.constant 0 : index
    %10 = vector.load %arg3[%c0_15, %c0_16] : memref<8x16xbf16, #tpu.memory_space<vmem>>, vector<8x16xbf16>
    %cst_17 = arith.constant dense<0.000000e+00> : vector<64x16xf32>
    %11 = tpu.matmul %9, %10, %cst_17 {dimension_numbers = #tpu.dot_dimension_numbers<[1], [0], [0], [1], [0, 0, 1, 1], [], []>} : vector<64x8xbf16>, vector<8x16xbf16>, vector<64x16xf32> -> vector<64x16xf32>
    %c0_18 = arith.constant 0 : index
    %c0_19 = arith.constant 0 : index
    %12 = vector.load %arg4[%c0_18, %c0_19] : memref<1x16xf32, #tpu.memory_space<vmem>>, vector<1x16xf32>
    %13 = vector.shape_cast %12 : vector<1x16xf32> to vector<16xf32>
    %14 = vector.shape_cast %13 : vector<16xf32> to vector<1x16xf32>
    %15 = vector.broadcast %14 : vector<1x16xf32> to vector<64x16xf32>
    %16 = arith.addf %11, %15 : vector<64x16xf32>
    %17 = arith.truncf %16 : vector<64x16xf32> to vector<64x16xbf16>
    %18 = vector.extract_strided_slice %17 {offsets = [0, 0], sizes = [64, 8], strides = [1, 1]} : vector<64x16xbf16> to vector<64x8xbf16>
    %19 = vector.shape_cast %18 : vector<64x8xbf16> to vector<8x8x8xbf16>
    %20 = vector.shape_cast %19 : vector<8x8x8xbf16> to vector<8x1x8x8xbf16>
    %21 = vector.extract_strided_slice %17 {offsets = [0, 8], sizes = [64, 8], strides = [1, 1]} : vector<64x16xbf16> to vector<64x8xbf16>
    %22 = vector.shape_cast %21 : vector<64x8xbf16> to vector<8x8x8xbf16>
    %23 = vector.shape_cast %22 : vector<8x8x8xbf16> to vector<8x1x8x8xbf16>
    %24 = tpu.concatenate %20, %23 in 1 : vector<8x1x8x8xbf16>, vector<8x1x8x8xbf16> -> vector<8x2x8x8xbf16>
    %25 = vector.shape_cast %24 : vector<8x2x8x8xbf16> to vector<16x8x8xbf16>
    %26 = vector.extract_strided_slice %25 {offsets = [0, 0, 0], sizes = [16, 8, 4], strides = [1, 1, 1]} : vector<16x8x8xbf16> to vector<16x8x4xbf16>
    %c1 = arith.constant 1 : index
    %c1_20 = arith.constant 1 : index
    %c0_21 = arith.constant 0 : index
    %27 = vector.load %arg12[%c1, %c1_20, %c0_21] : memref<18x10x16xbf16, #tpu.memory_space<vmem>>, vector<16x8x4xbf16>
    tpu.vector_store %arg12[%c1, %c1_20, %c0_21], %26 {strides = array<i32>} : memref<18x10x16xbf16, #tpu.memory_space<vmem>>, vector<16x8x4xbf16>,
    %28 = vector.extract_strided_slice %25 {offsets = [0, 0, 4], sizes = [16, 8, 4], strides = [1, 1, 1]} : vector<16x8x8xbf16> to vector<16x8x4xbf16>
    %c1_22 = arith.constant 1 : index
    %c1_23 = arith.constant 1 : index
    %c8 = arith.constant 8 : index
    %29 = vector.load %arg12[%c1_22, %c1_23, %c8] : memref<18x10x16xbf16, #tpu.memory_space<vmem>>, vector<16x8x4xbf16>
    tpu.vector_store %arg12[%c1_22, %c1_23, %c8], %28 {strides = array<i32>} : memref<18x10x16xbf16, #tpu.memory_space<vmem>>, vector<16x8x4xbf16>,
    %c0_24 = arith.constant 0 : index
    %c0_25 = arith.constant 0 : index
    %c0_26 = arith.constant 0 : index
    %c0_27 = arith.constant 0 : index
    %30 = vector.load %arg2[%c0_24, %c0_25, %c0_26, %c0_27] : memref<1x16x8x8xbf16, #tpu.memory_space<vmem>>, vector<1x16x8x4xbf16>
    %31 = vector.shape_cast %30 : vector<1x16x8x4xbf16> to vector<16x8x4xbf16>
    %c1_28 = arith.constant 1 : index
    %c1_29 = arith.constant 1 : index
    %c4 = arith.constant 4 : index
    %32 = vector.load %arg12[%c1_28, %c1_29, %c4] : memref<18x10x16xbf16, #tpu.memory_space<vmem>>, vector<16x8x4xbf16>
    tpu.vector_store %arg12[%c1_28, %c1_29, %c4], %31 {strides = array<i32>} : memref<18x10x16xbf16, #tpu.memory_space<vmem>>, vector<16x8x4xbf16>,
    %c0_30 = arith.constant 0 : index
    %c0_31 = arith.constant 0 : index
    %c0_32 = arith.constant 0 : index
    %c4_33 = arith.constant 4 : index
    %33 = vector.load %arg2[%c0_30, %c0_31, %c0_32, %c4_33] : memref<1x16x8x8xbf16, #tpu.memory_space<vmem>>, vector<1x16x8x4xbf16>
    %34 = vector.shape_cast %33 : vector<1x16x8x4xbf16> to vector<16x8x4xbf16>
    %c1_34 = arith.constant 1 : index
    %c1_35 = arith.constant 1 : index
    %c12 = arith.constant 12 : index
    %35 = vector.load %arg12[%c1_34, %c1_35, %c12] : memref<18x10x16xbf16, #tpu.memory_space<vmem>>, vector<16x8x4xbf16>
    tpu.vector_store %arg12[%c1_34, %c1_35, %c12], %34 {strides = array<i32>} : memref<18x10x16xbf16, #tpu.memory_space<vmem>>, vector<16x8x4xbf16>,
    %cst_36 = arith.constant 0.000000e+00 : f32
    %36 = vector.broadcast %cst_36 : f32 to vector<128x8xf32>
    %c0_37 = arith.constant 0 : index
    %c0_38 = arith.constant 0 : index
    %c0_39 = arith.constant 0 : index
    %37 = vector.load %arg12[%c0_37, %c0_38, %c0_39] : memref<18x10x16xbf16, #tpu.memory_space<vmem>>, vector<18x8x16xbf16>
    %38 = vector.extract_strided_slice %37 {offsets = [0, 0, 0], sizes = [16, 8, 16], strides = [1, 1, 1]} : vector<18x8x16xbf16> to vector<16x8x16xbf16>
    %39 = vector.shape_cast %38 : vector<16x8x16xbf16> to vector<128x16xbf16>
    %c0_40 = arith.constant 0 : index
    %c0_41 = arith.constant 0 : index
    %40 = vector.load %arg5[%c0_40, %c0_41] : memref<144x8xbf16, #tpu.memory_space<vmem>>, vector<16x8xbf16>
    %cst_42 = arith.constant dense<0.000000e+00> : vector<128x8xf32>
    %41 = tpu.matmul %39, %40, %cst_42 {dimension_numbers = #tpu.dot_dimension_numbers<[1], [0], [0], [1], [0, 0, 1, 1], [], []>} : vector<128x16xbf16>, vector<16x8xbf16>, vector<128x8xf32> -> vector<128x8xf32>
    %42 = arith.addf %36, %41 : vector<128x8xf32>
    %43 = vector.extract_strided_slice %37 {offsets = [1, 0, 0], sizes = [16, 8, 16], strides = [1, 1, 1]} : vector<18x8x16xbf16> to vector<16x8x16xbf16>
    %44 = vector.shape_cast %43 : vector<16x8x16xbf16> to vector<128x16xbf16>
    %c48 = arith.constant 48 : index
    %c0_43 = arith.constant 0 : index
    %45 = vector.load %arg5[%c48, %c0_43] : memref<144x8xbf16, #tpu.memory_space<vmem>>, vector<16x8xbf16>
    %cst_44 = arith.constant dense<0.000000e+00> : vector<128x8xf32>
    %46 = tpu.matmul %44, %45, %cst_44 {dimension_numbers = #tpu.dot_dimension_numbers<[1], [0], [0], [1], [0, 0, 1, 1], [], []>} : vector<128x16xbf16>, vector<16x8xbf16>, vector<128x8xf32> -> vector<128x8xf32>
    %47 = arith.addf %42, %46 : vector<128x8xf32>
    %48 = vector.extract_strided_slice %37 {offsets = [2, 0, 0], sizes = [16, 8, 16], strides = [1, 1, 1]} : vector<18x8x16xbf16> to vector<16x8x16xbf16>
    %49 = vector.shape_cast %48 : vector<16x8x16xbf16> to vector<128x16xbf16>
    %c96 = arith.constant 96 : index
    %c0_45 = arith.constant 0 : index
    %50 = vector.load %arg5[%c96, %c0_45] : memref<144x8xbf16, #tpu.memory_space<vmem>>, vector<16x8xbf16>
    %cst_46 = arith.constant dense<0.000000e+00> : vector<128x8xf32>
    %51 = tpu.matmul %49, %50, %cst_46 {dimension_numbers = #tpu.dot_dimension_numbers<[1], [0], [0], [1], [0, 0, 1, 1], [], []>} : vector<128x16xbf16>, vector<16x8xbf16>, vector<128x8xf32> -> vector<128x8xf32>
    %52 = arith.addf %47, %51 : vector<128x8xf32>
    %c0_47 = arith.constant 0 : index
    %c1_48 = arith.constant 1 : index
    %c0_49 = arith.constant 0 : index
    %53 = vector.load %arg12[%c0_47, %c1_48, %c0_49] : memref<18x10x16xbf16, #tpu.memory_space<vmem>>, vector<18x8x16xbf16>
    %54 = vector.extract_strided_slice %53 {offsets = [0, 0, 0], sizes = [16, 8, 16], strides = [1, 1, 1]} : vector<18x8x16xbf16> to vector<16x8x16xbf16>
    %55 = vector.shape_cast %54 : vector<16x8x16xbf16> to vector<128x16xbf16>
    %c16 = arith.constant 16 : index
    %c0_50 = arith.constant 0 : index
    %56 = vector.load %arg5[%c16, %c0_50] : memref<144x8xbf16, #tpu.memory_space<vmem>>, vector<16x8xbf16>
    %cst_51 = arith.constant dense<0.000000e+00> : vector<128x8xf32>
    %57 = tpu.matmul %55, %56, %cst_51 {dimension_numbers = #tpu.dot_dimension_numbers<[1], [0], [0], [1], [0, 0, 1, 1], [], []>} : vector<128x16xbf16>, vector<16x8xbf16>, vector<128x8xf32> -> vector<128x8xf32>
    %58 = arith.addf %52, %57 : vector<128x8xf32>
    %59 = vector.extract_strided_slice %53 {offsets = [1, 0, 0], sizes = [16, 8, 16], strides = [1, 1, 1]} : vector<18x8x16xbf16> to vector<16x8x16xbf16>
    %60 = vector.shape_cast %59 : vector<16x8x16xbf16> to vector<128x16xbf16>
    %c64 = arith.constant 64 : index
    %c0_52 = arith.constant 0 : index
    %61 = vector.load %arg5[%c64, %c0_52] : memref<144x8xbf16, #tpu.memory_space<vmem>>, vector<16x8xbf16>
    %cst_53 = arith.constant dense<0.000000e+00> : vector<128x8xf32>
    %62 = tpu.matmul %60, %61, %cst_53 {dimension_numbers = #tpu.dot_dimension_numbers<[1], [0], [0], [1], [0, 0, 1, 1], [], []>} : vector<128x16xbf16>, vector<16x8xbf16>, vector<128x8xf32> -> vector<128x8xf32>
    %63 = arith.addf %58, %62 : vector<128x8xf32>
    %64 = vector.extract_strided_slice %53 {offsets = [2, 0, 0], sizes = [16, 8, 16], strides = [1, 1, 1]} : vector<18x8x16xbf16> to vector<16x8x16xbf16>
    %65 = vector.shape_cast %64 : vector<16x8x16xbf16> to vector<128x16xbf16>
    %c112 = arith.constant 112 : index
    %c0_54 = arith.constant 0 : index
    %66 = vector.load %arg5[%c112, %c0_54] : memref<144x8xbf16, #tpu.memory_space<vmem>>, vector<16x8xbf16>
    %cst_55 = arith.constant dense<0.000000e+00> : vector<128x8xf32>
    %67 = tpu.matmul %65, %66, %cst_55 {dimension_numbers = #tpu.dot_dimension_numbers<[1], [0], [0], [1], [0, 0, 1, 1], [], []>} : vector<128x16xbf16>, vector<16x8xbf16>, vector<128x8xf32> -> vector<128x8xf32>
    %68 = arith.addf %63, %67 : vector<128x8xf32>
    %c0_56 = arith.constant 0 : index
    %c2 = arith.constant 2 : index
    %c0_57 = arith.constant 0 : index
    %69 = vector.load %arg12[%c0_56, %c2, %c0_57] : memref<18x10x16xbf16, #tpu.memory_space<vmem>>, vector<18x8x16xbf16>
    %70 = vector.extract_strided_slice %69 {offsets = [0, 0, 0], sizes = [16, 8, 16], strides = [1, 1, 1]} : vector<18x8x16xbf16> to vector<16x8x16xbf16>
    %71 = vector.shape_cast %70 : vector<16x8x16xbf16> to vector<128x16xbf16>
    %c32 = arith.constant 32 : index
    %c0_58 = arith.constant 0 : index
    %72 = vector.load %arg5[%c32, %c0_58] : memref<144x8xbf16, #tpu.memory_space<vmem>>, vector<16x8xbf16>
    %cst_59 = arith.constant dense<0.000000e+00> : vector<128x8xf32>
    %73 = tpu.matmul %71, %72, %cst_59 {dimension_numbers = #tpu.dot_dimension_numbers<[1], [0], [0], [1], [0, 0, 1, 1], [], []>} : vector<128x16xbf16>, vector<16x8xbf16>, vector<128x8xf32> -> vector<128x8xf32>
    %74 = arith.addf %68, %73 : vector<128x8xf32>
    %75 = vector.extract_strided_slice %69 {offsets = [1, 0, 0], sizes = [16, 8, 16], strides = [1, 1, 1]} : vector<18x8x16xbf16> to vector<16x8x16xbf16>
    %76 = vector.shape_cast %75 : vector<16x8x16xbf16> to vector<128x16xbf16>
    %c80 = arith.constant 80 : index
    %c0_60 = arith.constant 0 : index
    %77 = vector.load %arg5[%c80, %c0_60] : memref<144x8xbf16, #tpu.memory_space<vmem>>, vector<16x8xbf16>
    %cst_61 = arith.constant dense<0.000000e+00> : vector<128x8xf32>
    %78 = tpu.matmul %76, %77, %cst_61 {dimension_numbers = #tpu.dot_dimension_numbers<[1], [0], [0], [1], [0, 0, 1, 1], [], []>} : vector<128x16xbf16>, vector<16x8xbf16>, vector<128x8xf32> -> vector<128x8xf32>
    %79 = arith.addf %74, %78 : vector<128x8xf32>
    %80 = vector.extract_strided_slice %69 {offsets = [2, 0, 0], sizes = [16, 8, 16], strides = [1, 1, 1]} : vector<18x8x16xbf16> to vector<16x8x16xbf16>
    %81 = vector.shape_cast %80 : vector<16x8x16xbf16> to vector<128x16xbf16>
    %c128 = arith.constant 128 : index
    %c0_62 = arith.constant 0 : index
    %82 = vector.load %arg5[%c128, %c0_62] : memref<144x8xbf16, #tpu.memory_space<vmem>>, vector<16x8xbf16>
    %cst_63 = arith.constant dense<0.000000e+00> : vector<128x8xf32>
    %83 = tpu.matmul %81, %82, %cst_63 {dimension_numbers = #tpu.dot_dimension_numbers<[1], [0], [0], [1], [0, 0, 1, 1], [], []>} : vector<128x16xbf16>, vector<16x8xbf16>, vector<128x8xf32> -> vector<128x8xf32>
    %84 = arith.addf %79, %83 : vector<128x8xf32>
    %c0_64 = arith.constant 0 : index
    %c0_65 = arith.constant 0 : index
    %85 = vector.load %arg6[%c0_64, %c0_65] : memref<1x8xf32, #tpu.memory_space<vmem>>, vector<1x8xf32>
    %86 = vector.shape_cast %85 : vector<1x8xf32> to vector<8xf32>
    %87 = vector.shape_cast %86 : vector<8xf32> to vector<1x8xf32>
    %88 = vector.broadcast %87 : vector<1x8xf32> to vector<128x8xf32>
    %89 = arith.mulf %84, %88 : vector<128x8xf32>
    %c0_66 = arith.constant 0 : index
    %c0_67 = arith.constant 0 : index
    %90 = vector.load %arg7[%c0_66, %c0_67] : memref<1x8xf32, #tpu.memory_space<vmem>>, vector<1x8xf32>
    %91 = vector.shape_cast %90 : vector<1x8xf32> to vector<8xf32>
    %92 = vector.shape_cast %91 : vector<8xf32> to vector<1x8xf32>
    %93 = vector.broadcast %92 : vector<1x8xf32> to vector<128x8xf32>
    %94 = arith.addf %89, %93 : vector<128x8xf32>
    %cst_68 = arith.constant 0.000000e+00 : f32
    %95 = vector.broadcast %cst_68 : f32 to vector<128x8xf32>
    %96 = arith.maximumf %94, %95 : vector<128x8xf32>
    %97 = vector.shape_cast %96 : vector<128x8xf32> to vector<16x8x8xf32>
    %98 = arith.truncf %97 : vector<16x8x8xf32> to vector<16x8x8xbf16>
    %c1_69 = arith.constant 1 : index
    %c1_70 = arith.constant 1 : index
    %c0_71 = arith.constant 0 : index
    %99 = vector.load %arg12[%c1_69, %c1_70, %c0_71] : memref<18x10x16xbf16, #tpu.memory_space<vmem>>, vector<16x8x8xbf16>
    tpu.vector_store %arg12[%c1_69, %c1_70, %c0_71], %98 {strides = array<i32>} : memref<18x10x16xbf16, #tpu.memory_space<vmem>>, vector<16x8x8xbf16>,
    %cst_72 = arith.constant 0.000000e+00 : f32
    %100 = vector.broadcast %cst_72 : f32 to vector<128x8xf32>
    %c0_73 = arith.constant 0 : index
    %c0_74 = arith.constant 0 : index
    %c0_75 = arith.constant 0 : index
    %101 = vector.load %arg12[%c0_73, %c0_74, %c0_75] : memref<18x10x16xbf16, #tpu.memory_space<vmem>>, vector<18x8x8xbf16>
    %102 = vector.extract_strided_slice %101 {offsets = [0, 0, 0], sizes = [16, 8, 8], strides = [1, 1, 1]} : vector<18x8x8xbf16> to vector<16x8x8xbf16>
    %103 = vector.shape_cast %102 : vector<16x8x8xbf16> to vector<128x8xbf16>
    %c0_76 = arith.constant 0 : index
    %c0_77 = arith.constant 0 : index
    %104 = vector.load %arg8[%c0_76, %c0_77] : memref<72x8xbf16, #tpu.memory_space<vmem>>, vector<8x8xbf16>
    %cst_78 = arith.constant dense<0.000000e+00> : vector<128x8xf32>
    %105 = tpu.matmul %103, %104, %cst_78 {dimension_numbers = #tpu.dot_dimension_numbers<[1], [0], [0], [1], [0, 0, 1, 1], [], []>} : vector<128x8xbf16>, vector<8x8xbf16>, vector<128x8xf32> -> vector<128x8xf32>
    %106 = arith.addf %100, %105 : vector<128x8xf32>
    %107 = vector.extract_strided_slice %101 {offsets = [1, 0, 0], sizes = [16, 8, 8], strides = [1, 1, 1]} : vector<18x8x8xbf16> to vector<16x8x8xbf16>
    %108 = vector.shape_cast %107 : vector<16x8x8xbf16> to vector<128x8xbf16>
    %c24 = arith.constant 24 : index
    %c0_79 = arith.constant 0 : index
    %109 = vector.load %arg8[%c24, %c0_79] : memref<72x8xbf16, #tpu.memory_space<vmem>>, vector<8x8xbf16>
    %cst_80 = arith.constant dense<0.000000e+00> : vector<128x8xf32>
    %110 = tpu.matmul %108, %109, %cst_80 {dimension_numbers = #tpu.dot_dimension_numbers<[1], [0], [0], [1], [0, 0, 1, 1], [], []>} : vector<128x8xbf16>, vector<8x8xbf16>, vector<128x8xf32> -> vector<128x8xf32>
    %111 = arith.addf %106, %110 : vector<128x8xf32>
    %112 = vector.extract_strided_slice %101 {offsets = [2, 0, 0], sizes = [16, 8, 8], strides = [1, 1, 1]} : vector<18x8x8xbf16> to vector<16x8x8xbf16>
    %113 = vector.shape_cast %112 : vector<16x8x8xbf16> to vector<128x8xbf16>
    %c48_81 = arith.constant 48 : index
    %c0_82 = arith.constant 0 : index
    %114 = vector.load %arg8[%c48_81, %c0_82] : memref<72x8xbf16, #tpu.memory_space<vmem>>, vector<8x8xbf16>
    %cst_83 = arith.constant dense<0.000000e+00> : vector<128x8xf32>
    %115 = tpu.matmul %113, %114, %cst_83 {dimension_numbers = #tpu.dot_dimension_numbers<[1], [0], [0], [1], [0, 0, 1, 1], [], []>} : vector<128x8xbf16>, vector<8x8xbf16>, vector<128x8xf32> -> vector<128x8xf32>
    %116 = arith.addf %111, %115 : vector<128x8xf32>
    %c0_84 = arith.constant 0 : index
    %c1_85 = arith.constant 1 : index
    %c0_86 = arith.constant 0 : index
    %117 = vector.load %arg12[%c0_84, %c1_85, %c0_86] : memref<18x10x16xbf16, #tpu.memory_space<vmem>>, vector<18x8x8xbf16>
    %118 = vector.extract_strided_slice %117 {offsets = [0, 0, 0], sizes = [16, 8, 8], strides = [1, 1, 1]} : vector<18x8x8xbf16> to vector<16x8x8xbf16>
    %119 = vector.shape_cast %118 : vector<16x8x8xbf16> to vector<128x8xbf16>
    %c8_87 = arith.constant 8 : index
    %c0_88 = arith.constant 0 : index
    %120 = vector.load %arg8[%c8_87, %c0_88] : memref<72x8xbf16, #tpu.memory_space<vmem>>, vector<8x8xbf16>
    %cst_89 = arith.constant dense<0.000000e+00> : vector<128x8xf32>
    %121 = tpu.matmul %119, %120, %cst_89 {dimension_numbers = #tpu.dot_dimension_numbers<[1], [0], [0], [1], [0, 0, 1, 1], [], []>} : vector<128x8xbf16>, vector<8x8xbf16>, vector<128x8xf32> -> vector<128x8xf32>
    %122 = arith.addf %116, %121 : vector<128x8xf32>
    %123 = vector.extract_strided_slice %117 {offsets = [1, 0, 0], sizes = [16, 8, 8], strides = [1, 1, 1]} : vector<18x8x8xbf16> to vector<16x8x8xbf16>
    %124 = vector.shape_cast %123 : vector<16x8x8xbf16> to vector<128x8xbf16>
    %c32_90 = arith.constant 32 : index
    %c0_91 = arith.constant 0 : index
    %125 = vector.load %arg8[%c32_90, %c0_91] : memref<72x8xbf16, #tpu.memory_space<vmem>>, vector<8x8xbf16>
    %cst_92 = arith.constant dense<0.000000e+00> : vector<128x8xf32>
    %126 = tpu.matmul %124, %125, %cst_92 {dimension_numbers = #tpu.dot_dimension_numbers<[1], [0], [0], [1], [0, 0, 1, 1], [], []>} : vector<128x8xbf16>, vector<8x8xbf16>, vector<128x8xf32> -> vector<128x8xf32>
    %127 = arith.addf %122, %126 : vector<128x8xf32>
    %128 = vector.extract_strided_slice %117 {offsets = [2, 0, 0], sizes = [16, 8, 8], strides = [1, 1, 1]} : vector<18x8x8xbf16> to vector<16x8x8xbf16>
    %129 = vector.shape_cast %128 : vector<16x8x8xbf16> to vector<128x8xbf16>
    %c56 = arith.constant 56 : index
    %c0_93 = arith.constant 0 : index
    %130 = vector.load %arg8[%c56, %c0_93] : memref<72x8xbf16, #tpu.memory_space<vmem>>, vector<8x8xbf16>
    %cst_94 = arith.constant dense<0.000000e+00> : vector<128x8xf32>
    %131 = tpu.matmul %129, %130, %cst_94 {dimension_numbers = #tpu.dot_dimension_numbers<[1], [0], [0], [1], [0, 0, 1, 1], [], []>} : vector<128x8xbf16>, vector<8x8xbf16>, vector<128x8xf32> -> vector<128x8xf32>
    %132 = arith.addf %127, %131 : vector<128x8xf32>
    %c0_95 = arith.constant 0 : index
    %c2_96 = arith.constant 2 : index
    %c0_97 = arith.constant 0 : index
    %133 = vector.load %arg12[%c0_95, %c2_96, %c0_97] : memref<18x10x16xbf16, #tpu.memory_space<vmem>>, vector<18x8x8xbf16>
    %134 = vector.extract_strided_slice %133 {offsets = [0, 0, 0], sizes = [16, 8, 8], strides = [1, 1, 1]} : vector<18x8x8xbf16> to vector<16x8x8xbf16>
    %135 = vector.shape_cast %134 : vector<16x8x8xbf16> to vector<128x8xbf16>
    %c16_98 = arith.constant 16 : index
    %c0_99 = arith.constant 0 : index
    %136 = vector.load %arg8[%c16_98, %c0_99] : memref<72x8xbf16, #tpu.memory_space<vmem>>, vector<8x8xbf16>
    %cst_100 = arith.constant dense<0.000000e+00> : vector<128x8xf32>
    %137 = tpu.matmul %135, %136, %cst_100 {dimension_numbers = #tpu.dot_dimension_numbers<[1], [0], [0], [1], [0, 0, 1, 1], [], []>} : vector<128x8xbf16>, vector<8x8xbf16>, vector<128x8xf32> -> vector<128x8xf32>
    %138 = arith.addf %132, %137 : vector<128x8xf32>
    %139 = vector.extract_strided_slice %133 {offsets = [1, 0, 0], sizes = [16, 8, 8], strides = [1, 1, 1]} : vector<18x8x8xbf16> to vector<16x8x8xbf16>
    %140 = vector.shape_cast %139 : vector<16x8x8xbf16> to vector<128x8xbf16>
    %c40 = arith.constant 40 : index
    %c0_101 = arith.constant 0 : index
    %141 = vector.load %arg8[%c40, %c0_101] : memref<72x8xbf16, #tpu.memory_space<vmem>>, vector<8x8xbf16>
    %cst_102 = arith.constant dense<0.000000e+00> : vector<128x8xf32>
    %142 = tpu.matmul %140, %141, %cst_102 {dimension_numbers = #tpu.dot_dimension_numbers<[1], [0], [0], [1], [0, 0, 1, 1], [], []>} : vector<128x8xbf16>, vector<8x8xbf16>, vector<128x8xf32> -> vector<128x8xf32>
    %143 = arith.addf %138, %142 : vector<128x8xf32>
    %144 = vector.extract_strided_slice %133 {offsets = [2, 0, 0], sizes = [16, 8, 8], strides = [1, 1, 1]} : vector<18x8x8xbf16> to vector<16x8x8xbf16>
    %145 = vector.shape_cast %144 : vector<16x8x8xbf16> to vector<128x8xbf16>
    %c64_103 = arith.constant 64 : index
    %c0_104 = arith.constant 0 : index
    %146 = vector.load %arg8[%c64_103, %c0_104] : memref<72x8xbf16, #tpu.memory_space<vmem>>, vector<8x8xbf16>
    %cst_105 = arith.constant dense<0.000000e+00> : vector<128x8xf32>
    %147 = tpu.matmul %145, %146, %cst_105 {dimension_numbers = #tpu.dot_dimension_numbers<[1], [0], [0], [1], [0, 0, 1, 1], [], []>} : vector<128x8xbf16>, vector<8x8xbf16>, vector<128x8xf32> -> vector<128x8xf32>
    %148 = arith.addf %143, %147 : vector<128x8xf32>
    %c0_106 = arith.constant 0 : index
    %c0_107 = arith.constant 0 : index
    %149 = vector.load %arg9[%c0_106, %c0_107] : memref<1x8xf32, #tpu.memory_space<vmem>>, vector<1x8xf32>
    %150 = vector.shape_cast %149 : vector<1x8xf32> to vector<8xf32>
    %151 = vector.shape_cast %150 : vector<8xf32> to vector<1x8xf32>
    %152 = vector.broadcast %151 : vector<1x8xf32> to vector<128x8xf32>
    %153 = arith.mulf %148, %152 : vector<128x8xf32>
    %c0_108 = arith.constant 0 : index
    %c0_109 = arith.constant 0 : index
    %154 = vector.load %arg10[%c0_108, %c0_109] : memref<1x8xf32, #tpu.memory_space<vmem>>, vector<1x8xf32>
    %155 = vector.shape_cast %154 : vector<1x8xf32> to vector<8xf32>
    %156 = vector.shape_cast %155 : vector<8xf32> to vector<1x8xf32>
    %157 = vector.broadcast %156 : vector<1x8xf32> to vector<128x8xf32>
    %158 = arith.addf %153, %157 : vector<128x8xf32>
    %cst_110 = arith.constant 0.000000e+00 : f32
    %159 = vector.broadcast %cst_110 : f32 to vector<128x8xf32>
    %160 = arith.maximumf %158, %159 : vector<128x8xf32>
    %161 = vector.shape_cast %160 : vector<128x8xf32> to vector<16x8x8xf32>
    %162 = arith.truncf %161 : vector<16x8x8xf32> to vector<16x8x8xbf16>
    %c0_111 = arith.constant 0 : index
    %c0_112 = arith.constant 0 : index
    %c0_113 = arith.constant 0 : index
    %c0_114 = arith.constant 0 : index
    %163 = vector.load %arg11[%c0_111, %c0_112, %c0_113, %c0_114] : memref<1x16x8x8xbf16, #tpu.memory_space<vmem>>, vector<1x16x8x8xbf16>
    %164 = vector.shape_cast %163 : vector<1x16x8x8xbf16> to vector<16x8x8xbf16>
    %165 = vector.shape_cast %162 : vector<16x8x8xbf16> to vector<1x16x8x8xbf16>
    tpu.vector_store %arg11[%c0_111, %c0_112, %c0_113, %c0_114], %165 {strides = array<i32>} : memref<1x16x8x8xbf16, #tpu.memory_space<vmem>>, vector<1x16x8x8xbf16>,
    return
  }
  func.func @transform_0(%arg0: i32) -> (i32, i32, i32) {
    %c0_i32 = arith.constant 0 : i32
    %c0_i32_0 = arith.constant 0 : i32
    %c0_i32_1 = arith.constant 0 : i32
    return %arg0, %c0_i32, %c0_i32_0 : i32, i32, i32
  }
  func.func @transform_1(%arg0: i32) -> (i32, i32, i32, i32) {
    %c0_i32 = arith.constant 0 : i32
    %c0_i32_0 = arith.constant 0 : i32
    %c0_i32_1 = arith.constant 0 : i32
    %c0_i32_2 = arith.constant 0 : i32
    return %arg0, %c0_i32, %c0_i32_0, %c0_i32_1 : i32, i32, i32, i32
  }
  func.func @transform_2(%arg0: i32) -> (i32, i32) {
    %c0_i32 = arith.constant 0 : i32
    %c0_i32_0 = arith.constant 0 : i32
    %c0_i32_1 = arith.constant 0 : i32
    return %c0_i32, %c0_i32_0 : i32, i32
  }
  func.func @transform_3(%arg0: i32) -> (i32, i32) {
    %c0_i32 = arith.constant 0 : i32
    %c0_i32_0 = arith.constant 0 : i32
    %c0_i32_1 = arith.constant 0 : i32
    return %c0_i32, %c0_i32_0 : i32, i32
  }
  func.func @transform_4(%arg0: i32) -> (i32, i32) {
    %c0_i32 = arith.constant 0 : i32
    %c0_i32_0 = arith.constant 0 : i32
    %c0_i32_1 = arith.constant 0 : i32
    return %c0_i32, %c0_i32_0 : i32, i32
  }
  func.func @transform_5(%arg0: i32) -> (i32, i32) {
    %c0_i32 = arith.constant 0 : i32
    %c0_i32_0 = arith.constant 0 : i32
    %c0_i32_1 = arith.constant 0 : i32
    return %c0_i32, %c0_i32_0 : i32, i32
  }
  func.func @transform_6(%arg0: i32) -> (i32, i32) {
    %c0_i32 = arith.constant 0 : i32
    %c0_i32_0 = arith.constant 0 : i32
    %c0_i32_1 = arith.constant 0 : i32
    return %c0_i32, %c0_i32_0 : i32, i32
  }
  func.func @transform_7(%arg0: i32) -> (i32, i32) {
    %c0_i32 = arith.constant 0 : i32
    %c0_i32_0 = arith.constant 0 : i32
    %c0_i32_1 = arith.constant 0 : i32
    return %c0_i32, %c0_i32_0 : i32, i32
  }
  func.func @transform_8(%arg0: i32) -> (i32, i32) {
    %c0_i32 = arith.constant 0 : i32
    %c0_i32_0 = arith.constant 0 : i32
    %c0_i32_1 = arith.constant 0 : i32
    return %c0_i32, %c0_i32_0 : i32, i32
  }
  func.func @transform_9(%arg0: i32) -> (i32, i32) {
    %c0_i32 = arith.constant 0 : i32
    %c0_i32_0 = arith.constant 0 : i32
    %c0_i32_1 = arith.constant 0 : i32
    return %c0_i32, %c0_i32_0 : i32, i32
  }
  func.func @transform_10(%arg0: i32) -> (i32, i32, i32, i32) {
    %c0_i32 = arith.constant 0 : i32
    %c0_i32_0 = arith.constant 0 : i32
    %c0_i32_1 = arith.constant 0 : i32
    %c0_i32_2 = arith.constant 0 : i32
    return %arg0, %c0_i32, %c0_i32_0, %c0_i32_1 : i32, i32, i32, i32
  }
}

</mosaic_0001>

<bundles_post_ra>
// kernel: decoder_forward.2
= control target key start
LH: loop header
LB: loop body
LE: loop exit
PB: predicated region body
PF: predicated region fallthrough
CT: control target
= control target key end

     0   :  { %s6252_s0 = inlined_call_operand.hbm [shape: bf16[2,16,16], index: 0, kind: input, shape index: {}]   ;;  %s6253_s1 = inlined_call_operand.hbm [shape: bf16[2,8,4,16], index: 1, kind: input, shape index: {}]   ;;  %s6254_s2 = inlined_call_operand.hbm [shape: bf16[16,32], index: 2, kind: input, shape index: {}]   ;;  %s6255_s3 = inlined_call_operand.hbm [shape: f32[1,32], index: 3, kind: input, shape index: {}]   ;;  %s6256_s4 = inlined_call_operand.hbm [shape: bf16[288,16], index: 4, kind: input, shape index: {}]   ;;  %s6257_s5 = inlined_call_operand.hbm [shape: f32[1,16], index: 5, kind: input, shape index: {}]   ;;  %s6258_s6 = inlined_call_operand.hbm [shape: f32[1,16], index: 6, kind: input, shape index: {}]   ;;  %s6259_s7 = inlined_call_operand.hbm [shape: bf16[144,16], index: 7, kind: input, shape index: {}]   ;;  %s6260_s8 = inlined_call_operand.hbm [shape: f32[1,16], index: 8, kind: input, shape index: {}]   ;;  %s6261_s9 = inlined_call_operand.hbm [shape: f32[1,16], index: 9, kind: input, shape index: {}]   ;;  %s6262_s10 = inlined_call_operand.hbm [shape: bf16[2,8,4,16], index: 10, kind: output, shape index: {}]  }
   0x1   :  { %6271 = sst [smem:[#allocation30_spill]] %s6252_s0 }
   0x2   :  { %6272 = sst [smem:[#allocation31_spill]] %s6254_s2 }
   0x3   :  { %6273 = sst [smem:[#allocation32_spill]] %s6255_s3 }
   0x4   :  { %6274 = sst [smem:[#allocation33_spill]] %s6256_s4 }
   0x5   :  { %6275 = sst [smem:[#allocation34_spill]] %s6257_s5 }
   0x6   :  { %6276 = sst [smem:[#allocation35_spill]] %s6258_s6 }
   0x7   :  { %6277 = sst [smem:[#allocation36_spill]] %s6262_s10 }
   0x8   :  { %15 = vsyncpa [#allocation4], 0 }
   0x9   :  { %17 = vsyncpa [#allocation4 + $0x1], 0 }
   0xa   :  { %18 = vsyncpa [#allocation7], 0 }
   0xb   :  { %20 = vsyncpa [#allocation7 + $0x1], 0 }
   0xc   :  { %21 = vsyncpa [#allocation10], 0 }
   0xd   :  { %22 = vsyncpa [#allocation13], 0 }
   0xe   :  { %23 = vsyncpa [#allocation16], 0 }
   0xf   :  { %24 = vsyncpa [#allocation19], 0 }
  0x10   :  { %25 = vsyncpa [#allocation5], 0 }
  0x11   :  { %27 = vsyncpa [#allocation5 + $0x1], 0  ;;  %s5297_s13 = smov 0   ;;  %s5299_s14 = smov 0  }
  0x12   :  { %s5301_s15 = smov 0   ;;  %s5303_s16 = smov 0  }
  0x13 LB: > { %s5218_s17 = smov [#allocation8]   ;;  %s5318_s19 = sadd.s32 4294967295, %s5216_s16   ;;  %s5216_s16 = sphi %s5303_s16, %s6336_s16   ;;  %s5212_s15 = sphi %s5301_s15, %s6335_s15   ;;  %s5208_s14 = sphi %s5299_s14, %s6334_s14   ;;  %s5204_s13 = sphi %s5297_s13, %s6333_s13  }
  0x14   : > { %s296_s18 = sshll.u32 %s5218_s17, 4  ;;  %p4190_p0 = scmp.ge.s32.totalorder %s5216_s16, 1  ;;  %s5323_s18 = int_to_ptr.vmem [resolvable:$true] %s296_s18 }
  0x15   : > { %p6267_p1 = scmp.eq.s32.totalorder %s5318_s19, 0  ;;  %p284_p2 = scmp.lt.s32.totalorder %s5216_s16, 3 }
  0x16   : > { %s5219_s21 = smov [#allocation9]   ;;  %s5220_s24 = smov [#allocation12]  }
  0x17   : > { %p5325_p3 = pnand %p4190_p0, %p284_p2  ;;  %s310_s22 = sshll.u32 %s5219_s21, 4  ;;  %s5338_s22 = int_to_ptr.vmem [resolvable:$true] %s310_s22 }
  0x18   : > { %s334_s25 = sshll.u32 %s5220_s24, 4  ;;  %s6281_s2 = sld [smem:[#allocation31_spill]]  ;;  %s5340_s25 = int_to_ptr.vmem [resolvable:$true] %s334_s25 }
  0x19   : > { %s6278_s20 = scalar_select %p5325_p3, 1, 0 }
  0x1a   : > { %p4689_p5 = pneg %p5325_p3 }
  0x1b   : > { %6279 = sst [smem:[#allocation29_spill]] %s6278_s20 }
  0x1c   : > { %p5334_p6 = pnand %p4689_p5, %p6267_p1 }
  0x1e   : > { %s4842_s28 = scalar_lea.hbm %s6281_s2, 128  ;;  %p5350_p8 = pneg %p5334_p6 }
  0x1f   : > { %p4843_p7 = scmp.ne.s32.totalorder %s6281_s2, %s4842_s28  ;;  %p4849_p11 = scmp.lt.u32.totalorder %s4842_s28, %s6281_s2 }
  0x21   : > { %p4845_p9 = pnand %p5350_p8, %p4843_p7 }
  0x23   : > { %p4846_p10 = pneg %p4845_p9 }
  0x25   : > { %p4851_p12 = pnand %p4849_p11, %p4846_p10 }
  0x27   : > { %4854 = shalt.err (!%p4851_p12)
}
  0x28   : > { %s4855_s21 = scalar_lea.vmem %s5323_s18, 128  ;;  %p4863_p5 = scmp.lt.s32.totalorder %s5323_s18, %s5323_s18 }
  0x29   : > { %p4856_p13 = scmp.ne.s32.totalorder %s5323_s18, %s4855_s21  ;;  %p4864_p4 = scmp.lt.s32.totalorder %s4855_s21, %s4855_s21 }
  0x2b   : > { %p4858_p0 = pnand %p4856_p13, %p5350_p8  ;;  %p4865_p7 = por %p4864_p4, %p4863_p5 }
  0x2d   : > { %p4859_p2 = pneg %p4858_p0 }
  0x2f   : > { %p4866_p9 = pnand %p4865_p7, %p4859_p2 }
  0x31   : > { %4869 = shalt.err (!%p4866_p9)
}
  0x32   : > { %s6265_s24 = smov 64   ;;  %s6269_s26 = smov 4  }
  0x33   : > { %4692 = dma.hbm_to_vmem [thread:$0]  (!%p5334_p6), %s6281_s2, 128, %s5323_s18, [#allocation7], %s6265_s24, %s6265_s24, %s6269_s26  }
  0x34   : > { %s6283_s3 = sld [smem:[#allocation32_spill]] }
  0x3a   : > { %s4870_s12 = scalar_lea.hbm %s6283_s3, 16 }
  0x3b   : > { %p4871_p4 = scmp.ne.s32.totalorder %s6283_s3, %s4870_s12  ;;  %p4877_p12 = scmp.lt.u32.totalorder %s4870_s12, %s6283_s3 }
  0x3d   : > { %p4873_p10 = pnand %p4871_p4, %p5350_p8 }
  0x3f   : > { %p4874_p11 = pneg %p4873_p10 }
  0x41   : > { %p4879_p13 = pnand %p4877_p12, %p4874_p11 }
  0x43   : > { %4882 = shalt.err (!%p4879_p13)
}
  0x44   : > { %s4883_s18 = scalar_lea.vmem %s5338_s22, 16  ;;  %s4890_s27 = scalar_lea.vmem %s5338_s22, 32 }
  0x45   : > { %p4884_p0 = scmp.ne.s32.totalorder %s5338_s22, %s4883_s18  ;;  %p4891_p7 = scmp.lt.s32.totalorder %s5338_s22, %s5338_s22 }
  0x46   : > { %p4892_p9 = scmp.lt.s32.totalorder %s4890_s27, %s4883_s18 }
  0x47   : > { %p4886_p2 = pnand %p4884_p0, %p5350_p8 }
  0x48   : > { %p4893_p4 = por %p4892_p9, %p4891_p7 }
  0x49   : > { %p4887_p5 = pneg %p4886_p2 }
  0x4b   : > { %p4894_p10 = pnand %p4893_p4, %p4887_p5 }
  0x4d   : > { %4897 = shalt.err (!%p4894_p10)
}
  0x4e   : > { %4695 = dma.hbm_to_vmem [thread:$0]  (!%p5334_p6), %s6283_s3, 16, %s5338_s22, [#allocation10]  }
  0x4f   : > { %s6284_s5 = sld [smem:[#allocation34_spill]] }
  0x55   : > { %s4898_s30 = scalar_lea.hbm %s6284_s5, 16 }
  0x56   : > { %p4899_p11 = scmp.ne.s32.totalorder %s6284_s5, %s4898_s30  ;;  %p4905_p0 = scmp.lt.u32.totalorder %s4898_s30, %s6284_s5 }
  0x58   : > { %p4901_p12 = pnand %p4899_p11, %p5350_p8 }
  0x5a   : > { %p4902_p13 = pneg %p4901_p12 }
  0x5c   : > { %p4907_p2 = pnand %p4905_p0, %p4902_p13 }
  0x5e   : > { %4910 = shalt.err (!%p4907_p2)
}
  0x5f   : > { %s4911_s22 = scalar_lea.vmem %s5340_s25, 16  ;;  %s4918_s27 = scalar_lea.vmem %s5340_s25, 32 }
  0x60   : > { %p4912_p5 = scmp.ne.s32.totalorder %s5340_s25, %s4911_s22  ;;  %p4919_p4 = scmp.lt.s32.totalorder %s5340_s25, %s5340_s25 }
  0x61   : > { %p4920_p10 = scmp.lt.s32.totalorder %s4918_s27, %s4911_s22 }
  0x62   : > { %p4914_p7 = pnand %p4912_p5, %p5350_p8 }
  0x63   : > { %p4921_p11 = por %p4920_p10, %p4919_p4 }
  0x64   : > { %p4915_p9 = pneg %p4914_p7 }
  0x66   : > { %p4922_p12 = pnand %p4921_p11, %p4915_p9 }
  0x68   : > { %4925 = shalt.err (!%p4922_p12)
}
  0x69   : > { %4701 = dma.hbm_to_vmem [thread:$0]  (!%p5334_p6), %s6284_s5, 16, %s5340_s25, [#allocation13]  }
  0x6a   : > { %s5223_s28 = smov [#allocation15]   ;;  %s5224_s30 = smov [#allocation11]  }
  0x6b   : > { %s355_s29 = sshll.u32 %s5223_s28, 4  ;;  %s320_s12 = sshll.u32 %s5224_s30, 4  ;;  %s356_s29 = int_to_ptr.vmem [resolvable:$true] %s355_s29  ;;  %s321_s12 = int_to_ptr.vmem [resolvable:$true] %s320_s12 }
  0x6c   : > { %s4926_s18 = scalar_lea.hbm %s6259_s7, 1152 }
  0x6d   : > { %p4927_p13 = scmp.ne.s32.totalorder %s6259_s7, %s4926_s18  ;;  %p4933_p5 = scmp.lt.u32.totalorder %s4926_s18, %s6259_s7 }
  0x6f   : > { %p4929_p0 = pnand %p4927_p13, %p5350_p8 }
  0x71   : > { %p4930_p2 = pneg %p4929_p0 }
  0x73   : > { %p4935_p7 = pnand %p4933_p5, %p4930_p2 }
  0x75   : > { %4938 = shalt.err (!%p4935_p7)
}
  0x76   : > { %s4939_s25 = scalar_lea.vmem %s356_s29, 1152  ;;  %p4947_p11 = scmp.lt.s32.totalorder %s356_s29, %s356_s29 }
  0x77   : > { %p4940_p9 = scmp.ne.s32.totalorder %s356_s29, %s4939_s25  ;;  %p4948_p12 = scmp.lt.s32.totalorder %s4939_s25, %s4939_s25 }
  0x79   : > { %p4942_p4 = pnand %p4940_p9, %p5350_p8  ;;  %p4949_p1 = por %p4948_p12, %p4947_p11 }
  0x7b   : > { %p4943_p10 = pneg %p4942_p4 }
  0x7d   : > { %p4950_p3 = pnand %p4949_p1, %p4943_p10 }
  0x7f   : > { %4953 = shalt.err (!%p4950_p3)
}
  0x80   : > { %s6285_s20 = smov 64   ;;  %s6286_s4 = sld [smem:[#allocation33_spill]] }
  0x81   : > { %4707 = dma.hbm_to_vmem [thread:$0]  (!%p5334_p6), %s6259_s7, 1152, %s356_s29, [#allocation16], %s6285_s20, %s6285_s20, %s6269_s26  }
  0x86   : > { %s4954_s21 = scalar_lea.hbm %s6286_s4, 2304 }
  0x87   : > { %p4955_p1 = scmp.ne.s32.totalorder %s6286_s4, %s4954_s21  ;;  %p4961_p0 = scmp.lt.u32.totalorder %s4954_s21, %s6286_s4 }
  0x89   : > { %p4957_p3 = pnand %p4955_p1, %p5350_p8 }
  0x8b   : > { %p4958_p13 = pneg %p4957_p3 }
  0x8d   : > { %p4963_p2 = pnand %p4961_p0, %p4958_p13 }
  0x8f   : > { %4966 = shalt.err (!%p4963_p2)
}
  0x90   : > { %s4967_s25 = scalar_lea.vmem %s321_s12, 2304  ;;  %p4975_p4 = scmp.lt.s32.totalorder %s321_s12, %s321_s12 }
  0x91   : > { %p4968_p5 = scmp.ne.s32.totalorder %s321_s12, %s4967_s25  ;;  %p4976_p10 = scmp.lt.s32.totalorder %s4967_s25, %s4967_s25 }
  0x93   : > { %p4970_p7 = pnand %p4968_p5, %p5350_p8  ;;  %p4977_p11 = por %p4976_p10, %p4975_p4 }
  0x95   : > { %p4971_p9 = pneg %p4970_p7 }
  0x97   : > { %p4978_p12 = pnand %p4977_p11, %p4971_p9 }
  0x99   : > { %4981 = shalt.err (!%p4978_p12)
}
  0x9a   : > { %4698 = dma.hbm_to_vmem [thread:$0]  (!%p5334_p6), %s6286_s4, 2304, %s321_s12, [#allocation10], %s6285_s20, %s6285_s20, %s6269_s26  }
  0x9b   : > { %s5225_s28 = smov [#allocation14]   ;;  %s5226_s17 = smov [#allocation17]  }
  0x9c   : > { %s345_s30 = sshll.u32 %s5225_s28, 4  ;;  %s369_s21 = sshll.u32 %s5226_s17, 4  ;;  %s346_s30 = int_to_ptr.vmem [resolvable:$true] %s345_s30  ;;  %s370_s21 = int_to_ptr.vmem [resolvable:$true] %s369_s21 }
  0x9d   : > { %s6287_s6 = sld [smem:[#allocation35_spill]] }
  0xa3   : > { %s4982_s27 = scalar_lea.hbm %s6287_s6, 16 }
  0xa4   : > { %p4983_p1 = scmp.ne.s32.totalorder %s6287_s6, %s4982_s27  ;;  %p4989_p0 = scmp.lt.u32.totalorder %s4982_s27, %s6287_s6 }
  0xa6   : > { %p4985_p3 = pnand %p4983_p1, %p5350_p8 }
  0xa8   : > { %p4986_p13 = pneg %p4985_p3 }
  0xaa   : > { %p4991_p2 = pnand %p4989_p0, %p4986_p13 }
  0xac   : > { %4994 = shalt.err (!%p4991_p2)
}
  0xad   : > { %s4995_s12 = scalar_lea.vmem %s346_s30, 16  ;;  %s5002_s24 = scalar_lea.vmem %s346_s30, 32 }
  0xae   : > { %p4996_p5 = scmp.ne.s32.totalorder %s346_s30, %s4995_s12  ;;  %p5003_p4 = scmp.lt.s32.totalorder %s346_s30, %s346_s30 }
  0xaf   : > { %p5004_p10 = scmp.lt.s32.totalorder %s5002_s24, %s4995_s12 }
  0xb0   : > { %p4998_p7 = pnand %p4996_p5, %p5350_p8 }
  0xb1   : > { %p5005_p11 = por %p5004_p10, %p5003_p4 }
  0xb2   : > { %p4999_p9 = pneg %p4998_p7 }
  0xb4   : > { %p5006_p12 = pnand %p5005_p11, %p4999_p9 }
  0xb6   : > { %5009 = shalt.err (!%p5006_p12)
}
  0xb7   : > { %4704 = dma.hbm_to_vmem [thread:$0]  (!%p5334_p6), %s6287_s6, 16, %s346_s30, [#allocation13]  }
  0xb8   : > { %s5010_s22 = scalar_lea.hbm %s6260_s8, 16 }
  0xb9   : > { %p5011_p1 = scmp.ne.s32.totalorder %s6260_s8, %s5010_s22  ;;  %p5017_p0 = scmp.lt.u32.totalorder %s5010_s22, %s6260_s8 }
  0xbb   : > { %p5013_p3 = pnand %p5011_p1, %p5350_p8 }
  0xbd   : > { %p5014_p13 = pneg %p5013_p3 }
  0xbf   : > { %p5019_p2 = pnand %p5017_p0, %p5014_p13 }
  0xc1   : > { %5022 = shalt.err (!%p5019_p2)
}
  0xc2   : > { %s5023_s12 = scalar_lea.vmem %s370_s21, 16  ;;  %s5030_s30 = scalar_lea.vmem %s370_s21, 32 }
  0xc3   : > { %p5024_p5 = scmp.ne.s32.totalorder %s370_s21, %s5023_s12  ;;  %p5031_p4 = scmp.lt.s32.totalorder %s370_s21, %s370_s21 }
  0xc4   : > { %p5032_p10 = scmp.lt.s32.totalorder %s5030_s30, %s5023_s12 }
  0xc5   : > { %p5026_p7 = pnand %p5024_p5, %p5350_p8 }
  0xc6   : > { %p5033_p11 = por %p5032_p10, %p5031_p4 }
  0xc7   : > { %p5027_p9 = pneg %p5026_p7 }
  0xc9   : > { %p5034_p12 = pnand %p5033_p11, %p5027_p9 }
  0xcb   : > { %5037 = shalt.err (!%p5034_p12)
}
  0xcc   : > { %4710 = dma.hbm_to_vmem [thread:$0]  (!%p5334_p6), %s6260_s8, 16, %s370_s21, [#allocation16]  }
  0xcd   : > { %s5227_s17 = smov [#allocation18]   ;;  %s5038_s27 = scalar_lea.hbm %s6261_s9, 16 }
  0xce   : > { %s380_s2 = sshll.u32 %s5227_s17, 4  ;;  %p5039_p1 = scmp.ne.s32.totalorder %s6261_s9, %s5038_s27  ;;  %s381_s2 = int_to_ptr.vmem [resolvable:$true] %s380_s2 }
  0xcf   : > { %p5045_p0 = scmp.lt.u32.totalorder %s5038_s27, %s6261_s9 }
  0xd0   : > { %p5041_p3 = pnand %p5039_p1, %p5350_p8 }
  0xd2   : > { %p5042_p13 = pneg %p5041_p3 }
  0xd4   : > { %p5047_p2 = pnand %p5045_p0, %p5042_p13 }
  0xd6   : > { %5050 = shalt.err (!%p5047_p2)
}
  0xd7   : > { %s5051_s21 = scalar_lea.vmem %s381_s2, 16  ;;  %s5058_s30 = scalar_lea.vmem %s381_s2, 32 }
  0xd8   : > { %p5052_p5 = scmp.ne.s32.totalorder %s381_s2, %s5051_s21  ;;  %p5059_p4 = scmp.lt.s32.totalorder %s381_s2, %s381_s2 }
  0xd9   : > { %p5060_p10 = scmp.lt.s32.totalorder %s5058_s30, %s5051_s21 }
  0xda   : > { %p5054_p7 = pnand %p5052_p5, %p5350_p8 }
  0xdb   : > { %p5061_p11 = por %p5060_p10, %p5059_p4 }
  0xdc   : > { %p5055_p9 = pneg %p5054_p7 }
  0xde   : > { %p5062_p12 = pnand %p5061_p11, %p5055_p9 }
  0xe0   : > { %5065 = shalt.err (!%p5062_p12)
}
  0xe1   : > { %4713 = dma.hbm_to_vmem [thread:$0]  (!%p5334_p6), %s6261_s9, 16, %s381_s2, [#allocation19]  }
  0xe2   : > { %s4189_s11 = sadd.s32 4294967294, %s5216_s16   ;;  %s5520_s23 = sadd.s32 1, %s5216_s16  }
  0xe3   : > { %s37_s17 = ssub.s32 %s5216_s16, %s5520_s23  ;;  %s40_s18 = sadd.s32 1, %s5212_s15 }
  0xe4   : > { %p38_p8 = scmp.eq.s32.totalorder %s37_s17, 0  ;;  %p47_p1 = scmp.ne.s32.totalorder %s5212_s15, %s5208_s14 }
  0xe5   : > { %p48_p3 = scmp.eq.s32.totalorder %s5216_s16, 0  ;;  %p53_p13 = scmp.ne.s32.totalorder %s5208_s14, %s5204_s13 }
  0xe6   : > { %s5531_s22 = scalar_select %p38_p8, %s5212_s15, %s40_s18  }
  0xe7   : > { %p5533_p0 = por %p48_p3, %p47_p1  ;;  %p6289_p2 = scmp.eq.s32.totalorder %s5318_s19, 0 }
  0xe8   : > { %p271_p5 = scmp.eq.s32.totalorder %s5318_s19, 1  ;;  %p277_p7 = scmp.eq.s32.totalorder %s4189_s11, 1 }
  0xe9   : > { %p5539_p6 = por %p6289_p2, %p53_p13  ;;  %p4733_p9 = scmp.lt.s32.totalorder %s5216_s16, 2 }
  0xea   : > { %s5546_s10 = sand.u32 1, %s5212_s15   ;;  %p5548_p4 = por %p271_p5, %p47_p1 }
  0xeb   : > { %p5552_p10 = por %p277_p7, %p53_p13  ;;  %s4200_s12 = sshll.u32 %s5546_s10, 3 }
  0xec   : > { %s6291_s25 = scalar_select %p5548_p4, 1, 0 }
  0xed   : > { %s6292_s29 = scalar_select %p5552_p10, 1, 0 }
  0xee   : > { %s4379_s21 = sshll.u32 %s5216_s16, 7  ;;  %s6293_s0 = sld [smem:[#allocation30_spill]] }
  0xef   : > { %s395_s11 = scalar_lea.vmem [#allocation3], %s4200_s12  ;;  %p5567_p11 = pnand %p4733_p9, %p5533_p0 }
  0xf0   : > { %s402_s17 = sshll.u32 %s395_s11, 4  ;;  %s4203_s3 = sshll.u32 %s5546_s10, 4  ;;  %s5563_s17 = int_to_ptr.vmem [resolvable:$true] %s402_s17 }
  0xf1   : > { %s392_s30 = scalar_lea.sflag [#allocation4], %s5546_s10  ;;  %p5068_p8 = pneg %p5567_p11 }
  0xf4   : > { %s5561_s28 = scalar_lea.hbm %s6293_s0, %s4379_s21  ;;  %s5071_s27 = scalar_lea.hbm %s6293_s0, 256 }
  0xf5   : > { %s5066_s21 = scalar_lea.hbm %s5561_s28, 128  ;;  %p5072_p13 = scmp.lt.u32.totalorder %s5561_s28, %s6293_s0 }
  0xf6   : > { %p5067_p12 = scmp.ne.s32.totalorder %s5561_s28, %s5066_s21  ;;  %p5073_p0 = scmp.lt.u32.totalorder %s5071_s27, %s5066_s21 }
  0xf7   : > { %p5075_p5 = scmp.lt.u32.totalorder %s5066_s21, %s5561_s28 }
  0xf8   : > { %p5069_p1 = pnand %p5068_p8, %p5067_p12  ;;  %p5074_p2 = por %p5073_p0, %p5072_p13 }
  0xfa   : > { %p5070_p3 = pneg %p5069_p1  ;;  %p5076_p7 = por %p5075_p5, %p5074_p2 }
  0xfc   : > { %p5077_p9 = pnand %p5076_p7, %p5070_p3 }
  0xfe   : > { %5080 = shalt.err (!%p5077_p9)
}
  0xff   : > { %s5081_s26 = scalar_lea.vmem %s5563_s17, 128  ;;  %s5228_s12 = smov [#allocation3]  }
 0x100   : > { %p5082_p12 = scmp.ne.s32.totalorder %s5563_s17, %s5081_s26  ;;  %s5086_s24 = sshll.u32 %s5228_s12, 4  ;;  %s5087_s24 = int_to_ptr.vmem [resolvable:$false] %s5086_s24 }
 0x101   : > { %s5088_s4 = scalar_lea.vmem %s5087_s24, 256  ;;  %p5089_p4 = scmp.lt.s32.totalorder %s5563_s17, %s5087_s24 }
 0x102   : > { %p5084_p1 = pnand %p5082_p12, %p5068_p8  ;;  %p5090_p13 = scmp.lt.s32.totalorder %s5088_s4, %s5081_s26 }
 0x104   : > { %p5085_p10 = pneg %p5084_p1  ;;  %p5091_p0 = por %p5090_p13, %p5089_p4 }
 0x106   : > { %p5092_p2 = pnand %p5091_p0, %p5085_p10 }
 0x108   : > { %5095 = shalt.err (!%p5092_p2)
}
 0x109   : > { %s6295_s21 = smov 4   ;;  %s4380_s27 = sshll.u32 %s5216_s16, 8 }
 0x10a   : > { %4717 = dma.hbm_to_vmem [thread:$0]  (!%p5567_p11), %s5561_s28, 128, %s5563_s17, %s392_s30, %s6285_s20, %s6285_s20, %s6295_s21  }
 0x10b   : > { %s5608_s12 = scalar_lea.hbm %s6253_s1, %s4380_s27  ;;  %s416_s24 = scalar_lea.vmem [#allocation6], %s4203_s3 }
 0x10c   : > { %s423_s4 = sshll.u32 %s416_s24, 4  ;;  %s6296_s0 = sand.u32 1, %s5216_s16   ;;  %s5612_s4 = int_to_ptr.vmem [resolvable:$true] %s423_s4 }
 0x10d   : > { %s5616_s5 = scalar_lea.sflag [#allocation7], %s6296_s0  ;;  %s5096_s6 = scalar_lea.hbm %s5608_s12, 256 }
 0x10e   : > { %p5097_p4 = scmp.ne.s32.totalorder %s5608_s12, %s5096_s6  ;;  %s5101_s10 = scalar_lea.hbm %s6253_s1, 512 }
 0x10f   : > { %p5102_p5 = scmp.lt.u32.totalorder %s5608_s12, %s6253_s1  ;;  %p5103_p7 = scmp.lt.u32.totalorder %s5101_s10, %s5096_s6 }
 0x110   : > { %p5099_p10 = pnand %p5097_p4, %p5068_p8  ;;  %p5105_p12 = scmp.lt.u32.totalorder %s5096_s6, %s5608_s12 }
 0x111   : > { %p5104_p9 = por %p5103_p7, %p5102_p5 }
 0x112   : > { %p5100_p3 = pneg %p5099_p10 }
 0x113   : > { %p5106_p1 = por %p5105_p12, %p5104_p9 }
 0x115   : > { %p5107_p13 = pnand %p5106_p1, %p5100_p3 }
 0x117   : > { %5110 = shalt.err (!%p5107_p13)
}
 0x118   : > { %s5111_s0 = scalar_lea.vmem %s5612_s4, 256  ;;  %s5229_s3 = smov [#allocation6]  }
 0x119   : > { %p5112_p0 = scmp.ne.s32.totalorder %s5612_s4, %s5111_s0  ;;  %s5116_s21 = sshll.u32 %s5229_s3, 4  ;;  %s5117_s21 = int_to_ptr.vmem [resolvable:$false] %s5116_s21 }
 0x11a   : > { %s5118_s27 = scalar_lea.vmem %s5117_s21, 512  ;;  %p5119_p10 = scmp.lt.s32.totalorder %s5612_s4, %s5117_s21 }
 0x11b   : > { %p5114_p2 = pnand %p5112_p0, %p5068_p8  ;;  %p5120_p5 = scmp.lt.s32.totalorder %s5118_s27, %s5111_s0 }
 0x11d   : > { %p5115_p4 = pneg %p5114_p2  ;;  %p5121_p7 = por %p5120_p5, %p5119_p10 }
 0x11f   : > { %p5122_p9 = pnand %p5121_p7, %p5115_p4 }
 0x121   : > { %5125 = shalt.err (!%p5122_p9)
}
 0x122   : > { %s5230_s6 = smov 32   ;;  %s5231_s11 = smov 2  }
 0x123   : > { %4720 = dma.hbm_to_vmem [thread:$0]  (!%p5567_p11), %s5608_s12, 256, %s5612_s4, %s5616_s5, %s5230_s6, %s5230_s6, %s5231_s11  }
 0x124   : > { %s6297_s26 = sld [smem:[#allocation29_spill]] }
 0x12a   : > { %p6298_p8 = scmp.ne.s32.totalorder %s6297_s26, 0 }
 0x12b   : > { %s5645_s24 = sand.u32 (!%p6298_p8), 1, %s5208_s14  }
 0x12c   : > { %435 = sbr.rel (%p6298_p8) target bundleno = 1521 (0x5f1), region = 60  ;;  %s4207_s20 = sshll.u32 (!%p6298_p8), %s5645_s24, 3 }
 0x12d   : > { %s438_s28 = scalar_lea.sflag (!%p6298_p8), [#allocation4], %s5645_s24  ;;  %s441_s10 = scalar_lea.vmem (!%p6298_p8), [#allocation3], %s4207_s20 }
 0x133   : > { %5171 = dma.done.wait (%p5539_p6), %s438_s28, 128  }
 0x134   : > { %5173 = vsyncadd (%p5539_p6), %s438_s28, 4294967168  ;;  %s446_s5 = sand.u32 1, %s5318_s19   ;;  %s4208_s18 = sshll.u32 %s5645_s24, 4 }
 0x135   : > { %s447_s12 = scalar_lea.sflag [#allocation7], %s446_s5  ;;  %s5657_s4 = scalar_lea.vmem [#allocation6], %s4208_s18 }
 0x136   : > { %5175 = dma.done.wait (%p5539_p6), %s447_s12, 256  }
 0x137   : > { %5177 = vsyncadd (%p5539_p6), %s447_s12, 4294967040  ;;  %p6299_p11 = scmp.eq.s32.totalorder %s5318_s19, 0 }
 0x139   : > { %5179 = dma.done.wait (%p6299_p11), [#allocation7], 128   ;;  %p6300_p3 = pmov %p6299_p11 }
 0x13b   : > { %5181 = vsyncadd (%p6300_p3), [#allocation7], 4294967168  ;;  %p6301_p12 = pmov %p6300_p3 }
 0x13c   : > { %p6302_p1 = pmov %p6300_p3 }
 0x13d   : > { %5183 = dma.done.wait (%p6301_p12), [#allocation10], 2320  }
 0x13e   : > { %5185 = vsyncadd (%p6302_p1), [#allocation10], 4294964976  ;;  %p6303_p13 = pmov %p6302_p1 }
 0x13f   : > { %p6304_p0 = pmov %p6302_p1 }
 0x140   : > { %5187 = dma.done.wait (%p6303_p13), [#allocation13], 32  }
 0x141   : > { %5189 = vsyncadd (%p6304_p0), [#allocation13], 4294967264  ;;  %p6305_p6 = pmov %p6304_p0 }
 0x142   : > { %p6306_p2 = pmov %p6304_p0 }
 0x143   : > { %5191 = dma.done.wait (%p6305_p6), [#allocation16], 1168  }
 0x144   : > { %5193 = vsyncadd (%p6306_p2), [#allocation16], 4294966128  ;;  %p6307_p4 = pmov %p6304_p0 }
 0x145   : > { %p6308_p10 = pmov %p6304_p0 }
 0x146   : > { %5195 = dma.done.wait (%p6307_p4), [#allocation19], 16  }
 0x147   : > { %5197 = vsyncadd (%p6308_p10), [#allocation19], 4294967280  ;;  %v5232_v0 = vmov 0.0   ;;  %vm5233_vm0 = vmmov 0   ;;  %v4796_v1 = vld [vmem:[#allocation8] sm:$0xff]   ;;  %v4797_v2 = vld [vmem:[%s441_s10] sm:$0xff]   ;;  %v668_v21 = vlaneseq }
 0x148   : > { %4455 = vmatprep.subr.bf16.mxu0 %v5232_v0  ;;  %4457 = vmatprep.mubr.msk.bf16.mxu0 %vm5233_vm0, %v5232_v0  ;;  %vm617_vm1 = vcmask 130048   ;;  %vm529_vm2 = vcmask 253952   ;;  %vm530_vm3 = vsmask.f32 256  ;;  %vm562_vm4 = vcmask 256002   ;;  %s5235_s2 = smov 112  }
 0x149   : > { %4456 = vmatpush3.bf16.msra.mxu0 %v4796_v1  ;;  %vm563_vm5 = vsmask.f32 7946  ;;  %vm5684_vm6 = vmand %vm529_vm2, %vm530_vm3  ;;  %v535_v4 = vld [vmem:[#allocation2 + $0x4] sm:$0x1]  ;;  %v568_v5 = vld [vmem:[#allocation2 + $0x4] sm:$0x4] }
 0x14a   : > { %vm5688_vm7 = vmand %vm562_vm4, %vm563_vm5  ;;  %v536_v7 = vsel %vm5684_vm6, 0, %v535_v4  ;;  %v547_v8 = vld [vmem:[#allocation2 + $0x14] sm:$0x1]  ;;  %v580_v9 = vld [vmem:[#allocation2 + $0x14] sm:$0x4]  ;;  %v669_v35 = vshrl.u32 %v668_v21, 7 }
 0x14b   : > { %537 = vst [vmem:[#allocation2 + $0x4] sm:$0x1] %v536_v7  ;;  %v569_v10 = vsel %vm5688_vm7, 0, %v568_v5  ;;  %v548_v11 = vsel %vm5684_vm6, 0, %v547_v8  ;;  %v581_v12 = vsel %vm5688_vm7, 0, %v580_v9  ;;  %vm810_vm8 = vcmask 59392  }
 0x14c   : > { %4458 = vmatmul.mubr.msk.bf16.vlgmr.msra.gmra.mrb[0].mxu0 %vm617_vm1, %v4797_v2  ;;  %570 = vst [vmem:[#allocation2 + $0x4] sm:$0x4] %v569_v10  ;;  %549 = vst [vmem:[#allocation2 + $0x14] sm:$0x1] %v548_v11  ;;  %v541_v13 = vld [vmem:[#allocation2 + $0xc] sm:$0x1] }
 0x14d   : > { %582 = vst [vmem:[#allocation2 + $0x14] sm:$0x4] %v581_v12  ;;  %v542_v14 = vsel %vm5684_vm6, 0, %v541_v13  ;;  %v574_v15 = vld [vmem:[#allocation2 + $0xc] sm:$0x4]  ;;  %s5236_s17 = smov 8  }
 0x14e   : > { %v553_v16 = vld [vmem:[#allocation2 + $0x1c] sm:$0x1]  ;;  %543 = vst [vmem:[#allocation2 + $0xc] sm:$0x1] %v542_v14  ;;  %v575_v17 = vsel %vm5688_vm7, 0, %v574_v15  ;;  %vm525_vm11 = vcmask 256000  }
 0x14f   : > { %v554_v18 = vsel %vm5684_vm6, 0, %v553_v16  ;;  %v586_v19 = vld [vmem:[#allocation2 + $0x1c] sm:$0x4]  ;;  %576 = vst [vmem:[#allocation2 + $0xc] sm:$0x4] %v575_v17  ;;  %s5238_s30 = smov 16  }
 0x150   : > { %555 = vst [vmem:[#allocation2 + $0x1c] sm:$0x1] %v554_v18  ;;  %v587_v20 = vsel %vm5688_vm7, 0, %v586_v19  ;;  %v5234_v23 = vmov 1983009808   ;;  %vm861_vm12 = vcmask 190592  }
 0x151   : > { %588 = vst [vmem:[#allocation2 + $0x1c] sm:$0x4] %v587_v20  ;;  %v4223_v22 = vld.sshfl [vmem:[%s5657_s4] sm:$0x3 pattern:$0x76325410]  ;;  %v666_v24 = vunpack.c.l.s4 %v5234_v23 }
 0x152   : > { %v538_v25 = vld [vmem:[#allocation2 + $0x8] sm:$0x1]  ;;  %v571_v26 = vld [vmem:[#allocation2 + $0x8] sm:$0x4]  ;;  %v550_v29 = vld [vmem:[#allocation2 + $0x18] sm:$0x1] }
 0x153   : > { %v539_v27 = vsel %vm5684_vm6, 0, %v538_v25  ;;  %v572_v28 = vsel %vm5688_vm7, 0, %v571_v26  ;;  %v583_v30 = vld [vmem:[#allocation2 + $0x18] sm:$0x4]  ;;  %v551_v32 = vsel %vm5684_vm6, 0, %v550_v29  ;;  %v960_v36 = vshrl.u32 %v4223_v22, 16 }
 0x154   : > { %v4225_v31 = vld.sshfl [vmem:[%s5657_s4 + $0x4] sm:$0x3 pattern:$0x76325410]  ;;  %540 = vst [vmem:[#allocation2 + $0x8] sm:$0x1] %v539_v27  ;;  %v667_v38 = vunpack.c.0.s8 %v666_v24 }
 0x155   : > { %573 = vst [vmem:[#allocation2 + $0x8] sm:$0x4] %v572_v28  ;;  %v584_v33 = vsel %vm5688_vm7, 0, %v583_v30  ;;  %v4218_v34 = vld [vmem:[#allocation9] ss:$0 sm:$0xff]  ;;  %v974_v50 = vshrl.u32 %v4225_v31, 16 }
 0x156   : > { %v4224_v37 = vld.sshfl [vmem:[%s5657_s4 + $0x2] sm:$0x3 pattern:$0x76325410]  ;;  %552 = vst [vmem:[#allocation2 + $0x18] sm:$0x1] %v551_v32  ;;  %v5727_v54 = vsub.s32 %v667_v38, %v669_v35 }
 0x157   : > { %585 = vst [vmem:[#allocation2 + $0x18] sm:$0x4] %v584_v33  ;;  %v544_v39 = vld [vmem:[#allocation2 + $0x10] sm:$0x1]  ;;  %v577_v40 = vld [vmem:[#allocation2 + $0x10] sm:$0x4] }
 0x158   : > { %v556_v41 = vld [vmem:[#allocation2 + $0x20] sm:$0x1]  ;;  %v545_v43 = vsel %vm5684_vm6, 0, %v544_v39  ;;  %v578_v44 = vsel %vm5688_vm7, 0, %v577_v40  ;;  %v589_v46 = vld [vmem:[#allocation2 + $0x20] sm:$0x4] }
 0x159   : > { %v557_v45 = vsel %vm5684_vm6, 0, %v556_v41  ;;  %546 = vst [vmem:[#allocation2 + $0x10] sm:$0x1] %v545_v43  ;;  %579 = vst [vmem:[#allocation2 + $0x10] sm:$0x4] %v578_v44  ;;  %v590_v48 = vsel %vm5688_vm7, 0, %v589_v46 }
 0x15a   : > { %558 = vst [vmem:[#allocation2 + $0x20] sm:$0x1] %v557_v45  ;;  %591 = vst [vmem:[#allocation2 + $0x20] sm:$0x4] %v590_v48  ;;  %v967_v55 = vshrl.u32 %v4224_v37, 16  ;;  %v962_v56 = vrot.slane %v960_v36, 7 }
 0x15b   : > { %v963_v57 = vshll.u32 %v4223_v22, 16  ;;  %v4226_v60 = vld.sshfl [vmem:[%s5657_s4 + $0x6] sm:$0x3 pattern:$0x76325410]  ;;  %v976_v61 = vrot.slane %v974_v50, 7 }
 0x15c   : > { %v977_v62 = vshll.u32 %v4225_v31, 16  ;;  %v5733_v1 = vld.sshfl [vmem:[%s5657_s4 + $0x8] sm:$0x3 pattern:$0x76325410]  ;;  %v969_v2 = vrot.slane %v967_v55, 7 }
 0x15d   : > { %v970_v4 = vshll.u32 %v4224_v37, 16  ;;  %v5735_v5 = vor.u32 %v963_v57, %v962_v56  ;;  %v981_v7 = vshrl.u32 %v4226_v60, 16  ;;  %v4228_v11 = vld.sshfl [vmem:[%s5657_s4 + $0xa] sm:$0x3 pattern:$0x76325410] }
 0x15e   : > { %v5739_v12 = vor.u32 %v977_v62, %v976_v61  ;;  %v988_v13 = vshrl.u32 %v5733_v1, 16  ;;  %vm811_vm9 = vsmask.f32 2306  ;;  %v984_v21 = vshll.u32 %v4226_v60, 16  ;;  %v813_v29 = vld [vmem:[#allocation2 + $0x4] sm:$0x7] }
 0x15f   : > { %v5745_v18 = vor.u32 %v970_v4, %v969_v2  ;;  %v983_v20 = vrot.slane %v981_v7, 7  ;;  %v995_v22 = vshrl.u32 %v4228_v11, 16  ;;  %vm5749_vm10 = vmand %vm810_vm8, %vm811_vm9  ;;  %v991_v38 = vshll.u32 %v5733_v1, 16  ;;  %v819_v40 = vld [vmem:[#allocation2 + $0xc] sm:$0x7]  ;;  %s4389_s0 = sshll.u32 %s5318_s19, 8 }
 0x160   : > { %v990_v27 = vrot.slane %v988_v13, 7  ;;  %v831_v41 = vld [vmem:[#allocation2 + $0x1c] sm:$0x7]  ;;  %vm5810_vm13 = vmand %vm861_vm12, %vm811_vm9  ;;  %vm1039_vm14 = vcmask 124992   ;;  %vm1217_vm0 = vcmask 256192   ;;  %vm1315_vm3 = vcmask 261120  }
 0x161   : > { %v997_v43 = vrot.slane %v995_v22, 7  ;;  %v4229_v55 = vld.sshfl [vmem:[%s5657_s4 + $0xc] sm:$0x3 pattern:$0x76325410]  ;;  %vm5821_vm15 = vmand %vm1039_vm14, %vm811_vm9  ;;  %vm2191_vm12 = vcmask 1040384  }
 0x162   : > { %v1002_v56 = vshrl.u32 %v4229_v55, 16  ;;  %v1005_v60 = vshll.u32 %v4229_v55, 16  ;;  %vm5846_vm2 = vmand %vm1217_vm0, %vm811_vm9  ;;  %vm1641_vm4 = vsmask.f32 1280  ;;  %vm1642_vm5 = vsmask.f32 3336 }
 0x163   : > { %vm1646_vm8 = vsmask.f32 7448  ;;  %s523_s3 = scalar_lea.vmem [#allocation20], %s4208_s18  ;;  %s6329_s6 = sld [smem:[#allocation36_spill]] }
 0x164   : > { %s4017_s21 = sshll.u32 %s523_s3, 4  ;;  %s4004_s26 = scalar_lea.sflag [#allocation5], %s5645_s24  ;;  %s6204_s21 = int_to_ptr.vmem [resolvable:$true] %s4017_s21 }
 0x165   : > { %s5126_s20 = scalar_lea.vmem %s6204_s21, 256  ;;  %p6330_p7 = scmp.ne.s32.totalorder %s6291_s25, 0 }
 0x166   : > { %p5127_p5 = scmp.ne.s32.totalorder %s6204_s21, %s5126_s20  ;;  %s5239_s28 = smov [#allocation20]  }
 0x167   : > { %s5130_s10 = sshll.u32 %s5239_s28, 4  ;;  %s5131_s10 = int_to_ptr.vmem [resolvable:$false] %s5130_s10 }
 0x168   : > { %p5128_p9 = pnand %p5127_p5, %p6330_p7  ;;  %s5132_s5 = scalar_lea.vmem %s5131_s10, 512 }
 0x169   : > { %s6202_s11 = scalar_lea.hbm %s6329_s6, %s4389_s0  ;;  %p5133_p11 = scmp.lt.s32.totalorder %s6204_s21, %s5131_s10 }
 0x16a   : > { %p5129_p8 = pneg %p5128_p9  ;;  %p5134_p3 = scmp.lt.s32.totalorder %s5132_s5, %s5126_s20 }
 0x16c   : > { %p5135_p12 = por %p5134_p3, %p5133_p11 }
 0x16e   : > { %p5136_p1 = pnand %p5135_p12, %p5129_p8 }
 0x21f   : > { %v655_v42 = vpop.f32.mrb[0].mxu0 }
 0x220   : > { %v4459_v47 = vpop.f32.mrb[1].mxu0  ;;  %v656_v51 = vadd.f32 %v4218_v34, %v655_v42  ;;  %v5754_v42 = vor.u32 %v984_v21, %v983_v20  ;;  %v828_v20 = vld [vmem:[#allocation2 + $0x18] sm:$0x7] }
 0x221   : > { %v658_v49 = vpop.f32.mrb[2].mxu0  ;;  %v998_v47 = vshll.u32 %v4228_v11, 16 }
 0x222   : > { %v659_v52 = vadd.f32 %v4218_v34, %v658_v49  ;;  %v4460_v53 = vpop.f32.mrb[3].mxu0  ;;  %v825_v34 = vld [vmem:[#allocation2 + $0x14] sm:$0x7] }
 0x223   : > { %v5237_v53 = vmov 0  }
 0x224   : > { %v662_v58 = vpack.c.bf16 %v659_v52, %v656_v51  ;;  %v4222_v59 = vpack.c.bf16 %v659_v52, %v659_v52  ;;  %v993_v51 = vor.u32 %v991_v38, %v990_v27  ;;  %v5772_v52 = vor.u32 %v998_v47, %v997_v43  ;;  %526 = vst.msk [vmem:[#allocation2] sm:$0x7] %vm525_vm11, %v5237_v53 }
 0x225   : > { %528 = vst.msk [vmem:[#allocation2 + $0x24] sm:$0x7] %vm525_vm11, %v5237_v53 }
 0x226   : > { %v678_v63 = vrot.slane %v4222_v59, %v5727_v54  ;;  %v671_v0 = vrot.slane %v662_v58, %v5727_v54  ;;  %v1004_v59 = vrot.slane %v1002_v56, 7 }
 0x228   : > { %685 = vrot.lane.b32.xlu1 %v678_v63, %s5235_s2  ;;  %681 = vrot.lane.b32.xlu0 %v671_v0, %s5235_s2  ;;  %v680_v8 = vcombine.high %v678_v63, %v678_v63  ;;  %v679_v9 = vcombine.high %v671_v0, %v671_v0  ;;  %v695_v10 = vrot.slane %v671_v0, %v5727_v54 }
 0x229   : > { %v723_v14 = vrot.slane %v678_v63, %v5727_v54  ;;  %v1007_v63 = vor.u32 %v1005_v60, %v1004_v59 }
 0x22a   : > { %v737_v15 = vrot.slane %v680_v8, %v5727_v54  ;;  %v709_v16 = vrot.slane %v679_v9, %v5727_v54  ;;  %v746_v17 = vshrl.u32 %v695_v10, 16  ;;  %v749_v24 = vshll.u32 %v695_v10, 16 }
 0x22b   : > { %v774_v19 = vshrl.u32 %v723_v14, 16  ;;  %v777_v31 = vshll.u32 %v723_v14, 16  ;;  %v532_v57 = vld [vmem:[#allocation2] sm:$0x1]  ;;  %v565_v58 = vld [vmem:[#allocation2] sm:$0x4] }
 0x22c   : > { %687 = vrot.lane.b32.xlu1 %v680_v8, %s5235_s2  ;;  %683 = vrot.lane.b32.xlu0 %v679_v9, %s5235_s2  ;;  %v748_v23 = vrot.slane %v746_v17, 7  ;;  %v760_v25 = vshrl.u32 %v709_v16, 16  ;;  %v788_v26 = vshrl.u32 %v737_v15, 16  ;;  %v763_v32 = vshll.u32 %v709_v16, 16  ;;  %v559_v56 = vld [vmem:[#allocation2 + $0x24] sm:$0x1] }
 0x22d   : > { %v776_v30 = vrot.slane %v774_v19, 7  ;;  %v791_v37 = vshll.u32 %v737_v15, 16  ;;  %v533_v61 = vsel %vm5684_vm6, 0, %v532_v57  ;;  %v566_v62 = vsel %vm5688_vm7, 0, %v565_v58  ;;  %v816_v19 = vld [vmem:[#allocation2 + $0x8] sm:$0x7] }
 0x22e   : > { %v751_v33 = vor.u32 %v749_v24, %v748_v23  ;;  %v762_v35 = vrot.slane %v760_v25, 7  ;;  %v790_v36 = vrot.slane %v788_v26, 7  ;;  %534 = vst [vmem:[#allocation2] sm:$0x1] %v533_v61  ;;  %567 = vst [vmem:[#allocation2] sm:$0x4] %v566_v62 }
 0x22f   : > { %v779_v39 = vor.u32 %v777_v31, %v776_v30  ;;  %v822_v31 = vld [vmem:[#allocation2 + $0x10] sm:$0x7]  ;;  %v560_v59 = vsel %vm5684_vm6, 0, %v559_v56  ;;  %vm5911_vm6 = vmor %vm1641_vm4, %vm1642_vm5 }
 0x230   : > { %1015 = vrot.lane.b32.xlu0 %v5735_v5, %s5236_s17  ;;  %v814_v44 = vsel %vm5749_vm10, %v751_v33, %v813_v29  ;;  %v765_v45 = vor.u32 %v763_v32, %v762_v35  ;;  %v793_v46 = vor.u32 %v791_v37, %v790_v36  ;;  %1017 = vrot.lane.b32.xlu1 %v5745_v18, %s5236_s17  ;;  %v834_v32 = vld [vmem:[#allocation2 + $0x20] sm:$0x7]  ;;  %v4230_v35 = vld.sshfl [vmem:[%s5657_s4 + $0xe] sm:$0x3 pattern:$0x76325410] }
 0x231   : > { %815 = vst [vmem:[#allocation2 + $0x4] sm:$0x7] %v814_v44  ;;  %v826_v48 = vsel %vm5749_vm10, %v779_v39, %v825_v34  ;;  %v1012_v44 = vshll.u32 %v4230_v35, 16  ;;  %v4798_v61 = vld [vmem:[#allocation11 + $0x30] sm:$0xff]   ;;  %561 = vst [vmem:[#allocation2 + $0x24] sm:$0x1] %v560_v59 }
 0x232   : > { %827 = vst [vmem:[#allocation2 + $0x14] sm:$0x7] %v826_v48  ;;  %v820_v49 = vsel %vm5749_vm10, %v765_v45, %v819_v40  ;;  %v832_v50 = vsel %vm5749_vm10, %v793_v46, %v831_v41  ;;  %4461 = vmatprep.subr.bf16.mxu1 %v4798_v61 }
 0x233   : > { %821 = vst [vmem:[#allocation2 + $0xc] sm:$0x7] %v820_v49  ;;  %833 = vst [vmem:[#allocation2 + $0x1c] sm:$0x7] %v832_v50  ;;  %4462 = vmatpush3.bf16.msra.mxu1 %v4798_v61 }
 0x234   : > { %1019 = vrot.lane.b32.xlu0 %v5739_v12, %s5236_s17  ;;  %1021 = vrot.lane.b32.xlu1 %v5754_v42, %s5236_s17 }
 0x238   : > { %1023 = vrot.lane.b32.xlu0 %v993_v51, %s5236_s17  ;;  %1025 = vrot.lane.b32.xlu1 %v5772_v52, %s5236_s17 }
 0x239   : > { %v875_v49 = vld [vmem:[#allocation2 + $0x14] sm:$0x7] }
 0x23a   : > { %v869_v55 = vld [vmem:[#allocation2 + $0xc] sm:$0x7] }
 0x23c   : > { %837 = vrot.lane.b32.xlu0 %v751_v33, %s5236_s17 }
 0x240   : > { %845 = vrot.lane.b32.xlu0 %v779_v39, %s5236_s17  ;;  %v1009_v39 = vshrl.u32 %v4230_v35, 16 }
 0x242   : > { %v1011_v43 = vrot.slane %v1009_v39, 7 }
 0x244   : > { %841 = vrot.lane.b32.xlu0 %v765_v45, %s5236_s17  ;;  %v1014_v47 = vor.u32 %v1012_v44, %v1011_v43 }
 0x248   : > { %849 = vrot.lane.b32.xlu0 %v793_v46, %s5236_s17  ;;  %v863_v46 = vld [vmem:[#allocation2 + $0x4] sm:$0x7] }
 0x24c   : > { %1027 = vrot.lane.b32.xlu0 %v1007_v63, %s5236_s17 }
 0x250   : > { %1193 = vrot.lane.b32.xlu0 %v5735_v5, %s5238_s30 }
 0x254   : > { %1197 = vrot.lane.b32.xlu0 %v5739_v12, %s5238_s30 }
 0x258   : > { %1201 = vrot.lane.b32.xlu0 %v993_v51, %s5238_s30 }
 0x25c   : > { %1205 = vrot.lane.b32.xlu0 %v1007_v63, %s5238_s30  ;;  %v881_v63 = vld [vmem:[#allocation2 + $0x1c] sm:$0x7] }
 0x29a   : > { %v686_v0 = vpop.permute.xlu1 %685  ;;  %v682_v1 = vpop.permute.xlu0 %681 }
 0x29b   : > { %v730_v2 = vrot.slane %v686_v0, %v5727_v54  ;;  %v702_v4 = vrot.slane %v682_v1, %v5727_v54 }
 0x29d   : > { %v781_v7 = vshrl.u32 %v730_v2, 16  ;;  %v753_v8 = vshrl.u32 %v702_v4, 16  ;;  %v784_v14 = vshll.u32 %v730_v2, 16  ;;  %v756_v15 = vshll.u32 %v702_v4, 16 }
 0x29e   : > { %v688_v9 = vpop.permute.xlu1 %687  ;;  %v684_v10 = vpop.permute.xlu0 %683 }
 0x29f   : > { %v783_v11 = vrot.slane %v781_v7, 7  ;;  %v755_v13 = vrot.slane %v753_v8, 7  ;;  %v744_v5 = vrot.slane %v688_v9, %v5727_v54  ;;  %v716_v12 = vrot.slane %v684_v10, %v5727_v54  ;;  %v4804_v9 = vld [vmem:[#allocation11 + $0x38] sm:$0xff]   ;;  %v5850_v10 = vld [vmem:[#allocation11] sm:$0xff]  }
 0x2a0   : > { %4463 = vmatprep.subr.bf16.mxu1 %v4804_v9 }
 0x2a1   : > { %v795_v16 = vshrl.u32 %v744_v5, 16  ;;  %v767_v17 = vshrl.u32 %v716_v12, 16  ;;  %v758_v22 = vor.u32 %v756_v15, %v755_v13  ;;  %v786_v23 = vor.u32 %v784_v14, %v783_v11  ;;  %4464 = vmatpush3.bf16.msra.mxu1 %v4804_v9 }
 0x2a2   : > { %v1016_v21 = vpop.permute.xlu0 %1015  ;;  %v798_v25 = vshll.u32 %v744_v5, 16  ;;  %v770_v27 = vshll.u32 %v716_v12, 16  ;;  %4469 = vmatprep.subr.bf16.mxu1 %v5850_v10 }
 0x2a3   : > { %v797_v24 = vrot.slane %v795_v16, 7  ;;  %v769_v26 = vrot.slane %v767_v17, 7  ;;  %839 = vrot.lane.b32.xlu1 %v758_v22, %s5236_s17  ;;  %v817_v29 = vsel %vm5749_vm10, %v758_v22, %v816_v19  ;;  %v829_v30 = vsel %vm5749_vm10, %v786_v23, %v828_v20 }
 0x2a4   : > { %818 = vst [vmem:[#allocation2 + $0x8] sm:$0x7] %v817_v29  ;;  %830 = vst [vmem:[#allocation2 + $0x18] sm:$0x7] %v829_v30 }
 0x2a5   : > { %v772_v33 = vor.u32 %v770_v27, %v769_v26  ;;  %v800_v34 = vor.u32 %v798_v25, %v797_v24 }
 0x2a6   : > { %v1020_v36 = vpop.permute.xlu0 %1019 }
 0x2a7   : > { %v823_v37 = vsel %vm5749_vm10, %v772_v33, %v822_v31  ;;  %v835_v38 = vsel %vm5749_vm10, %v800_v34, %v834_v32  ;;  %847 = vrot.lane.b32.xlu1 %v786_v23, %s5236_s17  ;;  %v1018_v23 = vpop.permute.xlu1 %1017 }
 0x2a8   : > { %824 = vst [vmem:[#allocation2 + $0x10] sm:$0x7] %v823_v37  ;;  %836 = vst [vmem:[#allocation2 + $0x20] sm:$0x7] %v835_v38 }
 0x2aa   : > { %v1024_v40 = vpop.permute.xlu0 %1023 }
 0x2ab   : > { %843 = vrot.lane.b32.xlu1 %v772_v33, %s5236_s17  ;;  %v1022_v24 = vpop.permute.xlu1 %1021  ;;  %v866_v27 = vld [vmem:[#allocation2 + $0x8] sm:$0x7]  ;;  %v878_v31 = vld [vmem:[#allocation2 + $0x18] sm:$0x7] }
 0x2ae   : > { %v838_v45 = vpop.permute.xlu0 %837 }
 0x2af   : > { %v864_v28 = vsel %vm5810_vm13, %v838_v45, %v863_v46  ;;  %851 = vrot.lane.b32.xlu1 %v800_v34, %s5236_s17  ;;  %v1026_v25 = vpop.permute.xlu1 %1025  ;;  %v872_v34 = vld [vmem:[#allocation2 + $0x10] sm:$0x7]  ;;  %v884_v39 = vld [vmem:[#allocation2 + $0x20] sm:$0x7] }
 0x2b0   : > { %865 = vst [vmem:[#allocation2 + $0x4] sm:$0x7] %v864_v28 }
 0x2b2   : > { %v846_v48 = vpop.permute.xlu0 %845 }
 0x2b3   : > { %v876_v50 = vsel %vm5810_vm13, %v846_v48, %v875_v49  ;;  %1029 = vrot.lane.b32.xlu1 %v1014_v47, %s5236_s17 }
 0x2b4   : > { %877 = vst [vmem:[#allocation2 + $0x14] sm:$0x7] %v876_v50 }
 0x2b6   : > { %v842_v53 = vpop.permute.xlu0 %841 }
 0x2b7   : > { %v870_v57 = vsel %vm5810_vm13, %v842_v53, %v869_v55  ;;  %v1041_v58 = vld [vmem:[#allocation2 + $0x4] sm:$0x7]  ;;  %1195 = vrot.lane.b32.xlu1 %v5745_v18, %s5238_s30 }
 0x2b8   : > { %871 = vst [vmem:[#allocation2 + $0xc] sm:$0x7] %v870_v57  ;;  %v1042_v60 = vsel %vm5821_vm15, %v1016_v21, %v1041_v58  ;;  %v592_v18 = vld [vmem:[#allocation2 + $0x24] sm:$0x4] }
 0x2b9   : > { %1043 = vst [vmem:[#allocation2 + $0x4] sm:$0x7] %v1042_v60  ;;  %v593_v2 = vsel %vm5688_vm7, 0, %v592_v18  ;;  %vm1644_vm7 = vsmask.f32 5392 }
 0x2ba   : > { %v850_v62 = vpop.permute.xlu0 %849  ;;  %594 = vst [vmem:[#allocation2 + $0x24] sm:$0x4] %v593_v2  ;;  %vm1645_vm10 = vmor %vm5911_vm6, %vm1644_vm7 }
 0x2bb   : > { %v882_v0 = vsel %vm5810_vm13, %v850_v62, %v881_v63  ;;  %v1053_v1 = vld [vmem:[#allocation2 + $0x14] sm:$0x7]  ;;  %1199 = vrot.lane.b32.xlu1 %v5754_v42, %s5238_s30  ;;  %vm5927_vm11 = vmor %vm1645_vm10, %vm1646_vm8 }
 0x2bc   : > { %883 = vst [vmem:[#allocation2 + $0x1c] sm:$0x7] %v882_v0  ;;  %v1054_v3 = vsel %vm5821_vm15, %v1024_v40, %v1053_v1  ;;  %v4251_v1 = vld.sshfl [vmem:[#allocation2] sm:$0x13 pattern:$0x76325410] }
 0x2bd   : > { %1055 = vst [vmem:[#allocation2 + $0x14] sm:$0x7] %v1054_v3  ;;  %v1652_v42 = vshll.u32 %v4251_v1, 16 }
 0x2be   : > { %v1028_v4 = vpop.permute.xlu0 %1027 }
 0x2bf   : > { %v1047_v7 = vld [vmem:[#allocation2 + $0xc] sm:$0x7]  ;;  %1203 = vrot.lane.b32.xlu1 %v5772_v52, %s5238_s30 }
 0x2c0   : > { %v1048_v8 = vsel %vm5821_vm15, %v1020_v36, %v1047_v7  ;;  %v1219_v11 = vld [vmem:[#allocation2 + $0x4] sm:$0x7] }
 0x2c1   : > { %1049 = vst [vmem:[#allocation2 + $0xc] sm:$0x7] %v1048_v8  ;;  %v1243_v8 = vld [vmem:[#allocation2] sm:$0x3] }
 0x2c2   : > { %v1194_v6 = vpop.permute.xlu0 %1193 }
 0x2c3   : > { %v1059_v13 = vld [vmem:[#allocation2 + $0x1c] sm:$0x7]  ;;  %v1220_v5 = vsel %vm5846_vm2, %v1194_v6, %v1219_v11  ;;  %1207 = vrot.lane.b32.xlu1 %v1014_v47, %s5238_s30  ;;  %v1649_v11 = vshrl.u32 %v4251_v1, 16 }
 0x2c4   : > { %v1060_v52 = vsel %vm5821_vm15, %v1028_v4, %v1059_v13  ;;  %1221 = vst [vmem:[#allocation2 + $0x4] sm:$0x7] %v1220_v5  ;;  %v1231_v17 = vld [vmem:[#allocation2 + $0x14] sm:$0x7] }
 0x2c5   : > { %1061 = vst [vmem:[#allocation2 + $0x1c] sm:$0x7] %v1060_v52 }
 0x2c6   : > { %v1198_v12 = vpop.permute.xlu0 %1197 }
 0x2c8   : > { %v1225_v14 = vld [vmem:[#allocation2 + $0xc] sm:$0x7] }
 0x2c9   : > { %v1226_v15 = vsel %vm5846_vm2, %v1198_v12, %v1225_v14 }
 0x2ca   : > { %1227 = vst [vmem:[#allocation2 + $0xc] sm:$0x7] %v1226_v15  ;;  %v1202_v16 = vpop.permute.xlu0 %1201 }
 0x2cb   : > { %v1232_v19 = vsel %vm5846_vm2, %v1202_v16, %v1231_v17  ;;  %v1244_v63 = vld [vmem:[#allocation2 + $0x4] sm:$0x3] }
 0x2cc   : > { %1233 = vst [vmem:[#allocation2 + $0x14] sm:$0x7] %v1232_v19  ;;  %v1237_v21 = vld [vmem:[#allocation2 + $0x1c] sm:$0x7]  ;;  %v1372_v17 = vcombine.low %v1243_v8, %v1244_v63 }
 0x2cd   : > { %v4252_v7 = vld.sshfl [vmem:[#allocation2 + $0x4] sm:$0x13 pattern:$0x76325410] }
 0x2ce   : > { %v1206_v20 = vpop.permute.xlu0 %1205  ;;  %v1663_v15 = vshrl.u32 %v4252_v7, 16  ;;  %v1666_v16 = vshll.u32 %v4252_v7, 16 }
 0x2cf   : > { %v1238_v22 = vsel %vm5846_vm2, %v1206_v20, %v1237_v21 }
 0x2d0   : > { %1239 = vst [vmem:[#allocation2 + $0x1c] sm:$0x7] %v1238_v22  ;;  %v1651_v22 = vrot.slane %v1649_v11, 6 }
 0x2d1   : > { %v1246_v3 = vld [vmem:[#allocation2 + $0xc] sm:$0x3] }
 0x2d3   : > { %v5895_v13 = vld [vmem:[#allocation2 + $0x14] sm:$0x3] }
 0x2d7   : > { %v1250_v12 = vld [vmem:[#allocation2 + $0x1c] sm:$0x3] }
 0x315   : > { %v840_v26 = vpop.permute.xlu1 %839 }
 0x316   : > { %v867_v29 = vsel %vm5810_vm13, %v840_v26, %v866_v27  ;;  %v1584_v26 = vcombine.high %v4251_v1, %v4251_v1 }
 0x317   : > { %868 = vst [vmem:[#allocation2 + $0x8] sm:$0x7] %v867_v29 }
 0x319   : > { %v848_v30 = vpop.permute.xlu1 %847 }
 0x31a   : > { %v879_v32 = vsel %vm5810_vm13, %v848_v30, %v878_v31 }
 0x31b   : > { %880 = vst [vmem:[#allocation2 + $0x18] sm:$0x7] %v879_v32  ;;  %v1380_v32 = vrot.slane %v1372_v17, %v5727_v54 }
 0x31d   : > { %v844_v33 = vpop.permute.xlu1 %843 }
 0x31e   : > { %v1044_v35 = vld [vmem:[#allocation2 + $0x8] sm:$0x7]  ;;  %v873_v36 = vsel %vm5810_vm13, %v844_v33, %v872_v34  ;;  %v1592_v33 = vcombine.high %v4252_v7, %v4252_v7  ;;  %v1665_v34 = vrot.slane %v1663_v15, 6 }
 0x31f   : > { %v1045_v37 = vsel %vm5821_vm15, %v1018_v23, %v1044_v35  ;;  %874 = vst [vmem:[#allocation2 + $0x10] sm:$0x7] %v873_v36  ;;  %v1654_v23 = vrot.slane %v1652_v42, 7  ;;  %v1668_v35 = vrot.slane %v1666_v16, 7  ;;  %v4811_v16 = vld [vmem:[#allocation11 + $0x68] sm:$0xff]  }
 0x320   : > { %1046 = vst [vmem:[#allocation2 + $0x8] sm:$0x7] %v1045_v37  ;;  %v4808_v37 = vld [vmem:[#allocation11 + $0x8] sm:$0xff]  }
 0x321   : > { %v852_v38 = vpop.permute.xlu1 %851 }
 0x322   : > { %v1056_v40 = vld [vmem:[#allocation2 + $0x18] sm:$0x7]  ;;  %v885_v43 = vsel %vm5810_vm13, %v852_v38, %v884_v39  ;;  %vm2192_vm13 = vcmask 1042434  }
 0x323   : > { %v1057_v44 = vsel %vm5821_vm15, %v1026_v25, %v1056_v40  ;;  %886 = vst [vmem:[#allocation2 + $0x20] sm:$0x7] %v885_v43  ;;  %v4254_v25 = vld.sshfl [vmem:[#allocation2 + $0xc] sm:$0x13 pattern:$0x76325410]  ;;  %vm2193_vm14 = vmor %vm2191_vm12, %vm2192_vm13 }
 0x324   : > { %1058 = vst [vmem:[#allocation2 + $0x18] sm:$0x7] %v1057_v44  ;;  %v1691_v38 = vshrl.u32 %v4254_v25, 16  ;;  %v1694_v39 = vshll.u32 %v4254_v25, 16  ;;  %v1655_v44 = vor.u32 %v1654_v23, %v1651_v22  ;;  %v1252_v23 = vld [vmem:[#allocation2 + $0x24] sm:$0x3] }
 0x325   : > { %v1030_v45 = vpop.permute.xlu1 %1029 }
 0x326   : > { %v1050_v46 = vld [vmem:[#allocation2 + $0x10] sm:$0x7] }
 0x327   : > { %v1051_v28 = vsel %vm5821_vm15, %v1022_v24, %v1050_v46  ;;  %v1222_v48 = vld [vmem:[#allocation2 + $0x8] sm:$0x7] }
 0x328   : > { %1052 = vst [vmem:[#allocation2 + $0x10] sm:$0x7] %v1051_v28 }
 0x329   : > { %v1196_v47 = vpop.permute.xlu1 %1195 }
 0x32a   : > { %v1062_v49 = vld [vmem:[#allocation2 + $0x20] sm:$0x7]  ;;  %v1223_v50 = vsel %vm5846_vm2, %v1196_v47, %v1222_v48  ;;  %v1669_v47 = vor.u32 %v1668_v35, %v1665_v34  ;;  %v1672_v48 = vshll.u32 %v1592_v33, 16 }
 0x32b   : > { %v1063_v41 = vsel %vm5821_vm15, %v1030_v45, %v1062_v49  ;;  %1224 = vst [vmem:[#allocation2 + $0x8] sm:$0x7] %v1223_v50  ;;  %v1234_v58 = vld [vmem:[#allocation2 + $0x18] sm:$0x7]  ;;  %v1658_v45 = vshll.u32 %v1584_v26, 16  ;;  %v4809_v49 = vld [vmem:[#allocation11 + $0x60] sm:$0xff]  }
 0x32c   : > { %1064 = vst [vmem:[#allocation2 + $0x20] sm:$0x7] %v1063_v41  ;;  %v1674_v1 = vrot.slane %v1672_v48, 7  ;;  %vm2194_vm15 = vcmask 1044484  }
 0x32d   : > { %v1200_v53 = vpop.permute.xlu1 %1199  ;;  %vm2195_vm0 = vmor %vm2193_vm14, %vm2194_vm15 }
 0x32f   : > { %v1228_v55 = vld [vmem:[#allocation2 + $0x10] sm:$0x7] }
 0x330   : > { %v1229_v56 = vsel %vm5846_vm2, %v1200_v53, %v1228_v55  ;;  %v1693_v53 = vrot.slane %v1691_v38, 6  ;;  %v1696_v55 = vrot.slane %v1694_v39, 7 }
 0x331   : > { %1230 = vst [vmem:[#allocation2 + $0x10] sm:$0x7] %v1229_v56  ;;  %v1204_v57 = vpop.permute.xlu1 %1203 }
 0x332   : > { %v1235_v59 = vsel %vm5846_vm2, %v1204_v57, %v1234_v58  ;;  %v1245_v60 = vld [vmem:[#allocation2 + $0x8] sm:$0x3]  ;;  %v1656_v57 = vrot.slane %v1655_v44, 2  ;;  %v1660_v58 = vrot.slane %v1658_v45, 7 }
 0x333   : > { %1236 = vst [vmem:[#allocation2 + $0x18] sm:$0x7] %v1235_v59  ;;  %v1240_v62 = vld [vmem:[#allocation2 + $0x20] sm:$0x7]  ;;  %v1269_v0 = vcombine.low %v1244_v63, %v1245_v60  ;;  %v1373_v5 = vcombine.low %v1245_v60, %v1246_v3 }
 0x334   : > { %v4253_v20 = vld.sshfl [vmem:[#allocation2 + $0x8] sm:$0x13 pattern:$0x76325410] }
 0x335   : > { %v1208_v61 = vpop.permute.xlu1 %1207  ;;  %v1277_v9 = vrot.slane %v1269_v0, %v5727_v54  ;;  %v5904_v24 = vrot.slane %v1373_v5, %v5727_v54  ;;  %v1677_v30 = vshrl.u32 %v4253_v20, 16  ;;  %v1680_v31 = vshll.u32 %v4253_v20, 16  ;;  %v5924_v60 = vld.sshfl [vmem:[#allocation2 + $0x14] sm:$0x13 pattern:$0x76325410] }
 0x336   : > { %v1241_v51 = vsel %vm5846_vm2, %v1208_v61, %v1240_v62  ;;  %v1600_v41 = vcombine.high %v4253_v20, %v4253_v20  ;;  %vm2196_vm2 = vcmask 1046534  }
 0x337   : > { %1242 = vst [vmem:[#allocation2 + $0x20] sm:$0x7] %v1241_v51  ;;  %v1388_v40 = vcombine.low %v1380_v32, %v5904_v24  ;;  %v1679_v46 = vrot.slane %v1677_v30, 6  ;;  %v1682_v28 = vrot.slane %v1680_v31, 7  ;;  %v1670_v51 = vrot.slane %v1669_v47, 2  ;;  %vm6005_vm4 = vmor %vm2195_vm0, %vm2196_vm2 }
 0x338   : > { %v5888_v18 = vld [vmem:[#allocation2 + $0x10] sm:$0x3]  ;;  %v1624_v47 = vcombine.high %v5924_v60, %v5924_v60 }
 0x339   : > { %v1270_v2 = vcombine.low %v1246_v3, %v5888_v18  ;;  %v1389_v56 = vcombine.low %v5888_v18, %v5895_v13  ;;  %v1683_v59 = vor.u32 %v1682_v28, %v1679_v46  ;;  %v4255_v63 = vld.sshfl [vmem:[#allocation2 + $0x10] sm:$0x13 pattern:$0x76325410]  ;;  %v1686_v3 = vshll.u32 %v1600_v41, 16 }
 0x33a   : > { %v5891_v4 = vld [vmem:[#allocation2 + $0x18] sm:$0x3]  ;;  %v1697_v18 = vor.u32 %v1696_v55, %v1693_v53  ;;  %v1705_v42 = vshrl.u32 %v4255_v63, 16  ;;  %v5941_v5 = vsel %vm5927_vm11, %v1670_v51, %v1674_v1  ;;  %v1616_v39 = vcombine.high %v4255_v63, %v4255_v63  ;;  %v4813_v1 = vld [vmem:[#allocation11 + $0x18] sm:$0xff]  }
 0x33b   : > { %v1284_v6 = vrot.slane %v1270_v2, %v5727_v54  ;;  %v1286_v14 = vcombine.low %v5895_v13, %v5891_v4  ;;  %v1390_v50 = vcombine.low %v5891_v4, %v1250_v12  ;;  %v4257_v61 = vld.sshfl [vmem:[#allocation2 + $0x18] sm:$0x13 pattern:$0x76325410]  ;;  %v1397_v4 = vrot.slane %v1389_v56, %v5727_v54 }
 0x33c   : > { %v4258_v2 = vld.sshfl [vmem:[#allocation2 + $0x1c] sm:$0x13 pattern:$0x76325410]  ;;  %v1733_v8 = vshrl.u32 %v4257_v61, 16  ;;  %v1684_v11 = vrot.slane %v1683_v59, 2  ;;  %v1632_v33 = vcombine.high %v4257_v61, %v4257_v61 }
 0x33d   : > { %v1285_v52 = vcombine.low %v1277_v9, %v1284_v6  ;;  %v1294_v27 = vrot.slane %v1286_v14, %v5727_v54  ;;  %v5932_v0 = vrot.slane %v1390_v50, %v5727_v54  ;;  %v1736_v9 = vshll.u32 %v4257_v61, 16 }
 0x33e   : > { %v5899_v19 = vld [vmem:[#allocation2 + $0x20] sm:$0x3]  ;;  %v5937_v6 = vsel %vm5927_vm11, %v1656_v57, %v1660_v58  ;;  %v1708_v13 = vshll.u32 %v4255_v63, 16  ;;  %v1750_v14 = vshll.u32 %v4258_v2, 16  ;;  %v1688_v17 = vrot.slane %v1686_v3, 7 }
 0x33f   : > { %4465 = vmatprep.mubr.msk.bf16.mxu1 %vm1315_vm3, %v1285_v52  ;;  %v1287_v21 = vcombine.low %v1250_v12, %v5899_v19  ;;  %v1719_v52 = vshrl.u32 %v5924_v60, 16  ;;  %v1747_v12 = vshrl.u32 %v4258_v2, 16  ;;  %v1405_v15 = vcombine.low %v1397_v4, %v5932_v0  ;;  %v4263_v46 = vld.sshfl [vmem:[#allocation2 + $0x20] sm:$0x13 pattern:$0x76325410] }
 0x340   : > { %v1698_v20 = vrot.slane %v1697_v18, 2  ;;  %v1478_v22 = vcombine.low %v5904_v24, %v1397_v4  ;;  %v1735_v26 = vrot.slane %v1733_v8, 6  ;;  %v1640_v30 = vcombine.high %v4258_v2, %v4258_v2 }
 0x341   : > { %v1301_v29 = vrot.slane %v1287_v21, %v5727_v54  ;;  %v1722_v21 = vshll.u32 %v5924_v60, 16  ;;  %v1707_v31 = vrot.slane %v1705_v42, 6  ;;  %v1710_v32 = vrot.slane %v1708_v13, 7 }
 0x342   : > { %v1721_v34 = vrot.slane %v1719_v52, 6  ;;  %v1749_v35 = vrot.slane %v1747_v12, 6  ;;  %v1752_v24 = vrot.slane %v1750_v14, 7  ;;  %v1764_v28 = vcombine.low %v5937_v6, %v5941_v5  ;;  %v4814_v52 = vld [vmem:[#allocation11 + $0x40] sm:$0xff]  }
 0x343   : > { %v1302_v36 = vcombine.low %v1294_v27, %v1301_v29  ;;  %v1738_v27 = vrot.slane %v1736_v9, 7  ;;  %v5950_v29 = vsel %vm5927_vm11, %v1684_v11, %v1688_v17  ;;  %v1711_v45 = vor.u32 %v1710_v32, %v1707_v31 }
 0x344   : > { %v1742_v48 = vshll.u32 %v1632_v33, 16  ;;  %v1714_v50 = vshll.u32 %v1616_v39, 16  ;;  %v1756_v53 = vshll.u32 %v1640_v30, 16  ;;  %v1882_v57 = vshll.u32 %v4263_v46, 16 }
 0x345   : > { %4466 = vmatmul.mubr.msk.bf16.vlgmr.msra.gmra.mrb[0].mxu1 %vm1315_vm3, %v1302_v36  ;;  %v4812_v36 = vld [vmem:[#allocation11 + $0x10] sm:$0xff]   ;;  %v1739_v44 = vor.u32 %v1738_v27, %v1735_v26  ;;  %v1712_v58 = vrot.slane %v1711_v45, 2  ;;  %v1772_v59 = vrot.slane %v1764_v28, %v5727_v54  ;;  %v1728_v61 = vshll.u32 %v1624_v47, 16 }
 0x346   : > { %4470 = vmatpush3.bf16.msra.mxu1 %v5850_v10  ;;  %4473 = vmatprep.mubr.msk.bf16.mxu1 %vm1315_vm3, %v1388_v40  ;;  %v1608_v10 = vcombine.high %v4254_v25, %v4254_v25  ;;  %v1724_v40 = vrot.slane %v1722_v21, 7  ;;  %v1744_v51 = vrot.slane %v1742_v48, 7  ;;  %v1716_v3 = vrot.slane %v1714_v50, 7 }
 0x347   : > { %4471 = vmatprep.subr.bf16.mxu1 %v4808_v37  ;;  %v1740_v56 = vrot.slane %v1739_v44, 2  ;;  %v1758_v2 = vrot.slane %v1756_v53, 7  ;;  %v1884_v9 = vrot.slane %v1882_v57, 7  ;;  %v1877_v13 = vcombine.high %v4263_v46, %v4263_v46 }
 0x348   : > { %v1700_v7 = vshll.u32 %v1608_v10, 16  ;;  %v1725_v41 = vor.u32 %v1724_v40, %v1721_v34  ;;  %v1879_v10 = vshrl.u32 %v4263_v46, 16  ;;  %v1717_v11 = vsel %vm5927_vm11, %v1712_v58, %v1716_v3  ;;  %v4275_v39 = vld.sshfl [vmem:[#allocation2 + $0x8] sm:$0x12 pattern:$0x76325410] }
 0x349   : > { %v1896_v21 = vcombine.low %v5941_v5, %v5950_v29  ;;  %v4816_v40 = vld [vmem:[#allocation11 + $0x70] sm:$0xff]   ;;  %v4274_v44 = vld.sshfl [vmem:[#allocation2 + $0x4] sm:$0x12 pattern:$0x76325410]  ;;  %v2150_v48 = vcombine.high %v4275_v39, %v4275_v39 }
 0x34a   : > { %4472 = vmatpush3.bf16.msra.mxu1 %v4808_v37  ;;  %v1702_v25 = vrot.slane %v1700_v7, 7  ;;  %v1479_v37 = vcombine.low %v5899_v19, %v1252_v23  ;;  %v1726_v18 = vrot.slane %v1725_v41, 2  ;;  %v5970_v7 = vsel %vm5927_vm11, %v1740_v56, %v1744_v51  ;;  %v4276_v28 = vld.sshfl [vmem:[#allocation2 + $0xc] sm:$0x12 pattern:$0x76325410] }
 0x34b   : > { %4477 = vmatprep.subr.bf16.mxu1 %v4809_v49  ;;  %v1881_v8 = vrot.slane %v1879_v10, 6  ;;  %v1904_v32 = vrot.slane %v1896_v21, %v5727_v54  ;;  %v2142_v50 = vcombine.high %v4274_v44, %v4274_v44  ;;  %v2158_v41 = vcombine.high %v4276_v28, %v4276_v28  ;;  %v4817_v51 = vld [vmem:[#allocation11 + $0x78] sm:$0xff]  }
 0x34c   : > { %v1703_v38 = vsel %vm5927_vm11, %v1698_v20, %v1702_v25  ;;  %v1486_v19 = vrot.slane %v1479_v37, %v5727_v54  ;;  %v4268_v20 = vld.sshfl [vmem:[#allocation2 + $0x24] sm:$0x13 pattern:$0x76325410]  ;;  %v2208_v57 = vrot.slane %v2150_v48, 7 }
 0x34d   : > { %v1765_v43 = vcombine.low %v5950_v29, %v1703_v38  ;;  %v2011_v27 = vshrl.u32 %v4268_v20, 16  ;;  %v2014_v30 = vshll.u32 %v4268_v20, 16 }
 0x34e   : > { %v1487_v63 = vcombine.low %v5932_v0, %v1486_v19  ;;  %v1730_v0 = vrot.slane %v1728_v61, 7 }
 0x34f   : > { %v5963_v55 = vrot.slane %v1765_v43, %v5727_v54  ;;  %v2016_v37 = vrot.slane %v2014_v30, 7 }
 0x350   : > { %v1731_v14 = vsel %vm5927_vm11, %v1726_v18, %v1730_v0 }
 0x351   : > { %4474 = vmatmul.mubr.msk.bf16.vlgmr.msra.gmra.mrb[0].mxu1 %vm1315_vm3, %v1405_v15  ;;  %v1780_v4 = vcombine.low %v1772_v59, %v5963_v55  ;;  %v1897_v15 = vcombine.low %v1703_v38, %v1717_v11  ;;  %v1781_v17 = vcombine.low %v1717_v11, %v1731_v14  ;;  %v4273_v38 = vld.sshfl [vmem:[#allocation2] sm:$0x12 pattern:$0x76325410]  ;;  %v1913_v47 = vcombine.low %v1731_v14, %v5970_v7 }
 0x352   : > { %4478 = vmatpush3.bf16.msra.mxu1 %v4809_v49  ;;  %4481 = vmatprep.mubr.msk.bf16.mxu1 %vm1315_vm3, %v1478_v22  ;;  %v1753_v49 = vor.u32 %v1752_v24, %v1749_v35  ;;  %v1888_v22 = vshll.u32 %v1877_v13, 16  ;;  %v4815_v35 = vld [vmem:[#allocation11 + $0x48] sm:$0xff]   ;;  %v2009_v24 = vcombine.high %v4268_v20, %v4268_v20  ;;  %v4281_v58 = vrot.slane %v4273_v38, 9  ;;  %v4818_v11 = vld [vmem:[#allocation11 + $0x20] sm:$0xff]  }
 0x353   : > { %4479 = vmatprep.subr.bf16.mxu1 %v4811_v16  ;;  %v1911_v25 = vrot.slane %v1897_v15, %v5727_v54  ;;  %v1789_v31 = vrot.slane %v1781_v17, %v5727_v54  ;;  %v1921_v10 = vrot.slane %v1913_v47, %v5727_v54 }
 0x354   : > { %v1754_v60 = vrot.slane %v1753_v49, 2  ;;  %v1890_v33 = vrot.slane %v1888_v22, 7  ;;  %v2020_v46 = vshll.u32 %v2009_v24, 16  ;;  %v2134_v49 = vcombine.high %v4273_v38, %v4273_v38 }
 0x355   : > { %v1912_v5 = vcombine.low %v1904_v32, %v1911_v25  ;;  %v2028_v3 = vcombine.low %v5963_v55, %v1789_v31  ;;  %v4277_v55 = vld.sshfl [vmem:[#allocation2 + $0x10] sm:$0x12 pattern:$0x76325410] }
 0x356   : > { %4480 = vmatpush3.bf16.msra.mxu1 %v4811_v16  ;;  %v1759_v42 = vsel %vm5927_vm11, %v1754_v60, %v1758_v2  ;;  %v1885_v16 = vor.u32 %v1884_v9, %v1881_v8  ;;  %v2022_v56 = vrot.slane %v2020_v46, 7  ;;  %v2200_v59 = vrot.slane %v2134_v49, 7  ;;  %v4279_v9 = vld.sshfl [vmem:[#allocation2 + $0x18] sm:$0x12 pattern:$0x76325410] }
 0x357   : > { %4485 = vmatprep.subr.bf16.mxu1 %v4812_v36  ;;  %v1782_v12 = vcombine.low %v5970_v7, %v1759_v42  ;;  %v2204_v60 = vrot.slane %v2142_v50, 7  ;;  %v4284_v8 = vrot.slane %v4276_v28, 9  ;;  %v2182_v15 = vcombine.high %v4279_v9, %v4279_v9 }
 0x358   : > { %v1886_v26 = vrot.slane %v1885_v16, 2  ;;  %v4278_v16 = vld.sshfl [vmem:[#allocation2 + $0x14] sm:$0x12 pattern:$0x76325410]  ;;  %v2166_v17 = vcombine.high %v4277_v55, %v4277_v55  ;;  %v4287_v32 = vrot.slane %v4279_v9, 9 }
 0x359   : > { %v5984_v23 = vrot.slane %v1782_v12, %v5727_v54  ;;  %v4280_v12 = vld.sshfl [vmem:[#allocation2 + $0x1c] sm:$0x12 pattern:$0x76325410]  ;;  %v4285_v24 = vrot.slane %v4277_v55, 9  ;;  %v4823_v55 = vld [vmem:[#allocation11 + $0x88] sm:$0xff]  }
 0x35a   : > { %v5992_v29 = vsel %vm5927_vm11, %v1886_v26, %v1890_v33  ;;  %v2190_v21 = vcombine.high %v4280_v12, %v4280_v12  ;;  %v2174_v26 = vcombine.high %v4278_v16, %v4278_v16  ;;  %v2216_v30 = vrot.slane %v2166_v17, 7 }
 0x35b   : > { %v1797_v34 = vcombine.low %v1789_v31, %v5984_v23  ;;  %v1914_v43 = vcombine.low %v1759_v42, %v5992_v29  ;;  %v6017_v42 = vsel %vm6005_vm4, %v4281_v58, %v2200_v59 }
 0x35c   : > { %v2228_v33 = vrot.slane %v2190_v21, 7  ;;  %v2217_v38 = vsel %vm6005_vm4, %v4285_v24, %v2216_v30 }
 0x35d   : > { %4482 = vmatmul.mubr.msk.bf16.vlgmr.msra.gmra.mrb[0].mxu1 %vm1315_vm3, %v1487_v63  ;;  %v1928_v19 = vrot.slane %v1914_v43, %v5727_v54  ;;  %v4283_v63 = vrot.slane %v4275_v39, 9  ;;  %v4293_v39 = vld.sshfl [vmem:[#allocation2 + $0x20] sm:$0x12 pattern:$0x76325410]  ;;  %v4820_v43 = vld [vmem:[#allocation11 + $0x50] sm:$0xff]  }
 0x35e   : > { %4486 = vmatpush3.bf16.msra.mxu1 %v4812_v36  ;;  %4489 = vmatprep.mubr.msk.bf16.mxu1 %vm1315_vm3, %v1780_v4  ;;  %v2013_v36 = vrot.slane %v2011_v27, 6  ;;  %v4282_v4 = vrot.slane %v4274_v44, 9  ;;  %v2224_v27 = vrot.slane %v2182_v15, 7  ;;  %v2347_v28 = vcombine.high %v4293_v39, %v4293_v39  ;;  %v6061_v15 = vld [vmem:[#allocation15] sm:$0xff]  }
 0x35f   : > { %4487 = vmatprep.subr.bf16.mxu1 %v4813_v1  ;;  %v1929_v61 = vcombine.low %v1921_v10, %v1928_v19  ;;  %v2209_v7 = vsel %vm6005_vm4, %v4283_v63, %v2208_v57  ;;  %v4821_v57 = vld [vmem:[#allocation11 + $0x58] sm:$0xff]  }
 0x360   : > { %v2017_v45 = vor.u32 %v2016_v37, %v2013_v36  ;;  %v2205_v13 = vsel %vm6005_vm4, %v4282_v4, %v2204_v60  ;;  %v2225_v36 = vsel %vm6005_vm4, %v4287_v32, %v2224_v27  ;;  %v4288_v37 = vrot.slane %v4280_v12, 9 }
 0x361   : > { %v2234_v20 = vcombine.low %v6017_v42, %v2205_v13  ;;  %v2356_v48 = vcombine.low %v2205_v13, %v2209_v7  ;;  %v2350_v50 = vrot.slane %v2347_v28, 7 }
 0x362   : > { %4488 = vmatpush3.bf16.msra.mxu1 %v4813_v1  ;;  %v2018_v53 = vrot.slane %v2017_v45, 2  ;;  %v2212_v1 = vrot.slane %v2158_v41, 7 }
 0x363   : > { %4493 = vmatprep.subr.bf16.mxu1 %v4814_v52  ;;  %v2242_v31 = vrot.slane %v2234_v20, %v5727_v54  ;;  %v4306_v20 = vld [vmem:[#allocation14] ss:$0 sm:$0xff] }
 0x364   : > { %v6003_v18 = vsel %vm5927_vm11, %v2018_v53, %v2022_v56  ;;  %v2364_v53 = vrot.slane %v2356_v48, %v5727_v54  ;;  %v4294_v56 = vrot.slane %v4293_v39, 9 }
 0x365   : > { %v2029_v0 = vcombine.low %v5992_v29, %v6003_v18  ;;  %v2220_v29 = vrot.slane %v2174_v26, 7 }
 0x366   : > { %v2351_v59 = vsel %vm6005_vm4, %v4294_v56, %v2350_v50 }
 0x367   : > { %v2036_v22 = vrot.slane %v2029_v0, %v5727_v54 }
 0x369   : > { %4490 = vmatmul.mubr.msk.bf16.vlgmr.msra.gmra.mrb[0].mxu1 %vm1315_vm3, %v1797_v34  ;;  %v2037_v34 = vcombine.low %v5984_v23, %v2036_v22  ;;  %v2229_v23 = vsel %vm6005_vm4, %v4288_v37, %v2228_v33 }
 0x36a   : > { %4494 = vmatpush3.bf16.msra.mxu1 %v4814_v52  ;;  %4497 = vmatprep.mubr.msk.bf16.mxu1 %vm1315_vm3, %v1912_v5  ;;  %v2213_v52 = vsel %vm6005_vm4, %v4284_v8, %v2212_v1  ;;  %v2252_v44 = vcombine.low %v2225_v36, %v2229_v23  ;;  %v2374_v60 = vcombine.low %v2229_v23, %v2351_v59 }
 0x36b   : > { %4495 = vmatprep.subr.bf16.mxu1 %v4815_v35  ;;  %v2235_v14 = vcombine.low %v2209_v7, %v2213_v52  ;;  %v2357_v46 = vcombine.low %v2213_v52, %v2217_v38 }
 0x36c   : > { %v2266_v49 = vrot.slane %v2252_v44, %v5727_v54 }
 0x36d   : > { %v6026_v25 = vrot.slane %v2235_v14, %v5727_v54  ;;  %v2371_v19 = vrot.slane %v2357_v46, %v5727_v54  ;;  %v4824_v14 = vld [vmem:[#allocation15 + $0x18] sm:$0xff]  }
 0x36e   : > { %4496 = vmatpush3.bf16.msra.mxu1 %v4815_v35  ;;  %v4819_v35 = vld [vmem:[#allocation11 + $0x28] sm:$0xff]   ;;  %4533 = vmatprep.subr.bf16.mxu0 %v4824_v14 }
 0x36f   : > { %4501 = vmatprep.subr.bf16.mxu1 %v4816_v40  ;;  %v2250_v5 = vcombine.low %v2242_v31, %v6026_v25  ;;  %v2372_v58 = vcombine.low %v2364_v53, %v2371_v19  ;;  %4534 = vmatpush3.bf16.msra.mxu0 %v4824_v14 }
 0x370   : > { %4539 = vmatprep.subr.bf16.mxu0 %v6061_v15 }
 0x375   : > { %4498 = vmatmul.mubr.msk.bf16.vlgmr.msra.gmra.mrb[0].mxu1 %vm1315_vm3, %v1929_v61  ;;  %v4299_v61 = vld.sshfl [vmem:[#allocation2 + $0x24] sm:$0x12 pattern:$0x76325410] }
 0x376   : > { %4502 = vmatpush3.bf16.msra.mxu1 %v4816_v40  ;;  %4505 = vmatprep.mubr.msk.bf16.mxu1 %vm1315_vm3, %v2028_v3  ;;  %v4286_v40 = vrot.slane %v4278_v16, 9  ;;  %v2469_v63 = vcombine.high %v4299_v61, %v4299_v61  ;;  %v2388_v3 = vrot.slane %v2374_v60, %v5727_v54  ;;  %v4300_v4 = vrot.slane %v4299_v61, 9  ;;  %v4305_v16 = vld [vmem:[#allocation12] ss:$0 sm:$0xff] }
 0x377   : > { %4503 = vmatprep.subr.bf16.mxu1 %v4817_v51 }
 0x378   : > { %v2221_v45 = vsel %vm6005_vm4, %v4286_v40, %v2220_v29  ;;  %v2472_v7 = vrot.slane %v2469_v63, 7  ;;  %v2707_v63 = vld [vmem:[#allocation2 + $0x14] sm:$0x7] }
 0x379   : > { %v2251_v47 = vcombine.low %v2217_v38, %v2221_v45  ;;  %v2373_v1 = vcombine.low %v2221_v45, %v2225_v36 }
 0x37a   : > { %4504 = vmatpush3.bf16.msra.mxu1 %v4817_v51  ;;  %v4822_v51 = vld [vmem:[#allocation11 + $0x80] sm:$0xff]   ;;  %v6054_v0 = vsel %vm6005_vm4, %v4300_v4, %v2472_v7 }
 0x37b   : > { %4509 = vmatprep.subr.bf16.mxu1 %v4818_v11  ;;  %v2259_v41 = vrot.slane %v2251_v47, %v5727_v54  ;;  %v2381_v8 = vrot.slane %v2373_v1, %v5727_v54  ;;  %v2479_v13 = vcombine.low %v2351_v59, %v6054_v0 }
 0x37d   : > { %v2267_v10 = vcombine.low %v2259_v41, %v2266_v49  ;;  %v2389_v9 = vcombine.low %v2381_v8, %v2388_v3  ;;  %v2486_v52 = vrot.slane %v2479_v13, %v5727_v54 }
 0x37f   : > { %v2487_v12 = vcombine.low %v2266_v49, %v2486_v52  ;;  %v2710_v52 = vld [vmem:[#allocation2 + $0x18] sm:$0x7] }
 0x381   : > { %4506 = vmatmul.mubr.msk.bf16.vlgmr.msra.gmra.mrb[0].mxu1 %vm1315_vm3, %v2037_v34 }
 0x382   : > { %4510 = vmatpush3.bf16.msra.mxu1 %v4818_v11  ;;  %4513 = vmatprep.mubr.msk.bf16.mxu1 %vm1315_vm3, %v2250_v5  ;;  %v2478_v11 = vcombine.low %v6026_v25, %v2259_v41 }
 0x383   : > { %4511 = vmatprep.subr.bf16.mxu1 %v4819_v35 }
 0x386   : > { %4512 = vmatpush3.bf16.msra.mxu1 %v4819_v35 }
 0x387   : > { %4517 = vmatprep.subr.bf16.mxu1 %v4820_v43 }
 0x38d   : > { %4514 = vmatmul.mubr.msk.bf16.vlgmr.msra.gmra.mrb[0].mxu1 %vm1315_vm3, %v2267_v10 }
 0x38e   : > { %4518 = vmatpush3.bf16.msra.mxu1 %v4820_v43  ;;  %4521 = vmatprep.mubr.msk.bf16.mxu1 %vm1315_vm3, %v2372_v58 }
 0x38f   : > { %4519 = vmatprep.subr.bf16.mxu1 %v4821_v57 }
 0x392   : > { %4520 = vmatpush3.bf16.msra.mxu1 %v4821_v57 }
 0x393   : > { %4525 = vmatprep.subr.bf16.mxu1 %v4822_v51 }
 0x399   : > { %4522 = vmatmul.mubr.msk.bf16.vlgmr.msra.gmra.mrb[0].mxu1 %vm1315_vm3, %v2389_v9 }
 0x39a   : > { %4526 = vmatpush3.bf16.msra.mxu1 %v4822_v51  ;;  %4529 = vmatprep.mubr.msk.bf16.mxu1 %vm1315_vm3, %v2478_v11 }
 0x39b   : > { %4527 = vmatprep.subr.bf16.mxu1 %v4823_v55 }
 0x39e   : > { %4528 = vmatpush3.bf16.msra.mxu1 %v4823_v55  ;;  %v2695_v55 = vld [vmem:[#allocation2 + $0x4] sm:$0x7] }
 0x3a5   : > { %4530 = vmatmul.mubr.msk.bf16.vlgmr.msra.gmra.mrb[0].mxu1 %vm1315_vm3, %v2487_v12  ;;  %vm2693_vm3 = vcmask 124928  }
 0x3a6   : > { %vm6066_vm5 = vmand %vm2693_vm3, %vm811_vm9  ;;  %vm3994_vm9 = vcmask 123904  }
 0x478   : > { %v4531_v17 = vpop.f32.mrb[0].mxu1 }
 0x479   : > { %v2568_v21 = vmul.f32 %v4531_v17, %v4305_v16  ;;  %v2540_v22 = vpop.f32.mrb[1].mxu1 }
 0x47a   : > { %v2566_v25 = vmul.f32 %v4305_v16, %v2540_v22  ;;  %v4532_v26 = vpop.f32.mrb[2].mxu1 }
 0x47b   : > { %v2579_v27 = vadd.f32 %v4306_v20, %v2568_v21  ;;  %v2569_v30 = vmul.f32 %v4532_v26, %v4305_v16  ;;  %v2543_v31 = vpop.f32.mrb[3].mxu1  ;;  %v2698_v21 = vld [vmem:[#allocation2 + $0x8] sm:$0x7] }
 0x47c   : > { %v2577_v32 = vadd.f32 %v4306_v20, %v2566_v25  ;;  %v2567_v33 = vmul.f32 %v4305_v16, %v2543_v31  ;;  %v2713_v25 = vld [vmem:[#allocation2 + $0x1c] sm:$0x7]  ;;  %v2716_v31 = vld [vmem:[#allocation2 + $0x20] sm:$0x7] }
 0x47d   : > { %v2583_v34 = vmax.f32 %v2579_v27, 0.0  ;;  %v2580_v35 = vadd.f32 %v4306_v20, %v2569_v30 }
 0x47e   : > { %v2581_v24 = vmax.f32 %v2577_v32, 0.0  ;;  %v2578_v5 = vadd.f32 %v4306_v20, %v2567_v33 }
 0x47f   : > { %v2591_v29 = vcombine.high %v2583_v34, %v2583_v34  ;;  %v4385_v36 = vpack.c.bf16 %v2583_v34, %v2583_v34  ;;  %v2584_v37 = vmax.f32 %v2580_v35, 0.0 }
 0x480   : > { %v2589_v38 = vcombine.high %v2581_v24, %v2581_v24  ;;  %v4381_v39 = vpack.c.bf16 %v2581_v24, %v2581_v24  ;;  %v2582_v40 = vmax.f32 %v2578_v5, 0.0 }
 0x481   : > { %v4386_v23 = vpack.c.bf16 %v2591_v29, %v2591_v29  ;;  %v2658_v43 = vshrl.u32 %v4385_v36, 16  ;;  %v2661_v44 = vshll.u32 %v4385_v36, 16  ;;  %v2592_v45 = vcombine.high %v2584_v37, %v2584_v37 }
 0x482   : > { %v4382_v46 = vpack.c.bf16 %v2589_v38, %v2589_v38  ;;  %v2630_v28 = vshrl.u32 %v4381_v39, 16  ;;  %v2633_v47 = vshll.u32 %v4381_v39, 16  ;;  %v4387_v48 = vpack.c.bf16 %v2584_v37, %v2584_v37  ;;  %v2701_v38 = vld [vmem:[#allocation2 + $0xc] sm:$0x7] }
 0x483   : > { %v2660_v49 = vrot.slane %v2658_v43, 7  ;;  %v2665_v19 = vshrl.u32 %v4386_v23, 16  ;;  %v2668_v50 = vshll.u32 %v4386_v23, 16  ;;  %v4388_v41 = vpack.c.bf16 %v2592_v45, %v2592_v45 }
 0x484   : > { %v2632_v56 = vrot.slane %v2630_v28, 7  ;;  %v2637_v10 = vshrl.u32 %v4382_v46, 16  ;;  %v2640_v57 = vshll.u32 %v4382_v46, 16  ;;  %v2672_v58 = vshrl.u32 %v4387_v48, 16 }
 0x485   : > { %v2663_v59 = vor.u32 %v2661_v44, %v2660_v49  ;;  %v2667_v61 = vrot.slane %v2665_v19, 7  ;;  %v2675_v51 = vshll.u32 %v4387_v48, 16  ;;  %v2679_v60 = vshrl.u32 %v4388_v41, 16  ;;  %v2719_v49 = vld [vmem:[#allocation2] sm:$0x3] }
 0x486   : > { %v2635_v1 = vor.u32 %v2633_v47, %v2632_v56  ;;  %v2639_v3 = vrot.slane %v2637_v10, 7  ;;  %v2674_v4 = vrot.slane %v2672_v58, 7  ;;  %v2682_v7 = vshll.u32 %v4388_v41, 16 }
 0x487   : > { %v2670_v8 = vor.u32 %v2668_v50, %v2667_v61  ;;  %v2708_v9 = vsel %vm6066_vm5, %v2663_v59, %v2707_v63  ;;  %v2681_v11 = vrot.slane %v2679_v60, 7  ;;  %v2590_v13 = vcombine.high %v2582_v40, %v2582_v40 }
 0x488   : > { %2709 = vst [vmem:[#allocation2 + $0x14] sm:$0x7] %v2708_v9  ;;  %v2642_v12 = vor.u32 %v2640_v57, %v2639_v3  ;;  %v2696_v14 = vsel %vm6066_vm5, %v2635_v1, %v2695_v55  ;;  %v2677_v16 = vor.u32 %v2675_v51, %v2674_v4  ;;  %v4383_v17 = vpack.c.bf16 %v2582_v40, %v2582_v40  ;;  %v2704_v40 = vld [vmem:[#allocation2 + $0x10] sm:$0x7] }
 0x489   : > { %v2711_v20 = vsel %vm6066_vm5, %v2670_v8, %v2710_v52  ;;  %2697 = vst [vmem:[#allocation2 + $0x4] sm:$0x7] %v2696_v14  ;;  %v2684_v22 = vor.u32 %v2682_v7, %v2681_v11  ;;  %v4384_v26 = vpack.c.bf16 %v2590_v13, %v2590_v13  ;;  %v4833_v14 = vld [vmem:[#allocation15 + $0x30] sm:$0xff]  }
 0x48a   : > { %2712 = vst [vmem:[#allocation2 + $0x18] sm:$0x7] %v2711_v20  ;;  %v2699_v27 = vsel %vm6066_vm5, %v2642_v12, %v2698_v21  ;;  %v2714_v30 = vsel %vm6066_vm5, %v2677_v16, %v2713_v25  ;;  %v2644_v32 = vshrl.u32 %v4383_v17, 16  ;;  %v2647_v24 = vshll.u32 %v4383_v17, 16 }
 0x48b   : > { %2700 = vst [vmem:[#allocation2 + $0x8] sm:$0x7] %v2699_v27  ;;  %v2717_v33 = vsel %vm6066_vm5, %v2684_v22, %v2716_v31  ;;  %2715 = vst [vmem:[#allocation2 + $0x1c] sm:$0x7] %v2714_v30  ;;  %v2651_v34 = vshrl.u32 %v4384_v26, 16  ;;  %v2654_v29 = vshll.u32 %v4384_v26, 16 }
 0x48c   : > { %2718 = vst [vmem:[#allocation2 + $0x20] sm:$0x7] %v2717_v33  ;;  %v2646_v35 = vrot.slane %v2644_v32, 7 }
 0x48d   : > { %v2653_v5 = vrot.slane %v2651_v34, 7 }
 0x48e   : > { %v2649_v36 = vor.u32 %v2647_v24, %v2646_v35 }
 0x48f   : > { %v2656_v37 = vor.u32 %v2654_v29, %v2653_v5  ;;  %v2724_v47 = vld [vmem:[#allocation2 + $0x14] sm:$0x3] }
 0x490   : > { %v2702_v39 = vsel %vm6066_vm5, %v2649_v36, %v2701_v38  ;;  %v2720_v28 = vld [vmem:[#allocation2 + $0x4] sm:$0x3]  ;;  %v4329_v32 = vld.sshfl [vmem:[#allocation2 + $0x14] sm:$0x13 pattern:$0x76325410] }
 0x491   : > { %v2705_v23 = vsel %vm6066_vm5, %v2656_v37, %v2704_v40  ;;  %2703 = vst [vmem:[#allocation2 + $0xc] sm:$0x7] %v2702_v39  ;;  %v2725_v45 = vld [vmem:[#allocation2 + $0x18] sm:$0x3]  ;;  %v2837_v59 = vcombine.low %v2719_v49, %v2720_v28 }
 0x492   : > { %2706 = vst [vmem:[#allocation2 + $0x10] sm:$0x7] %v2705_v23  ;;  %v2721_v44 = vld [vmem:[#allocation2 + $0x8] sm:$0x3]  ;;  %v2726_v46 = vld [vmem:[#allocation2 + $0x1c] sm:$0x3]  ;;  %v2758_v41 = vcombine.low %v2724_v47, %v2725_v45 }
 0x493   : > { %v6086_v43 = vld [vmem:[#allocation2 + $0x20] sm:$0x3]  ;;  %v2741_v50 = vcombine.low %v2720_v28, %v2721_v44  ;;  %v4325_v56 = vld.sshfl [vmem:[#allocation2 + $0x4] sm:$0x13 pattern:$0x76325410]  ;;  %v2845_v52 = vrot.slane %v2837_v59, %v5727_v54  ;;  %v2855_v33 = vcombine.low %v2725_v45, %v2726_v46 }
 0x494   : > { %v2759_v48 = vcombine.low %v2726_v46, %v6086_v43  ;;  %v4326_v53 = vld.sshfl [vmem:[#allocation2 + $0x8] sm:$0x13 pattern:$0x76325410]  ;;  %v3107_v60 = vshrl.u32 %v4325_v56, 16  ;;  %v3110_v63 = vshll.u32 %v4325_v56, 16  ;;  %v2766_v4 = vrot.slane %v2758_v41, %v5727_v54 }
 0x495   : > { %v2749_v1 = vrot.slane %v2741_v50, %v5727_v54  ;;  %v3121_v8 = vshrl.u32 %v4326_v53, 16  ;;  %v3124_v9 = vshll.u32 %v4326_v53, 16  ;;  %v3051_v17 = vcombine.high %v4326_v53, %v4326_v53  ;;  %v4330_v37 = vld.sshfl [vmem:[#allocation2 + $0x18] sm:$0x13 pattern:$0x76325410] }
 0x496   : > { %v2773_v51 = vrot.slane %v2759_v48, %v5727_v54  ;;  %v3109_v20 = vrot.slane %v3107_v60, 6  ;;  %v3112_v21 = vrot.slane %v3110_v63, 7  ;;  %v3043_v34 = vcombine.high %v4325_v56, %v4325_v56  ;;  %v4331_v38 = vld.sshfl [vmem:[#allocation2 + $0x1c] sm:$0x13 pattern:$0x76325410] }
 0x497   : > { %v3123_v22 = vrot.slane %v3121_v8, 6  ;;  %v3126_v25 = vrot.slane %v3124_v9, 7  ;;  %v3130_v29 = vshll.u32 %v3051_v17, 16  ;;  %v3163_v48 = vshrl.u32 %v4329_v32, 16  ;;  %v4835_v53 = vld [vmem:[#allocation15 + $0x8] sm:$0xff]  }
 0x498   : > { %v2722_v19 = vld [vmem:[#allocation2 + $0xc] sm:$0x3]  ;;  %v2774_v12 = vcombine.low %v2766_v4, %v2773_v51  ;;  %v3113_v35 = vor.u32 %v3112_v21, %v3109_v20  ;;  %v3177_v50 = vshrl.u32 %v4330_v37, 16  ;;  %v3180_v41 = vshll.u32 %v4330_v37, 16  ;;  %v2728_v60 = vld [vmem:[#allocation2 + $0x24] sm:$0x3] }
 0x499   : > { %v2723_v10 = vld [vmem:[#allocation2 + $0x10] sm:$0x3]  ;;  %v2838_v57 = vcombine.low %v2721_v44, %v2722_v19  ;;  %v4327_v61 = vld.sshfl [vmem:[#allocation2 + $0xc] sm:$0x13 pattern:$0x76325410]  ;;  %v3127_v5 = vor.u32 %v3126_v25, %v3123_v22  ;;  %v6104_v44 = vrot.slane %v2855_v33, %v5727_v54  ;;  %v3083_v17 = vcombine.high %v4330_v37, %v4330_v37 }
 0x49a   : > { %v2742_v58 = vcombine.low %v2722_v19, %v2723_v10  ;;  %v3135_v55 = vshrl.u32 %v4327_v61, 16  ;;  %v3138_v11 = vshll.u32 %v4327_v61, 16  ;;  %v2854_v30 = vcombine.low %v2723_v10, %v2724_v47  ;;  %v4328_v24 = vld.sshfl [vmem:[#allocation2 + $0x10] sm:$0x13 pattern:$0x76325410] }
 0x49b   : > { %v6094_v7 = vrot.slane %v2838_v57, %v5727_v54  ;;  %v3059_v31 = vcombine.high %v4327_v61, %v4327_v61  ;;  %v3149_v23 = vshrl.u32 %v4328_v24, 16  ;;  %v3114_v28 = vrot.slane %v3113_v35, 2 }
 0x49c   : > { %v2756_v3 = vrot.slane %v2742_v58, %v5727_v54  ;;  %v3137_v26 = vrot.slane %v3135_v55, 6  ;;  %v3140_v27 = vrot.slane %v3138_v11, 7  ;;  %v2862_v39 = vrot.slane %v2854_v30, %v5727_v54 }
 0x49d   : > { %v2853_v16 = vcombine.low %v2845_v52, %v6094_v7  ;;  %v3144_v40 = vshll.u32 %v3059_v31, 16  ;;  %v3116_v47 = vshll.u32 %v3043_v34, 16  ;;  %v3128_v45 = vrot.slane %v3127_v5, 2 }
 0x49e   : > { %v2757_v13 = vcombine.low %v2749_v1, %v2756_v3  ;;  %v3141_v36 = vor.u32 %v3140_v27, %v3137_v26  ;;  %v3132_v46 = vrot.slane %v3130_v29, 7  ;;  %v3166_v19 = vshll.u32 %v4329_v32, 16  ;;  %v4335_v26 = vld.sshfl [vmem:[#allocation2 + $0x20] sm:$0x13 pattern:$0x76325410] }
 0x49f   : > { %v3191_v56 = vshrl.u32 %v4331_v38, 16  ;;  %v3194_v10 = vshll.u32 %v4331_v38, 16  ;;  %v2870_v57 = vcombine.low %v2862_v39, %v6104_v44  ;;  %v3146_v58 = vrot.slane %v3144_v40, 7 }
 0x4a0   : > { %4535 = vmatprep.mubr.msk.bf16.mxu0 %vm617_vm1, %v2757_v13  ;;  %v3142_v49 = vrot.slane %v3141_v36, 2  ;;  %v3151_v59 = vrot.slane %v3149_v23, 6  ;;  %v2935_v51 = vcombine.low %v6094_v7, %v2862_v39  ;;  %v3118_v63 = vrot.slane %v3116_v47, 7  ;;  %v4837_v23 = vld [vmem:[#allocation15 + $0x20] sm:$0xff]  }
 0x4a1   : > { %4536 = vmatmul.mubr.msk.bf16.vlgmr.msra.gmra.mrb[4].mxu0 %vm617_vm1, %v2774_v12  ;;  %v3067_v1 = vcombine.high %v4328_v24, %v4328_v24  ;;  %v3075_v3 = vcombine.high %v4329_v32, %v4329_v32  ;;  %v6111_v4 = vsel %vm5927_vm11, %v3128_v45, %v3132_v46  ;;  %v3165_v9 = vrot.slane %v3163_v48, 6 }
 0x4a2   : > { %4540 = vmatpush3.bf16.msra.mxu0 %v6061_v15  ;;  %4541 = vmatprep.mubr.msk.bf16.mxu0 %vm617_vm1, %v2853_v16  ;;  %v3152_v15 = vshll.u32 %v4328_v24, 16  ;;  %v3147_v8 = vsel %vm5927_vm11, %v3142_v49, %v3146_v58  ;;  %v3168_v55 = vrot.slane %v3166_v19, 7  ;;  %v3179_v11 = vrot.slane %v3177_v50, 6 }
 0x4a3   : > { %4545 = vmatprep.subr.bf16.mxu0 %v4833_v14  ;;  %v3182_v7 = vrot.slane %v3180_v41, 7  ;;  %v3193_v13 = vrot.slane %v3191_v56, 6  ;;  %v3196_v52 = vrot.slane %v3194_v10, 7  ;;  %v2936_v12 = vcombine.low %v6086_v43, %v2728_v60 }
 0x4a4   : > { %v3154_v61 = vrot.slane %v3152_v15, 7  ;;  %v3119_v16 = vsel %vm5927_vm11, %v3114_v28, %v3118_v63  ;;  %v3207_v21 = vcombine.low %v6111_v4, %v3147_v8  ;;  %v3091_v22 = vcombine.high %v4331_v38, %v4331_v38 }
 0x4a5   : > { %v3158_v25 = vshll.u32 %v3067_v1, 16  ;;  %v3169_v27 = vor.u32 %v3168_v55, %v3165_v9  ;;  %v3183_v30 = vor.u32 %v3182_v7, %v3179_v11  ;;  %v3197_v31 = vor.u32 %v3196_v52, %v3193_v13  ;;  %v4838_v55 = vld [vmem:[#allocation15 + $0x38] sm:$0xff]   ;;  %v4344_v52 = vld.sshfl [vmem:[#allocation2 + $0x4] sm:$0x12 pattern:$0x76325410] }
 0x4a6   : > { %v3155_v20 = vor.u32 %v3154_v61, %v3151_v59  ;;  %v2943_v32 = vrot.slane %v2936_v12, %v5727_v54  ;;  %v3172_v34 = vshll.u32 %v3075_v3, 16  ;;  %v3186_v43 = vshll.u32 %v3083_v17, 16  ;;  %v4346_v7 = vld.sshfl [vmem:[#allocation2 + $0xc] sm:$0x12 pattern:$0x76325410] }
 0x4a7   : > { %v6123_v35 = vrot.slane %v3207_v21, %v5727_v54  ;;  %v3200_v24 = vshll.u32 %v3091_v22, 16  ;;  %v3315_v5 = vshrl.u32 %v4335_v26, 16  ;;  %v3318_v29 = vshll.u32 %v4335_v26, 16 }
 0x4a8   : > { %v3156_v33 = vrot.slane %v3155_v20, 2  ;;  %v3160_v36 = vrot.slane %v3158_v25, 7  ;;  %v3170_v38 = vrot.slane %v3169_v27, 2  ;;  %v3184_v39 = vrot.slane %v3183_v30, 2  ;;  %v4839_v27 = vld [vmem:[#allocation15 + $0x10] sm:$0xff]  }
 0x4a9   : > { %v2944_v40 = vcombine.low %v6104_v44, %v2943_v32  ;;  %v3174_v28 = vrot.slane %v3172_v34, 7  ;;  %v3188_v47 = vrot.slane %v3186_v43, 7  ;;  %v3202_v45 = vrot.slane %v3200_v24, 7 }
 0x4aa   : > { %v3161_v15 = vsel %vm5927_vm11, %v3156_v33, %v3160_v36  ;;  %v3317_v46 = vrot.slane %v3315_v5, 6  ;;  %v3320_v49 = vrot.slane %v3318_v29, 7  ;;  %v3313_v19 = vcombine.high %v4335_v26, %v4335_v26  ;;  %v4347_v34 = vld.sshfl [vmem:[#allocation2 + $0x10] sm:$0x12 pattern:$0x76325410] }
 0x4ab   : > { %v3175_v44 = vsel %vm5927_vm11, %v3170_v38, %v3174_v28  ;;  %v3189_v50 = vsel %vm5927_vm11, %v3184_v39, %v3188_v47  ;;  %v3331_v10 = vcombine.low %v3147_v8, %v3161_v15  ;;  %v3330_v59 = vcombine.low %v3119_v16, %v6111_v4  ;;  %v4345_v4 = vld.sshfl [vmem:[#allocation2 + $0x8] sm:$0x12 pattern:$0x76325410] }
 0x4ac   : > { %v3223_v56 = vcombine.low %v3161_v15, %v3175_v44  ;;  %v3324_v61 = vshll.u32 %v3313_v19, 16  ;;  %v3347_v12 = vcombine.low %v3175_v44, %v3189_v50  ;;  %v3578_v17 = vcombine.high %v4346_v7, %v4346_v7  ;;  %v4348_v5 = vld.sshfl [vmem:[#allocation2 + $0x14] sm:$0x12 pattern:$0x76325410] }
 0x4ad   : > { %4542 = vmatmul.mubr.msk.bf16.vlgmr.msra.gmra.mrb[4].mxu0 %vm617_vm1, %v2870_v57  ;;  %v3321_v57 = vor.u32 %v3320_v49, %v3317_v46  ;;  %v3338_v1 = vrot.slane %v3330_v59, %v5727_v54  ;;  %v3562_v20 = vcombine.high %v4344_v52, %v4344_v52  ;;  %v4353_v30 = vrot.slane %v4345_v4, 9  ;;  %v4349_v36 = vld.sshfl [vmem:[#allocation2 + $0x18] sm:$0x12 pattern:$0x76325410] }
 0x4ae   : > { %4546 = vmatpush3.bf16.msra.mxu0 %v4833_v14  ;;  %4547 = vmatprep.mubr.msk.bf16.mxu0 %vm617_vm1, %v2935_v51  ;;  %v3206_v14 = vcombine.low %v5937_v6, %v3119_v16  ;;  %v3198_v6 = vrot.slane %v3197_v31, 2  ;;  %v3345_v51 = vrot.slane %v3331_v10, %v5727_v54  ;;  %v3326_v3 = vrot.slane %v3324_v61, 7 }
 0x4af   : > { %4551 = vmatprep.subr.bf16.mxu0 %v4835_v53  ;;  %v3322_v60 = vrot.slane %v3321_v57, 2  ;;  %v3570_v16 = vcombine.high %v4345_v4, %v4345_v4  ;;  %v3355_v22 = vrot.slane %v3347_v12, %v5727_v54  ;;  %v3625_v25 = vrot.slane %v3578_v17, 7 }
 0x4b0   : > { %v3214_v37 = vrot.slane %v3206_v14, %v5727_v54  ;;  %v3203_v41 = vsel %vm5927_vm11, %v3198_v6, %v3202_v45  ;;  %v3346_v8 = vcombine.low %v3338_v1, %v3345_v51  ;;  %v3617_v26 = vrot.slane %v3562_v20, 7 }
 0x4b1   : > { %v3224_v58 = vcombine.low %v3189_v50, %v3203_v41  ;;  %v3327_v11 = vsel %vm5927_vm11, %v3322_v60, %v3326_v3  ;;  %v3621_v62 = vrot.slane %v3570_v16, 7  ;;  %v4354_v31 = vrot.slane %v4346_v7, 9  ;;  %v4840_v50 = vld [vmem:[#allocation15 + $0x28] sm:$0xff]  }
 0x4b2   : > { %v3222_v48 = vcombine.low %v3214_v37, %v6123_v35  ;;  %v3348_v13 = vcombine.low %v3203_v41, %v3327_v11  ;;  %v4352_v33 = vrot.slane %v4344_v52, 9  ;;  %v4350_v37 = vld.sshfl [vmem:[#allocation2 + $0x1c] sm:$0x12 pattern:$0x76325410]  ;;  %v3586_v39 = vcombine.high %v4347_v34, %v4347_v34 }
 0x4b3   : > { %v6142_v63 = vrot.slane %v3224_v58, %v5727_v54  ;;  %v3622_v43 = vsel %vm6005_vm4, %v4353_v30, %v3621_v62  ;;  %v3626_v24 = vsel %vm6005_vm4, %v4354_v31, %v3625_v25  ;;  %v3610_v15 = vcombine.high %v4350_v37, %v4350_v37  ;;  %v4362_v58 = vld.sshfl [vmem:[#allocation2 + $0x20] sm:$0x12 pattern:$0x76325410]  ;;  %v4841_v52 = vld [vmem:[#allocation15 + $0x40] sm:$0xff]  }
 0x4b4   : > { %v3362_v21 = vrot.slane %v3348_v13, %v5727_v54  ;;  %v3618_v29 = vsel %vm6005_vm4, %v4352_v33, %v3617_v26  ;;  %v3646_v38 = vcombine.low %v3622_v43, %v3626_v24  ;;  %v4355_v46 = vrot.slane %v4347_v34, 9  ;;  %v4373_v31 = vld [vmem:[#allocation18] ss:$0 sm:$0xff] }
 0x4b5   : > { %v3645_v6 = vcombine.low %v6017_v42, %v3618_v29  ;;  %v3641_v44 = vrot.slane %v3610_v15, 7  ;;  %v4356_v41 = vrot.slane %v4348_v5, 9  ;;  %v4357_v10 = vrot.slane %v4349_v36, 9 }
 0x4b6   : > { %v3363_v14 = vcombine.low %v3355_v22, %v3362_v21  ;;  %v3660_v47 = vrot.slane %v3646_v38, %v5727_v54  ;;  %v4358_v57 = vrot.slane %v4350_v37, 9  ;;  %v3759_v3 = vcombine.low %v3618_v29, %v3622_v43 }
 0x4b7   : > { %v3653_v45 = vrot.slane %v3645_v6, %v5727_v54  ;;  %v4363_v7 = vrot.slane %v4362_v58, 9 }
 0x4b8   : > { %v3767_v4 = vrot.slane %v3759_v3, %v5727_v54 }
 0x4b9   : > { %4548 = vmatmul.mubr.msk.bf16.vlgmr.msra.gmra.mrb[4].mxu0 %vm617_vm1, %v2944_v40  ;;  %v3594_v40 = vcombine.high %v4348_v5, %v4348_v5 }
 0x4ba   : > { %4552 = vmatpush3.bf16.msra.mxu0 %v4835_v53  ;;  %4553 = vmatprep.mubr.msk.bf16.mxu0 %vm617_vm1, %v3222_v48  ;;  %v3231_v53 = vrot.slane %v3223_v56, %v5727_v54  ;;  %v3629_v48 = vrot.slane %v3586_v39, 7  ;;  %v3661_v56 = vcombine.low %v3653_v45, %v3660_v47 }
 0x4bb   : > { %4557 = vmatprep.subr.bf16.mxu0 %v4837_v23  ;;  %v3633_v49 = vrot.slane %v3594_v40, 7 }
 0x4bc   : > { %v3239_v9 = vcombine.low %v3231_v53, %v6142_v63  ;;  %v3454_v32 = vcombine.low %v6123_v35, %v3231_v53  ;;  %v3455_v35 = vcombine.low %v3327_v11, %v6003_v18  ;;  %v3630_v42 = vsel %vm6005_vm4, %v4355_v46, %v3629_v48 }
 0x4bd   : > { %v3634_v59 = vsel %vm6005_vm4, %v4356_v41, %v3633_v49  ;;  %v3642_v53 = vsel %vm6005_vm4, %v4358_v57, %v3641_v44  ;;  %v3760_v60 = vcombine.low %v3626_v24, %v3630_v42 }
 0x4be   : > { %v3462_v28 = vrot.slane %v3455_v35, %v5727_v54  ;;  %v3662_v51 = vcombine.low %v3630_v42, %v3634_v59 }
 0x4c0   : > { %v3463_v18 = vcombine.low %v6142_v63, %v3462_v28  ;;  %v3752_v63 = vcombine.high %v4362_v58, %v4362_v58 }
 0x4c5   : > { %4554 = vmatmul.mubr.msk.bf16.vlgmr.msra.gmra.mrb[4].mxu0 %vm617_vm1, %v3239_v9  ;;  %v3670_v9 = vrot.slane %v3662_v51, %v5727_v54 }
 0x4c6   : > { %4558 = vmatpush3.bf16.msra.mxu0 %v4837_v23  ;;  %4559 = vmatprep.mubr.msk.bf16.mxu0 %vm617_vm1, %v3346_v8  ;;  %v3602_v23 = vcombine.high %v4349_v36, %v4349_v36  ;;  %v3755_v8 = vrot.slane %v3752_v63, 7 }
 0x4c7   : > { %4563 = vmatprep.subr.bf16.mxu0 %v4838_v55  ;;  %v3873_v25 = vcombine.low %v3660_v47, %v3670_v9 }
 0x4c8   : > { %v3637_v19 = vrot.slane %v3602_v23, 7  ;;  %v3756_v16 = vsel %vm6005_vm4, %v4363_v7, %v3755_v8 }
 0x4c9   : > { %v3777_v17 = vcombine.low %v3642_v53, %v3756_v16  ;;  %v3874_v2 = vcombine.low %v3756_v16, %v6054_v0 }
 0x4ca   : > { %v3638_v61 = vsel %vm6005_vm4, %v4357_v10, %v3637_v19 }
 0x4cb   : > { %v3663_v1 = vcombine.low %v3638_v61, %v3642_v53  ;;  %v3776_v20 = vcombine.low %v3634_v59, %v3638_v61  ;;  %v3791_v21 = vrot.slane %v3777_v17, %v5727_v54  ;;  %v3881_v26 = vrot.slane %v3874_v2, %v5727_v54 }
 0x4cd   : > { %v3677_v11 = vrot.slane %v3663_v1, %v5727_v54  ;;  %v3784_v22 = vrot.slane %v3776_v20, %v5727_v54 }
 0x4cf   : > { %v3678_v13 = vcombine.low %v3670_v9, %v3677_v11  ;;  %v3792_v62 = vcombine.low %v3784_v22, %v3791_v21 }
 0x4d1   : > { %4560 = vmatmul.mubr.msk.bf16.vlgmr.msra.gmra.mrb[4].mxu0 %vm617_vm1, %v3363_v14  ;;  %v3882_v14 = vcombine.low %v3677_v11, %v3881_v26 }
 0x4d2   : > { %4564 = vmatpush3.bf16.msra.mxu0 %v4838_v55  ;;  %4565 = vmatprep.mubr.msk.bf16.mxu0 %vm617_vm1, %v3454_v32  ;;  %v3774_v55 = vrot.slane %v3760_v60, %v5727_v54 }
 0x4d3   : > { %4569 = vmatprep.subr.bf16.mxu0 %v4839_v27 }
 0x4d4   : > { %v3775_v12 = vcombine.low %v3767_v4, %v3774_v55 }
 0x4dd   : > { %4566 = vmatmul.mubr.msk.bf16.vlgmr.msra.gmra.mrb[4].mxu0 %vm617_vm1, %v3463_v18 }
 0x4de   : > { %4570 = vmatpush3.bf16.msra.mxu0 %v4839_v27  ;;  %4571 = vmatprep.mubr.msk.bf16.mxu0 %vm617_vm1, %v3661_v56  ;;  %v4372_v27 = vld [vmem:[#allocation17] ss:$0 sm:$0xff] }
 0x4df   : > { %4575 = vmatprep.subr.bf16.mxu0 %v4840_v50 }
 0x4e9   : > { %4572 = vmatmul.mubr.msk.bf16.vlgmr.msra.gmra.mrb[4].mxu0 %vm617_vm1, %v3678_v13 }
 0x4ea   : > { %4576 = vmatpush3.bf16.msra.mxu0 %v4840_v50  ;;  %4577 = vmatprep.mubr.msk.bf16.mxu0 %vm617_vm1, %v3775_v12 }
 0x4eb   : > { %4581 = vmatprep.subr.bf16.mxu0 %v4841_v52 }
 0x4f5   : > { %4578 = vmatmul.mubr.msk.bf16.vlgmr.msra.gmra.mrb[4].mxu0 %vm617_vm1, %v3792_v62 }
 0x4f6   : > { %4582 = vmatpush3.bf16.msra.mxu0 %v4841_v52  ;;  %4583 = vmatprep.mubr.msk.bf16.mxu0 %vm617_vm1, %v3873_v25 }
 0x501   : > { %4584 = vmatmul.mubr.msk.bf16.vlgmr.msra.gmra.mrb[4].mxu0 %vm617_vm1, %v3882_v14 }
 0x5d4   : > { %v4585_v30 = vpop.f32.mrb[4].mxu0 }
 0x5d5   : > { %v3957_v32 = vmul.f32 %v4585_v30, %v4372_v27  ;;  %v3929_v33 = vpop.f32.mrb[5].mxu0 }
 0x5d6   : > { %v3955_v34 = vmul.f32 %v4372_v27, %v3929_v33  ;;  %v4586_v43 = vpop.f32.mrb[6].mxu0 }
 0x5d7   : > { %v3968_v24 = vadd.f32 %v4373_v31, %v3957_v32  ;;  %v3958_v5 = vmul.f32 %v4586_v43, %v4372_v27  ;;  %v3932_v29 = vpop.f32.mrb[7].mxu0 }
 0x5d8   : > { %v3966_v36 = vadd.f32 %v4373_v31, %v3955_v34  ;;  %v3956_v35 = vmul.f32 %v4372_v27, %v3932_v29 }
 0x5d9   : > { %v3972_v0 = vmax.f32 %v3968_v24, 0.0  ;;  %v3969_v37 = vadd.f32 %v4373_v31, %v3958_v5 }
 0x5da   : > { %v3970_v54 = vmax.f32 %v3966_v36, 0.0  ;;  %v3967_v38 = vadd.f32 %v4373_v31, %v3956_v35 }
 0x5db   : > { %v3980_v39 = vcombine.high %v3972_v0, %v3972_v0  ;;  %v3990_v6 = vpack.c.bf16 %v3972_v0, %v3972_v0  ;;  %v3973_v40 = vmax.f32 %v3969_v37, 0.0 }
 0x5dc   : > { %v3978_v23 = vcombine.high %v3970_v54, %v3970_v54  ;;  %v3986_v15 = vpack.c.bf16 %v3970_v54, %v3970_v54  ;;  %v3971_v28 = vmax.f32 %v3967_v38, 0.0 }
 0x5dd   : > { %v3991_v47 = vpack.c.bf16 %v3980_v39, %v3980_v39  ;;  %3999 = vst.msk [vmem:[%s523_s3 + $0x8] sm:$0x3] %vm3994_vm9, %v3990_v6  ;;  %v3981_v48 = vcombine.high %v3973_v40, %v3973_v40  ;;  %v3992_v45 = vpack.c.bf16 %v3973_v40, %v3973_v40 }
 0x5de   : > { %v3987_v46 = vpack.c.bf16 %v3978_v23, %v3978_v23  ;;  %3995 = vst.msk [vmem:[%s523_s3] sm:$0x3] %vm3994_vm9, %v3986_v15  ;;  %v3979_v49 = vcombine.high %v3971_v28, %v3971_v28  ;;  %v3988_v19 = vpack.c.bf16 %v3971_v28, %v3971_v28 }
 0x5df   : > { %4000 = vst.msk [vmem:[%s523_s3 + $0xa] sm:$0x3] %vm3994_vm9, %v3991_v47  ;;  %v3993_v44 = vpack.c.bf16 %v3981_v48, %v3981_v48  ;;  %4001 = vst.msk [vmem:[%s523_s3 + $0xc] sm:$0x3] %vm3994_vm9, %v3992_v45 }
 0x5e0   : > { %3996 = vst.msk [vmem:[%s523_s3 + $0x2] sm:$0x3] %vm3994_vm9, %v3987_v46  ;;  %v3989_v18 = vpack.c.bf16 %v3979_v49, %v3979_v49  ;;  %3997 = vst.msk [vmem:[%s523_s3 + $0x4] sm:$0x3] %vm3994_vm9, %v3988_v19 }
 0x5e1   : > { %4002 = vst.msk [vmem:[%s523_s3 + $0xe] sm:$0x3] %vm3994_vm9, %v3993_v44 }
 0x5e2   : > { %3998 = vst.msk [vmem:[%s523_s3 + $0x6] sm:$0x3] %vm3994_vm9, %v3989_v18 }
 0x5e3   : > { %5139 = shalt.err (!%p5136_p1)
}
 0x5e4   : > { %s5140_s18 = scalar_lea.hbm %s6202_s11, 256  ;;  %s5144_s2 = scalar_lea.hbm %s6329_s6, 512 }
 0x5e5   : > { %p5141_p13 = scmp.ne.s32.totalorder %s6202_s11, %s5140_s18  ;;  %p5145_p2 = scmp.lt.u32.totalorder %s6202_s11, %s6329_s6 }
 0x5e6   : > { %p5146_p4 = scmp.lt.u32.totalorder %s5144_s2, %s5140_s18  ;;  %p5148_p5 = scmp.lt.u32.totalorder %s5140_s18, %s6202_s11 }
 0x5e7   : > { %p5142_p0 = pnand %p5141_p13, %p6330_p7 }
 0x5e8   : > { %p5147_p10 = por %p5146_p4, %p5145_p2 }
 0x5e9   : > { %p5143_p6 = pneg %p5142_p0 }
 0x5ea   : > { %p5149_p9 = por %p5148_p5, %p5147_p10 }
 0x5ec   : > { %p5150_p8 = pnand %p5149_p9, %p5143_p6 }
 0x5ee   : > { %5153 = shalt.err (!%p5150_p8)
}
 0x5ef   : > { %s5240_s0 = smov 32   ;;  %s5241_s3 = smov 2  }
 0x5f0   : > { %4687 = dma.vmem_to_hbm [thread:$0]  (%p6330_p7), %s6204_s21, 256, %s6202_s11, %s4004_s26, %s5240_s0, %s5240_s0, %s5241_s3  }
 0x5f1 PF: > { %s4032_s19 = sand.u32 1, %s5204_s13   ;;  %p6331_p11 = scmp.ne.s32.totalorder %s6292_s29, 0 }
 0x5f2   : > { %p6332_p3 = scmp.ge.s32.totalorder %s5216_s16, 2  ;;  %s4033_s27 = scalar_lea.sflag [#allocation5], %s4032_s19 }
 0x5f4   : > { %p4722_p12 = pnand %p6332_p3, %p6331_p11 }
 0x5f6   : > { %5199 = dma.done.wait (!%p4722_p12), %s4033_s27, 256  }
 0x5f7   : > { %5201 = vsyncadd (!%p4722_p12), %s4033_s27, 4294967040  ;;  %p30_p1 = scmp.ge.s32.totalorder %s5520_s23, 4   ;;  %s6333_s13 = smov %s5208_s14 }
 0x5f8   : > { %s6334_s14 = smov %s5212_s15  ;;  %s6335_s15 = smov %s5531_s22 }
 0x5f9   : > { %s6336_s16 = smov %s5520_s23  ;;  %32 = sbr.rel (!%p30_p1) target bundleno = 19 (0x13), region = 152 }
 0x600   :  { %4038 = vsyncpa [#allocation4], 1 }
 0x601   :  { %4040 = vsyncpa [#allocation4 + $0x1], 1 }
 0x602   :  { %4041 = vsyncpa [#allocation7], 1 }
 0x603   :  { %4043 = vsyncpa [#allocation7 + $0x1], 1 }
 0x604   :  { %4044 = vsyncpa [#allocation10], 1 }
 0x605   :  { %4045 = vsyncpa [#allocation13], 1 }
 0x606   :  { %4046 = vsyncpa [#allocation16], 1 }
 0x607   :  { %4047 = vsyncpa [#allocation19], 1 }
 0x608   :  { %4048 = vsyncpa [#allocation5], 1 }
 0x609   :  { %4050 = vsyncpa [#allocation5 + $0x1], 1 }

// kernel: decoder_forward.3
= control target key start
LH: loop header
LB: loop body
LE: loop exit
PB: predicated region body
PF: predicated region fallthrough
CT: control target
= control target key end

     0   :  { %s10414_s0 = inlined_call_operand.hbm [shape: bf16[2,64,8], index: 0, kind: input, shape index: {}]   ;;  %s10415_s1 = inlined_call_operand.hbm [shape: bf16[2,16,8,8], index: 1, kind: input, shape index: {}]   ;;  %s10416_s2 = inlined_call_operand.hbm [shape: bf16[8,16], index: 2, kind: input, shape index: {}]   ;;  %s10417_s3 = inlined_call_operand.hbm [shape: f32[1,16], index: 3, kind: input, shape index: {}]   ;;  %s10418_s4 = inlined_call_operand.hbm [shape: bf16[144,8], index: 4, kind: input, shape index: {}]   ;;  %s10419_s5 = inlined_call_operand.hbm [shape: f32[1,8], index: 5, kind: input, shape index: {}]   ;;  %s10420_s6 = inlined_call_operand.hbm [shape: f32[1,8], index: 6, kind: input, shape index: {}]   ;;  %s10421_s7 = inlined_call_operand.hbm [shape: bf16[72,8], index: 7, kind: input, shape index: {}]   ;;  %s10422_s8 = inlined_call_operand.hbm [shape: f32[1,8], index: 8, kind: input, shape index: {}]   ;;  %s10423_s9 = inlined_call_operand.hbm [shape: f32[1,8], index: 9, kind: input, shape index: {}]   ;;  %s10424_s10 = inlined_call_operand.hbm [shape: bf16[2,16,8,8], index: 10, kind: output, shape index: {}]  }
   0x1   :  { %10444 = sst [smem:[#allocation39_spill]] %s10414_s0 }
   0x2   :  { %10445 = sst [smem:[#allocation40_spill]] %s10416_s2 }
   0x3   :  { %10446 = sst [smem:[#allocation41_spill]] %s10417_s3 }
   0x4   :  { %10447 = sst [smem:[#allocation42_spill]] %s10418_s4 }
   0x5   :  { %10448 = sst [smem:[#allocation43_spill]] %s10419_s5 }
   0x6   :  { %10449 = sst [smem:[#allocation44_spill]] %s10420_s6 }
   0x7   :  { %10450 = sst [smem:[#allocation45_spill]] %s10421_s7 }
   0x8   :  { %10451 = sst [smem:[#allocation46_spill]] %s10422_s8 }
   0x9   :  { %15 = vsyncpa [#allocation4], 0 }
   0xa   :  { %17 = vsyncpa [#allocation4 + $0x1], 0 }
   0xb   :  { %18 = vsyncpa [#allocation7], 0 }
   0xc   :  { %20 = vsyncpa [#allocation7 + $0x1], 0 }
   0xd   :  { %21 = vsyncpa [#allocation10], 0 }
   0xe   :  { %22 = vsyncpa [#allocation13], 0 }
   0xf   :  { %23 = vsyncpa [#allocation16], 0 }
  0x10   :  { %24 = vsyncpa [#allocation19], 0 }
  0x11   :  { %25 = vsyncpa [#allocation5], 0 }
  0x12   :  { %27 = vsyncpa [#allocation5 + $0x1], 0  ;;  %s7892_s13 = smov 0   ;;  %s7894_s14 = smov 0  }
  0x13   :  { %s7896_s15 = smov 0   ;;  %s7898_s16 = smov 0  }
  0x14 LB: > { %s7819_s17 = smov [#allocation8]   ;;  %s7913_s19 = sadd.s32 4294967295, %s7817_s16   ;;  %s7817_s16 = sphi %s7898_s16, %s10550_s16   ;;  %s7813_s15 = sphi %s7896_s15, %s10549_s15   ;;  %s7809_s14 = sphi %s7894_s14, %s10548_s14   ;;  %s7805_s13 = sphi %s7892_s13, %s10547_s13  }
  0x15   : > { %s297_s18 = sshll.u32 %s7819_s17, 4  ;;  %p6107_p0 = scmp.ge.s32.totalorder %s7817_s16, 1  ;;  %s298_s18 = int_to_ptr.vmem [resolvable:$true] %s297_s18 }
  0x16   : > { %p10425_p1 = scmp.eq.s32.totalorder %s7913_s19, 0  ;;  %p284_p2 = scmp.lt.s32.totalorder %s7817_s16, 3 }
  0x17   : > { %s7820_s21 = smov [#allocation9]   ;;  %s7821_s23 = smov [#allocation12]  }
  0x18   : > { %p7918_p3 = pnand %p6107_p0, %p284_p2  ;;  %s308_s22 = sshll.u32 %s7820_s21, 4  ;;  %s7925_s22 = int_to_ptr.vmem [resolvable:$true] %s308_s22 }
  0x19   : > { %s332_s24 = sshll.u32 %s7821_s23, 4  ;;  %s10454_s2 = sld [smem:[#allocation40_spill]]  ;;  %s7933_s24 = int_to_ptr.vmem [resolvable:$true] %s332_s24 }
  0x1a   : > { %s10452_s20 = scalar_select %p7918_p3, 1, 0 }
  0x1b   : > { %p7303_p5 = pneg %p7918_p3 }
  0x1d   : > { %p7929_p6 = pnand %p7303_p5, %p10425_p1 }
  0x1f   : > { %s7443_s28 = scalar_lea.hbm %s10454_s2, 64  ;;  %p7943_p8 = pneg %p7929_p6 }
  0x20   : > { %p7444_p7 = scmp.ne.s32.totalorder %s10454_s2, %s7443_s28  ;;  %p7450_p11 = scmp.lt.u32.totalorder %s7443_s28, %s10454_s2 }
  0x22   : > { %p7446_p9 = pnand %p7943_p8, %p7444_p7 }
  0x24   : > { %p7447_p10 = pneg %p7446_p9 }
  0x26   : > { %p7452_p12 = pnand %p7450_p11, %p7447_p10 }
  0x28   : > { %7455 = shalt.err (!%p7452_p12)
}
  0x29   : > { %s7456_s21 = scalar_lea.vmem %s298_s18, 64  ;;  %p7464_p5 = scmp.lt.s32.totalorder %s298_s18, %s298_s18 }
  0x2a   : > { %p7457_p13 = scmp.ne.s32.totalorder %s298_s18, %s7456_s21  ;;  %p7465_p4 = scmp.lt.s32.totalorder %s7456_s21, %s7456_s21 }
  0x2c   : > { %p7459_p0 = pnand %p7457_p13, %p7943_p8  ;;  %p7466_p1 = por %p7465_p4, %p7464_p5 }
  0x2e   : > { %p7460_p2 = pneg %p7459_p0 }
  0x30   : > { %p7467_p3 = pnand %p7466_p1, %p7460_p2 }
  0x32   : > { %7470 = shalt.err (!%p7467_p3)
}
  0x33   : > { %7306 = dma.hbm_to_vmem [thread:$0]  (!%p7929_p6), %s10454_s2, 64, %s298_s18, [#allocation7]  }
  0x34   : > { %s10456_s3 = sld [smem:[#allocation41_spill]] }
  0x3a   : > { %s7471_s29 = scalar_lea.hbm %s10456_s3, 16 }
  0x3b   : > { %p7472_p7 = scmp.ne.s32.totalorder %s10456_s3, %s7471_s29  ;;  %p7478_p1 = scmp.lt.u32.totalorder %s7471_s29, %s10456_s3 }
  0x3d   : > { %p7474_p9 = pnand %p7472_p7, %p7943_p8 }
  0x3f   : > { %p7475_p4 = pneg %p7474_p9 }
  0x41   : > { %p7480_p3 = pnand %p7478_p1, %p7475_p4 }
  0x43   : > { %7483 = shalt.err (!%p7480_p3)
}
  0x44   : > { %s7484_s18 = scalar_lea.vmem %s7925_s22, 16  ;;  %s7491_s23 = scalar_lea.vmem %s7925_s22, 32 }
  0x45   : > { %p7485_p10 = scmp.ne.s32.totalorder %s7925_s22, %s7484_s18  ;;  %p7492_p13 = scmp.lt.s32.totalorder %s7925_s22, %s7925_s22 }
  0x46   : > { %p7493_p0 = scmp.lt.s32.totalorder %s7491_s23, %s7484_s18 }
  0x47   : > { %p7487_p11 = pnand %p7485_p10, %p7943_p8 }
  0x48   : > { %p7494_p2 = por %p7493_p0, %p7492_p13 }
  0x49   : > { %p7488_p12 = pneg %p7487_p11 }
  0x4b   : > { %p7495_p5 = pnand %p7494_p2, %p7488_p12 }
  0x4d   : > { %7498 = shalt.err (!%p7495_p5)
}
  0x4e   : > { %7309 = dma.hbm_to_vmem [thread:$0]  (!%p7929_p6), %s10456_s3, 16, %s7925_s22, [#allocation10]  }
  0x4f   : > { %s10457_s5 = sld [smem:[#allocation43_spill]] }
  0x55   : > { %s7499_s30 = scalar_lea.hbm %s10457_s5, 16 }
  0x56   : > { %p7500_p7 = scmp.ne.s32.totalorder %s10457_s5, %s7499_s30  ;;  %p7506_p1 = scmp.lt.u32.totalorder %s7499_s30, %s10457_s5 }
  0x58   : > { %p7502_p9 = pnand %p7500_p7, %p7943_p8 }
  0x5a   : > { %p7503_p4 = pneg %p7502_p9 }
  0x5c   : > { %p7508_p3 = pnand %p7506_p1, %p7503_p4 }
  0x5e   : > { %7511 = shalt.err (!%p7508_p3)
}
  0x5f   : > { %s7512_s22 = scalar_lea.vmem %s7933_s24, 16  ;;  %s7519_s23 = scalar_lea.vmem %s7933_s24, 32 }
  0x60   : > { %p7513_p10 = scmp.ne.s32.totalorder %s7933_s24, %s7512_s22  ;;  %p7520_p13 = scmp.lt.s32.totalorder %s7933_s24, %s7933_s24 }
  0x61   : > { %p7521_p0 = scmp.lt.s32.totalorder %s7519_s23, %s7512_s22 }
  0x62   : > { %p7515_p11 = pnand %p7513_p10, %p7943_p8 }
  0x63   : > { %p7522_p2 = por %p7521_p0, %p7520_p13 }
  0x64   : > { %p7516_p12 = pneg %p7515_p11 }
  0x66   : > { %p7523_p5 = pnand %p7522_p2, %p7516_p12 }
  0x68   : > { %7526 = shalt.err (!%p7523_p5)
}
  0x69   : > { %7315 = dma.hbm_to_vmem [thread:$0]  (!%p7929_p6), %s10457_s5, 16, %s7933_s24, [#allocation13]  }
  0x6a   : > { %s7822_s28 = smov [#allocation15]   ;;  %s7823_s30 = smov [#allocation11]  }
  0x6b   : > { %s353_s29 = sshll.u32 %s7822_s28, 4  ;;  %s318_s12 = sshll.u32 %s7823_s30, 4  ;;  %s354_s29 = int_to_ptr.vmem [resolvable:$true] %s353_s29  ;;  %s319_s12 = int_to_ptr.vmem [resolvable:$true] %s318_s12 }
  0x6c   : > { %s10458_s7 = sld [smem:[#allocation45_spill]] }
  0x72   : > { %s7527_s18 = scalar_lea.hbm %s10458_s7, 576 }
  0x73   : > { %p7528_p7 = scmp.ne.s32.totalorder %s10458_s7, %s7527_s18  ;;  %p7534_p1 = scmp.lt.u32.totalorder %s7527_s18, %s10458_s7 }
  0x75   : > { %p7530_p9 = pnand %p7528_p7, %p7943_p8 }
  0x77   : > { %p7531_p4 = pneg %p7530_p9 }
  0x79   : > { %p7536_p3 = pnand %p7534_p1, %p7531_p4 }
  0x7b   : > { %7539 = shalt.err (!%p7536_p3)
}
  0x7c   : > { %s7540_s24 = scalar_lea.vmem %s354_s29, 576  ;;  %p7548_p13 = scmp.lt.s32.totalorder %s354_s29, %s354_s29 }
  0x7d   : > { %p7541_p10 = scmp.ne.s32.totalorder %s354_s29, %s7540_s24  ;;  %p7549_p0 = scmp.lt.s32.totalorder %s7540_s24, %s7540_s24 }
  0x7f   : > { %p7543_p11 = pnand %p7541_p10, %p7943_p8  ;;  %p7550_p2 = por %p7549_p0, %p7548_p13 }
  0x81   : > { %p7544_p12 = pneg %p7543_p11 }
  0x83   : > { %p7551_p5 = pnand %p7550_p2, %p7544_p12 }
  0x85   : > { %7554 = shalt.err (!%p7551_p5)
}
  0x86   : > { %s10427_s27 = smov 64   ;;  %s10429_s28 = smov 4  }
  0x87   : > { %7321 = dma.hbm_to_vmem [thread:$0]  (!%p7929_p6), %s10458_s7, 576, %s354_s29, [#allocation16], %s10427_s27, %s10427_s27, %s10429_s28  }
  0x88   : > { %s10459_s4 = sld [smem:[#allocation42_spill]] }
  0x8e   : > { %s7555_s18 = scalar_lea.hbm %s10459_s4, 1152 }
  0x8f   : > { %p7556_p7 = scmp.ne.s32.totalorder %s10459_s4, %s7555_s18  ;;  %p7562_p1 = scmp.lt.u32.totalorder %s7555_s18, %s10459_s4 }
  0x91   : > { %p7558_p9 = pnand %p7556_p7, %p7943_p8 }
  0x93   : > { %p7559_p4 = pneg %p7558_p9 }
  0x95   : > { %p7564_p3 = pnand %p7562_p1, %p7559_p4 }
  0x97   : > { %7567 = shalt.err (!%p7564_p3)
}
  0x98   : > { %s7568_s2 = scalar_lea.vmem %s319_s12, 1152  ;;  %p7576_p13 = scmp.lt.s32.totalorder %s319_s12, %s319_s12 }
  0x99   : > { %p7569_p10 = scmp.ne.s32.totalorder %s319_s12, %s7568_s2  ;;  %p7577_p0 = scmp.lt.s32.totalorder %s7568_s2, %s7568_s2 }
  0x9b   : > { %p7571_p11 = pnand %p7569_p10, %p7943_p8  ;;  %p7578_p2 = por %p7577_p0, %p7576_p13 }
  0x9d   : > { %p7572_p12 = pneg %p7571_p11 }
  0x9f   : > { %p7579_p5 = pnand %p7578_p2, %p7572_p12 }
  0xa1   : > { %7582 = shalt.err (!%p7579_p5)
}
  0xa2   : > { %7312 = dma.hbm_to_vmem [thread:$0]  (!%p7929_p6), %s10459_s4, 1152, %s319_s12, [#allocation10], %s10427_s27, %s10427_s27, %s10429_s28  }
  0xa3   : > { %s7826_s17 = smov [#allocation14]   ;;  %s7827_s18 = smov [#allocation17]  }
  0xa4   : > { %s343_s21 = sshll.u32 %s7826_s17, 4  ;;  %s367_s22 = sshll.u32 %s7827_s18, 4  ;;  %s344_s21 = int_to_ptr.vmem [resolvable:$true] %s343_s21  ;;  %s368_s22 = int_to_ptr.vmem [resolvable:$true] %s367_s22 }
  0xa5   : > { %s10460_s6 = sld [smem:[#allocation44_spill]] }
  0xab   : > { %s7583_s24 = scalar_lea.hbm %s10460_s6, 16 }
  0xac   : > { %p7584_p7 = scmp.ne.s32.totalorder %s10460_s6, %s7583_s24  ;;  %p7590_p1 = scmp.lt.u32.totalorder %s7583_s24, %s10460_s6 }
  0xae   : > { %p7586_p9 = pnand %p7584_p7, %p7943_p8 }
  0xb0   : > { %p7587_p4 = pneg %p7586_p9 }
  0xb2   : > { %p7592_p3 = pnand %p7590_p1, %p7587_p4 }
  0xb4   : > { %7595 = shalt.err (!%p7592_p3)
}
  0xb5   : > { %s7596_s12 = scalar_lea.vmem %s344_s21, 16  ;;  %s7603_s30 = scalar_lea.vmem %s344_s21, 32 }
  0xb6   : > { %p7597_p10 = scmp.ne.s32.totalorder %s344_s21, %s7596_s12  ;;  %p7604_p13 = scmp.lt.s32.totalorder %s344_s21, %s344_s21 }
  0xb7   : > { %p7605_p0 = scmp.lt.s32.totalorder %s7603_s30, %s7596_s12 }
  0xb8   : > { %p7599_p11 = pnand %p7597_p10, %p7943_p8 }
  0xb9   : > { %p7606_p2 = por %p7605_p0, %p7604_p13 }
  0xba   : > { %p7600_p12 = pneg %p7599_p11 }
  0xbc   : > { %p7607_p5 = pnand %p7606_p2, %p7600_p12 }
  0xbe   : > { %7610 = shalt.err (!%p7607_p5)
}
  0xbf   : > { %7318 = dma.hbm_to_vmem [thread:$0]  (!%p7929_p6), %s10460_s6, 16, %s344_s21, [#allocation13]  }
  0xc0   : > { %s10461_s8 = sld [smem:[#allocation46_spill]] }
  0xc6   : > { %s7611_s23 = scalar_lea.hbm %s10461_s8, 16 }
  0xc7   : > { %p7612_p7 = scmp.ne.s32.totalorder %s10461_s8, %s7611_s23  ;;  %p7618_p1 = scmp.lt.u32.totalorder %s7611_s23, %s10461_s8 }
  0xc9   : > { %p7614_p9 = pnand %p7612_p7, %p7943_p8 }
  0xcb   : > { %p7615_p4 = pneg %p7614_p9 }
  0xcd   : > { %p7620_p3 = pnand %p7618_p1, %p7615_p4 }
  0xcf   : > { %7623 = shalt.err (!%p7620_p3)
}
  0xd0   : > { %s7624_s12 = scalar_lea.vmem %s368_s22, 16  ;;  %s7631_s21 = scalar_lea.vmem %s368_s22, 32 }
  0xd1   : > { %p7625_p10 = scmp.ne.s32.totalorder %s368_s22, %s7624_s12  ;;  %p7632_p13 = scmp.lt.s32.totalorder %s368_s22, %s368_s22 }
  0xd2   : > { %p7633_p0 = scmp.lt.s32.totalorder %s7631_s21, %s7624_s12 }
  0xd3   : > { %p7627_p11 = pnand %p7625_p10, %p7943_p8 }
  0xd4   : > { %p7634_p2 = por %p7633_p0, %p7632_p13 }
  0xd5   : > { %p7628_p12 = pneg %p7627_p11 }
  0xd7   : > { %p7635_p5 = pnand %p7634_p2, %p7628_p12 }
  0xd9   : > { %7638 = shalt.err (!%p7635_p5)
}
  0xda   : > { %7324 = dma.hbm_to_vmem [thread:$0]  (!%p7929_p6), %s10461_s8, 16, %s368_s22, [#allocation16]  }
  0xdb   : > { %s7828_s17 = smov [#allocation18]   ;;  %s7639_s26 = scalar_lea.hbm %s10423_s9, 16 }
  0xdc   : > { %s378_s5 = sshll.u32 %s7828_s17, 4  ;;  %p7640_p7 = scmp.ne.s32.totalorder %s10423_s9, %s7639_s26  ;;  %s379_s5 = int_to_ptr.vmem [resolvable:$true] %s378_s5 }
  0xdd   : > { %p7646_p1 = scmp.lt.u32.totalorder %s7639_s26, %s10423_s9 }
  0xde   : > { %p7642_p9 = pnand %p7640_p7, %p7943_p8 }
  0xe0   : > { %p7643_p4 = pneg %p7642_p9 }
  0xe2   : > { %p7648_p3 = pnand %p7646_p1, %p7643_p4 }
  0xe4   : > { %7651 = shalt.err (!%p7648_p3)
}
  0xe5   : > { %s7652_s22 = scalar_lea.vmem %s379_s5, 16  ;;  %s7659_s21 = scalar_lea.vmem %s379_s5, 32 }
  0xe6   : > { %p7653_p10 = scmp.ne.s32.totalorder %s379_s5, %s7652_s22  ;;  %p7660_p13 = scmp.lt.s32.totalorder %s379_s5, %s379_s5 }
  0xe7   : > { %p7661_p0 = scmp.lt.s32.totalorder %s7659_s21, %s7652_s22 }
  0xe8   : > { %p7655_p11 = pnand %p7653_p10, %p7943_p8 }
  0xe9   : > { %p7662_p2 = por %p7661_p0, %p7660_p13 }
  0xea   : > { %p7656_p12 = pneg %p7655_p11 }
  0xec   : > { %p7663_p5 = pnand %p7662_p2, %p7656_p12 }
  0xee   : > { %7666 = shalt.err (!%p7663_p5)
}
  0xef   : > { %7327 = dma.hbm_to_vmem [thread:$0]  (!%p7929_p6), %s10423_s9, 16, %s379_s5, [#allocation19]  }
  0xf0   : > { %s6106_s11 = sadd.s32 4294967294, %s7817_s16   ;;  %s8105_s25 = sadd.s32 1, %s7817_s16  }
  0xf1   : > { %s37_s17 = ssub.s32 %s7817_s16, %s8105_s25  ;;  %s40_s18 = sadd.s32 1, %s7813_s15 }
  0xf2   : > { %p38_p8 = scmp.eq.s32.totalorder %s37_s17, 0  ;;  %p47_p7 = scmp.ne.s32.totalorder %s7813_s15, %s7809_s14 }
  0xf3   : > { %p48_p9 = scmp.eq.s32.totalorder %s7817_s16, 0  ;;  %p53_p4 = scmp.ne.s32.totalorder %s7809_s14, %s7805_s13 }
  0xf4   : > { %s8116_s23 = scalar_select %p38_p8, %s7813_s15, %s40_s18  }
  0xf5   : > { %p8118_p1 = por %p48_p9, %p47_p7  ;;  %p10463_p3 = scmp.eq.s32.totalorder %s7913_s19, 0 }
  0xf6   : > { %p271_p10 = scmp.eq.s32.totalorder %s7913_s19, 1  ;;  %p277_p11 = scmp.eq.s32.totalorder %s6106_s11, 1 }
  0xf7   : > { %p8124_p6 = por %p10463_p3, %p53_p4  ;;  %p7347_p12 = scmp.lt.s32.totalorder %s7817_s16, 2 }
  0xf8   : > { %s8131_s24 = sand.u32 1, %s7813_s15   ;;  %p8133_p13 = por %p271_p10, %p47_p7 }
  0xf9   : > { %p8137_p0 = por %p277_p11, %p53_p4  ;;  %s6117_s12 = sshll.u32 %s8131_s24, 5 }
  0xfa   : > { %s10465_s2 = scalar_select %p8133_p13, 1, 0 }
  0xfb   : > { %s10466_s29 = scalar_select %p8137_p0, 1, 0 }
  0xfc   : > { %s6468_s22 = sshll.u32 %s7817_s16, 9  ;;  %s10467_s0 = sld [smem:[#allocation39_spill]] }
  0xfd   : > { %s393_s11 = scalar_lea.vmem [#allocation3], %s6117_s12  ;;  %p8152_p2 = pnand %p7347_p12, %p8118_p1 }
  0xfe   : > { %s400_s17 = sshll.u32 %s393_s11, 4  ;;  %s6120_s28 = sshll.u32 %s8131_s24, 6  ;;  %s8148_s17 = int_to_ptr.vmem [resolvable:$true] %s400_s17 }
  0xff   : > { %s390_s21 = scalar_lea.sflag [#allocation4], %s8131_s24  ;;  %p7669_p8 = pneg %p8152_p2 }
 0x102   : > { %s8146_s3 = scalar_lea.hbm %s10467_s0, %s6468_s22  ;;  %s7672_s26 = scalar_lea.hbm %s10467_s0, 1024 }
 0x103   : > { %s7667_s22 = scalar_lea.hbm %s8146_s3, 512  ;;  %p7673_p4 = scmp.lt.u32.totalorder %s8146_s3, %s10467_s0 }
 0x104   : > { %p7668_p5 = scmp.ne.s32.totalorder %s8146_s3, %s7667_s22  ;;  %p7674_p1 = scmp.lt.u32.totalorder %s7672_s26, %s7667_s22 }
 0x105   : > { %p7676_p10 = scmp.lt.u32.totalorder %s7667_s22, %s8146_s3 }
 0x106   : > { %p7670_p7 = pnand %p7669_p8, %p7668_p5  ;;  %p7675_p3 = por %p7674_p1, %p7673_p4 }
 0x108   : > { %p7671_p9 = pneg %p7670_p7  ;;  %p7677_p11 = por %p7676_p10, %p7675_p3 }
 0x10a   : > { %p7678_p12 = pnand %p7677_p11, %p7671_p9 }
 0x10c   : > { %7681 = shalt.err (!%p7678_p12)
}
 0x10d   : > { %s7682_s27 = scalar_lea.vmem %s8148_s17, 512  ;;  %s7829_s12 = smov [#allocation3]  }
 0x10e   : > { %p7683_p5 = scmp.ne.s32.totalorder %s8148_s17, %s7682_s27  ;;  %s7687_s30 = sshll.u32 %s7829_s12, 4  ;;  %s7688_s30 = int_to_ptr.vmem [resolvable:$false] %s7687_s30 }
 0x10f   : > { %s7689_s4 = scalar_lea.vmem %s7688_s30, 1024  ;;  %p7690_p13 = scmp.lt.s32.totalorder %s8148_s17, %s7688_s30 }
 0x110   : > { %p7685_p7 = pnand %p7683_p5, %p7669_p8  ;;  %p7691_p4 = scmp.lt.s32.totalorder %s7689_s4, %s7682_s27 }
 0x112   : > { %p7686_p0 = pneg %p7685_p7  ;;  %p7692_p1 = por %p7691_p4, %p7690_p13 }
 0x114   : > { %p7693_p3 = pnand %p7692_p1, %p7686_p0 }
 0x116   : > { %7696 = shalt.err (!%p7693_p3)
}
 0x117   : > { %s10469_s22 = smov 4   ;;  %s10470_s26 = smov 64  }
 0x118   : > { %7331 = dma.hbm_to_vmem [thread:$0]  (!%p8152_p2), %s8146_s3, 512, %s8148_s17, %s390_s21, %s10470_s26, %s10470_s26, %s10469_s22  }
 0x119   : > { %s6469_s11 = sshll.u32 %s7817_s16, 10  ;;  %s414_s4 = scalar_lea.vmem [#allocation6], %s6120_s28 }
 0x11a   : > { %s8193_s30 = scalar_lea.hbm %s10415_s1, %s6469_s11  ;;  %s421_s0 = sshll.u32 %s414_s4, 4  ;;  %s8197_s0 = int_to_ptr.vmem [resolvable:$true] %s421_s0 }
 0x11b   : > { %s10471_s6 = sand.u32 1, %s7817_s16   ;;  %s7697_s8 = scalar_lea.hbm %s8193_s30, 1024 }
 0x11c   : > { %s8201_s7 = scalar_lea.sflag [#allocation7], %s10471_s6  ;;  %p7698_p13 = scmp.ne.s32.totalorder %s8193_s30, %s7697_s8 }
 0x11d   : > { %s7702_s24 = scalar_lea.hbm %s10415_s1, 2048  ;;  %p7703_p10 = scmp.lt.u32.totalorder %s8193_s30, %s10415_s1 }
 0x11e   : > { %p7700_p0 = pnand %p7698_p13, %p7669_p8  ;;  %p7704_p11 = scmp.lt.u32.totalorder %s7702_s24, %s7697_s8 }
 0x11f   : > { %p7706_p5 = scmp.lt.u32.totalorder %s7697_s8, %s8193_s30 }
 0x120   : > { %p7701_p9 = pneg %p7700_p0  ;;  %p7705_p12 = por %p7704_p11, %p7703_p10 }
 0x122   : > { %p7707_p7 = por %p7706_p5, %p7705_p12 }
 0x124   : > { %p7708_p4 = pnand %p7707_p7, %p7701_p9 }
 0x126   : > { %7711 = shalt.err (!%p7708_p4)
}
 0x127   : > { %s7712_s6 = scalar_lea.vmem %s8197_s0, 1024  ;;  %s7830_s28 = smov [#allocation6]  }
 0x128   : > { %p7713_p1 = scmp.ne.s32.totalorder %s8197_s0, %s7712_s6  ;;  %s7717_s12 = sshll.u32 %s7830_s28, 4  ;;  %s7718_s12 = int_to_ptr.vmem [resolvable:$false] %s7717_s12 }
 0x129   : > { %s7719_s27 = scalar_lea.vmem %s7718_s12, 2048  ;;  %p7720_p0 = scmp.lt.s32.totalorder %s8197_s0, %s7718_s12 }
 0x12a   : > { %p7715_p3 = pnand %p7713_p1, %p7669_p8  ;;  %p7721_p10 = scmp.lt.s32.totalorder %s7719_s27, %s7712_s6 }
 0x12c   : > { %p7716_p13 = pneg %p7715_p3  ;;  %p7722_p11 = por %p7721_p10, %p7720_p0 }
 0x12e   : > { %p7723_p12 = pnand %p7722_p11, %p7716_p13 }
 0x130   : > { %7726 = shalt.err (!%p7723_p12)
}
 0x131   : > { %7334 = dma.hbm_to_vmem [thread:$0]  (!%p8152_p2), %s8193_s30, 1024, %s8197_s0, %s8201_s7, %s10470_s26, %s10470_s26, %s10469_s22  }
 0x132   : > { %p10472_p8 = scmp.ne.s32.totalorder %s10452_s20, 0 }
 0x134   : > { %433 = sbr.rel (%p10472_p8) target bundleno = 1886 (0x75e), region = 60 }
 0x13b   : > { %s8233_s8 = sand.u32 1, %s7809_s14  }
 0x13c   : > { %s6124_s4 = sshll.u32 %s8233_s8, 5  ;;  %s436_s3 = scalar_lea.sflag [#allocation4], %s8233_s8 }
 0x13d   : > { %s8237_s17 = scalar_lea.vmem [#allocation3], %s6124_s4 }
 0x13e   : > { %7772 = dma.done.wait (%p8124_p6), %s436_s3, 512  }
 0x13f   : > { %7774 = vsyncadd (%p8124_p6), %s436_s3, 4294966784  ;;  %s444_s0 = sand.u32 1, %s7913_s19   ;;  %s6125_s7 = sshll.u32 %s8233_s8, 6 }
 0x140   : > { %s445_s20 = scalar_lea.sflag [#allocation7], %s444_s0  ;;  %s8247_s18 = scalar_lea.vmem [#allocation6], %s6125_s7 }
 0x141   : > { %7776 = dma.done.wait (%p8124_p6), %s445_s20, 1024  }
 0x142   : > { %7778 = vsyncadd (%p8124_p6), %s445_s20, 4294966272  ;;  %p10473_p2 = scmp.eq.s32.totalorder %s7913_s19, 0 }
 0x144   : > { %7780 = dma.done.wait (%p10473_p2), [#allocation7], 64   ;;  %p10474_p9 = pmov %p10473_p2 }
 0x145   : > { %p10475_p5 = pmov %p10473_p2 }
 0x146   : > { %7782 = vsyncadd (%p10474_p9), [#allocation7], 4294967232 }
 0x147   : > { %7784 = dma.done.wait (%p10475_p5), [#allocation10], 1168   ;;  %p10476_p7 = pmov %p10473_p2 }
 0x148   : > { %p10477_p4 = pmov %p10473_p2 }
 0x149   : > { %7786 = vsyncadd (%p10476_p7), [#allocation10], 4294966128 }
 0x14a   : > { %7788 = dma.done.wait (%p10477_p4), [#allocation13], 32   ;;  %p10478_p1 = pmov %p10473_p2 }
 0x14c   : > { %7790 = vsyncadd (%p10478_p1), [#allocation13], 4294967264  ;;  %p10479_p6 = pmov %p10478_p1 }
 0x14d   : > { %p10480_p3 = pmov %p10478_p1 }
 0x14e   : > { %7792 = dma.done.wait (%p10479_p6), [#allocation16], 592  }
 0x14f   : > { %7794 = vsyncadd (%p10480_p3), [#allocation16], 4294966704  ;;  %p10481_p13 = pmov %p10478_p1 }
 0x150   : > { %p10482_p0 = pmov %p10478_p1 }
 0x151   : > { %7796 = dma.done.wait (%p10481_p13), [#allocation19], 16  }
 0x152   : > { %7798 = vsyncadd (%p10482_p0), [#allocation19], 4294967280  ;;  %vm692_vm0 = vcmask 1043456   ;;  %vm679_vm1 = vcmask 64512   ;;  %v651_v0 = vld [vmem:[#allocation8] sm:$0xf] }
 0x153   : > { %7254 = vmatprep.subr.msk.bf16.mxu0 %vm692_vm0, %v651_v0  ;;  %v694_v1 = vsel %vm692_vm0, %v651_v0, 0  ;;  %7255 = vmatprep.subr.msk.bf16.mxu1 %vm692_vm0, %v651_v0  ;;  %v7404_v2 = vld [vmem:[%s8237_s17] sm:$0xff]   ;;  %v7405_v3 = vld [vmem:[%s8237_s17 + $0x8] sm:$0xff]   ;;  %v7406_v4 = vld [vmem:[%s8237_s17 + $0x10] sm:$0xff]   ;;  %vm525_vm2 = vcmask 122880   ;;  %vm962_vm7 = vcmask 27648  }
 0x154   : > { %6663 = vmatpush3.bf16.msra.mxu0 %v694_v1  ;;  %6997 = vmatpush3.bf16.msra.mxu1 %v694_v1  ;;  %v7407_v5 = vld [vmem:[%s8237_s17 + $0x18] sm:$0xff]   ;;  %vm531_vm3 = vsmask.f32 256  ;;  %vm587_vm4 = vsmask.f32 7938  ;;  %vm967_vm8 = vcmask 24576  }
 0x155   : > { %6664 = vmatprep.mubr.msk.bf16.mxu0 %vm679_vm1, %v7404_v2  ;;  %6668 = vmatprep.mubr.msk.bf16.mxu1 %vm679_vm1, %v7406_v4  ;;  %vm8286_vm5 = vmand %vm525_vm2, %vm531_vm3  ;;  %v548_v7 = vld [vmem:[#allocation2 + $0x28] sm:$0x1]  ;;  %v554_v11 = vld [vmem:[#allocation2 + $0x38] sm:$0x1]  ;;  %s7831_s5 = smov 120   ;;  %s7832_s22 = smov 4  }
 0x156   : > { %v549_v8 = vsel %vm8286_vm5, 0, %v548_v7  ;;  %v536_v9 = vld [vmem:[#allocation2 + $0x8] sm:$0x1]  ;;  %vm8296_vm6 = vmand %vm525_vm2, %vm587_vm4  ;;  %v555_v13 = vsel %vm8286_vm5, 0, %v554_v11  ;;  %v542_v14 = vld [vmem:[#allocation2 + $0x18] sm:$0x1] }
 0x157   : > { %6665 = vmatmul.mubr.msk.bf16.vlgmr.msra.gmra.mrb[0].mxu0 %vm679_vm1, %v7405_v3  ;;  %6669 = vmatmul.mubr.msk.bf16.vlgmr.msra.gmra.mrb[0].mxu1 %vm679_vm1, %v7407_v5  ;;  %550 = vst [vmem:[#allocation2 + $0x28] sm:$0x1] %v549_v8  ;;  %v537_v10 = vsel %vm8286_vm5, 0, %v536_v9  ;;  %556 = vst [vmem:[#allocation2 + $0x38] sm:$0x1] %v555_v13  ;;  %v543_v16 = vsel %vm8286_vm5, 0, %v542_v14 }
 0x158   : > { %538 = vst [vmem:[#allocation2 + $0x8] sm:$0x1] %v537_v10  ;;  %v592_v15 = vld [vmem:[#allocation2 + $0xc] sm:$0x1]  ;;  %v572_v19 = vld [vmem:[#allocation2 + $0x68] sm:$0x1]  ;;  %vm8405_vm9 = vmand %vm962_vm7, %vm587_vm4 }
 0x159   : > { %v593_v17 = vsel %vm8296_vm6, 0, %v592_v15  ;;  %v604_v18 = vld [vmem:[#allocation2 + $0x2c] sm:$0x1]  ;;  %v560_v20 = vld [vmem:[#allocation2 + $0x48] sm:$0x1]  ;;  %v573_v22 = vsel %vm8286_vm5, 0, %v572_v19  ;;  %vm8445_vm10 = vmand %vm967_vm8, %vm531_vm3 }
 0x15a   : > { %v578_v21 = vld [vmem:[#allocation2 + $0x78] sm:$0x1]  ;;  %544 = vst [vmem:[#allocation2 + $0x18] sm:$0x1] %v543_v16  ;;  %594 = vst [vmem:[#allocation2 + $0xc] sm:$0x1] %v593_v17 }
 0x15b   : > { %v561_v23 = vsel %vm8286_vm5, 0, %v560_v20  ;;  %v579_v24 = vsel %vm8286_vm5, 0, %v578_v21  ;;  %v566_v25 = vld [vmem:[#allocation2 + $0x58] sm:$0x1]  ;;  %v605_v26 = vsel %vm8296_vm6, 0, %v604_v18  ;;  %s7833_s26 = smov 8  }
 0x15c   : > { %574 = vst [vmem:[#allocation2 + $0x68] sm:$0x1] %v573_v22  ;;  %562 = vst [vmem:[#allocation2 + $0x48] sm:$0x1] %v561_v23  ;;  %v567_v27 = vsel %vm8286_vm5, 0, %v566_v25  ;;  %vm523_vm11 = vcmask 125952  }
 0x15d   : > { %580 = vst [vmem:[#allocation2 + $0x78] sm:$0x1] %v579_v24  ;;  %v598_v28 = vld [vmem:[#allocation2 + $0x1c] sm:$0x1]  ;;  %606 = vst [vmem:[#allocation2 + $0x2c] sm:$0x1] %v605_v26 }
 0x15e   : > { %v610_v29 = vld [vmem:[#allocation2 + $0x3c] sm:$0x1]  ;;  %568 = vst [vmem:[#allocation2 + $0x58] sm:$0x1] %v567_v27  ;;  %v599_v30 = vsel %vm8296_vm6, 0, %v598_v28  ;;  %vm1158_vm12 = vcmask 93248  }
 0x15f   : > { %v611_v31 = vsel %vm8296_vm6, 0, %v610_v29  ;;  %600 = vst [vmem:[#allocation2 + $0x1c] sm:$0x1] %v599_v30  ;;  %v628_v32 = vld [vmem:[#allocation2 + $0x6c] sm:$0x1]  ;;  %vm8799_vm13 = vmand %vm1158_vm12, %vm587_vm4  ;;  %vm1498_vm14 = vcmask 60448  }
 0x160   : > { %612 = vst [vmem:[#allocation2 + $0x3c] sm:$0x1] %v611_v31  ;;  %v629_v33 = vsel %vm8296_vm6, 0, %v628_v32  ;;  %v634_v34 = vld [vmem:[#allocation2 + $0x7c] sm:$0x1]  ;;  %vm8825_vm15 = vmand %vm1498_vm14, %vm587_vm4  ;;  %vm1843_vm12 = vcmask 122976  }
 0x161   : > { %630 = vst [vmem:[#allocation2 + $0x6c] sm:$0x1] %v629_v33  ;;  %v635_v35 = vsel %vm8296_vm6, 0, %v634_v34  ;;  %v616_v36 = vld [vmem:[#allocation2 + $0x4c] sm:$0x1]  ;;  %s10304_s30 = scalar_lea.vmem [#allocation20], %s6125_s7 }
 0x162   : > { %636 = vst [vmem:[#allocation2 + $0x7c] sm:$0x1] %v635_v35  ;;  %v622_v37 = vld [vmem:[#allocation2 + $0x5c] sm:$0x1]  ;;  %v617_v38 = vsel %vm8296_vm6, 0, %v616_v36  ;;  %s6494_s24 = sshll.u32 %s7913_s19, 10 }
 0x163   : > { %618 = vst [vmem:[#allocation2 + $0x4c] sm:$0x1] %v617_v38  ;;  %v623_v39 = vsel %vm8296_vm6, 0, %v622_v37  ;;  %v1259_v40 = vld [vmem:[%s8247_s18 + $0x4] sm:$0xf]  ;;  %s5934_s21 = sshll.u32 %s10304_s30, 4  ;;  %s10361_s28 = scalar_lea.hbm %s10424_s10, %s6494_s24  ;;  %s10365_s21 = int_to_ptr.vmem [resolvable:$true] %s5934_s21 }
 0x164   : > { %624 = vst [vmem:[#allocation2 + $0x5c] sm:$0x1] %v623_v39  ;;  %v1258_v41 = vld [vmem:[%s8247_s18] sm:$0xf]  ;;  %v1283_v42 = vshrl.u32 %v1259_v40, 16  ;;  %v1286_v48 = vshll.u32 %v1259_v40, 16 }
 0x165   : > { %v1275_v43 = vshrl.u32 %v1258_v41, 16  ;;  %v1260_v44 = vld [vmem:[%s8247_s18 + $0x8] sm:$0xf]  ;;  %v551_v46 = vld [vmem:[#allocation2 + $0x30] sm:$0x1]  ;;  %v1278_v54 = vshll.u32 %v1258_v41, 16 }
 0x166   : > { %v1291_v45 = vshrl.u32 %v1260_v44, 16  ;;  %v8331_v47 = vrot.slane %v1283_v42, 7  ;;  %v552_v50 = vsel %vm8286_vm5, 0, %v551_v46  ;;  %v8338_v51 = vld [vmem:[%s8247_s18 + $0x10] sm:$0xf]  ;;  %v1294_v59 = vshll.u32 %v1260_v44, 16 }
 0x167   : > { %v8333_v49 = vrot.slane %v1275_v43, 7  ;;  %v8341_v52 = vld [vmem:[%s8247_s18 + $0xc] sm:$0xf]  ;;  %553 = vst [vmem:[#allocation2 + $0x30] sm:$0x1] %v552_v50  ;;  %v1307_v63 = vshrl.u32 %v8338_v51, 16 }
 0x168   : > { %v607_v53 = vld [vmem:[#allocation2 + $0x34] sm:$0x1]  ;;  %v539_v55 = vld [vmem:[#allocation2 + $0x10] sm:$0x1]  ;;  %v8345_v58 = vrot.slane %v1291_v45, 7  ;;  %v1299_v0 = vshrl.u32 %v8341_v52, 16  ;;  %v8359_v2 = vor.u32 %v1286_v48, %v8331_v47 }
 0x169   : > { %v595_v56 = vld [vmem:[#allocation2 + $0x14] sm:$0x1]  ;;  %v608_v57 = vsel %vm8296_vm6, 0, %v607_v53  ;;  %v540_v60 = vsel %vm8286_vm5, 0, %v539_v55  ;;  %v8356_v1 = vld [vmem:[%s8247_s18 + $0x14] sm:$0xf]  ;;  %v8362_v8 = vor.u32 %v1278_v54, %v8333_v49 }
 0x16a   : > { %v596_v61 = vsel %vm8296_vm6, 0, %v595_v56  ;;  %609 = vst [vmem:[#allocation2 + $0x34] sm:$0x1] %v608_v57  ;;  %v8351_v62 = vld [vmem:[#allocation9] ss:$0 sm:$0xff]  ;;  %v8372_v17 = vor.u32 %v1294_v59, %v8345_v58  ;;  %v1302_v18 = vshll.u32 %v8341_v52, 16 }
 0x16b   : > { %541 = vst [vmem:[#allocation2 + $0x10] sm:$0x1] %v540_v60  ;;  %597 = vst [vmem:[#allocation2 + $0x14] sm:$0x1] %v596_v61  ;;  %v637_v3 = vld [vmem:[#allocation2 + $0x84] sm:$0x1] }
 0x16c   : > { %v613_v4 = vld [vmem:[#allocation2 + $0x44] sm:$0x1]  ;;  %v557_v5 = vld [vmem:[#allocation2 + $0x40] sm:$0x1]  ;;  %v638_v9 = vsel %vm8296_vm6, 0, %v637_v3  ;;  %v8379_v25 = vrot.slane %v1299_v0, 7 }
 0x16d   : > { %v614_v10 = vsel %vm8296_vm6, 0, %v613_v4  ;;  %v558_v11 = vsel %vm8286_vm5, 0, %v557_v5  ;;  %v545_v13 = vld [vmem:[#allocation2 + $0x20] sm:$0x1]  ;;  %639 = vst [vmem:[#allocation2 + $0x84] sm:$0x1] %v638_v9 }
 0x16e   : > { %615 = vst [vmem:[#allocation2 + $0x44] sm:$0x1] %v614_v10  ;;  %559 = vst [vmem:[#allocation2 + $0x40] sm:$0x1] %v558_v11  ;;  %v546_v19 = vsel %vm8286_vm5, 0, %v545_v13  ;;  %v1315_v32 = vshrl.u32 %v8356_v1, 16 }
 0x16f   : > { %v601_v20 = vld [vmem:[#allocation2 + $0x24] sm:$0x1]  ;;  %547 = vst [vmem:[#allocation2 + $0x20] sm:$0x1] %v546_v19  ;;  %v990_v59 = vld [vmem:[#allocation2 + $0x28] sm:$0xf] }
 0x170   : > { %v602_v26 = vsel %vm8296_vm6, 0, %v601_v20  ;;  %v964_v4 = vld [vmem:[#allocation2 + $0x8] sm:$0xf]  ;;  %v1002_v20 = vld [vmem:[#allocation2 + $0x38] sm:$0xf]  ;;  %s5921_s19 = scalar_lea.sflag [#allocation5], %s8233_s8 }
 0x171   : > { %603 = vst [vmem:[#allocation2 + $0x24] sm:$0x1] %v602_v26  ;;  %v1014_v19 = vld [vmem:[#allocation2 + $0x48] sm:$0xf]  ;;  %vm2429_vm14 = vsmask.f32 7440 }
 0x172   : > { %s7727_s12 = scalar_lea.vmem %s10365_s21, 1024  ;;  %p10544_p11 = scmp.ne.s32.totalorder %s10465_s2, 0 }
 0x173   : > { %p7728_p10 = scmp.ne.s32.totalorder %s10365_s21, %s7727_s12  ;;  %s7835_s27 = smov [#allocation20]  }
 0x174   : > { %s7731_s4 = sshll.u32 %s7835_s27, 4  ;;  %s7732_s4 = int_to_ptr.vmem [resolvable:$false] %s7731_s4 }
 0x175   : > { %p7729_p12 = pnand %p7728_p10, %p10544_p11  ;;  %s7733_s3 = scalar_lea.vmem %s7732_s4, 2048 }
 0x176   : > { %p7734_p2 = scmp.lt.s32.totalorder %s10365_s21, %s7732_s4  ;;  %p7735_p9 = scmp.lt.s32.totalorder %s7733_s3, %s7727_s12 }
 0x177   : > { %p7730_p8 = pneg %p7729_p12 }
 0x178   : > { %p7736_p5 = por %p7735_p9, %p7734_p2 }
 0x17a   : > { %p7737_p7 = pnand %p7736_p5, %p7730_p8 }
 0x22a   : > { %v6666_v7 = vpop.f32.mrb[0].mxu0  ;;  %v6670_v16 = vpop.f32.mrb[0].mxu1 }
 0x22b   : > { %v739_v14 = vadd.f32 %v6666_v7, %v8351_v62  ;;  %v730_v15 = vpop.f32.mrb[1].mxu0  ;;  %v755_v23 = vadd.f32 %v6670_v16, %v8351_v62  ;;  %v746_v24 = vpop.f32.mrb[1].mxu1 }
 0x22c   : > { %v731_v21 = vadd.f32 %v8351_v62, %v730_v15  ;;  %v6667_v22 = vpop.f32.mrb[2].mxu0  ;;  %v747_v30 = vadd.f32 %v8351_v62, %v746_v24  ;;  %v6671_v31 = vpop.f32.mrb[2].mxu1  ;;  %v1050_v24 = vld [vmem:[#allocation2 + $0x78] sm:$0xf] }
 0x22d   : > { %v6472_v27 = vpack.c.bf16 %v739_v14, %v739_v14  ;;  %v742_v28 = vadd.f32 %v6667_v22, %v8351_v62  ;;  %v733_v29 = vpop.f32.mrb[3].mxu0  ;;  %v8387_v35 = vpack.c.bf16 %v755_v23, %v755_v23  ;;  %v758_v36 = vadd.f32 %v6671_v31, %v8351_v62  ;;  %v749_v37 = vpop.f32.mrb[3].mxu1 }
 0x22e   : > { %v6470_v33 = vpack.c.bf16 %v731_v21, %v731_v21  ;;  %v734_v34 = vadd.f32 %v8351_v62, %v733_v29  ;;  %v6474_v41 = vpack.c.bf16 %v747_v30, %v747_v30  ;;  %v750_v60 = vadd.f32 %v8351_v62, %v749_v37  ;;  %v1038_v62 = vld [vmem:[#allocation2 + $0x68] sm:$0xf]  ;;  %v575_v37 = vld [vmem:[#allocation2 + $0x70] sm:$0x1] }
 0x22f   : > { %v834_v38 = vshrl.u32 %v6472_v27, 16  ;;  %v837_v39 = vshll.u32 %v6472_v27, 16  ;;  %v6473_v40 = vpack.c.bf16 %v742_v28, %v742_v28  ;;  %789 = vrot.lane.b32.xlu1 %v6472_v27, %s7831_s5  ;;  %v898_v45 = vshrl.u32 %v8387_v35, 16  ;;  %v978_v27 = vld [vmem:[#allocation2 + $0x18] sm:$0xf] }
 0x230   : > { %v802_v42 = vshrl.u32 %v6470_v33, 16  ;;  %v805_v43 = vshll.u32 %v6470_v33, 16  ;;  %v6471_v44 = vpack.c.bf16 %v734_v34, %v734_v34  ;;  %785 = vrot.lane.b32.xlu0 %v6470_v33, %s7831_s5  ;;  %v901_v50 = vshll.u32 %v8387_v35, 16  ;;  %v969_v28 = vld [vmem:[#allocation2 + $0xc] sm:$0x1] }
 0x231   : > { %v850_v46 = vshrl.u32 %v6473_v40, 16  ;;  %v853_v48 = vshll.u32 %v6473_v40, 16  ;;  %v866_v53 = vshrl.u32 %v6474_v41, 16  ;;  %v869_v56 = vshll.u32 %v6474_v41, 16 }
 0x232   : > { %v818_v54 = vshrl.u32 %v6471_v44, 16  ;;  %v821_v55 = vshll.u32 %v6471_v44, 16  ;;  %v6477_v57 = vpack.c.bf16 %v758_v36, %v758_v36  ;;  %v8396_v61 = vrot.slane %v834_v38, 7  ;;  %v993_v36 = vld [vmem:[#allocation2 + $0x2c] sm:$0x1] }
 0x233   : > { %791 = vrot.lane.b32.xlu1 %v6473_v40, %s7831_s5  ;;  %v8398_v0 = vrot.slane %v898_v45, 7  ;;  %v8400_v3 = vrot.slane %v802_v42, 7  ;;  %v8409_v10 = vrot.slane %v866_v53, 7  ;;  %v8411_v11 = vrot.slane %v850_v46, 7  ;;  %v619_v45 = vld [vmem:[#allocation2 + $0x54] sm:$0x1] }
 0x234   : > { %v914_v5 = vshrl.u32 %v6477_v57, 16  ;;  %v917_v7 = vshll.u32 %v6477_v57, 16  ;;  %787 = vrot.lane.b32.xlu0 %v6471_v44, %s7831_s5  ;;  %v8413_v13 = vpack.c.bf16 %v750_v60, %v750_v60  ;;  %v8416_v14 = vor.u32 %v837_v39, %v8396_v61  ;;  %v981_v44 = vld [vmem:[#allocation2 + $0x1c] sm:$0x1] }
 0x235   : > { %v8419_v15 = vor.u32 %v901_v50, %v8398_v0  ;;  %v8422_v16 = vor.u32 %v805_v43, %v8400_v3  ;;  %v8425_v21 = vor.u32 %v869_v56, %v8409_v10  ;;  %v8428_v22 = vor.u32 %v853_v48, %v8411_v11  ;;  %v1026_v43 = vld [vmem:[#allocation2 + $0x58] sm:$0xf] }
 0x236   : > { %v8430_v23 = vrot.slane %v914_v5, 7  ;;  %v8432_v26 = vrot.slane %v818_v54, 7  ;;  %v882_v29 = vshrl.u32 %v8413_v13, 16  ;;  %v885_v30 = vshll.u32 %v8413_v13, 16  ;;  %v569_v54 = vld [vmem:[#allocation2 + $0x60] sm:$0x1] }
 0x237   : > { %799 = vrot.lane.b32.xlu1 %v6477_v57, %s7831_s5  ;;  %v991_v31 = vsel %vm8405_vm9, %v8416_v14, %v990_v59  ;;  %v1039_v33 = vsel %vm8405_vm9, %v8419_v15, %v1038_v62  ;;  %v965_v38 = vsel %vm8405_vm9, %v8422_v16, %v964_v4  ;;  %v1015_v39 = vsel %vm8405_vm9, %v8425_v21, %v1014_v19  ;;  %v8479_v4 = vld [vmem:[%s8247_s18 + $0x18] sm:$0xf]  ;;  %v581_v19 = vld [vmem:[#allocation2 + $0x80] sm:$0x1] }
 0x238   : > { %793 = vrot.lane.b32.xlu0 %v6474_v41, %s7831_s5  ;;  %992 = vst [vmem:[#allocation2 + $0x28] sm:$0xf] %v991_v31  ;;  %1040 = vst [vmem:[#allocation2 + $0x68] sm:$0xf] %v1039_v33  ;;  %v1003_v40 = vsel %vm8405_vm9, %v8428_v22, %v1002_v20  ;;  %v8460_v42 = vor.u32 %v917_v7, %v8430_v23  ;;  %v1005_v41 = vld [vmem:[#allocation2 + $0x3c] sm:$0x1]  ;;  %v8463_v46 = vor.u32 %v821_v55, %v8432_v26 }
 0x239   : > { %966 = vst [vmem:[#allocation2 + $0x8] sm:$0xf] %v965_v38  ;;  %1016 = vst [vmem:[#allocation2 + $0x48] sm:$0xf] %v1015_v39  ;;  %v8465_v48 = vrot.slane %v882_v29, 7  ;;  %v808_v50 = vrot.slane %v8400_v3, 4 }
 0x23a   : > { %1004 = vst [vmem:[#allocation2 + $0x38] sm:$0xf] %v1003_v40  ;;  %v824_v53 = vrot.slane %v8432_v26, 4  ;;  %v1051_v56 = vsel %vm8405_vm9, %v8460_v42, %v1050_v24  ;;  %v840_v57 = vrot.slane %v8396_v61, 4  ;;  %v856_v59 = vrot.slane %v8411_v11, 4 }
 0x23b   : > { %v576_v60 = vsel %vm8286_vm5, 0, %v575_v37  ;;  %v563_v55 = vld [vmem:[#allocation2 + $0x50] sm:$0x1]  ;;  %1406 = vrot.lane.b32.xlu1 %v8359_v2, %s7832_s22  ;;  %1052 = vst [vmem:[#allocation2 + $0x78] sm:$0xf] %v1051_v56  ;;  %v979_v5 = vsel %vm8405_vm9, %v8463_v46, %v978_v27  ;;  %v8485_v7 = vor.u32 %v885_v30, %v8465_v48  ;;  %v970_v62 = vsel %vm8445_vm10, %v808_v50, %v969_v28 }
 0x23c   : > { %v982_v2 = vsel %vm8445_vm10, %v824_v53, %v981_v44  ;;  %577 = vst [vmem:[#allocation2 + $0x70] sm:$0x1] %v576_v60  ;;  %v1041_v20 = vld [vmem:[#allocation2 + $0x6c] sm:$0x1]  ;;  %v1053_v24 = vld [vmem:[#allocation2 + $0x7c] sm:$0x1]  ;;  %797 = vrot.lane.b32.xlu0 %v8387_v35, %s7831_s5  ;;  %v994_v28 = vsel %vm8445_vm10, %v840_v57, %v993_v36  ;;  %v1006_v30 = vsel %vm8445_vm10, %v856_v59, %v1005_v41 }
 0x23d   : > { %v1310_v27 = vshll.u32 %v8338_v51, 16  ;;  %980 = vst [vmem:[#allocation2 + $0x18] sm:$0xf] %v979_v5  ;;  %v1265_v29 = vld [vmem:[%s8247_s18 + $0x1c] sm:$0xf]  ;;  %v570_v31 = vsel %vm8286_vm5, 0, %v569_v54  ;;  %v1027_v33 = vsel %vm8405_vm9, %v8485_v7, %v1026_v43  ;;  %v1304_v37 = vor.u32 %v1302_v18, %v8379_v25 }
 0x23e   : > { %971 = vst [vmem:[#allocation2 + $0xc] sm:$0x1] %v970_v62  ;;  %983 = vst [vmem:[#allocation2 + $0x1c] sm:$0x1] %v982_v2  ;;  %v1017_v35 = vld [vmem:[#allocation2 + $0x4c] sm:$0x1] }
 0x23f   : > { %995 = vst [vmem:[#allocation2 + $0x2c] sm:$0x1] %v994_v28  ;;  %1007 = vst [vmem:[#allocation2 + $0x3c] sm:$0x1] %v1006_v30  ;;  %v620_v36 = vsel %vm8296_vm6, 0, %v619_v45  ;;  %v564_v38 = vsel %vm8286_vm5, 0, %v563_v55  ;;  %795 = vrot.lane.b32.xlu1 %v8413_v13, %s7831_s5 }
 0x240   : > { %571 = vst [vmem:[#allocation2 + $0x60] sm:$0x1] %v570_v31  ;;  %v1029_v39 = vld [vmem:[#allocation2 + $0x5c] sm:$0x1]  ;;  %v631_v40 = vld [vmem:[#allocation2 + $0x74] sm:$0x1]  ;;  %1402 = vrot.lane.b32.xlu0 %v8362_v8, %s7832_s22 }
 0x241   : > { %1028 = vst [vmem:[#allocation2 + $0x58] sm:$0xf] %v1027_v33  ;;  %v1318_v44 = vshll.u32 %v8356_v1, 16  ;;  %621 = vst [vmem:[#allocation2 + $0x54] sm:$0x1] %v620_v36  ;;  %v582_v52 = vsel %vm8286_vm5, 0, %v581_v19 }
 0x242   : > { %565 = vst [vmem:[#allocation2 + $0x50] sm:$0x1] %v564_v38  ;;  %v904_v18 = vrot.slane %v8398_v0, 4  ;;  %v920_v43 = vrot.slane %v8430_v23, 4  ;;  %v625_v41 = vld [vmem:[#allocation2 + $0x64] sm:$0x1] }
 0x243   : > { %v8528_v45 = vrot.slane %v1315_v32, 7  ;;  %v1331_v54 = vshrl.u32 %v1265_v29, 16  ;;  %583 = vst [vmem:[#allocation2 + $0x80] sm:$0x1] %v582_v52  ;;  %v872_v56 = vrot.slane %v8409_v10, 4  ;;  %v888_v60 = vrot.slane %v8465_v48, 4  ;;  %1414 = vrot.lane.b32.xlu1 %v1304_v37, %s7832_s22 }
 0x244   : > { %v8536_v55 = vrot.slane %v1307_v63, 7  ;;  %v1323_v5 = vshrl.u32 %v8479_v4, 16  ;;  %v1599_v13 = vld [vmem:[%s8247_s18 + $0x4] sm:$0xf]  ;;  %v1042_v1 = vsel %vm8445_vm10, %v904_v18, %v1041_v20  ;;  %v1054_v32 = vsel %vm8445_vm10, %v920_v43, %v1053_v24  ;;  %v1598_v62 = vld [vmem:[%s8247_s18] sm:$0xf]  ;;  %1410 = vrot.lane.b32.xlu0 %v8372_v17, %s7832_s22 }
 0x245   : > { %1043 = vst [vmem:[#allocation2 + $0x6c] sm:$0x1] %v1042_v1  ;;  %1055 = vst [vmem:[#allocation2 + $0x7c] sm:$0x1] %v1054_v32  ;;  %v1018_v51 = vsel %vm8445_vm10, %v872_v56, %v1017_v35  ;;  %v1030_v63 = vsel %vm8445_vm10, %v888_v60, %v1029_v39  ;;  %v632_v8 = vsel %vm8296_vm6, 0, %v631_v40  ;;  %v626_v2 = vsel %vm8296_vm6, 0, %v625_v41 }
 0x246   : > { %1019 = vst [vmem:[#allocation2 + $0x4c] sm:$0x1] %v1018_v51  ;;  %1031 = vst [vmem:[#allocation2 + $0x5c] sm:$0x1] %v1030_v63  ;;  %v1320_v19 = vor.u32 %v1318_v44, %v8528_v45  ;;  %v8563_v20 = vrot.slane %v1331_v54, 7  ;;  %v1334_v24 = vshll.u32 %v1265_v29, 16  ;;  %v1312_v30 = vor.u32 %v1310_v27, %v8536_v55 }
 0x247   : > { %633 = vst [vmem:[#allocation2 + $0x74] sm:$0x1] %v632_v8  ;;  %627 = vst [vmem:[#allocation2 + $0x64] sm:$0x1] %v626_v2  ;;  %v1623_v28 = vshrl.u32 %v1599_v13, 16  ;;  %v8568_v31 = vrot.slane %v1323_v5, 7 }
 0x248   : > { %v1326_v35 = vshll.u32 %v8479_v4, 16  ;;  %v1615_v33 = vshrl.u32 %v1598_v62, 16  ;;  %v1601_v36 = vld [vmem:[%s8247_s18 + $0xc] sm:$0xf]  ;;  %v1600_v38 = vld [vmem:[%s8247_s18 + $0x8] sm:$0xf]  ;;  %1422 = vrot.lane.b32.xlu1 %v1320_v19, %s7832_s22  ;;  %v1336_v37 = vor.u32 %v1334_v24, %v8563_v20  ;;  %1418 = vrot.lane.b32.xlu0 %v1312_v30, %s7832_s22 }
 0x249   : > { %v8575_v39 = vrot.slane %v1623_v28, 7  ;;  %v1626_v29 = vshll.u32 %v1599_v13, 16  ;;  %v1639_v40 = vshrl.u32 %v1601_v36, 16  ;;  %v1618_v44 = vshll.u32 %v1598_v62, 16  ;;  %v1268_v2 = vld [vmem:[%s8247_s18 + $0x28] sm:$0xf] }
 0x24a   : > { %v1328_v17 = vor.u32 %v1326_v35, %v8568_v31  ;;  %v8579_v27 = vrot.slane %v1615_v33, 7  ;;  %v1631_v52 = vshrl.u32 %v1600_v38, 16  ;;  %v1642_v54 = vshll.u32 %v1601_v36, 16  ;;  %v1602_v24 = vld [vmem:[%s8247_s18 + $0x10] sm:$0xf] }
 0x24b   : > { %v1628_v4 = vor.u32 %v1626_v29, %v8575_v39  ;;  %v8583_v41 = vrot.slane %v1639_v40, 7  ;;  %v1634_v1 = vshll.u32 %v1600_v38, 16  ;;  %v7834_v51 = vmov 0   ;;  %v1604_v35 = vld [vmem:[%s8247_s18 + $0x18] sm:$0xf] }
 0x24c   : > { %1430 = vrot.lane.b32.xlu1 %v1336_v37, %s7832_s22  ;;  %1426 = vrot.lane.b32.xlu0 %v1328_v17, %s7832_s22  ;;  %v1620_v5 = vor.u32 %v1618_v44, %v8579_v27  ;;  %v8587_v13 = vrot.slane %v1631_v52, 7  ;;  %524 = vst.msk [vmem:[#allocation2] sm:$0xf] %vm523_vm11, %v7834_v51  ;;  %528 = vst.msk [vmem:[#allocation2 + $0x88] sm:$0xf] %vm523_vm11, %v7834_v51  ;;  %v1355_v19 = vshrl.u32 %v1268_v2, 16 }
 0x24d   : > { %v1644_v32 = vor.u32 %v1642_v54, %v8583_v41  ;;  %526 = vst.msk [vmem:[#allocation2 + $0x4] sm:$0x1] %vm525_vm2, %v7834_v51  ;;  %529 = vst.msk [vmem:[#allocation2 + $0x8c] sm:$0x1] %vm525_vm2, %v7834_v51  ;;  %v1358_v28 = vshll.u32 %v1268_v2, 16  ;;  %v1647_v30 = vshrl.u32 %v1602_v24, 16 }
 0x24e   : > { %v1636_v62 = vor.u32 %v1634_v1, %v8587_v13  ;;  %v1663_v38 = vshrl.u32 %v1604_v35, 16  ;;  %v1270_v37 = vld [vmem:[%s8247_s18 + $0x30] sm:$0xf]  ;;  %v1666_v17 = vshll.u32 %v1604_v35, 16  ;;  %v1272_v52 = vld [vmem:[%s8247_s18 + $0x38] sm:$0xf] }
 0x24f   : > { %v8626_v36 = vrot.slane %v1647_v30, 7  ;;  %v1371_v44 = vshrl.u32 %v1270_v37, 16  ;;  %v1374_v54 = vshll.u32 %v1270_v37, 16  ;;  %v1606_v1 = vld [vmem:[%s8247_s18 + $0x20] sm:$0xf]  ;;  %v1390_v51 = vshll.u32 %v1272_v52, 16 }
 0x250   : > { %1746 = vrot.lane.b32.xlu1 %v1628_v4, %s7833_s26  ;;  %1742 = vrot.lane.b32.xlu0 %v1620_v5, %s7833_s26  ;;  %v8631_v40 = vrot.slane %v1663_v38, 7  ;;  %v1387_v5 = vshrl.u32 %v1272_v52, 16  ;;  %v1612_v35 = vld [vmem:[%s8247_s18 + $0x38] sm:$0xf]  ;;  %v1321_v9 = vrot.slane %v8528_v45, 4  ;;  %v1621_v34 = vrot.slane %v8579_v27, 4 }
 0x251   : > { %v8636_v4 = vrot.slane %v1371_v44, 7  ;;  %v1727_v37 = vshrl.u32 %v1612_v35, 16  ;;  %v1730_v44 = vshll.u32 %v1612_v35, 16  ;;  %v1637_v45 = vrot.slane %v8587_v13, 4  ;;  %v1603_v27 = vld [vmem:[%s8247_s18 + $0x14] sm:$0xf] }
 0x252   : > { %vm1838_vm2 = vcmask 126048   ;;  %v1329_v48 = vrot.slane %v8568_v31, 4 }
 0x253   : > { %vm8876_vm7 = vmand %vm1838_vm2, %vm587_vm4  ;;  %vm3182_vm2 = vcmask 1042432  }
 0x254   : > { %1754 = vrot.lane.b32.xlu1 %v1644_v32, %s7833_s26  ;;  %1750 = vrot.lane.b32.xlu0 %v1636_v62, %s7833_s26  ;;  %v1376_v32 = vor.u32 %v1374_v54, %v8636_v4  ;;  %v8641_v62 = vrot.slane %v1387_v5, 7 }
 0x258   : > { %1078 = vrot.lane.b32.xlu0 %v8416_v14, %s7832_s22  ;;  %v1266_v14 = vld [vmem:[%s8247_s18 + $0x20] sm:$0xf] }
 0x25c   : > { %1110 = vrot.lane.b32.xlu0 %v8419_v15, %s7832_s22  ;;  %v1339_v15 = vshrl.u32 %v1266_v14, 16 }
 0x25e   : > { %v8610_v63 = vrot.slane %v1339_v15, 7  ;;  %v1608_v15 = vld [vmem:[%s8247_s18 + $0x28] sm:$0xf] }
 0x25f   : > { %v1695_v2 = vshrl.u32 %v1608_v15, 16 }
 0x260   : > { %1062 = vrot.lane.b32.xlu0 %v8422_v16, %s7832_s22  ;;  %v533_v16 = vld [vmem:[#allocation2] sm:$0x1]  ;;  %v1345_v0 = vrot.slane %v8610_v63, 4 }
 0x261   : > { %v534_v8 = vsel %vm8286_vm5, 0, %v533_v16  ;;  %v1392_v16 = vor.u32 %v1390_v51, %v8641_v62 }
 0x262   : > { %535 = vst [vmem:[#allocation2] sm:$0x1] %v534_v8  ;;  %v1682_v8 = vshll.u32 %v1606_v1, 16 }
 0x264   : > { %1094 = vrot.lane.b32.xlu0 %v8425_v21, %s7832_s22  ;;  %v1342_v21 = vshll.u32 %v1266_v14, 16  ;;  %v1679_v14 = vshrl.u32 %v1606_v1, 16 }
 0x268   : > { %1086 = vrot.lane.b32.xlu0 %v8428_v22, %s7832_s22  ;;  %v1344_v22 = vor.u32 %v1342_v21, %v8610_v63  ;;  %v8646_v21 = vrot.slane %v1679_v14, 7 }
 0x26c   : > { %1118 = vrot.lane.b32.xlu0 %v8460_v42, %s7832_s22  ;;  %v8620_v42 = vrot.slane %v1355_v19, 7  ;;  %v1684_v19 = vor.u32 %v1682_v8, %v8646_v21  ;;  %v996_v8 = vld [vmem:[#allocation2 + $0x30] sm:$0xf] }
 0x26e   : > { %v1360_v33 = vor.u32 %v1358_v28, %v8620_v42  ;;  %v1698_v28 = vshll.u32 %v1608_v15, 16  ;;  %v1361_v63 = vrot.slane %v8620_v42, 4  ;;  %v1653_v42 = vrot.slane %v8626_v36, 4 }
 0x270   : > { %1070 = vrot.lane.b32.xlu0 %v8463_v46, %s7832_s22  ;;  %v1650_v46 = vshll.u32 %v1602_v24, 16  ;;  %v8651_v24 = vrot.slane %v1695_v2, 7  ;;  %v999_v2 = vld [vmem:[#allocation2 + $0x34] sm:$0x1] }
 0x272   : > { %v1652_v29 = vor.u32 %v1650_v46, %v8626_v36 }
 0x274   : > { %1434 = vrot.lane.b32.xlu0 %v1344_v22, %s7832_s22  ;;  %v1610_v22 = vld [vmem:[%s8247_s18 + $0x30] sm:$0xf] }
 0x275   : > { %v1711_v30 = vshrl.u32 %v1610_v22, 16  ;;  %v1714_v38 = vshll.u32 %v1610_v22, 16 }
 0x277   : > { %v8656_v46 = vrot.slane %v1711_v30, 7 }
 0x278   : > { %1102 = vrot.lane.b32.xlu0 %v8485_v7, %s7832_s22  ;;  %v1668_v7 = vor.u32 %v1666_v17, %v8631_v40  ;;  %v8660_v17 = vrot.slane %v1727_v37, 7 }
 0x27a   : > { %v1732_v52 = vor.u32 %v1730_v44, %v8660_v17 }
 0x27c   : > { %1442 = vrot.lane.b32.xlu0 %v1360_v33, %s7832_s22  ;;  %v1700_v33 = vor.u32 %v1698_v28, %v8651_v24  ;;  %v975_v28 = vld [vmem:[#allocation2 + $0x14] sm:$0x1] }
 0x280   : > { %1758 = vrot.lane.b32.xlu0 %v1652_v29, %s7833_s26  ;;  %v1716_v29 = vor.u32 %v1714_v38, %v8656_v46 }
 0x284   : > { %1766 = vrot.lane.b32.xlu0 %v1668_v7, %s7833_s26 }
 0x288   : > { %1450 = vrot.lane.b32.xlu0 %v1376_v32, %s7832_s22 }
 0x28c   : > { %1458 = vrot.lane.b32.xlu0 %v1392_v16, %s7832_s22 }
 0x290   : > { %1774 = vrot.lane.b32.xlu0 %v1684_v19, %s7833_s26  ;;  %v972_v19 = vld [vmem:[#allocation2 + $0x10] sm:$0xf] }
 0x294   : > { %1782 = vrot.lane.b32.xlu0 %v1700_v33, %s7833_s26 }
 0x298   : > { %1790 = vrot.lane.b32.xlu0 %v1716_v29, %s7833_s26 }
 0x29c   : > { %1798 = vrot.lane.b32.xlu0 %v1732_v52, %s7833_s26 }
 0x2a0   : > { %1064 = vrot.lane.b32.xlu0 %v808_v50, %s7832_s22 }
 0x2a1   : > { %v790_v7 = vpop.permute.xlu1 %789 }
 0x2a2   : > { %v842_v54 = vshrl.u32 %v790_v7, 16  ;;  %v786_v5 = vpop.permute.xlu0 %785  ;;  %v845_v51 = vshll.u32 %v790_v7, 16 }
 0x2a3   : > { %v810_v1 = vshrl.u32 %v786_v5, 16  ;;  %v813_v15 = vshll.u32 %v786_v5, 16 }
 0x2a4   : > { %v8668_v32 = vrot.slane %v842_v54, 7  ;;  %1072 = vrot.lane.b32.xlu0 %v824_v53, %s7832_s22  ;;  %v1011_v54 = vld [vmem:[#allocation2 + $0x44] sm:$0x1] }
 0x2a5   : > { %v8673_v14 = vrot.slane %v810_v1, 7  ;;  %v792_v16 = vpop.permute.xlu1 %791  ;;  %v1008_v1 = vld [vmem:[#allocation2 + $0x40] sm:$0xf] }
 0x2a6   : > { %v858_v22 = vshrl.u32 %v792_v16, 16  ;;  %v788_v3 = vpop.permute.xlu0 %787  ;;  %v847_v50 = vor.u32 %v845_v51, %v8668_v32  ;;  %v848_v30 = vrot.slane %v8668_v32, 4  ;;  %v861_v38 = vshll.u32 %v792_v16, 16  ;;  %v589_v32 = vld [vmem:[#allocation2 + $0x4] sm:$0x1] }
 0x2a7   : > { %v826_v35 = vshrl.u32 %v788_v3, 16  ;;  %v8678_v33 = vor.u32 %v813_v15, %v8673_v14  ;;  %v816_v26 = vrot.slane %v8673_v14, 4  ;;  %v829_v52 = vshll.u32 %v788_v3, 16 }
 0x2a8   : > { %v8681_v53 = vrot.slane %v858_v22, 7  ;;  %1082 = vrot.lane.b32.xlu1 %v847_v50, %s7832_s22  ;;  %v997_v37 = vsel %vm8405_vm9, %v847_v50, %v996_v8  ;;  %1080 = vrot.lane.b32.xlu0 %v840_v57, %s7832_s22  ;;  %v1000_v29 = vsel %vm8445_vm10, %v848_v30, %v999_v2  ;;  %v984_v8 = vld [vmem:[#allocation2 + $0x20] sm:$0xf]  ;;  %v987_v2 = vld [vmem:[#allocation2 + $0x24] sm:$0x1]  ;;  %v1289_v3 = vrot.slane %v8331_v47, 4 }
 0x2a9   : > { %v8693_v44 = vrot.slane %v826_v35, 7  ;;  %998 = vst [vmem:[#allocation2 + $0x30] sm:$0xf] %v997_v37  ;;  %v800_v7 = vpop.permute.xlu1 %799  ;;  %v973_v5 = vsel %vm8405_vm9, %v8678_v33, %v972_v19  ;;  %v976_v61 = vsel %vm8445_vm10, %v816_v26, %v975_v28  ;;  %1001 = vst [vmem:[#allocation2 + $0x34] sm:$0x1] %v1000_v29 }
 0x2aa   : > { %v922_v57 = vshrl.u32 %v800_v7, 16  ;;  %v794_v51 = vpop.permute.xlu0 %793  ;;  %v864_v15 = vrot.slane %v8681_v53, 4  ;;  %974 = vst [vmem:[#allocation2 + $0x10] sm:$0xf] %v973_v5  ;;  %v8704_v16 = vor.u32 %v861_v38, %v8681_v53  ;;  %977 = vst [vmem:[#allocation2 + $0x14] sm:$0x1] %v976_v61 }
 0x2ab   : > { %v874_v22 = vshrl.u32 %v794_v51, 16  ;;  %v8708_v50 = vor.u32 %v829_v52, %v8693_v44  ;;  %v10432_v19 = vrot.slane %v8693_v44, 4  ;;  %v925_v35 = vshll.u32 %v800_v7, 16  ;;  %v1059_v47 = vld [vmem:[#allocation2 + $0x84] sm:$0x1] }
 0x2ac   : > { %v8711_v28 = vrot.slane %v922_v57, 7  ;;  %1088 = vrot.lane.b32.xlu0 %v856_v59, %s7832_s22  ;;  %v1012_v53 = vsel %vm8445_vm10, %v864_v15, %v1011_v54  ;;  %v1009_v38 = vsel %vm8405_vm9, %v8704_v16, %v1008_v1  ;;  %v877_v29 = vshll.u32 %v794_v51, 16  ;;  %v1056_v5 = vld [vmem:[#allocation2 + $0x80] sm:$0xf]  ;;  %v1023_v1 = vld [vmem:[#allocation2 + $0x54] sm:$0x1] }
 0x2ad   : > { %v876_v37 = vrot.slane %v874_v22, 7  ;;  %v8721_v52 = vpop.permute.xlu1 %1406  ;;  %1013 = vst [vmem:[#allocation2 + $0x44] sm:$0x1] %v1012_v53  ;;  %1010 = vst [vmem:[#allocation2 + $0x40] sm:$0xf] %v1009_v38  ;;  %v985_v11 = vsel %vm8405_vm9, %v8708_v50, %v984_v8  ;;  %v988_v59 = vsel %vm8445_vm10, %v10432_v19, %v987_v2 }
 0x2ae   : > { %v928_v7 = vrot.slane %v8711_v28, 4  ;;  %v798_v54 = vpop.permute.xlu0 %797  ;;  %v1020_v61 = vld [vmem:[#allocation2 + $0x50] sm:$0xf]  ;;  %v927_v57 = vor.u32 %v925_v35, %v8711_v28  ;;  %986 = vst [vmem:[#allocation2 + $0x20] sm:$0xf] %v985_v11 }
 0x2af   : > { %989 = vst [vmem:[#allocation2 + $0x24] sm:$0x1] %v988_v59  ;;  %v906_v51 = vshrl.u32 %v798_v54, 16  ;;  %v880_v22 = vrot.slane %v876_v37, 4  ;;  %v879_v53 = vor.u32 %v877_v29, %v876_v37  ;;  %v909_v19 = vshll.u32 %v798_v54, 16 }
 0x2b0   : > { %v1060_v8 = vsel %vm8445_vm10, %v928_v7, %v1059_v47  ;;  %1408 = vrot.lane.b32.xlu0 %v1289_v3, %s7832_s22  ;;  %v1057_v2 = vsel %vm8405_vm9, %v927_v57, %v1056_v5  ;;  %v1044_v29 = vld [vmem:[#allocation2 + $0x70] sm:$0xf]  ;;  %v1047_v3 = vld [vmem:[#allocation2 + $0x74] sm:$0x1] }
 0x2b1   : > { %1061 = vst [vmem:[#allocation2 + $0x84] sm:$0x1] %v1060_v8  ;;  %v8739_v38 = vrot.slane %v906_v51, 7  ;;  %v796_v35 = vpop.permute.xlu1 %795  ;;  %v1024_v11 = vsel %vm8445_vm10, %v880_v22, %v1023_v1  ;;  %v1021_v37 = vsel %vm8405_vm9, %v879_v53, %v1020_v61  ;;  %1058 = vst [vmem:[#allocation2 + $0x80] sm:$0xf] %v1057_v2 }
 0x2b2   : > { %v890_v59 = vshrl.u32 %v796_v35, 16  ;;  %v8745_v47 = vpop.permute.xlu0 %1402  ;;  %1025 = vst [vmem:[#allocation2 + $0x54] sm:$0x1] %v1024_v11  ;;  %1022 = vst [vmem:[#allocation2 + $0x50] sm:$0xf] %v1021_v37  ;;  %v893_v8 = vshll.u32 %v796_v35, 16 }
 0x2b3   : > { %v911_v5 = vor.u32 %v909_v19, %v8739_v38  ;;  %v912_v51 = vrot.slane %v8739_v38, 4  ;;  %v1032_v61 = vld [vmem:[#allocation2 + $0x60] sm:$0xf]  ;;  %v1035_v11 = vld [vmem:[#allocation2 + $0x64] sm:$0x1] }
 0x2b4   : > { %v8749_v54 = vrot.slane %v890_v59, 7  ;;  %1092 = vrot.lane.b32.xlu0 %v864_v15, %s7832_s22  ;;  %v1207_v38 = vld [vmem:[#allocation2 + $0x44] sm:$0x1] }
 0x2b5   : > { %v1045_v1 = vsel %vm8405_vm9, %v911_v5, %v1044_v29  ;;  %1114 = vrot.lane.b32.xlu1 %v911_v5, %s7832_s22  ;;  %v1048_v2 = vsel %vm8445_vm10, %v912_v51, %v1047_v3  ;;  %v1305_v29 = vrot.slane %v8379_v25, 4  ;;  %v1267_v25 = vld [vmem:[%s8247_s18 + $0x24] sm:$0xf] }
 0x2b6   : > { %1046 = vst [vmem:[#allocation2 + $0x70] sm:$0xf] %v1045_v1  ;;  %v8760_v19 = vor.u32 %v893_v8, %v8749_v54  ;;  %v8762_v35 = vpop.permute.xlu0 %1410  ;;  %1049 = vst [vmem:[#allocation2 + $0x74] sm:$0x1] %v1048_v2  ;;  %v896_v15 = vrot.slane %v8749_v54, 4  ;;  %v1350_v1 = vshll.u32 %v1267_v25, 16 }
 0x2b7   : > { %v1269_v8 = vld [vmem:[%s8247_s18 + $0x2c] sm:$0xf] }
 0x2b8   : > { %v1033_v37 = vsel %vm8405_vm9, %v8760_v19, %v1032_v61  ;;  %1100 = vrot.lane.b32.xlu0 %v880_v22, %s7832_s22  ;;  %v1036_v59 = vsel %vm8445_vm10, %v896_v15, %v1035_v11  ;;  %v1363_v61 = vshrl.u32 %v1269_v8, 16  ;;  %v1366_v11 = vshll.u32 %v1269_v8, 16  ;;  %v1234_v8 = vld [vmem:[#allocation2 + $0x68] sm:$0xf] }
 0x2b9   : > { %1034 = vst [vmem:[#allocation2 + $0x60] sm:$0xf] %v1033_v37  ;;  %1066 = vrot.lane.b32.xlu1 %v8678_v33, %s7832_s22  ;;  %1037 = vst [vmem:[#allocation2 + $0x64] sm:$0x1] %v1036_v59  ;;  %v1347_v33 = vshrl.u32 %v1267_v25, 16  ;;  %v1655_v37 = vshrl.u32 %v1603_v27, 16 }
 0x2ba   : > { %v1419_v3 = vpop.permute.xlu0 %1418  ;;  %v1186_v59 = vld [vmem:[#allocation2 + $0x28] sm:$0xf]  ;;  %vm2006_vm9 = vcmask 130048   ;;  %vm1503_vm10 = vcmask 57376  }
 0x2bb   : > { %v8815_v25 = vrot.slane %v1655_v37, 7  ;;  %v1271_v37 = vld [vmem:[%s8247_s18 + $0x34] sm:$0xf]  ;;  %vm9101_vm11 = vmand %vm1503_vm10, %vm531_vm3 }
 0x2bc   : > { %1416 = vrot.lane.b32.xlu0 %v1305_v29, %s7832_s22 }
 0x2bd   : > { %1098 = vrot.lane.b32.xlu1 %v879_v53, %s7832_s22  ;;  %v8792_v53 = vrot.slane %v1347_v33, 7 }
 0x2be   : > { %v8779_v22 = vpop.permute.xlu0 %1426 }
 0x2bf   : > { %v1352_v13 = vor.u32 %v1350_v1, %v8792_v53 }
 0x2c0   : > { %1424 = vrot.lane.b32.xlu0 %v1321_v9, %s7832_s22 }
 0x2c1   : > { %1090 = vrot.lane.b32.xlu1 %v8704_v16, %s7832_s22 }
 0x2c2   : > { %v8786_v5 = vpop.permute.xlu0 %1742 }
 0x2c4   : > { %1744 = vrot.lane.b32.xlu0 %v1621_v34, %s7833_s26  ;;  %v1658_v34 = vshll.u32 %v1603_v27, 16 }
 0x2c5   : > { %1122 = vrot.lane.b32.xlu1 %v927_v57, %s7832_s22  ;;  %v8806_v57 = vrot.slane %v1363_v61, 7 }
 0x2c6   : > { %v8794_v2 = vpop.permute.xlu0 %1750  ;;  %v1660_v61 = vor.u32 %v1658_v34, %v8815_v25 }
 0x2c8   : > { %1752 = vrot.lane.b32.xlu0 %v1637_v45, %s7833_s26  ;;  %v1605_v45 = vld [vmem:[%s8247_s18 + $0x1c] sm:$0xf] }
 0x2c9   : > { %1074 = vrot.lane.b32.xlu1 %v8708_v50, %s7832_s22  ;;  %v1368_v50 = vor.u32 %v1366_v11, %v8806_v57  ;;  %v1671_v27 = vshrl.u32 %v1605_v45, 16  ;;  %v1160_v11 = vld [vmem:[#allocation2 + $0x8] sm:$0xf] }
 0x2ca   : > { %v1079_v29 = vpop.permute.xlu0 %1078 }
 0x2cb   : > { %v1187_v9 = vsel %vm8799_vm13, %v1079_v29, %v1186_v59  ;;  %v8839_v59 = vrot.slane %v1671_v27, 7 }
 0x2cc   : > { %1188 = vst [vmem:[#allocation2 + $0x28] sm:$0xf] %v1187_v9  ;;  %1112 = vrot.lane.b32.xlu0 %v904_v18, %s7832_s22  ;;  %v1674_v9 = vshll.u32 %v1605_v45, 16 }
 0x2cd   : > { %1438 = vrot.lane.b32.xlu1 %v1352_v13, %s7832_s22  ;;  %v1677_v54 = vrot.slane %v8839_v59, 4 }
 0x2ce   : > { %v1111_v33 = vpop.permute.xlu0 %1110  ;;  %v1676_v45 = vor.u32 %v1674_v9, %v8839_v59 }
 0x2cf   : > { %v1235_v1 = vsel %vm8799_vm13, %v1111_v33, %v1234_v8  ;;  %v1210_v33 = vld [vmem:[#allocation2 + $0x48] sm:$0xf]  ;;  %v1273_v8 = vld [vmem:[%s8247_s18 + $0x3c] sm:$0xf] }
 0x2d0   : > { %1236 = vst [vmem:[#allocation2 + $0x68] sm:$0xf] %v1235_v1  ;;  %1120 = vrot.lane.b32.xlu0 %v920_v43, %s7832_s22  ;;  %v7410_v1 = vld [vmem:[#allocation11 + $0x18] sm:$0xff]   ;;  %v1395_v27 = vshrl.u32 %v1273_v8, 16 }
 0x2d1   : > { %1446 = vrot.lane.b32.xlu1 %v1368_v50, %s7832_s22  ;;  %v1379_v50 = vshrl.u32 %v1271_v37, 16  ;;  %6672 = vmatprep.subr.bf16.mxu1 %v7410_v1 }
 0x2d2   : > { %v1063_v13 = vpop.permute.xlu0 %1062  ;;  %6673 = vmatpush3.bf16.msra.mxu1 %v7410_v1  ;;  %v1246_v1 = vld [vmem:[#allocation2 + $0x78] sm:$0xf] }
 0x2d3   : > { %v1526_v29 = vld [vmem:[#allocation2 + $0x28] sm:$0xf]  ;;  %v1161_v23 = vsel %vm8799_vm13, %v1063_v13, %v1160_v11  ;;  %v1607_v13 = vld [vmem:[%s8247_s18 + $0x24] sm:$0xf] }
 0x2d4   : > { %v1527_v43 = vsel %vm8825_vm15, %v1419_v3, %v1526_v29  ;;  %1162 = vst [vmem:[#allocation2 + $0x8] sm:$0xf] %v1161_v23  ;;  %1436 = vrot.lane.b32.xlu0 %v1345_v0, %s7832_s22  ;;  %v8849_v0 = vrot.slane %v1379_v50, 7  ;;  %v8852_v11 = vld [vmem:[#allocation11] sm:$0xff]   ;;  %v8864_v50 = vrot.slane %v1395_v27, 7 }
 0x2d5   : > { %1528 = vst [vmem:[#allocation2 + $0x28] sm:$0xf] %v1527_v43  ;;  %1762 = vrot.lane.b32.xlu1 %v1660_v61, %s7833_s26  ;;  %v1382_v61 = vshll.u32 %v1271_v37, 16  ;;  %v1198_v23 = vld [vmem:[#allocation2 + $0x38] sm:$0xf]  ;;  %6690 = vmatprep.subr.bf16.mxu1 %v8852_v11  ;;  %v1669_v37 = vrot.slane %v8631_v40, 4 }
 0x2d6   : > { %v1095_v34 = vpop.permute.xlu0 %1094  ;;  %v1377_v40 = vrot.slane %v8636_v4, 4 }
 0x2d7   : > { %v1211_v3 = vsel %vm8799_vm13, %v1095_v34, %v1210_v33  ;;  %v1384_v9 = vor.u32 %v1382_v61, %v8849_v0  ;;  %v1398_v34 = vshll.u32 %v1273_v8, 16 }
 0x2d8   : > { %1212 = vst [vmem:[#allocation2 + $0x48] sm:$0xf] %v1211_v3  ;;  %1444 = vrot.lane.b32.xlu0 %v1361_v63, %s7832_s22  ;;  %v1687_v63 = vshrl.u32 %v1607_v13, 16  ;;  %v1609_v3 = vld [vmem:[%s8247_s18 + $0x2c] sm:$0xf] }
 0x2d9   : > { %1106 = vrot.lane.b32.xlu1 %v8760_v19, %s7832_s22  ;;  %v1400_v8 = vor.u32 %v1398_v34, %v8864_v50  ;;  %v1703_v61 = vshrl.u32 %v1609_v3, 16 }
 0x2da   : > { %v1087_v29 = vpop.permute.xlu0 %1086 }
 0x2db   : > { %v1500_v43 = vld [vmem:[#allocation2 + $0x8] sm:$0xf]  ;;  %v1199_v36 = vsel %vm8799_vm13, %v1087_v29, %v1198_v23  ;;  %v1174_v23 = vld [vmem:[#allocation2 + $0x18] sm:$0xf]  ;;  %v8893_v34 = vrot.slane %v1703_v61, 7 }
 0x2dc   : > { %v1501_v19 = vsel %vm8825_vm15, %v8745_v47, %v1500_v43  ;;  %1200 = vst [vmem:[#allocation2 + $0x38] sm:$0xf] %v1199_v36  ;;  %1760 = vrot.lane.b32.xlu0 %v1653_v42, %s7833_s26  ;;  %v8871_v42 = vrot.slane %v1687_v63, 7  ;;  %v1611_v43 = vld [vmem:[%s8247_s18 + $0x34] sm:$0xf] }
 0x2dd   : > { %1502 = vst [vmem:[#allocation2 + $0x8] sm:$0xf] %v1501_v19  ;;  %1770 = vrot.lane.b32.xlu1 %v1676_v45, %s7833_s26  ;;  %v1690_v45 = vshll.u32 %v1607_v13, 16 }
 0x2de   : > { %v1119_v33 = vpop.permute.xlu0 %1118  ;;  %v1693_v59 = vrot.slane %v8871_v42, 4 }
 0x2df   : > { %v1247_v47 = vsel %vm8799_vm13, %v1119_v33, %v1246_v1  ;;  %v1692_v63 = vor.u32 %v1690_v45, %v8871_v42  ;;  %v1706_v33 = vshll.u32 %v1609_v3, 16  ;;  %v1719_v1 = vshrl.u32 %v1611_v43, 16 }
 0x2e0   : > { %1248 = vst [vmem:[#allocation2 + $0x78] sm:$0xf] %v1247_v47  ;;  %1768 = vrot.lane.b32.xlu0 %v1669_v37, %s7833_s26  ;;  %v1393_v37 = vrot.slane %v8641_v62, 4  ;;  %v1550_v47 = vld [vmem:[#allocation2 + $0x48] sm:$0xf]  ;;  %v1722_v3 = vshll.u32 %v1611_v43, 16 }
 0x2e1   : > { %1454 = vrot.lane.b32.xlu1 %v1384_v9, %s7832_s22  ;;  %v8902_v45 = vrot.slane %v1719_v1, 7 }
 0x2e2   : > { %v1071_v29 = vpop.permute.xlu0 %1070 }
 0x2e3   : > { %v1538_v36 = vld [vmem:[#allocation2 + $0x38] sm:$0xf]  ;;  %v1175_v4 = vsel %vm8799_vm13, %v1071_v29, %v1174_v23  ;;  %v1613_v29 = vld [vmem:[%s8247_s18 + $0x3c] sm:$0xf]  ;;  %v1724_v43 = vor.u32 %v1722_v3, %v8902_v45 }
 0x2e4   : > { %v1840_v19 = vld [vmem:[#allocation2 + $0x8] sm:$0xf]  ;;  %v1539_v13 = vsel %vm8825_vm15, %v8779_v22, %v1538_v36  ;;  %1176 = vst [vmem:[#allocation2 + $0x18] sm:$0xf] %v1175_v4  ;;  %1452 = vrot.lane.b32.xlu0 %v1377_v40, %s7832_s22  ;;  %v1685_v40 = vrot.slane %v8646_v21, 4  ;;  %v1701_v21 = vrot.slane %v8651_v24, 4 }
 0x2e5   : > { %v1841_v9 = vsel %vm8876_vm7, %v8786_v5, %v1840_v19  ;;  %1540 = vst [vmem:[#allocation2 + $0x38] sm:$0xf] %v1539_v13  ;;  %1462 = vrot.lane.b32.xlu1 %v1400_v8, %s7832_s22  ;;  %v1708_v5 = vor.u32 %v1706_v33, %v8893_v34  ;;  %v1735_v8 = vshrl.u32 %v1613_v29, 16  ;;  %v1222_v23 = vld [vmem:[#allocation2 + $0x58] sm:$0xf] }
 0x2e6   : > { %1842 = vst [vmem:[#allocation2 + $0x8] sm:$0xf] %v1841_v9  ;;  %v1435_v22 = vpop.permute.xlu0 %1434  ;;  %v584_v9 = vld [vmem:[#allocation2 + $0x88] sm:$0x1] }
 0x2e7   : > { %v1551_v62 = vsel %vm8825_vm15, %v1435_v22, %v1550_v47  ;;  %v8913_v13 = vrot.slane %v1735_v8, 7  ;;  %v585_v33 = vsel %vm8286_vm5, 0, %v584_v9  ;;  %v1866_v22 = vld [vmem:[#allocation2 + $0x28] sm:$0xf]  ;;  %vm1163_vm5 = vcmask 90176  }
 0x2e8   : > { %1552 = vst [vmem:[#allocation2 + $0x48] sm:$0xf] %v1551_v62  ;;  %1460 = vrot.lane.b32.xlu0 %v1393_v37, %s7832_s22  ;;  %v1738_v37 = vshll.u32 %v1613_v29, 16  ;;  %586 = vst [vmem:[#allocation2 + $0x88] sm:$0x1] %v585_v33 }
 0x2e9   : > { %1778 = vrot.lane.b32.xlu1 %v1692_v63, %s7833_s26  ;;  %vm8974_vm8 = vmand %vm1163_vm5, %vm531_vm3  ;;  %v1741_v16 = vrot.slane %v8913_v13, 4 }
 0x2ea   : > { %v1103_v61 = vpop.permute.xlu0 %1102  ;;  %v1740_v24 = vor.u32 %v1738_v37, %v8913_v13 }
 0x2eb   : > { %v1514_v36 = vld [vmem:[#allocation2 + $0x18] sm:$0xf]  ;;  %v1223_v4 = vsel %vm8799_vm13, %v1103_v61, %v1222_v23  ;;  %v1401_v61 = vrot.slane %v8864_v50, 4  ;;  %v1281_v50 = vrot.slane %v8333_v49, 4  ;;  %v590_v49 = vsel %vm8296_vm6, 0, %v589_v32 }
 0x2ec   : > { %v1515_v19 = vsel %vm8825_vm15, %v8762_v35, %v1514_v36  ;;  %1224 = vst [vmem:[#allocation2 + $0x58] sm:$0xf] %v1223_v4  ;;  %1776 = vrot.lane.b32.xlu0 %v1685_v40, %s7833_s26  ;;  %v1717_v35 = vrot.slane %v8656_v46, 4  ;;  %v1733_v46 = vrot.slane %v8660_v17, 4  ;;  %v1878_v3 = vld [vmem:[#allocation2 + $0x38] sm:$0xf]  ;;  %v8940_v36 = vpop.permute.xlu1 %1414 }
 0x2ed   : > { %1516 = vst [vmem:[#allocation2 + $0x18] sm:$0xf] %v1515_v19  ;;  %1786 = vrot.lane.b32.xlu1 %v1708_v5, %s7833_s26  ;;  %v1586_v19 = vld [vmem:[#allocation2 + $0x78] sm:$0xf]  ;;  %591 = vst [vmem:[#allocation2 + $0x4] sm:$0x1] %v590_v49 }
 0x2ee   : > { %v1443_v63 = vpop.permute.xlu0 %1442  ;;  %v1240_v49 = vld [vmem:[#allocation2 + $0x70] sm:$0xf]  ;;  %v9069_v42 = vld [vmem:[#allocation2 + $0x8] sm:$0xf] }
 0x2f0   : > { %1784 = vrot.lane.b32.xlu0 %v1701_v21, %s7833_s26  ;;  %v1423_v37 = vpop.permute.xlu1 %1422 }
 0x2f1   : > { %1794 = vrot.lane.b32.xlu1 %v1724_v43, %s7833_s26  ;;  %v1890_v43 = vld [vmem:[#allocation2 + $0x48] sm:$0xf] }
 0x2f2   : > { %v1759_v1 = vpop.permute.xlu0 %1758 }
 0x2f3   : > { %v1562_v47 = vld [vmem:[#allocation2 + $0x58] sm:$0xf]  ;;  %v1867_v29 = vsel %vm8876_vm7, %v1759_v1, %v1866_v22  ;;  %v1313_v22 = vrot.slane %v8536_v55, 4  ;;  %v1165_v55 = vld [vmem:[#allocation2 + $0xc] sm:$0x1] }
 0x2f4   : > { %v1854_v62 = vld [vmem:[#allocation2 + $0x18] sm:$0xf]  ;;  %v1563_v6 = vsel %vm8825_vm15, %v1443_v63, %v1562_v47  ;;  %1868 = vst [vmem:[#allocation2 + $0x28] sm:$0xf] %v1867_v29  ;;  %1792 = vrot.lane.b32.xlu0 %v1717_v35, %s7833_s26 }
 0x2f5   : > { %v1855_v40 = vsel %vm8876_vm7, %v8794_v2, %v1854_v62  ;;  %1564 = vst [vmem:[#allocation2 + $0x58] sm:$0xf] %v1563_v6  ;;  %1802 = vrot.lane.b32.xlu1 %v1740_v24, %s7833_s26  ;;  %v1574_v2 = vld [vmem:[#allocation2 + $0x68] sm:$0xf] }
 0x2f6   : > { %1856 = vst [vmem:[#allocation2 + $0x18] sm:$0xf] %v1855_v40  ;;  %v1767_v5 = vpop.permute.xlu0 %1766  ;;  %v1629_v40 = vrot.slane %v8575_v39, 4  ;;  %v1337_v39 = vrot.slane %v8563_v20, 4 }
 0x2f7   : > { %v1879_v8 = vsel %vm8876_vm7, %v1767_v5, %v1878_v3  ;;  %v1177_v3 = vld [vmem:[#allocation2 + $0x1c] sm:$0x1] }
 0x2f8   : > { %1880 = vst [vmem:[#allocation2 + $0x38] sm:$0xf] %v1879_v8  ;;  %1800 = vrot.lane.b32.xlu0 %v1733_v46, %s7833_s26 }
 0x2f9   : > { %1068 = vrot.lane.b32.xlu1 %v816_v26, %s7832_s22  ;;  %v1297_v26 = vrot.slane %v8345_v58, 4  ;;  %v8958_v58 = vpop.permute.xlu1 %1430 }
 0x2fa   : > { %v1451_v17 = vpop.permute.xlu0 %1450 }
 0x2fb   : > { %v1575_v23 = vsel %vm8825_vm15, %v1451_v17, %v1574_v2  ;;  %v1189_v2 = vld [vmem:[#allocation2 + $0x2c] sm:$0x1] }
 0x2fc   : > { %1576 = vst [vmem:[#allocation2 + $0x68] sm:$0xf] %v1575_v23  ;;  %1464 = vrot.lane.b32.xlu0 %v1401_v61, %s7832_s22  ;;  %v1902_v9 = vld [vmem:[#allocation2 + $0x58] sm:$0xf]  ;;  %v1192_v61 = vld [vmem:[#allocation2 + $0x30] sm:$0xf] }
 0x2fd   : > { %1084 = vrot.lane.b32.xlu1 %v848_v30, %s7832_s22  ;;  %v8969_v62 = vpop.permute.xlu1 %1746  ;;  %v9110_v13 = vld [vmem:[#allocation2 + $0x18] sm:$0xf] }
 0x2fe   : > { %v1459_v4 = vpop.permute.xlu0 %1458 }
 0x2ff   : > { %v1587_v14 = vsel %vm8825_vm15, %v1459_v4, %v1586_v19  ;;  %v1201_v19 = vld [vmem:[#allocation2 + $0x3c] sm:$0x1] }
 0x300   : > { %1588 = vst [vmem:[#allocation2 + $0x78] sm:$0xf] %v1587_v14 }
 0x301   : > { %1404 = vrot.lane.b32.xlu1 %v1281_v50, %s7832_s22  ;;  %v8982_v46 = vpop.permute.xlu1 %1754 }
 0x302   : > { %v1775_v21 = vpop.permute.xlu0 %1774 }
 0x303   : > { %v1891_v63 = vsel %vm8876_vm7, %v1775_v21, %v1890_v43  ;;  %v1914_v24 = vld [vmem:[#allocation2 + $0x68] sm:$0xf] }
 0x304   : > { %1892 = vst [vmem:[#allocation2 + $0x48] sm:$0xf] %v1891_v63 }
 0x305   : > { %1412 = vrot.lane.b32.xlu1 %v1297_v26, %s7832_s22  ;;  %v1353_v26 = vrot.slane %v8792_v53, 4 }
 0x306   : > { %v1783_v30 = vpop.permute.xlu0 %1782 }
 0x307   : > { %v1903_v33 = vsel %vm8876_vm7, %v1783_v30, %v1902_v9  ;;  %v1926_v29 = vld [vmem:[#allocation2 + $0x78] sm:$0xf]  ;;  %v10499_v30 = vrot.slane %v8693_v44, 4 }
 0x308   : > { %1904 = vst [vmem:[#allocation2 + $0x58] sm:$0xf] %v1903_v33  ;;  %v1219_v33 = vld [vmem:[#allocation2 + $0x54] sm:$0x1] }
 0x309   : > { %1096 = vrot.lane.b32.xlu1 %v872_v56, %s7832_s22 }
 0x30a   : > { %v1791_v35 = vpop.permute.xlu0 %1790 }
 0x30b   : > { %v1915_v1 = vsel %vm8876_vm7, %v1791_v35, %v1914_v24 }
 0x30c   : > { %1916 = vst [vmem:[#allocation2 + $0x68] sm:$0xf] %v1915_v1  ;;  %v1168_v1 = vld [vmem:[#allocation2 + $0x10] sm:$0xf] }
 0x30d   : > { %1104 = vrot.lane.b32.xlu1 %v888_v60, %s7832_s22 }
 0x30e   : > { %v1799_v47 = vpop.permute.xlu0 %1798 }
 0x30f   : > { %v1927_v10 = vsel %vm8876_vm7, %v1799_v47, %v1926_v29  ;;  %v1661_v47 = vrot.slane %v8815_v25, 4 }
 0x310   : > { %1928 = vst [vmem:[#allocation2 + $0x78] sm:$0xf] %v1927_v10 }
 0x311   : > { %1420 = vrot.lane.b32.xlu1 %v1313_v22, %s7832_s22 }
 0x312   : > { %v1065_v60 = vpop.permute.xlu0 %1064 }
 0x313   : > { %v1166_v6 = vsel %vm8974_vm8, %v1065_v60, %v1165_v55 }
 0x314   : > { %1167 = vst [vmem:[#allocation2 + $0xc] sm:$0x1] %v1166_v6  ;;  %v1204_v6 = vld [vmem:[#allocation2 + $0x40] sm:$0xf] }
 0x315   : > { %1428 = vrot.lane.b32.xlu1 %v1329_v48, %s7832_s22  ;;  %v1369_v48 = vrot.slane %v8806_v57, 4  ;;  %v1252_v57 = vld [vmem:[#allocation2 + $0x80] sm:$0xf] }
 0x316   : > { %v1073_v5 = vpop.permute.xlu0 %1072 }
 0x317   : > { %v1178_v8 = vsel %vm8974_vm8, %v1073_v5, %v1177_v3 }
 0x318   : > { %1179 = vst [vmem:[#allocation2 + $0x1c] sm:$0x1] %v1178_v8 }
 0x319   : > { %1748 = vrot.lane.b32.xlu1 %v1629_v40, %s7833_s26 }
 0x31a   : > { %v1083_v31 = vpop.permute.xlu1 %1082  ;;  %v1081_v17 = vpop.permute.xlu0 %1080 }
 0x31b   : > { %v1193_v23 = vsel %vm8799_vm13, %v1083_v31, %v1192_v61  ;;  %v1190_v50 = vsel %vm8974_vm8, %v1081_v17, %v1189_v2  ;;  %v1385_v61 = vrot.slane %v8849_v0, 4  ;;  %v1180_v2 = vld [vmem:[#allocation2 + $0x20] sm:$0xf] }
 0x31c   : > { %1194 = vst [vmem:[#allocation2 + $0x30] sm:$0xf] %v1193_v23  ;;  %1191 = vst [vmem:[#allocation2 + $0x2c] sm:$0x1] %v1190_v50 }
 0x31d   : > { %1116 = vrot.lane.b32.xlu1 %v912_v51, %s7832_s22 }
 0x31e   : > { %v1089_v4 = vpop.permute.xlu0 %1088 }
 0x31f   : > { %v1202_v14 = vsel %vm8974_vm8, %v1089_v4, %v1201_v19  ;;  %v1237_v19 = vld [vmem:[#allocation2 + $0x6c] sm:$0x1] }
 0x320   : > { %1203 = vst [vmem:[#allocation2 + $0x3c] sm:$0x1] %v1202_v14 }
 0x321   : > { %1432 = vrot.lane.b32.xlu1 %v1337_v39, %s7832_s22 }
 0x322   : > { %v9001_v21 = vpop.permute.xlu0 %1408 }
 0x323   : > { %v1532_v43 = vld [vmem:[#allocation2 + $0x30] sm:$0xf] }
 0x324   : > { %v1533_v63 = vsel %vm8825_vm15, %v1423_v37, %v1532_v43  ;;  %v1645_v37 = vrot.slane %v8583_v41, 4  ;;  %v1216_v41 = vld [vmem:[#allocation2 + $0x50] sm:$0xf] }
 0x325   : > { %1534 = vst [vmem:[#allocation2 + $0x30] sm:$0xf] %v1533_v63  ;;  %1440 = vrot.lane.b32.xlu1 %v1353_v26, %s7832_s22 }
 0x326   : > { %v1093_v20 = vpop.permute.xlu0 %1092 }
 0x327   : > { %v1208_v51 = vsel %vm8974_vm8, %v1093_v20, %v1207_v38  ;;  %v1115_v32 = vpop.permute.xlu1 %1114 }
 0x328   : > { %1209 = vst [vmem:[#allocation2 + $0x44] sm:$0x1] %v1208_v51  ;;  %v1241_v53 = vsel %vm8799_vm13, %v1115_v32, %v1240_v49  ;;  %v1709_v49 = vrot.slane %v8893_v34, 4  ;;  %v1725_v34 = vrot.slane %v8902_v45, 4 }
 0x329   : > { %1242 = vst [vmem:[#allocation2 + $0x70] sm:$0xf] %v1241_v53  ;;  %1076 = vrot.lane.b32.xlu1 %v10499_v30, %s7832_s22 }
 0x32a   : > { %v1101_v9 = vpop.permute.xlu0 %1100 }
 0x32b   : > { %v1220_v35 = vsel %vm8974_vm8, %v1101_v9, %v1219_v33  ;;  %v1067_v24 = vpop.permute.xlu1 %1066 }
 0x32c   : > { %1221 = vst [vmem:[#allocation2 + $0x54] sm:$0x1] %v1220_v35  ;;  %v1169_v22 = vsel %vm8799_vm13, %v1067_v24, %v1168_v1  ;;  %v1872_v9 = vld [vmem:[#allocation2 + $0x30] sm:$0xf]  ;;  %v1228_v1 = vld [vmem:[#allocation2 + $0x60] sm:$0xf] }
 0x32d   : > { %1170 = vst [vmem:[#allocation2 + $0x10] sm:$0xf] %v1169_v22  ;;  %1756 = vrot.lane.b32.xlu1 %v1645_v37, %s7833_s26 }
 0x32e   : > { %v9020_v44 = vpop.permute.xlu0 %1416 }
 0x32f   : > { %v1099_v29 = vpop.permute.xlu1 %1098 }
 0x330   : > { %v1217_v10 = vsel %vm8799_vm13, %v1099_v29, %v1216_v41 }
 0x331   : > { %1218 = vst [vmem:[#allocation2 + $0x50] sm:$0xf] %v1217_v10  ;;  %1764 = vrot.lane.b32.xlu1 %v1661_v47, %s7833_s26 }
 0x332   : > { %v9026_v60 = vpop.permute.xlu0 %1424 }
 0x333   : > { %v1091_v55 = vpop.permute.xlu1 %1090 }
 0x334   : > { %v1508_v40 = vld [vmem:[#allocation2 + $0x10] sm:$0xf]  ;;  %v1205_v25 = vsel %vm8799_vm13, %v1091_v55, %v1204_v6 }
 0x335   : > { %v1509_v5 = vsel %vm8825_vm15, %v8721_v52, %v1508_v40  ;;  %1206 = vst [vmem:[#allocation2 + $0x40] sm:$0xf] %v1205_v25  ;;  %1448 = vrot.lane.b32.xlu1 %v1369_v48, %s7832_s22 }
 0x336   : > { %1510 = vst [vmem:[#allocation2 + $0x10] sm:$0xf] %v1509_v5  ;;  %v9034_v3 = vpop.permute.xlu0 %1744 }
 0x337   : > { %v1123_v8 = vpop.permute.xlu1 %1122 }
 0x338   : > { %v1253_v31 = vsel %vm8799_vm13, %v1123_v8, %v1252_v57  ;;  %v1556_v43 = vld [vmem:[#allocation2 + $0x50] sm:$0xf] }
 0x339   : > { %1254 = vst [vmem:[#allocation2 + $0x80] sm:$0xf] %v1253_v31  ;;  %1108 = vrot.lane.b32.xlu1 %v896_v15, %s7832_s22 }
 0x33a   : > { %v9042_v17 = vpop.permute.xlu0 %1752 }
 0x33b   : > { %v1075_v52 = vpop.permute.xlu1 %1074 }
 0x33c   : > { %v1544_v23 = vld [vmem:[#allocation2 + $0x40] sm:$0xf]  ;;  %v1181_v50 = vsel %vm8799_vm13, %v1075_v52, %v1180_v2 }
 0x33d   : > { %v1848_v39 = vld [vmem:[#allocation2 + $0x10] sm:$0xf]  ;;  %v1545_v4 = vsel %vm8825_vm15, %v8958_v58, %v1544_v23  ;;  %1182 = vst [vmem:[#allocation2 + $0x20] sm:$0xf] %v1181_v50  ;;  %1456 = vrot.lane.b32.xlu1 %v1385_v61, %s7832_s22  ;;  %v9118_v50 = vld [vmem:[#allocation2 + $0x28] sm:$0xf] }
 0x33e   : > { %v1849_v15 = vsel %vm8876_vm7, %v8969_v62, %v1848_v39  ;;  %1546 = vst [vmem:[#allocation2 + $0x40] sm:$0xf] %v1545_v4  ;;  %v1113_v0 = vpop.permute.xlu0 %1112  ;;  %v1249_v62 = vld [vmem:[#allocation2 + $0x7c] sm:$0x1]  ;;  %v9120_v39 = vld [vmem:[#allocation11 + $0x30] sm:$0xff]  }
 0x33f   : > { %1850 = vst [vmem:[#allocation2 + $0x10] sm:$0xf] %v1849_v15  ;;  %v1238_v14 = vsel %vm8974_vm8, %v1113_v0, %v1237_v19  ;;  %v1439_v26 = vpop.permute.xlu1 %1438 }
 0x340   : > { %1239 = vst [vmem:[#allocation2 + $0x6c] sm:$0x1] %v1238_v14  ;;  %v1557_v58 = vsel %vm8825_vm15, %v1439_v26, %v1556_v43  ;;  %v1592_v2 = vld [vmem:[#allocation2 + $0x80] sm:$0xf] }
 0x341   : > { %1558 = vst [vmem:[#allocation2 + $0x50] sm:$0xf] %v1557_v58  ;;  %1772 = vrot.lane.b32.xlu1 %v1677_v54, %s7833_s26  ;;  %v640_v58 = vld [vmem:[#allocation2 + $0x8c] sm:$0x1] }
 0x342   : > { %v1121_v63 = vpop.permute.xlu0 %1120 }
 0x343   : > { %v1250_v20 = vsel %vm8974_vm8, %v1121_v63, %v1249_v62  ;;  %v1447_v38 = vpop.permute.xlu1 %1446 }
 0x344   : > { %v1520_v51 = vld [vmem:[#allocation2 + $0x20] sm:$0xf]  ;;  %1251 = vst [vmem:[#allocation2 + $0x7c] sm:$0x1] %v1250_v20 }
 0x345   : > { %v1521_v32 = vsel %vm8825_vm15, %v8940_v36, %v1520_v51  ;;  %1780 = vrot.lane.b32.xlu1 %v1693_v59, %s7833_s26  ;;  %v1884_v45 = vld [vmem:[#allocation2 + $0x40] sm:$0xf]  ;;  %v641_v59 = vsel %vm8296_vm6, 0, %v640_v58  ;;  %vm9152_vm6 = vmand %vm1843_vm12, %vm531_vm3 }
 0x346   : > { %1522 = vst [vmem:[#allocation2 + $0x20] sm:$0xf] %v1521_v32  ;;  %v9067_v53 = vpop.permute.xlu0 %1436  ;;  %v9071_v30 = vld [vmem:[#allocation2 + $0x10] sm:$0xf]  ;;  %642 = vst [vmem:[#allocation2 + $0x8c] sm:$0x1] %v641_v59 }
 0x347   : > { %v1763_v37 = vpop.permute.xlu1 %1762  ;;  %v6152_v33 = vcombine.low %v9069_v42, %v9071_v30  ;;  %v1577_v57 = vld [vmem:[#allocation2 + $0x6c] sm:$0x1] }
 0x348   : > { %v1873_v36 = vsel %vm8876_vm7, %v1763_v37, %v1872_v9  ;;  %v1896_v26 = vld [vmem:[#allocation2 + $0x50] sm:$0xf] }
 0x349   : > { %1874 = vst [vmem:[#allocation2 + $0x30] sm:$0xf] %v1873_v36  ;;  %1788 = vrot.lane.b32.xlu1 %v1709_v49, %s7833_s26  ;;  %6674 = vmatprep.mubr.msk.bf16.mxu1 %vm2006_vm9, %v6152_v33  ;;  %v9156_v33 = vld [vmem:[#allocation2 + $0x48] sm:$0xf] }
 0x34a   : > { %v9080_v35 = vpop.permute.xlu0 %1444 }
 0x34b   : > { %v1107_v24 = vpop.permute.xlu1 %1106  ;;  %v1589_v0 = vld [vmem:[#allocation2 + $0x7c] sm:$0x1] }
 0x34c   : > { %v1229_v22 = vsel %vm8799_vm13, %v1107_v24, %v1228_v1  ;;  %vm2428_vm13 = vsmask.f32 3328 }
 0x34d   : > { %v1860_v47 = vld [vmem:[#allocation2 + $0x20] sm:$0xf]  ;;  %1230 = vst [vmem:[#allocation2 + $0x60] sm:$0xf] %v1229_v22  ;;  %1796 = vrot.lane.b32.xlu1 %v1725_v34, %s7833_s26 }
 0x34e   : > { %v1861_v29 = vsel %vm8876_vm7, %v8982_v46, %v1860_v47  ;;  %v9088_v41 = vpop.permute.xlu0 %1760  ;;  %v1580_v46 = vld [vmem:[#allocation2 + $0x70] sm:$0xf] }
 0x34f   : > { %1862 = vst [vmem:[#allocation2 + $0x20] sm:$0xf] %v1861_v29  ;;  %v1771_v10 = vpop.permute.xlu1 %1770 }
 0x350   : > { %v1885_v48 = vsel %vm8876_vm7, %v1771_v10, %v1884_v45  ;;  %v9167_v45 = vld [vmem:[#allocation2 + $0x58] sm:$0xf] }
 0x351   : > { %1886 = vst [vmem:[#allocation2 + $0x40] sm:$0xf] %v1885_v48  ;;  %1124 = vrot.lane.b32.xlu1 %v928_v7, %s7832_s22  ;;  %v9107_v7 = vld [vmem:[#allocation2 + $0x30] sm:$0xf] }
 0x352   : > { %v9096_v55 = vpop.permute.xlu0 %1768  ;;  %v6154_v54 = vcombine.low %v9118_v50, %v9107_v7 }
 0x353   : > { %v1455_v6 = vpop.permute.xlu1 %1454 }
 0x354   : > { %v1568_v40 = vld [vmem:[#allocation2 + $0x60] sm:$0xf]  ;;  %v1581_v25 = vsel %vm8825_vm15, %v1455_v6, %v1580_v46 }
 0x355   : > { %v1569_v28 = vsel %vm8825_vm15, %v1447_v38, %v1568_v40  ;;  %1582 = vst [vmem:[#allocation2 + $0x70] sm:$0xf] %v1581_v25  ;;  %1804 = vrot.lane.b32.xlu1 %v1741_v16, %s7833_s26 }
 0x356   : > { %1570 = vst [vmem:[#allocation2 + $0x60] sm:$0xf] %v1569_v28  ;;  %v1453_v8 = vpop.permute.xlu0 %1452  ;;  %v9112_v31 = vld [vmem:[#allocation2 + $0x20] sm:$0xf]  ;;  %v1171_v28 = vld [vmem:[#allocation2 + $0x14] sm:$0x1] }
 0x357   : > { %v1578_v61 = vsel %vm9101_vm11, %v1453_v8, %v1577_v57  ;;  %v1463_v52 = vpop.permute.xlu1 %1462  ;;  %v6153_v23 = vcombine.low %v9110_v13, %v9112_v31  ;;  %v9178_v8 = vld [vmem:[#allocation2 + $0x68] sm:$0xf] }
 0x358   : > { %1579 = vst [vmem:[#allocation2 + $0x6c] sm:$0x1] %v1578_v61  ;;  %v1593_v4 = vsel %vm8825_vm15, %v1463_v52, %v1592_v2  ;;  %v9134_v43 = vld [vmem:[#allocation2 + $0x40] sm:$0xf]  ;;  %v1195_v2 = vld [vmem:[#allocation2 + $0x34] sm:$0x1]  ;;  %vm9341_vm15 = vmor %vm2428_vm13, %vm2429_vm14 }
 0x359   : > { %1594 = vst [vmem:[#allocation2 + $0x80] sm:$0xf] %v1593_v4  ;;  %6675 = vmatmul.mubr.msk.bf16.vlgmr.msra.gmra.mrb[4].mxu1 %vm2006_vm9, %v6153_v23  ;;  %v1938_v23 = vld [vmem:[#allocation2] sm:$0xf] }
 0x35a   : > { %v1461_v15 = vpop.permute.xlu0 %1460  ;;  %6678 = vmatprep.mubr.msk.bf16.mxu1 %vm2006_vm9, %v6154_v54  ;;  %6691 = vmatpush3.bf16.msra.mxu1 %v8852_v11  ;;  %v9140_v11 = vld [vmem:[#allocation2 + $0x38] sm:$0xf] }
 0x35b   : > { %v1590_v19 = vsel %vm9101_vm11, %v1461_v15, %v1589_v0  ;;  %v1779_v14 = vpop.permute.xlu1 %1778  ;;  %6708 = vmatprep.subr.bf16.mxu1 %v9120_v39  ;;  %v6155_v38 = vcombine.low %v9140_v11, %v9134_v43  ;;  %v9187_v54 = vld [vmem:[#allocation2 + $0x78] sm:$0xf] }
 0x35c   : > { %1591 = vst [vmem:[#allocation2 + $0x7c] sm:$0x1] %v1590_v19  ;;  %v1897_v18 = vsel %vm8876_vm7, %v1779_v14, %v1896_v26  ;;  %v1920_v49 = vld [vmem:[#allocation2 + $0x70] sm:$0xf]  ;;  %v6169_v19 = vcombine.low %v1938_v23, %v9069_v42  ;;  %v1505_v26 = vld [vmem:[#allocation2 + $0xc] sm:$0x1] }
 0x35d   : > { %1898 = vst [vmem:[#allocation2 + $0x50] sm:$0xf] %v1897_v18  ;;  %v1908_v20 = vld [vmem:[#allocation2 + $0x60] sm:$0xf] }
 0x35e   : > { %v9138_v63 = vpop.permute.xlu0 %1776 }
 0x35f   : > { %v1787_v62 = vpop.permute.xlu1 %1786  ;;  %v1917_v1 = vld [vmem:[#allocation2 + $0x6c] sm:$0x1] }
 0x360   : > { %v1909_v51 = vsel %vm8876_vm7, %v1787_v62, %v1908_v20  ;;  %v1932_v29 = vld [vmem:[#allocation2 + $0x80] sm:$0xf]  ;;  %v1517_v20 = vld [vmem:[#allocation2 + $0x1c] sm:$0x1] }
 0x361   : > { %1910 = vst [vmem:[#allocation2 + $0x60] sm:$0xf] %v1909_v51  ;;  %6679 = vmatmul.mubr.msk.bf16.gmra.mrb[8].mxu1 %vm2006_vm9, %v6155_v38  ;;  %v9205_v51 = vcombine.low %v9071_v30, %v9110_v13 }
 0x362   : > { %v9147_v32 = vpop.permute.xlu0 %1784 }
 0x363   : > { %v1795_v12 = vpop.permute.xlu1 %1794  ;;  %v1929_v46 = vld [vmem:[#allocation2 + $0x7c] sm:$0x1] }
 0x364   : > { %v1921_v37 = vsel %vm8876_vm7, %v1795_v12, %v1920_v49  ;;  %v9158_v36 = vld [vmem:[#allocation2 + $0x50] sm:$0xf]  ;;  %v9210_v49 = vld [vmem:[#allocation11 + $0x8] sm:$0xff]  }
 0x365   : > { %1922 = vst [vmem:[#allocation2 + $0x70] sm:$0xf] %v1921_v37  ;;  %v6156_v34 = vcombine.low %v9156_v33, %v9158_v36 }
 0x366   : > { %v1793_v24 = vpop.permute.xlu0 %1792 }
 0x367   : > { %v1918_v22 = vsel %vm9152_vm6, %v1793_v24, %v1917_v1  ;;  %v1803_v47 = vpop.permute.xlu1 %1802  ;;  %6682 = vmatprep.mubr.msk.bf16.mxu1 %vm2006_vm9, %v6156_v34  ;;  %v1213_v34 = vld [vmem:[#allocation2 + $0x4c] sm:$0x1] }
 0x368   : > { %1919 = vst [vmem:[#allocation2 + $0x6c] sm:$0x1] %v1918_v22  ;;  %v1933_v10 = vsel %vm8876_vm7, %v1803_v47, %v1932_v29  ;;  %v9169_v48 = vld [vmem:[#allocation2 + $0x60] sm:$0xf]  ;;  %v9234_v22 = vcombine.low %v9107_v7, %v9140_v11  ;;  %v1529_v29 = vld [vmem:[#allocation2 + $0x2c] sm:$0x1] }
 0x369   : > { %1934 = vst [vmem:[#allocation2 + $0x80] sm:$0xf] %v1933_v10  ;;  %v6157_v16 = vcombine.low %v9167_v45, %v9169_v48  ;;  %vm3183_vm7 = vcmask 1046532  }
 0x36a   : > { %v1801_v6 = vpop.permute.xlu0 %1800  ;;  %vm9557_vm5 = vmor %vm3182_vm2, %vm3183_vm7 }
 0x36b   : > { %v1930_v40 = vsel %vm9152_vm6, %v1801_v6, %v1929_v46  ;;  %v1069_v25 = vpop.permute.xlu1 %1068  ;;  %6683 = vmatmul.mubr.msk.bf16.gmra.mrb[12].mxu1 %vm2006_vm9, %v6157_v16  ;;  %v9256_v46 = vcombine.low %v9158_v36, %v9167_v45 }
 0x36c   : > { %1931 = vst [vmem:[#allocation2 + $0x7c] sm:$0x1] %v1930_v40  ;;  %v1172_v27 = vsel %vm8974_vm8, %v1069_v25, %v1171_v28  ;;  %v9180_v57 = vld [vmem:[#allocation2 + $0x70] sm:$0xf] }
 0x36d   : > { %1173 = vst [vmem:[#allocation2 + $0x14] sm:$0x1] %v1172_v27  ;;  %v6158_v61 = vcombine.low %v9178_v8, %v9180_v57 }
 0x36f   : > { %v1085_v52 = vpop.permute.xlu1 %1084  ;;  %6686 = vmatprep.mubr.msk.bf16.mxu1 %vm2006_vm9, %v6158_v61 }
 0x370   : > { %v1196_v4 = vsel %vm8974_vm8, %v1085_v52, %v1195_v2  ;;  %v9189_v15 = vld [vmem:[#allocation2 + $0x80] sm:$0xf] }
 0x371   : > { %1197 = vst [vmem:[#allocation2 + $0x34] sm:$0x1] %v1196_v4  ;;  %v6159_v0 = vcombine.low %v9187_v54, %v9189_v15 }
 0x373   : > { %v1405_v14 = vpop.permute.xlu1 %1404  ;;  %6687 = vmatmul.mubr.msk.bf16.gmra.mrb[16].mxu1 %vm2006_vm9, %v6159_v0  ;;  %v1547_v0 = vld [vmem:[#allocation2 + $0x44] sm:$0x1] }
 0x374   : > { %v1511_v18 = vld [vmem:[#allocation2 + $0x14] sm:$0x1]  ;;  %v1506_v58 = vsel %vm9101_vm11, %v1405_v14, %v1505_v26  ;;  %6692 = vmatprep.mubr.msk.bf16.mxu1 %vm2006_vm9, %v6169_v19  ;;  %v9294_v14 = vld [vmem:[#allocation11 + $0x20] sm:$0xff]   ;;  %v2392_v26 = vld [vmem:[#allocation2] sm:$0xf] }
 0x375   : > { %v1512_v59 = vsel %vm9101_vm11, %v9001_v21, %v1511_v18  ;;  %1507 = vst [vmem:[#allocation2 + $0xc] sm:$0x1] %v1506_v58  ;;  %v9214_v21 = vcombine.low %v9112_v31, %v9118_v50  ;;  %v1225_v31 = vld [vmem:[#allocation2 + $0x5c] sm:$0x1]  ;;  %v2402_v18 = vld [vmem:[#allocation2 + $0x28] sm:$0xf] }
 0x376   : > { %1513 = vst [vmem:[#allocation2 + $0x14] sm:$0x1] %v1512_v59  ;;  %v1183_v59 = vld [vmem:[#allocation2 + $0x24] sm:$0x1] }
 0x377   : > { %v1413_v62 = vpop.permute.xlu1 %1412 }
 0x378   : > { %v1535_v38 = vld [vmem:[#allocation2 + $0x34] sm:$0x1]  ;;  %v1518_v42 = vsel %vm9101_vm11, %v1413_v62, %v1517_v20  ;;  %v2398_v62 = vld [vmem:[#allocation2 + $0x18] sm:$0xf] }
 0x379   : > { %v1536_v12 = vsel %vm9101_vm11, %v9026_v60, %v1535_v38  ;;  %1519 = vst [vmem:[#allocation2 + $0x1c] sm:$0x1] %v1518_v42  ;;  %v2406_v20 = vld [vmem:[#allocation2 + $0x38] sm:$0xf] }
 0x37a   : > { %1537 = vst [vmem:[#allocation2 + $0x34] sm:$0x1] %v1536_v12  ;;  %v2410_v12 = vld [vmem:[#allocation2 + $0x48] sm:$0xf] }
 0x37b   : > { %v1097_v37 = vpop.permute.xlu1 %1096  ;;  %6693 = vmatmul.mubr.msk.bf16.vlgmr.msra.gmra.mrb[4].mxu1 %vm2006_vm9, %v9205_v51 }
 0x37c   : > { %v1845_v24 = vld [vmem:[#allocation2 + $0xc] sm:$0x1]  ;;  %v1214_v30 = vsel %vm8974_vm8, %v1097_v37, %v1213_v34  ;;  %6709 = vmatpush3.bf16.msra.mxu1 %v9120_v39  ;;  %6696 = vmatprep.mubr.msk.bf16.mxu1 %vm2006_vm9, %v9214_v21  ;;  %v2432_v37 = vshrl.u32 %v2392_v26, 16  ;;  %v2435_v34 = vshll.u32 %v2392_v26, 16 }
 0x37d   : > { %v1846_v60 = vsel %vm9152_vm6, %v9034_v3, %v1845_v24  ;;  %1215 = vst [vmem:[#allocation2 + $0x4c] sm:$0x1] %v1214_v30  ;;  %6726 = vmatprep.subr.bf16.mxu1 %v9210_v49  ;;  %v9238_v3 = vcombine.low %v9134_v43, %v9156_v33  ;;  %v1541_v43 = vld [vmem:[#allocation2 + $0x3c] sm:$0x1]  ;;  %v1851_v25 = vld [vmem:[#allocation2 + $0x14] sm:$0x1] }
 0x37e   : > { %1847 = vst [vmem:[#allocation2 + $0xc] sm:$0x1] %v1846_v60  ;;  %v2502_v24 = vshrl.u32 %v2402_v18, 16  ;;  %v2474_v30 = vshrl.u32 %v2398_v62, 16  ;;  %v2477_v60 = vshll.u32 %v2398_v62, 16 }
 0x37f   : > { %v1105_v13 = vpop.permute.xlu1 %1104 }
 0x380   : > { %v1857_v50 = vld [vmem:[#allocation2 + $0x1c] sm:$0x1]  ;;  %v1226_v1 = vsel %vm8974_vm8, %v1105_v13, %v1225_v31  ;;  %v2530_v13 = vshrl.u32 %v2406_v20, 16  ;;  %v2533_v31 = vshll.u32 %v2406_v20, 16 }
 0x381   : > { %v1858_v39 = vsel %vm9152_vm6, %v9042_v17, %v1857_v50  ;;  %1227 = vst [vmem:[#allocation2 + $0x5c] sm:$0x1] %v1226_v1  ;;  %v2561_v1 = vshll.u32 %v2410_v12, 16 }
 0x382   : > { %1859 = vst [vmem:[#allocation2 + $0x1c] sm:$0x1] %v1858_v39 }
 0x383   : > { %v1421_v47 = vpop.permute.xlu1 %1420  ;;  %6697 = vmatmul.mubr.msk.bf16.gmra.mrb[8].mxu1 %vm2006_vm9, %v9234_v22 }
 0x384   : > { %v1553_v10 = vld [vmem:[#allocation2 + $0x4c] sm:$0x1]  ;;  %v1530_v16 = vsel %vm9101_vm11, %v1421_v47, %v1529_v29  ;;  %6700 = vmatprep.mubr.msk.bf16.mxu1 %vm2006_vm9, %v9238_v3  ;;  %v2434_v47 = vrot.slane %v2432_v37, 4  ;;  %v2437_v29 = vrot.slane %v2435_v34, 5 }
 0x385   : > { %v1554_v17 = vsel %vm9101_vm11, %v9067_v53, %v1553_v10  ;;  %1531 = vst [vmem:[#allocation2 + $0x2c] sm:$0x1] %v1530_v16  ;;  %v9260_v53 = vcombine.low %v9169_v48, %v9178_v8  ;;  %v1243_v8 = vld [vmem:[#allocation2 + $0x74] sm:$0x1]  ;;  %v2504_v10 = vrot.slane %v2502_v24, 4 }
 0x386   : > { %1555 = vst [vmem:[#allocation2 + $0x4c] sm:$0x1] %v1554_v17  ;;  %v9306_v17 = vld [vmem:[#allocation2 + $0x4] sm:$0x1] }
 0x387   : > { %v1429_v7 = vpop.permute.xlu1 %1428 }
 0x388   : > { %v1565_v11 = vld [vmem:[#allocation2 + $0x5c] sm:$0x1]  ;;  %v1542_v33 = vsel %vm9101_vm11, %v1429_v7, %v1541_v43  ;;  %v2476_v7 = vrot.slane %v2474_v30, 4  ;;  %v2479_v43 = vrot.slane %v2477_v60, 5  ;;  %v2404_v60 = vld [vmem:[#allocation2 + $0x30] sm:$0xf] }
 0x389   : > { %v1566_v6 = vsel %vm9101_vm11, %v9080_v35, %v1565_v11  ;;  %1543 = vst [vmem:[#allocation2 + $0x3c] sm:$0x1] %v1542_v33  ;;  %v2532_v11 = vrot.slane %v2530_v13, 4  ;;  %v2535_v33 = vrot.slane %v2533_v31, 5  ;;  %v2418_v13 = vld [vmem:[#allocation2 + $0x68] sm:$0xf] }
 0x38a   : > { %1567 = vst [vmem:[#allocation2 + $0x5c] sm:$0x1] %v1566_v6 }
 0x38b   : > { %v1749_v40 = vpop.permute.xlu1 %1748  ;;  %6701 = vmatmul.mubr.msk.bf16.gmra.mrb[12].mxu1 %vm2006_vm9, %v9256_v46 }
 0x38c   : > { %v1869_v28 = vld [vmem:[#allocation2 + $0x2c] sm:$0x1]  ;;  %v1852_v27 = vsel %vm9152_vm6, %v1749_v40, %v1851_v25  ;;  %6704 = vmatprep.mubr.msk.bf16.mxu1 %vm2006_vm9, %v9260_v53  ;;  %v1875_v40 = vld [vmem:[#allocation2 + $0x34] sm:$0x1]  ;;  %v2396_v25 = vld [vmem:[#allocation2 + $0x10] sm:$0xf] }
 0x38d   : > { %v1893_v35 = vld [vmem:[#allocation2 + $0x4c] sm:$0x1]  ;;  %v1870_v36 = vsel %vm9152_vm6, %v9088_v41, %v1869_v28  ;;  %1853 = vst [vmem:[#allocation2 + $0x14] sm:$0x1] %v1852_v27  ;;  %v9281_v41 = vcombine.low %v9180_v57, %v9187_v54  ;;  %v1559_v57 = vld [vmem:[#allocation2 + $0x54] sm:$0x1] }
 0x38e   : > { %v1894_v45 = vsel %vm9152_vm6, %v9138_v63, %v1893_v35  ;;  %1871 = vst [vmem:[#allocation2 + $0x2c] sm:$0x1] %v1870_v36  ;;  %v2563_v27 = vrot.slane %v2561_v1, 5  ;;  %v9347_v1 = vld [vmem:[#allocation2 + $0x1c] sm:$0x1] }
 0x38f   : > { %1895 = vst [vmem:[#allocation2 + $0x4c] sm:$0x1] %v1894_v45  ;;  %v1117_v48 = vpop.permute.xlu1 %1116  ;;  %v9314_v45 = vld [vmem:[#allocation2 + $0xc] sm:$0x1] }
 0x390   : > { %v1881_v61 = vld [vmem:[#allocation2 + $0x3c] sm:$0x1]  ;;  %v1244_v52 = vsel %vm8974_vm8, %v1117_v48, %v1243_v8 }
 0x391   : > { %v1905_v2 = vld [vmem:[#allocation2 + $0x5c] sm:$0x1]  ;;  %v1882_v23 = vsel %vm9152_vm6, %v9096_v55, %v1881_v61  ;;  %1245 = vst [vmem:[#allocation2 + $0x74] sm:$0x1] %v1244_v52  ;;  %v2438_v61 = vor.u32 %v2437_v29, %v2434_v47 }
 0x392   : > { %v1906_v63 = vsel %vm9152_vm6, %v9147_v32, %v1905_v2  ;;  %1883 = vst [vmem:[#allocation2 + $0x3c] sm:$0x1] %v1882_v23  ;;  %v2394_v32 = vld [vmem:[#allocation2 + $0x8] sm:$0xf]  ;;  %v2460_v2 = vshrl.u32 %v2396_v25, 16  ;;  %v2463_v23 = vshll.u32 %v2396_v25, 16 }
 0x393   : > { %1907 = vst [vmem:[#allocation2 + $0x5c] sm:$0x1] %v1906_v63  ;;  %v1433_v4 = vpop.permute.xlu1 %1432  ;;  %6705 = vmatmul.mubr.msk.bf16.gmra.mrb[16].mxu1 %vm2006_vm9, %v9281_v41  ;;  %v2446_v42 = vshrl.u32 %v2394_v32, 16  ;;  %v2480_v63 = vor.u32 %v2479_v43, %v2476_v7 }
 0x394   : > { %v1548_v19 = vsel %vm9101_vm11, %v1433_v4, %v1547_v0  ;;  %6710 = vmatprep.mubr.msk.bf16.mxu1 %vm2006_vm9, %v9205_v51  ;;  %v2449_v51 = vshll.u32 %v2394_v32, 16  ;;  %v2536_v0 = vor.u32 %v2535_v33, %v2532_v11  ;;  %v2400_v32 = vld [vmem:[#allocation2 + $0x20] sm:$0xf]  ;;  %v2516_v11 = vshrl.u32 %v2404_v60, 16 }
 0x395   : > { %1549 = vst [vmem:[#allocation2 + $0x44] sm:$0x1] %v1548_v19  ;;  %v2448_v39 = vrot.slane %v2446_v42, 4  ;;  %v9325_v62 = vrot.slane %v2480_v63, 4  ;;  %v2491_v30 = vshll.u32 %v2400_v32, 16 }
 0x396   : > { %v9364_v25 = vld [vmem:[#allocation2 + $0x2c] sm:$0x1] }
 0x397   : > { %v1441_v55 = vpop.permute.xlu1 %1440 }
 0x398   : > { %v1560_v54 = vsel %vm9101_vm11, %v1441_v55, %v1559_v57  ;;  %v2414_v55 = vld [vmem:[#allocation2 + $0x58] sm:$0xf]  ;;  %v2439_v57 = vrot.slane %v2438_v61, 4  ;;  %v1583_v7 = vld [vmem:[#allocation2 + $0x74] sm:$0x1] }
 0x399   : > { %1561 = vst [vmem:[#allocation2 + $0x54] sm:$0x1] %v1560_v54  ;;  %v2586_v20 = vshrl.u32 %v2414_v55, 16  ;;  %v2589_v34 = vshll.u32 %v2414_v55, 16  ;;  %v2518_v55 = vrot.slane %v2516_v11, 4 }
 0x39b   : > { %v1077_v58 = vpop.permute.xlu1 %1076  ;;  %6711 = vmatmul.mubr.msk.bf16.vlgmr.msra.gmra.mrb[4].mxu1 %vm2006_vm9, %v9214_v21  ;;  %v2505_v21 = vshll.u32 %v2402_v18, 16  ;;  %v1231_v18 = vld [vmem:[#allocation2 + $0x64] sm:$0x1]  ;;  %v9359_v33 = vrot.slane %v2589_v34, 5 }
 0x39c   : > { %v1184_v38 = vsel %vm8974_vm8, %v1077_v58, %v1183_v59  ;;  %6727 = vmatpush3.bf16.msra.mxu1 %v9210_v49  ;;  %6714 = vmatprep.mubr.msk.bf16.mxu1 %vm2006_vm9, %v9234_v22  ;;  %v2558_v49 = vshrl.u32 %v2410_v12, 16  ;;  %v2451_v22 = vrot.slane %v2449_v51, 5  ;;  %v2462_v58 = vrot.slane %v2460_v2, 4  ;;  %v9329_v51 = vld [vmem:[#allocation2 + $0x14] sm:$0x1] }
 0x39d   : > { %1185 = vst [vmem:[#allocation2 + $0x24] sm:$0x1] %v1184_v38  ;;  %6744 = vmatprep.subr.bf16.mxu1 %v9294_v14  ;;  %v2507_v16 = vrot.slane %v2505_v21, 5  ;;  %v2465_v59 = vrot.slane %v2463_v23, 5  ;;  %v9331_v12 = vrot.slane %v2536_v0, 4  ;;  %v2469_v29 = vshll.u32 %v9329_v51, 16 }
 0x39e   : > { %v2560_v28 = vrot.slane %v2558_v49, 4  ;;  %v2452_v48 = vor.u32 %v2451_v22, %v2448_v39  ;;  %v2408_v39 = vld [vmem:[#allocation2 + $0x40] sm:$0xf]  ;;  %v1955_v22 = vld [vmem:[#allocation2 + $0x88] sm:$0xf]  ;;  %v2617_v23 = vshll.u32 %v2418_v13, 16 }
 0x39f   : > { %v9304_v50 = vpop.permute.xlu1 %1756  ;;  %v2508_v52 = vor.u32 %v2507_v16, %v2504_v10  ;;  %v2466_v47 = vor.u32 %v2465_v59, %v2462_v58  ;;  %v9353_v10 = vrot.slane %v2586_v20, 4  ;;  %v2412_v2 = vld [vmem:[#allocation2 + $0x50] sm:$0xf]  ;;  %v2511_v0 = vshll.u32 %v9364_v25, 16  ;;  %v9378_v59 = vld [vmem:[#allocation2 + $0x3c] sm:$0x1] }
 0x3a0   : > { %v2564_v19 = vor.u32 %v2563_v27, %v2560_v28  ;;  %v2453_v54 = vrot.slane %v2452_v48, 4  ;;  %v2519_v28 = vshll.u32 %v2404_v60, 16  ;;  %v2544_v27 = vshrl.u32 %v2408_v39, 16 }
 0x3a1   : > { %v9323_v26 = vrot.slane %v2508_v52, 4  ;;  %v2493_v48 = vrot.slane %v2491_v30, 5  ;;  %v2471_v52 = vrot.slane %v2469_v29, 5  ;;  %v2575_v30 = vshll.u32 %v2412_v2, 16 }
 0x3a2   : > { %v9333_v37 = vrot.slane %v2564_v19, 4  ;;  %v2539_v29 = vshll.u32 %v9378_v59, 16 }
 0x3a3   : > { %v1765_v6 = vpop.permute.xlu1 %1764  ;;  %6715 = vmatmul.mubr.msk.bf16.gmra.mrb[8].mxu1 %vm2006_vm9, %v9238_v3  ;;  %v2441_v3 = vshll.u32 %v9306_v17, 16 }
 0x3a4   : > { %v1523_v35 = vld [vmem:[#allocation2 + $0x24] sm:$0x1]  ;;  %v1876_v36 = vsel %vm9152_vm6, %v1765_v6, %v1875_v40  ;;  %6718 = vmatprep.mubr.msk.bf16.mxu1 %vm2006_vm9, %v9256_v46  ;;  %v2455_v46 = vshll.u32 %v9314_v45, 16  ;;  %v2614_v6 = vshrl.u32 %v2418_v13, 16  ;;  %v2483_v40 = vshll.u32 %v9347_v1, 16 }
 0x3a5   : > { %v1524_v8 = vsel %vm9101_vm11, %v9020_v44, %v1523_v35  ;;  %1877 = vst [vmem:[#allocation2 + $0x34] sm:$0x1] %v1876_v36  ;;  %v2443_v44 = vrot.slane %v2441_v3, 5  ;;  %v6186_v35 = vcombine.low %v9189_v15, %v1955_v22  ;;  %v2467_v3 = vrot.slane %v2466_v47, 4 }
 0x3a6   : > { %1525 = vst [vmem:[#allocation2 + $0x24] sm:$0x1] %v1524_v8  ;;  %v2457_v42 = vrot.slane %v2455_v46, 5  ;;  %v2547_v8 = vshll.u32 %v2408_v39, 16  ;;  %v1887_v46 = vld [vmem:[#allocation2 + $0x44] sm:$0x1] }
 0x3a7   : > { %v9320_v4 = vpop.permute.xlu1 %1448  ;;  %v2444_v49 = vsel %vm9341_vm15, %v2439_v57, %v2443_v44  ;;  %v2485_v44 = vrot.slane %v2483_v40, 5  ;;  %v9392_v39 = vrot.slane %v2617_v23, 5  ;;  %v9407_v40 = vld [vmem:[#allocation11 + $0x38] sm:$0xff]   ;;  %v2541_v23 = vrot.slane %v2539_v29, 5 }
 0x3a8   : > { %v9357_v43 = vsel %vm9341_vm15, %v2453_v54, %v2457_v42  ;;  %v2521_v54 = vrot.slane %v2519_v28, 5  ;;  %v2549_v20 = vrot.slane %v2547_v8, 5  ;;  %v9382_v42 = vsel %vm9341_vm15, %v2467_v3, %v2471_v52 }
 0x3a9   : > { %v6196_v61 = vcombine.low %v2444_v49, %v9357_v43  ;;  %v9390_v49 = vrot.slane %v2614_v6, 4  ;;  %v9399_v22 = vsel %vm9341_vm15, %v9325_v62, %v2485_v44  ;;  %v2577_v62 = vrot.slane %v2575_v30, 5 }
 0x3aa   : > { %v2522_v47 = vor.u32 %v2521_v54, %v2518_v55 }
 0x3ab   : > { %v1109_v38 = vpop.permute.xlu1 %1108  ;;  %6719 = vmatmul.mubr.msk.bf16.gmra.mrb[12].mxu1 %vm2006_vm9, %v9260_v53  ;;  %v2488_v53 = vshrl.u32 %v2400_v32, 16  ;;  %v2546_v32 = vrot.slane %v2544_v27, 4 }
 0x3ac   : > { %v1232_v24 = vsel %vm8974_vm8, %v1109_v38, %v1231_v18  ;;  %6722 = vmatprep.mubr.msk.bf16.mxu1 %vm2006_vm9, %v9281_v41  ;;  %v9370_v19 = vld [vmem:[#allocation2 + $0x34] sm:$0x1]  ;;  %v2572_v38 = vshrl.u32 %v2412_v2, 16  ;;  %v2523_v2 = vrot.slane %v2522_v47, 4 }
 0x3ad   : > { %v1863_v31 = vld [vmem:[#allocation2 + $0x24] sm:$0x1]  ;;  %1233 = vst [vmem:[#allocation2 + $0x64] sm:$0x1] %v1232_v24  ;;  %v2490_v36 = vrot.slane %v2488_v53, 4  ;;  %v2525_v24 = vshll.u32 %v9370_v19, 16  ;;  %v2550_v27 = vor.u32 %v2549_v20, %v2546_v32 }
 0x3ae   : > { %v1864_v41 = vsel %vm9152_vm6, %v9304_v50, %v1863_v31  ;;  %v9387_v53 = vld [vmem:[#allocation2 + $0x4c] sm:$0x1]  ;;  %v2513_v31 = vrot.slane %v2511_v0, 5  ;;  %v2422_v32 = vld [vmem:[#allocation2 + $0x78] sm:$0xf] }
 0x3af   : > { %1865 = vst [vmem:[#allocation2 + $0x24] sm:$0x1] %v1864_v41  ;;  %v1457_v16 = vpop.permute.xlu1 %1456  ;;  %v2494_v58 = vor.u32 %v2493_v48, %v2490_v36  ;;  %v2527_v28 = vrot.slane %v2525_v24, 5  ;;  %v2551_v44 = vrot.slane %v2550_v27, 4  ;;  %v2645_v27 = vshll.u32 %v2422_v32, 16 }
 0x3b0   : > { %v1584_v50 = vsel %vm9101_vm11, %v1457_v16, %v1583_v7  ;;  %v2416_v16 = vld [vmem:[#allocation2 + $0x60] sm:$0xf]  ;;  %v9404_v7 = vcombine.low %v9382_v42, %v9399_v22  ;;  %v9418_v8 = vsel %vm9341_vm15, %v9323_v26, %v2513_v31 }
 0x3b1   : > { %1585 = vst [vmem:[#allocation2 + $0x74] sm:$0x1] %v1584_v50  ;;  %v2495_v11 = vrot.slane %v2494_v58, 4  ;;  %v2567_v50 = vshll.u32 %v9387_v53, 16  ;;  %v2603_v3 = vshll.u32 %v2416_v16, 16  ;;  %v9437_v26 = vsel %vm9341_vm15, %v2523_v2, %v2527_v28 }
 0x3b2   : > { %v2642_v28 = vshrl.u32 %v2422_v32, 16 }
 0x3b3   : > { %v1773_v63 = vpop.permute.xlu1 %1772  ;;  %6723 = vmatmul.mubr.msk.bf16.gmra.mrb[16].mxu1 %vm2006_vm9, %v6186_v35  ;;  %v2574_v35 = vrot.slane %v2572_v38, 4  ;;  %v2605_v24 = vrot.slane %v2603_v3, 5 }
 0x3b4   : > { %v1571_v57 = vld [vmem:[#allocation2 + $0x64] sm:$0x1]  ;;  %v1888_v15 = vsel %vm9152_vm6, %v1773_v63, %v1887_v46  ;;  %6728 = vmatprep.mubr.msk.bf16.mxu1 %vm2006_vm9, %v6196_v61  ;;  %v2600_v61 = vshrl.u32 %v2416_v16, 16  ;;  %v2420_v46 = vld [vmem:[#allocation2 + $0x70] sm:$0xf] }
 0x3b5   : > { %v1572_v18 = vsel %vm9101_vm11, %v9320_v4, %v1571_v57  ;;  %1889 = vst [vmem:[#allocation2 + $0x44] sm:$0x1] %v1888_v15  ;;  %v1899_v4 = vld [vmem:[#allocation2 + $0x54] sm:$0x1]  ;;  %v2569_v57 = vrot.slane %v2567_v50, 5  ;;  %v2578_v54 = vor.u32 %v2577_v62, %v2574_v35  ;;  %v2628_v30 = vshrl.u32 %v2420_v46, 16 }
 0x3b6   : > { %1573 = vst [vmem:[#allocation2 + $0x64] sm:$0x1] %v1572_v18  ;;  %v9384_v34 = vld [vmem:[#allocation2 + $0x24] sm:$0x1]  ;;  %v9428_v15 = vld [vmem:[#allocation2 + $0x5c] sm:$0x1]  ;;  %v2592_v50 = vor.u32 %v9359_v33, %v9353_v10 }
 0x3b7   : > { %v1781_v60 = vpop.permute.xlu1 %1780  ;;  %v2497_v13 = vshll.u32 %v9384_v34, 16  ;;  %v2602_v38 = vrot.slane %v2600_v61, 4  ;;  %v2595_v31 = vshll.u32 %v9428_v15, 16  ;;  %v2631_v47 = vshll.u32 %v2420_v46, 16  ;;  %v1255_v62 = vld [vmem:[#allocation2 + $0x84] sm:$0x1] }
 0x3b8   : > { %v1900_v41 = vsel %vm9152_vm6, %v1781_v60, %v1899_v4  ;;  %v1923_v58 = vld [vmem:[#allocation2 + $0x74] sm:$0x1]  ;;  %v9444_v4 = vsel %vm9341_vm15, %v9331_v12, %v2541_v23  ;;  %v9462_v12 = vsel %vm9341_vm15, %v9333_v37, %v2569_v57  ;;  %v2620_v37 = vor.u32 %v9392_v39, %v9390_v49 }
 0x3b9   : > { %1901 = vst [vmem:[#allocation2 + $0x54] sm:$0x1] %v1900_v41  ;;  %v2499_v6 = vrot.slane %v2497_v13, 5  ;;  %v9449_v41 = vld [vmem:[#allocation2 + $0x6c] sm:$0x1]  ;;  %v9453_v29 = vcombine.low %v9437_v26, %v9444_v4  ;;  %v2597_v10 = vrot.slane %v2595_v31, 5  ;;  %v2606_v46 = vor.u32 %v2605_v24, %v2602_v38  ;;  %v1465_v31 = vpop.permute.xlu0 %1464 }
 0x3ba   : > { %v2623_v3 = vshll.u32 %v9449_v41, 16  ;;  %v2630_v33 = vrot.slane %v2628_v30, 4  ;;  %v2633_v23 = vrot.slane %v2631_v47, 5  ;;  %v2593_v57 = vrot.slane %v2592_v50, 4 }
 0x3bb   : > { %v1789_v36 = vpop.permute.xlu1 %1788  ;;  %6729 = vmatmul.mubr.msk.bf16.vlgmr.msra.gmra.mrb[4].mxu1 %vm2006_vm9, %v9404_v7  ;;  %v9413_v48 = vsel %vm9341_vm15, %v2495_v11, %v2499_v6  ;;  %v2644_v39 = vrot.slane %v2642_v28, 4  ;;  %v2621_v32 = vrot.slane %v2620_v37, 4  ;;  %v2607_v24 = vrot.slane %v2606_v46, 4 }
 0x3bc   : > { %6745 = vmatpush3.bf16.msra.mxu1 %v9294_v14  ;;  %v9423_v52 = vcombine.low %v9413_v48, %v9418_v8  ;;  %v9425_v63 = vld [vmem:[#allocation2 + $0x44] sm:$0x1] }
 0x3bd   : > { %v1911_v0 = vld [vmem:[#allocation2 + $0x64] sm:$0x1]  ;;  %v2553_v55 = vshll.u32 %v9425_v63, 16  ;;  %6762 = vmatprep.subr.bf16.mxu1 %v9407_v40 }
 0x3be   : > { %v1912_v14 = vsel %vm9152_vm6, %v1789_v36, %v1911_v0  ;;  %6732 = vmatprep.mubr.msk.bf16.mxu1 %vm2006_vm9, %v9423_v52  ;;  %v2579_v36 = vrot.slane %v2578_v54, 4  ;;  %v9480_v0 = vld [vmem:[#allocation2 + $0x7c] sm:$0x1]  ;;  %v2598_v54 = vsel %vm9341_vm15, %v2593_v57, %v2597_v10  ;;  %v6214_v57 = vcombine.low %v9399_v22, %v9413_v48 }
 0x3bf   : > { %1913 = vst [vmem:[#allocation2 + $0x64] sm:$0x1] %v1912_v14  ;;  %v1797_v18 = vpop.permute.xlu1 %1796  ;;  %v2555_v20 = vrot.slane %v2553_v55, 5  ;;  %v2647_v14 = vrot.slane %v2645_v27, 5 }
 0x3c0   : > { %v1924_v60 = vsel %vm9152_vm6, %v1797_v18, %v1923_v58  ;;  %v9446_v13 = vld [vmem:[#allocation2 + $0x54] sm:$0x1]  ;;  %v2634_v58 = vor.u32 %v2633_v23, %v2630_v33  ;;  %v6213_v33 = vcombine.low %v9357_v43, %v9382_v42  ;;  %v2424_v43 = vld [vmem:[#allocation2 + $0x80] sm:$0xf] }
 0x3c1   : > { %1925 = vst [vmem:[#allocation2 + $0x74] sm:$0x1] %v1924_v60  ;;  %v9457_v16 = vsel %vm9341_vm15, %v2551_v44, %v2555_v20  ;;  %v2581_v11 = vshll.u32 %v9446_v13, 16  ;;  %v2625_v44 = vrot.slane %v2623_v3, 5  ;;  %v2651_v20 = vshll.u32 %v9480_v0, 16 }
 0x3c2   : > { %v9467_v6 = vcombine.low %v9457_v16, %v9462_v12  ;;  %v2648_v47 = vor.u32 %v2647_v14, %v2644_v39  ;;  %v7423_v39 = vld [vmem:[#allocation11 + $0x10] sm:$0xff]   ;;  %v6215_v14 = vcombine.low %v9418_v8, %v9437_v26  ;;  %v2825_v42 = vshrl.u32 %v2424_v43, 16 }
 0x3c3   : > { %v1125_v35 = vpop.permute.xlu1 %1124  ;;  %6733 = vmatmul.mubr.msk.bf16.gmra.mrb[8].mxu1 %vm2006_vm9, %v9453_v29  ;;  %v2583_v61 = vrot.slane %v2581_v11, 5  ;;  %v2626_v50 = vsel %vm9341_vm15, %v2621_v32, %v2625_v44  ;;  %v6216_v9 = vcombine.low %v9444_v4, %v9457_v16 }
 0x3c4   : > { %v1256_v2 = vsel %vm8974_vm8, %v1125_v35, %v1255_v62  ;;  %6736 = vmatprep.mubr.msk.bf16.mxu1 %vm2006_vm9, %v9467_v6  ;;  %v2635_v62 = vrot.slane %v2634_v58, 4  ;;  %v2649_v3 = vrot.slane %v2648_v47, 4  ;;  %v2827_v48 = vrot.slane %v2825_v42, 4  ;;  %v9545_v47 = vld [vmem:[#allocation2 + $0x8c] sm:$0x1] }
 0x3c5   : > { %1257 = vst [vmem:[#allocation2 + $0x84] sm:$0x1] %v1256_v2  ;;  %v2584_v55 = vsel %vm9341_vm15, %v2579_v36, %v2583_v61  ;;  %v2653_v36 = vrot.slane %v2651_v20, 5  ;;  %vm3996_vm8 = vcmask 60416  }
 0x3c6   : > { %v9484_v49 = vld [vmem:[#allocation2 + $0x64] sm:$0x1]  ;;  %v9492_v38 = vcombine.low %v2584_v55, %v2598_v54  ;;  %v6217_v44 = vcombine.low %v9462_v12, %v2584_v55  ;;  %vm9688_vm10 = vmand %vm3996_vm8, %vm587_vm4 }
 0x3c7   : > { %v2609_v56 = vshll.u32 %v9484_v49, 16  ;;  %v2654_v2 = vsel %vm9341_vm15, %v2649_v3, %v2653_v36  ;;  %v1805_v23 = vpop.permute.xlu1 %1804  ;;  %v7424_v55 = vld [vmem:[#allocation11 + $0x28] sm:$0xff]   ;;  %v3134_v3 = vld [vmem:[#allocation2 + $0x10] sm:$0xe] }
 0x3c8   : > { %v9489_v18 = vld [vmem:[#allocation2 + $0x74] sm:$0x1] }
 0x3c9   : > { %v2611_v30 = vrot.slane %v2609_v56, 5  ;;  %v2637_v60 = vshll.u32 %v9489_v18, 16  ;;  %v2828_v56 = vshll.u32 %v2424_v43, 16 }
 0x3cb   : > { %6737 = vmatmul.mubr.msk.bf16.gmra.mrb[12].mxu1 %vm2006_vm9, %v9492_v38  ;;  %v2612_v11 = vsel %vm9341_vm15, %v2607_v24, %v2611_v30  ;;  %v2639_v28 = vrot.slane %v2637_v60, 5  ;;  %v2830_v8 = vrot.slane %v2828_v56, 5 }
 0x3cc   : > { %v1595_v27 = vld [vmem:[#allocation2 + $0x84] sm:$0x1]  ;;  %v9501_v35 = vcombine.low %v2612_v11, %v2626_v50  ;;  %v6218_v32 = vcombine.low %v2598_v54, %v2612_v11  ;;  %v2426_v54 = vld [vmem:[#allocation2 + $0x88] sm:$0xf]  ;;  %v3132_v11 = vld [vmem:[#allocation2] sm:$0xe] }
 0x3cd   : > { %v1596_v61 = vsel %vm9101_vm11, %v1465_v31, %v1595_v27  ;;  %v2640_v37 = vsel %vm9341_vm15, %v2635_v62, %v2639_v28  ;;  %v2831_v26 = vor.u32 %v2830_v8, %v2827_v48  ;;  %v2993_v24 = vshrl.u32 %v2426_v54, 16 }
 0x3ce   : > { %1597 = vst [vmem:[#allocation2 + $0x84] sm:$0x1] %v1596_v61  ;;  %6740 = vmatprep.mubr.msk.bf16.mxu1 %vm2006_vm9, %v9501_v35  ;;  %v6203_v10 = vcombine.low %v2640_v37, %v2654_v2  ;;  %v6219_v58 = vcombine.low %v2626_v50, %v2640_v37  ;;  %v2996_v30 = vshll.u32 %v2426_v54, 16  ;;  %v6240_v27 = vrot.slane %v3132_v11, 9 }
 0x3cf   : > { %v2832_v4 = vrot.slane %v2831_v26, 4  ;;  %v2995_v60 = vrot.slane %v2993_v24, 4  ;;  %v3191_v62 = vrot.slane %v9314_v45, 5  ;;  %v3211_v8 = vrot.slane %v9370_v19, 5  ;;  %v3139_v26 = vld [vmem:[#allocation2 + $0x38] sm:$0xe] }
 0x3d0   : > { %v2998_v31 = vrot.slane %v2996_v30, 5  ;;  %v6247_v54 = vrot.slane %v3139_v26, 9  ;;  %v3235_v11 = vrot.slane %v9484_v49, 5  ;;  %v4114_v26 = vld [vmem:[#allocation15] sm:$0xf] }
 0x3d3   : > { %6741 = vmatmul.mubr.msk.bf16.gmra.mrb[16].mxu1 %vm2006_vm9, %v6203_v10 }
 0x3d4   : > { %6746 = vmatprep.mubr.msk.bf16.mxu1 %vm2006_vm9, %v6213_v33  ;;  %v3135_v33 = vld [vmem:[#allocation2 + $0x18] sm:$0xe] }
 0x3d5   : > { %v1935_v5 = vld [vmem:[#allocation2 + $0x84] sm:$0x1] }
 0x3d6   : > { %v1936_v46 = vsel %vm9152_vm6, %v1805_v23, %v1935_v5  ;;  %v3203_v23 = vrot.slane %v9384_v34, 5  ;;  %v6242_v5 = vrot.slane %v3134_v3, 9 }
 0x3d7   : > { %1937 = vst [vmem:[#allocation2 + $0x84] sm:$0x1] %v1936_v46  ;;  %v3199_v46 = vrot.slane %v9347_v1, 5 }
 0x3db   : > { %6747 = vmatmul.mubr.msk.bf16.vlgmr.msra.gmra.mrb[4].mxu1 %vm2006_vm9, %v6214_v57  ;;  %v3137_v57 = vld [vmem:[#allocation2 + $0x28] sm:$0xe] }
 0x3dc   : > { %6763 = vmatpush3.bf16.msra.mxu1 %v9407_v40  ;;  %6750 = vmatprep.mubr.msk.bf16.mxu1 %vm2006_vm9, %v6215_v14  ;;  %v3207_v14 = vrot.slane %v9364_v25, 5  ;;  %v6245_v56 = vrot.slane %v3137_v57, 9 }
 0x3dd   : > { %6780 = vmatprep.subr.bf16.mxu1 %v7423_v39 }
 0x3de   : > { %v9528_v22 = vld [vmem:[#allocation2 + $0x84] sm:$0x1]  ;;  %v9592_v25 = vsel %vm9557_vm5, %v6245_v56, %v3207_v14 }
 0x3df   : > { %v2834_v40 = vshll.u32 %v9528_v22, 16  ;;  %v3422_v56 = vrot.slane %v9528_v22, 5  ;;  %v3149_v22 = vld [vmem:[#allocation2 + $0x88] sm:$0xe] }
 0x3e1   : > { %v2836_v20 = vrot.slane %v2834_v40, 5  ;;  %v3140_v40 = vld [vmem:[#allocation2 + $0x40] sm:$0xe] }
 0x3e3   : > { %6751 = vmatmul.mubr.msk.bf16.gmra.mrb[8].mxu1 %vm2006_vm9, %v6216_v9  ;;  %v2837_v16 = vsel %vm9341_vm15, %v2832_v4, %v2836_v20  ;;  %v3138_v9 = vld [vmem:[#allocation2 + $0x30] sm:$0xe]  ;;  %v3215_v20 = vrot.slane %v9378_v59, 5  ;;  %v3141_v4 = vld [vmem:[#allocation2 + $0x48] sm:$0xe] }
 0x3e4   : > { %6754 = vmatprep.mubr.msk.bf16.mxu1 %vm2006_vm9, %v6217_v44  ;;  %v6220_v12 = vcombine.low %v2654_v2, %v2837_v16  ;;  %v3195_v2 = vrot.slane %v9329_v51, 5  ;;  %v6243_v51 = vrot.slane %v3135_v33, 9  ;;  %v7425_v44 = vld [vmem:[#allocation11 + $0x40] sm:$0xff]  }
 0x3e6   : > { %v9576_v43 = vsel %vm9557_vm5, %v6242_v5, %v3195_v2  ;;  %v9584_v34 = vsel %vm9557_vm5, %v6243_v51, %v3199_v46 }
 0x3e7   : > { %v9588_v1 = vcombine.low %v9576_v43, %v9584_v34 }
 0x3eb   : > { %6755 = vmatmul.mubr.msk.bf16.gmra.mrb[12].mxu1 %vm2006_vm9, %v6218_v32  ;;  %v3219_v32 = vrot.slane %v9425_v63, 5  ;;  %v6249_v63 = vrot.slane %v3141_v4, 9 }
 0x3ec   : > { %6758 = vmatprep.mubr.msk.bf16.mxu1 %vm2006_vm9, %v6219_v58  ;;  %v6246_v58 = vrot.slane %v3138_v9, 9  ;;  %v6291_v9 = vrot.slane %v3149_v22, 9 }
 0x3ee   : > { %v3212_v19 = vsel %vm9557_vm5, %v6246_v58, %v3211_v8  ;;  %v9671_v58 = vld [vmem:[#allocation14] ss:$0 sm:$0xff] }
 0x3f3   : > { %6759 = vmatmul.mubr.msk.bf16.gmra.mrb[16].mxu1 %vm2006_vm9, %v6220_v12  ;;  %v3223_v12 = vrot.slane %v9387_v53, 5  ;;  %v3227_v53 = vrot.slane %v9446_v13, 5 }
 0x3f4   : > { %6764 = vmatprep.mubr.msk.bf16.mxu1 %vm2006_vm9, %v9404_v7  ;;  %v2999_v7 = vor.u32 %v2998_v31, %v2995_v60  ;;  %v3142_v60 = vld [vmem:[#allocation2 + $0x50] sm:$0xe] }
 0x3f5   : > { %v3224_v59 = vsel %vm9557_vm5, %v6249_v63, %v3223_v12 }
 0x3f6   : > { %v3000_v50 = vrot.slane %v2999_v7, 4  ;;  %v3144_v7 = vld [vmem:[#allocation2 + $0x60] sm:$0xe] }
 0x3fb   : > { %6765 = vmatmul.mubr.msk.bf16.vlgmr.msra.gmra.mrb[4].mxu1 %vm2006_vm9, %v9423_v52  ;;  %v3002_v52 = vshll.u32 %v9545_v47, 16 }
 0x3fc   : > { %6781 = vmatpush3.bf16.msra.mxu1 %v7423_v39  ;;  %6768 = vmatprep.mubr.msk.bf16.mxu1 %vm2006_vm9, %v9453_v29  ;;  %v3133_v29 = vld [vmem:[#allocation2 + $0x8] sm:$0xe] }
 0x3fd   : > { %6798 = vmatprep.subr.bf16.mxu1 %v7424_v55  ;;  %v3004_v28 = vrot.slane %v3002_v52, 5  ;;  %v3143_v52 = vld [vmem:[#allocation2 + $0x58] sm:$0xe] }
 0x3ff   : > { %v3005_v36 = vsel %vm9341_vm15, %v3000_v50, %v3004_v28  ;;  %v6250_v50 = vrot.slane %v3142_v60, 9  ;;  %v3231_v28 = vrot.slane %v9428_v15, 5  ;;  %v3146_v15 = vld [vmem:[#allocation2 + $0x70] sm:$0xe] }
 0x400   : > { %v6254_v2 = vrot.slane %v3146_v15, 9 }
 0x403   : > { %6769 = vmatmul.mubr.msk.bf16.gmra.mrb[8].mxu1 %vm2006_vm9, %v9467_v6  ;;  %v3187_v6 = vrot.slane %v9306_v17, 5  ;;  %v6230_v17 = vcombine.low %v2837_v16, %v3005_v36  ;;  %v6248_v16 = vrot.slane %v3140_v40, 9 }
 0x404   : > { %6772 = vmatprep.mubr.msk.bf16.mxu1 %vm2006_vm9, %v9492_v38  ;;  %v6241_v38 = vrot.slane %v3133_v29, 9  ;;  %v3145_v29 = vld [vmem:[#allocation2 + $0x68] sm:$0xe] }
 0x405   : > { %v3188_v37 = vsel %vm9557_vm5, %v6240_v27, %v3187_v6  ;;  %v3220_v24 = vsel %vm9557_vm5, %v6248_v16, %v3219_v32  ;;  %v6252_v27 = vrot.slane %v3144_v7, 9  ;;  %v3239_v6 = vrot.slane %v9449_v41, 5  ;;  %v3147_v41 = vld [vmem:[#allocation2 + $0x78] sm:$0xe] }
 0x406   : > { %v6260_v31 = vcombine.low %v3220_v24, %v3224_v59  ;;  %v6253_v36 = vrot.slane %v3145_v29, 9 }
 0x407   : > { %v3236_v13 = vsel %vm9557_vm5, %v6252_v27, %v3235_v11 }
 0x40b   : > { %6773 = vmatmul.mubr.msk.bf16.gmra.mrb[12].mxu1 %vm2006_vm9, %v9501_v35  ;;  %v9565_v35 = vsel %vm9557_vm5, %v6241_v38, %v3191_v62  ;;  %v3228_v62 = vsel %vm9557_vm5, %v6250_v50, %v3227_v53  ;;  %v6251_v38 = vrot.slane %v3143_v52, 9 }
 0x40c   : > { %6776 = vmatprep.mubr.msk.bf16.mxu1 %vm2006_vm9, %v6203_v10  ;;  %v6256_v45 = vcombine.low %v3188_v37, %v9565_v35  ;;  %v3136_v10 = vld [vmem:[#allocation2 + $0x20] sm:$0xe]  ;;  %v6274_v57 = vcombine.low %v9565_v35, %v9576_v43  ;;  %v6278_v14 = vcombine.low %v3224_v59, %v3228_v62 }
 0x40d   : > { %v6244_v39 = vrot.slane %v3136_v10, 9  ;;  %v3232_v49 = vsel %vm9557_vm5, %v6251_v38, %v3231_v28  ;;  %v3247_v10 = vrot.slane %v9480_v0, 5  ;;  %v6276_v0 = vcombine.low %v9592_v25, %v3212_v19  ;;  %v3148_v43 = vld [vmem:[#allocation2 + $0x80] sm:$0xe] }
 0x40e   : > { %v6261_v37 = vcombine.low %v3228_v62, %v3232_v49  ;;  %v6279_v35 = vcombine.low %v3232_v49, %v3236_v13  ;;  %v9682_v28 = vsel %vm692_vm0, %v4114_v26, 0 }
 0x40f   : > { %v9580_v42 = vsel %vm9557_vm5, %v6244_v39, %v3203_v23  ;;  %v6255_v23 = vrot.slane %v3147_v41, 9 }
 0x410   : > { %v9596_v48 = vcombine.low %v9580_v42, %v9592_v25 }
 0x411   : > { %v3248_v5 = vsel %vm9557_vm5, %v6255_v23, %v3247_v10 }
 0x413   : > { %6777 = vmatmul.mubr.msk.bf16.gmra.mrb[16].mxu1 %vm2006_vm9, %v6230_v17  ;;  %v3240_v17 = vsel %vm9557_vm5, %v6253_v36, %v3239_v6 }
 0x414   : > { %6782 = vmatprep.mubr.msk.bf16.mxu1 %vm2006_vm9, %v6256_v45  ;;  %v6262_v3 = vcombine.low %v3236_v13, %v3240_v17  ;;  %v3243_v45 = vrot.slane %v9489_v18, 5  ;;  %v6275_v18 = vcombine.low %v9584_v34, %v9580_v42  ;;  %v6273_v42 = vrot.slane %v3148_v43, 9  ;;  %v4015_v43 = vld [vmem:[#allocation2 + $0x1c] sm:$0x1] }
 0x416   : > { %v3244_v33 = vsel %vm9557_vm5, %v6254_v2, %v3243_v45  ;;  %v3423_v34 = vsel %vm9557_vm5, %v6273_v42, %v3422_v56 }
 0x417   : > { %v6263_v46 = vcombine.low %v3244_v33, %v3248_v5  ;;  %v6280_v51 = vcombine.low %v3240_v17, %v3244_v33  ;;  %v6281_v25 = vcombine.low %v3248_v5, %v3423_v34 }
 0x41b   : > { %6783 = vmatmul.mubr.msk.bf16.vlgmr.msra.gmra.mrb[4].mxu1 %vm2006_vm9, %v9588_v1 }
 0x41c   : > { %6799 = vmatpush3.bf16.msra.mxu1 %v7424_v55  ;;  %6786 = vmatprep.mubr.msk.bf16.mxu1 %vm2006_vm9, %v9596_v48  ;;  %v3216_v55 = vsel %vm9557_vm5, %v6247_v54, %v3215_v20 }
 0x41d   : > { %6816 = vmatprep.subr.bf16.mxu1 %v7425_v44  ;;  %v6259_v30 = vcombine.low %v3212_v19, %v3216_v55  ;;  %v6277_v39 = vcombine.low %v3216_v55, %v3220_v24 }
 0x423   : > { %6787 = vmatmul.mubr.msk.bf16.gmra.mrb[8].mxu1 %vm2006_vm9, %v6259_v30 }
 0x424   : > { %6790 = vmatprep.mubr.msk.bf16.mxu1 %vm2006_vm9, %v6260_v31 }
 0x42b   : > { %6791 = vmatmul.mubr.msk.bf16.gmra.mrb[12].mxu1 %vm2006_vm9, %v6261_v37 }
 0x42c   : > { %6794 = vmatprep.mubr.msk.bf16.mxu1 %vm2006_vm9, %v6262_v3 }
 0x433   : > { %6795 = vmatmul.mubr.msk.bf16.gmra.mrb[16].mxu1 %vm2006_vm9, %v6263_v46 }
 0x434   : > { %6800 = vmatprep.mubr.msk.bf16.mxu1 %vm2006_vm9, %v6274_v57 }
 0x43b   : > { %6801 = vmatmul.mubr.msk.bf16.vlgmr.msra.gmra.mrb[4].mxu1 %vm2006_vm9, %v6275_v18 }
 0x43c   : > { %6817 = vmatpush3.bf16.msra.mxu1 %v7425_v44  ;;  %6804 = vmatprep.mubr.msk.bf16.mxu1 %vm2006_vm9, %v6276_v0  ;;  %v3582_v44 = vrot.slane %v9545_v47, 5  ;;  %v9669_v47 = vld [vmem:[#allocation12] ss:$0 sm:$0xff] }
 0x443   : > { %6805 = vmatmul.mubr.msk.bf16.gmra.mrb[8].mxu1 %vm2006_vm9, %v6277_v39  ;;  %v4012_v39 = vld [vmem:[#allocation2 + $0x18] sm:$0xf] }
 0x444   : > { %6808 = vmatprep.mubr.msk.bf16.mxu1 %vm2006_vm9, %v6278_v14 }
 0x44b   : > { %6809 = vmatmul.mubr.msk.bf16.gmra.mrb[12].mxu1 %vm2006_vm9, %v6279_v35 }
 0x44c   : > { %6812 = vmatprep.mubr.msk.bf16.mxu1 %vm2006_vm9, %v6280_v51 }
 0x453   : > { %6813 = vmatmul.mubr.msk.bf16.gmra.mrb[16].mxu1 %vm2006_vm9, %v6281_v25 }
 0x454   : > { %6818 = vmatprep.mubr.msk.bf16.mxu1 %vm2006_vm9, %v9588_v1  ;;  %v3583_v1 = vsel %vm9557_vm5, %v6291_v9, %v3582_v44  ;;  %v3998_v9 = vld [vmem:[#allocation2 + $0x8] sm:$0xf]  ;;  %v4003_v44 = vld [vmem:[#allocation2 + $0xc] sm:$0x1] }
 0x455   : > { %v6292_v8 = vcombine.low %v3423_v34, %v3583_v1 }
 0x45b   : > { %6819 = vmatmul.mubr.msk.bf16.vlgmr.msra.gmra.mrb[4].mxu1 %vm2006_vm9, %v9596_v48  ;;  %v4115_v48 = vld [vmem:[#allocation15 + $0xc] sm:$0xf] }
 0x45c   : > { %6822 = vmatprep.mubr.msk.bf16.mxu1 %vm2006_vm9, %v6259_v30  ;;  %7256 = vmatprep.subr.msk.bf16.mxu0 %vm692_vm0, %v4115_v48  ;;  %v4181_v40 = vsel %vm692_vm0, %v4115_v48, 0 }
 0x45d   : > { %6835 = vmatpush3.bf16.msra.mxu0 %v4181_v40 }
 0x45e   : > { %7257 = vmatprep.subr.msk.bf16.mxu0 %vm692_vm0, %v4114_v26  ;;  %v4018_v26 = vld [vmem:[#allocation2 + $0x20] sm:$0xf] }
 0x463   : > { %6823 = vmatmul.mubr.msk.bf16.gmra.mrb[8].mxu1 %vm2006_vm9, %v6260_v31 }
 0x464   : > { %6826 = vmatprep.mubr.msk.bf16.mxu1 %vm2006_vm9, %v6261_v37 }
 0x46b   : > { %6827 = vmatmul.mubr.msk.bf16.gmra.mrb[12].mxu1 %vm2006_vm9, %v6262_v3 }
 0x46c   : > { %6830 = vmatprep.mubr.msk.bf16.mxu1 %vm2006_vm9, %v6263_v46 }
 0x473   : > { %6831 = vmatmul.mubr.msk.bf16.gmra.mrb[16].mxu1 %vm2006_vm9, %v6292_v8  ;;  %vm4001_vm9 = vcmask 57344  }
 0x474   : > { %vm9695_vm11 = vmand %vm4001_vm9, %vm531_vm3 }
 0x52e   : > { %v6820_v32 = vpop.f32.mrb[4].mxu1 }
 0x52f   : > { %v3719_v20 = vmul.f32 %v6820_v32, %v9669_v47  ;;  %v3631_v4 = vpop.f32.mrb[5].mxu1  ;;  %v4021_v32 = vld [vmem:[#allocation2 + $0x24] sm:$0x1] }
 0x530   : > { %v3717_v16 = vmul.f32 %v9669_v47, %v3631_v4  ;;  %v6821_v12 = vpop.f32.mrb[6].mxu1 }
 0x531   : > { %v3742_v19 = vadd.f32 %v9671_v58, %v3719_v20  ;;  %v3720_v54 = vmul.f32 %v6821_v12, %v9669_v47  ;;  %v3634_v24 = vpop.f32.mrb[7].mxu1 }
 0x532   : > { %v3740_v63 = vadd.f32 %v9671_v58, %v3717_v16  ;;  %v3718_v55 = vmul.f32 %v9669_v47, %v3634_v24  ;;  %v4009_v24 = vld [vmem:[#allocation2 + $0x14] sm:$0x1] }
 0x533   : > { %v3758_v30 = vmax.f32 %v3742_v19, 0.0  ;;  %v3743_v59 = vadd.f32 %v9671_v58, %v3720_v54  ;;  %v4006_v54 = vld [vmem:[#allocation2 + $0x10] sm:$0xf] }
 0x534   : > { %v3756_v60 = vmax.f32 %v3740_v63, 0.0  ;;  %v3741_v31 = vadd.f32 %v9671_v58, %v3718_v55 }
 0x535   : > { %v6480_v53 = vpack.c.bf16 %v3758_v30, %v3758_v30  ;;  %v3759_v7 = vmax.f32 %v3743_v59, 0.0 }
 0x536   : > { %v6478_v52 = vpack.c.bf16 %v3756_v60, %v3756_v60  ;;  %v3757_v11 = vmax.f32 %v3741_v31, 0.0  ;;  %v6824_v50 = vpop.f32.mrb[8].mxu1 }
 0x537   : > { %v3853_v29 = vshrl.u32 %v6480_v53, 16  ;;  %v3856_v27 = vshll.u32 %v6480_v53, 16  ;;  %v6481_v6 = vpack.c.bf16 %v3759_v7, %v3759_v7  ;;  %v3723_v62 = vmul.f32 %v6824_v50, %v9669_v47  ;;  %v3647_v38 = vpop.f32.mrb[9].mxu1 }
 0x538   : > { %v3837_v13 = vshrl.u32 %v6478_v52, 16  ;;  %v3840_v36 = vshll.u32 %v6478_v52, 16  ;;  %v6479_v49 = vpack.c.bf16 %v3757_v11, %v3757_v11  ;;  %v3721_v37 = vmul.f32 %v9669_v47, %v3647_v38  ;;  %v6825_v17 = vpop.f32.mrb[10].mxu1 }
 0x539   : > { %v3855_v15 = vrot.slane %v3853_v29, 7  ;;  %v3861_v45 = vshrl.u32 %v6481_v6, 16  ;;  %v3864_v41 = vshll.u32 %v6481_v6, 16  ;;  %v3746_v2 = vadd.f32 %v9671_v58, %v3723_v62  ;;  %v3650_v10 = vpop.f32.mrb[11].mxu1 }
 0x53a   : > { %v3839_v23 = vrot.slane %v3837_v13, 7  ;;  %v3845_v5 = vshrl.u32 %v6479_v49, 16  ;;  %v3848_v46 = vshll.u32 %v6479_v49, 16  ;;  %v3744_v57 = vadd.f32 %v9671_v58, %v3721_v37 }
 0x53b   : > { %v3858_v18 = vor.u32 %v3856_v27, %v3855_v15  ;;  %v3859_v0 = vrot.slane %v3855_v15, 4  ;;  %v3863_v14 = vrot.slane %v3861_v45, 7  ;;  %v3762_v35 = vmax.f32 %v3746_v2, 0.0  ;;  %v4036_v15 = vld [vmem:[#allocation2 + $0x38] sm:$0xf] }
 0x53c   : > { %v3842_v51 = vor.u32 %v3840_v36, %v3839_v23  ;;  %v3843_v56 = vrot.slane %v3839_v23, 4  ;;  %v3847_v42 = vrot.slane %v3845_v5, 7  ;;  %v3760_v34 = vmax.f32 %v3744_v57, 0.0 }
 0x53d   : > { %v4013_v25 = vsel %vm9688_vm10, %v3858_v18, %v4012_v39  ;;  %v4016_v22 = vsel %vm9695_vm11, %v3859_v0, %v4015_v43  ;;  %v3866_v1 = vor.u32 %v3864_v41, %v3863_v14  ;;  %v3867_v8 = vrot.slane %v3863_v14, 4  ;;  %v4024_v18 = vld [vmem:[#allocation2 + $0x28] sm:$0xf]  ;;  %v4027_v0 = vld [vmem:[#allocation2 + $0x2c] sm:$0x1] }
 0x53e   : > { %4017 = vst [vmem:[#allocation2 + $0x1c] sm:$0x1] %v4016_v22  ;;  %4014 = vst [vmem:[#allocation2 + $0x18] sm:$0xf] %v4013_v25  ;;  %v3999_v48 = vsel %vm9688_vm10, %v3842_v51, %v3998_v9  ;;  %v4004_v40 = vsel %vm9695_vm11, %v3843_v56, %v4003_v44  ;;  %v3850_v20 = vor.u32 %v3848_v46, %v3847_v42  ;;  %v3851_v4 = vrot.slane %v3847_v42, 4  ;;  %v6828_v16 = vpop.f32.mrb[12].mxu1 }
 0x53f   : > { %4005 = vst [vmem:[#allocation2 + $0xc] sm:$0x1] %v4004_v40  ;;  %4000 = vst [vmem:[#allocation2 + $0x8] sm:$0xf] %v3999_v48  ;;  %v4019_v12 = vsel %vm9688_vm10, %v3866_v1, %v4018_v26  ;;  %v4022_v19 = vsel %vm9695_vm11, %v3867_v8, %v4021_v32  ;;  %v6484_v63 = vpack.c.bf16 %v3762_v35, %v3762_v35  ;;  %v3663_v30 = vpop.f32.mrb[13].mxu1 }
 0x540   : > { %v6482_v55 = vpack.c.bf16 %v3760_v34, %v3760_v34  ;;  %4023 = vst [vmem:[#allocation2 + $0x24] sm:$0x1] %v4022_v19  ;;  %4020 = vst [vmem:[#allocation2 + $0x20] sm:$0xf] %v4019_v12  ;;  %v4007_v59 = vsel %vm9688_vm10, %v3850_v20, %v4006_v54  ;;  %v4010_v60 = vsel %vm9695_vm11, %v3851_v4, %v4009_v24  ;;  %v6829_v7 = vpop.f32.mrb[14].mxu1 }
 0x541   : > { %v3724_v31 = vmul.f32 %v6825_v17, %v9669_v47  ;;  %v3722_v53 = vmul.f32 %v9669_v47, %v3650_v10  ;;  %4011 = vst [vmem:[#allocation2 + $0x14] sm:$0x1] %v4010_v60  ;;  %4008 = vst [vmem:[#allocation2 + $0x10] sm:$0xf] %v4007_v59  ;;  %v3885_v52 = vshrl.u32 %v6484_v63, 16  ;;  %v3888_v11 = vshll.u32 %v6484_v63, 16 }
 0x542   : > { %v3869_v50 = vshrl.u32 %v6482_v55, 16  ;;  %v3872_v29 = vshll.u32 %v6482_v55, 16  ;;  %v3666_v27 = vpop.f32.mrb[15].mxu1  ;;  %v3727_v38 = vmul.f32 %v6828_v16, %v9669_v47  ;;  %v3725_v13 = vmul.f32 %v9669_v47, %v3663_v30  ;;  %v4039_v39 = vld [vmem:[#allocation2 + $0x3c] sm:$0x1] }
 0x543   : > { %v3747_v6 = vadd.f32 %v9671_v58, %v3724_v31  ;;  %v3745_v62 = vadd.f32 %v9671_v58, %v3722_v53  ;;  %v3887_v36 = vrot.slane %v3885_v52, 7  ;;  %v3728_v37 = vmul.f32 %v6829_v7, %v9669_v47  ;;  %v4030_v63 = vld [vmem:[#allocation2 + $0x30] sm:$0xf]  ;;  %v4042_v7 = vld [vmem:[#allocation2 + $0x40] sm:$0xf] }
 0x544   : > { %v3871_v49 = vrot.slane %v3869_v50, 7  ;;  %v3726_v17 = vmul.f32 %v9669_v47, %v3666_v27  ;;  %v3750_v2 = vadd.f32 %v9671_v58, %v3727_v38  ;;  %v3748_v10 = vadd.f32 %v9671_v58, %v3725_v13  ;;  %v4033_v50 = vld [vmem:[#allocation2 + $0x34] sm:$0x1] }
 0x545   : > { %v3763_v45 = vmax.f32 %v3747_v6, 0.0  ;;  %v3761_v41 = vmax.f32 %v3745_v62, 0.0  ;;  %v3890_v23 = vor.u32 %v3888_v11, %v3887_v36  ;;  %v3891_v5 = vrot.slane %v3887_v36, 4 }
 0x546   : > { %v3874_v46 = vor.u32 %v3872_v29, %v3871_v49  ;;  %v3875_v57 = vrot.slane %v3871_v49, 4  ;;  %v3766_v43 = vmax.f32 %v3750_v2, 0.0  ;;  %v3764_v51 = vmax.f32 %v3748_v10, 0.0  ;;  %v6832_v56 = vpop.f32.mrb[16].mxu1  ;;  %v4045_v29 = vld [vmem:[#allocation2 + $0x44] sm:$0x1] }
 0x547   : > { %v6485_v14 = vpack.c.bf16 %v3763_v45, %v3763_v45  ;;  %v6483_v35 = vpack.c.bf16 %v3761_v41, %v3761_v41  ;;  %v4037_v42 = vsel %vm9688_vm10, %v3890_v23, %v4036_v15  ;;  %v4040_v34 = vsel %vm9695_vm11, %v3891_v5, %v4039_v39  ;;  %v3679_v9 = vpop.f32.mrb[17].mxu1  ;;  %v4048_v2 = vld [vmem:[#allocation2 + $0x48] sm:$0xf]  ;;  %v4060_v10 = vld [vmem:[#allocation2 + $0x58] sm:$0xf] }
 0x548   : > { %v4025_v25 = vsel %vm9688_vm10, %v3874_v46, %v4024_v18  ;;  %v4028_v22 = vsel %vm9695_vm11, %v3875_v57, %v4027_v0  ;;  %4041 = vst [vmem:[#allocation2 + $0x3c] sm:$0x1] %v4040_v34  ;;  %4038 = vst [vmem:[#allocation2 + $0x38] sm:$0xf] %v4037_v42  ;;  %v6833_v40 = vpop.f32.mrb[18].mxu1  ;;  %v6488_v26 = vpack.c.bf16 %v3766_v43, %v3766_v43 }
 0x549   : > { %4029 = vst [vmem:[#allocation2 + $0x2c] sm:$0x1] %v4028_v22  ;;  %4026 = vst [vmem:[#allocation2 + $0x28] sm:$0xf] %v4025_v25  ;;  %v3893_v44 = vshrl.u32 %v6485_v14, 16  ;;  %v3896_v1 = vshll.u32 %v6485_v14, 16  ;;  %v6486_v32 = vpack.c.bf16 %v3764_v51, %v3764_v51  ;;  %v3751_v20 = vadd.f32 %v9671_v58, %v3728_v37 }
 0x54a   : > { %v3877_v8 = vshrl.u32 %v6483_v35, 16  ;;  %v3880_v48 = vshll.u32 %v6483_v35, 16  ;;  %v3749_v4 = vadd.f32 %v9671_v58, %v3726_v17  ;;  %v3682_v16 = vpop.f32.mrb[19].mxu1  ;;  %v3731_v54 = vmul.f32 %v6832_v56, %v9669_v47  ;;  %v4063_v23 = vld [vmem:[#allocation2 + $0x5c] sm:$0x1] }
 0x54b   : > { %v3895_v12 = vrot.slane %v3893_v44, 7  ;;  %v3729_v24 = vmul.f32 %v9669_v47, %v3679_v9  ;;  %v3917_v55 = vshrl.u32 %v6488_v26, 16  ;;  %v3920_v30 = vshll.u32 %v6488_v26, 16  ;;  %v4051_v5 = vld [vmem:[#allocation2 + $0x4c] sm:$0x1] }
 0x54c   : > { %v3879_v19 = vrot.slane %v3877_v8, 7  ;;  %v3901_v59 = vshrl.u32 %v6486_v32, 16  ;;  %v3904_v60 = vshll.u32 %v6486_v32, 16  ;;  %v3767_v62 = vmax.f32 %v3751_v20, 0.0  ;;  %v9756_v51 = vld [vmem:[#allocation2 + $0x10] sm:$0xf] }
 0x54d   : > { %v3898_v31 = vor.u32 %v3896_v1, %v3895_v12  ;;  %v3899_v53 = vrot.slane %v3895_v12, 4  ;;  %v3919_v27 = vrot.slane %v3917_v55, 7  ;;  %v3765_v38 = vmax.f32 %v3749_v4, 0.0  ;;  %v9758_v56 = vld [vmem:[#allocation2 + $0x20] sm:$0xf] }
 0x54e   : > { %v3882_v52 = vor.u32 %v3880_v48, %v3879_v19  ;;  %v3883_v11 = vrot.slane %v3879_v19, 4  ;;  %v3903_v6 = vrot.slane %v3901_v59, 7  ;;  %v6489_v46 = vpack.c.bf16 %v3767_v62, %v3767_v62  ;;  %v9762_v48 = vld [vmem:[#allocation2 + $0x8] sm:$0xf]  ;;  %v9764_v26 = vld [vmem:[#allocation2 + $0x18] sm:$0xf] }
 0x54f   : > { %v4043_v13 = vsel %vm9688_vm10, %v3898_v31, %v4042_v7  ;;  %v4046_v36 = vsel %vm9695_vm11, %v3899_v53, %v4045_v29  ;;  %v3922_v17 = vor.u32 %v3920_v30, %v3919_v27  ;;  %v3923_v15 = vrot.slane %v3919_v27, 4  ;;  %v4066_v19 = vld [vmem:[#allocation2 + $0x60] sm:$0xf]  ;;  %v4069_v59 = vld [vmem:[#allocation2 + $0x64] sm:$0x1] }
 0x550   : > { %v4031_v49 = vsel %vm9688_vm10, %v3882_v52, %v4030_v63  ;;  %v4034_v37 = vsel %vm9695_vm11, %v3883_v11, %v4033_v50  ;;  %4047 = vst [vmem:[#allocation2 + $0x44] sm:$0x1] %v4046_v36  ;;  %4044 = vst [vmem:[#allocation2 + $0x40] sm:$0xf] %v4043_v13  ;;  %v3906_v45 = vor.u32 %v3904_v60, %v3903_v6  ;;  %v3907_v41 = vrot.slane %v3903_v6, 4 }
 0x551   : > { %4035 = vst [vmem:[#allocation2 + $0x34] sm:$0x1] %v4034_v37  ;;  %4032 = vst [vmem:[#allocation2 + $0x30] sm:$0xf] %v4031_v49  ;;  %v6487_v57 = vpack.c.bf16 %v3765_v38, %v3765_v38  ;;  %v3754_v18 = vadd.f32 %v9671_v58, %v3731_v54  ;;  %v3752_v0 = vadd.f32 %v9671_v58, %v3729_v24  ;;  %v3925_v42 = vshrl.u32 %v6489_v46, 16 }
 0x552   : > { %v4061_v39 = vsel %vm9688_vm10, %v3922_v17, %v4060_v10  ;;  %v4064_v14 = vsel %vm9695_vm11, %v3923_v15, %v4063_v23  ;;  %v4049_v35 = vsel %vm9688_vm10, %v3906_v45, %v4048_v2  ;;  %v4052_v43 = vsel %vm9695_vm11, %v3907_v41, %v4051_v5  ;;  %v4054_v54 = vld [vmem:[#allocation2 + $0x50] sm:$0xf]  ;;  %v4057_v24 = vld [vmem:[#allocation2 + $0x54] sm:$0x1]  ;;  %v9773_v53 = vld [vmem:[#allocation15 + $0x18] sm:$0xf] }
 0x553   : > { %4065 = vst [vmem:[#allocation2 + $0x5c] sm:$0x1] %v4064_v14  ;;  %4062 = vst [vmem:[#allocation2 + $0x58] sm:$0xf] %v4061_v39  ;;  %v3928_v34 = vshll.u32 %v6489_v46, 16  ;;  %v3909_v25 = vshrl.u32 %v6487_v57, 16  ;;  %v3732_v1 = vmul.f32 %v6833_v40, %v9669_v47  ;;  %v3730_v8 = vmul.f32 %v9669_v47, %v3682_v16 }
 0x554   : > { %4053 = vst [vmem:[#allocation2 + $0x4c] sm:$0x1] %v4052_v43  ;;  %4050 = vst [vmem:[#allocation2 + $0x48] sm:$0xf] %v4049_v35  ;;  %v3912_v22 = vshll.u32 %v6487_v57, 16  ;;  %v3770_v9 = vmax.f32 %v3754_v18, 0.0  ;;  %v6320_v4 = vcombine.low %v9762_v48, %v9756_v51  ;;  %v6321_v12 = vcombine.low %v9764_v26, %v9758_v56 }
 0x555   : > { %v3768_v44 = vmax.f32 %v3752_v0, 0.0  ;;  %v3927_v32 = vrot.slane %v3925_v42, 7  ;;  %v3911_v20 = vrot.slane %v3909_v25, 7  ;;  %v3755_v40 = vadd.f32 %v9671_v58, %v3732_v1  ;;  %v9787_v38 = vld [vmem:[#allocation2 + $0x28] sm:$0xf] }
 0x556   : > { %v6492_v63 = vpack.c.bf16 %v3770_v9, %v3770_v9  ;;  %v3753_v47 = vadd.f32 %v9671_v58, %v3730_v8  ;;  %6836 = vmatprep.mubr.msk.bf16.mxu0 %vm679_vm1, %v6320_v4  ;;  %v4072_v10 = vld [vmem:[#allocation2 + $0x68] sm:$0xf]  ;;  %v9795_v23 = vld [vmem:[#allocation2 + $0x38] sm:$0xf]  ;;  %v4087_v46 = vld [vmem:[#allocation2 + $0x7c] sm:$0x1] }
 0x557   : > { %v6490_v55 = vpack.c.bf16 %v3768_v44, %v3768_v44  ;;  %v3930_v16 = vor.u32 %v3928_v34, %v3927_v32  ;;  %v3931_v30 = vrot.slane %v3927_v32, 4  ;;  %v3914_v60 = vor.u32 %v3912_v22, %v3911_v20  ;;  %6837 = vmatmul.mubr.msk.bf16.vlgmr.msra.gmra.mrb[4].mxu0 %vm679_vm1, %v6321_v12  ;;  %v9789_v17 = vld [vmem:[#allocation2 + $0x40] sm:$0xf]  ;;  %v4084_v5 = vld [vmem:[#allocation2 + $0x78] sm:$0xf] }
 0x558   : > { %v3915_v31 = vrot.slane %v3911_v20, 4  ;;  %v3949_v7 = vshrl.u32 %v6492_v63, 16  ;;  %v3952_v52 = vshll.u32 %v6492_v63, 16  ;;  %v9776_v29 = vld [vmem:[#allocation2 + $0x30] sm:$0xf]  ;;  %6853 = vmatpush3.bf16.msra.mxu0 %v9682_v28  ;;  %v3771_v49 = vmax.f32 %v3755_v40, 0.0 }
 0x559   : > { %v3933_v11 = vshrl.u32 %v6490_v55, 16  ;;  %v3936_v50 = vshll.u32 %v6490_v55, 16  ;;  %v4067_v58 = vsel %vm9688_vm10, %v3930_v16, %v4066_v19  ;;  %v4070_v27 = vsel %vm9695_vm11, %v3931_v30, %v4069_v59  ;;  %7258 = vmatprep.subr.msk.bf16.mxu0 %vm692_vm0, %v9773_v53  ;;  %v4075_v57 = vld [vmem:[#allocation2 + $0x6c] sm:$0x1]  ;;  %v4090_v55 = vld [vmem:[#allocation2 + $0x80] sm:$0xf] }
 0x55a   : > { %v4055_v6 = vsel %vm9688_vm10, %v3914_v60, %v4054_v54  ;;  %v4058_v62 = vsel %vm9695_vm11, %v3915_v31, %v4057_v24  ;;  %4071 = vst [vmem:[#allocation2 + $0x64] sm:$0x1] %v4070_v27  ;;  %4068 = vst [vmem:[#allocation2 + $0x60] sm:$0xf] %v4067_v58  ;;  %v3951_v13 = vrot.slane %v3949_v7, 7  ;;  %v3769_v37 = vmax.f32 %v3753_v47, 0.0 }
 0x55b   : > { %4059 = vst [vmem:[#allocation2 + $0x54] sm:$0x1] %v4058_v62  ;;  %4056 = vst [vmem:[#allocation2 + $0x50] sm:$0xf] %v4055_v6  ;;  %v3935_v36 = vrot.slane %v3933_v11, 7  ;;  %v6322_v15 = vcombine.low %v9787_v38, %v9776_v29  ;;  %v6493_v18 = vpack.c.bf16 %v3771_v49, %v3771_v49  ;;  %v6323_v39 = vcombine.low %v9795_v23, %v9789_v17 }
 0x55c   : > { %v3954_v45 = vor.u32 %v3952_v52, %v3951_v13  ;;  %v3955_v28 = vrot.slane %v3951_v13, 4  ;;  %v6491_v0 = vpack.c.bf16 %v3769_v37, %v3769_v37  ;;  %v4105_v22 = vld [vmem:[#allocation2 + $0x48] sm:$0xf]  ;;  %v4078_v24 = vld [vmem:[#allocation2 + $0x70] sm:$0xf]  ;;  %v9828_v62 = vcombine.low %v9756_v51, %v9764_v26 }
 0x55d   : > { %v3938_v41 = vor.u32 %v3936_v50, %v3935_v36  ;;  %v3939_v2 = vrot.slane %v3935_v36, 4  ;;  %6840 = vmatprep.mubr.msk.bf16.mxu0 %vm679_vm1, %v6322_v15  ;;  %v3957_v34 = vshrl.u32 %v6493_v18, 16  ;;  %v3960_v44 = vshll.u32 %v6493_v18, 16  ;;  %v4093_v40 = vld [vmem:[#allocation2 + $0x84] sm:$0x1] }
 0x55e   : > { %v4085_v14 = vsel %vm9688_vm10, %v3954_v45, %v4084_v5  ;;  %v4088_v35 = vsel %vm9695_vm11, %v3955_v28, %v4087_v46  ;;  %v3941_v25 = vshrl.u32 %v6491_v0, 16  ;;  %v3944_v8 = vshll.u32 %v6491_v0, 16  ;;  %v4081_v47 = vld [vmem:[#allocation2 + $0x74] sm:$0x1]  ;;  %v4107_v31 = vld [vmem:[#allocation2 + $0x58] sm:$0xf] }
 0x55f   : > { %v4073_v43 = vsel %vm9688_vm10, %v3938_v41, %v4072_v10  ;;  %v4076_v42 = vsel %vm9695_vm11, %v3939_v2, %v4075_v57  ;;  %4089 = vst [vmem:[#allocation2 + $0x7c] sm:$0x1] %v4088_v35  ;;  %4086 = vst [vmem:[#allocation2 + $0x78] sm:$0xf] %v4085_v14  ;;  %6841 = vmatmul.mubr.msk.bf16.gmra.mrb[8].mxu0 %vm679_vm1, %v6323_v39  ;;  %v3959_v9 = vrot.slane %v3957_v34, 7  ;;  %v4422_v13 = vsel %vm692_vm0, %v9773_v53, 0 }
 0x560   : > { %4077 = vst [vmem:[#allocation2 + $0x6c] sm:$0x1] %v4076_v42  ;;  %4074 = vst [vmem:[#allocation2 + $0x68] sm:$0xf] %v4073_v43  ;;  %v3943_v1 = vrot.slane %v3941_v25, 7  ;;  %v9834_v36 = vcombine.low %v9758_v56, %v9787_v38  ;;  %v9843_v51 = vcombine.low %v9776_v29, %v9795_v23 }
 0x561   : > { %v3962_v4 = vor.u32 %v3960_v44, %v3959_v9  ;;  %v3963_v12 = vrot.slane %v3959_v9, 4  ;;  %v4108_v63 = vld [vmem:[#allocation2 + $0x60] sm:$0xf]  ;;  %v4797_v49 = vld [vmem:[#allocation15 + $0x4] sm:$0xf] }
 0x562   : > { %v4106_v32 = vld [vmem:[#allocation2 + $0x50] sm:$0xf]  ;;  %v3946_v19 = vor.u32 %v3944_v8, %v3943_v1  ;;  %v3947_v54 = vrot.slane %v3943_v1, 4  ;;  %v6325_v7 = vcombine.low %v4107_v31, %v4108_v63  ;;  %v4096_v52 = vld [vmem:[#allocation2] sm:$0xf]  ;;  %v9888_v25 = vsel %vm692_vm0, %v4797_v49, 0 }
 0x563   : > { %v6324_v20 = vcombine.low %v4105_v22, %v4106_v32  ;;  %v4091_v16 = vsel %vm9688_vm10, %v3962_v4, %v4090_v55  ;;  %v4094_v30 = vsel %vm9695_vm11, %v3963_v12, %v4093_v40  ;;  %v6336_v33 = vcombine.low %v4096_v52, %v9762_v48  ;;  %v4537_v56 = vld [vmem:[#allocation2] sm:$0xf]  ;;  %v9852_v26 = vld [vmem:[#allocation2 + $0x4] sm:$0x1]  ;;  %v5263_v29 = vld [vmem:[#allocation2 + $0x8] sm:$0xe] }
 0x564   : > { %v4079_v59 = vsel %vm9688_vm10, %v3946_v19, %v4078_v24  ;;  %v4082_v60 = vsel %vm9695_vm11, %v3947_v54, %v4081_v47  ;;  %4095 = vst [vmem:[#allocation2 + $0x84] sm:$0x1] %v4094_v30  ;;  %4092 = vst [vmem:[#allocation2 + $0x80] sm:$0xf] %v4091_v16  ;;  %v9846_v48 = vcombine.low %v9789_v17, %v4105_v22  ;;  %v4574_v53 = vshrl.u32 %v4537_v56, 16 }
 0x565   : > { %6844 = vmatprep.mubr.msk.bf16.mxu0 %vm679_vm1, %v6324_v20  ;;  %4083 = vst [vmem:[#allocation2 + $0x74] sm:$0x1] %v4082_v60  ;;  %4080 = vst [vmem:[#allocation2 + $0x70] sm:$0xf] %v4079_v59  ;;  %v5262_v38 = vld [vmem:[#allocation2] sm:$0xe]  ;;  %v9854_v37 = vcombine.low %v4106_v32, %v4107_v31 }
 0x566   : > { %v4111_v6 = vld [vmem:[#allocation2 + $0x78] sm:$0xf]  ;;  %v4577_v15 = vshll.u32 %v4537_v56, 16  ;;  %v6402_v28 = vrot.slane %v5262_v38, 9  ;;  %v5314_v17 = vrot.slane %v9852_v26, 5  ;;  %v9863_v2 = vrot.slane %v4574_v53, 4 }
 0x567   : > { %6845 = vmatmul.mubr.msk.bf16.gmra.mrb[12].mxu0 %vm679_vm1, %v6325_v7  ;;  %v4109_v11 = vld [vmem:[#allocation2 + $0x68] sm:$0xf]  ;;  %v9869_v23 = vld [vmem:[#allocation2 + $0xc] sm:$0x1]  ;;  %v9871_v5 = vld [vmem:[#allocation2 + $0x14] sm:$0x1] }
 0x568   : > { %v9856_v45 = vcombine.low %v4108_v63, %v4109_v11  ;;  %v9861_v41 = vld [vmem:[#allocation2 + $0x8] sm:$0xf]  ;;  %v5264_v46 = vld [vmem:[#allocation2 + $0x10] sm:$0xe]  ;;  %v9873_v57 = vrot.slane %v4577_v15, 5  ;;  %v6403_v39 = vrot.slane %v5263_v29, 9  ;;  %v9885_v42 = vsel %vm9557_vm5, %v6402_v28, %v5314_v17 }
 0x569   : > { %v9865_v10 = vld [vmem:[#allocation2 + $0x88] sm:$0xe]  ;;  %v9875_v18 = vld [vmem:[#allocation2 + $0x1c] sm:$0x1]  ;;  %v9877_v0 = vld [vmem:[#allocation2 + $0x8c] sm:$0x1] }
 0x56a   : > { %v5265_v14 = vld [vmem:[#allocation2 + $0x18] sm:$0xe]  ;;  %v9879_v35 = vld [vmem:[#allocation2 + $0x24] sm:$0x1]  ;;  %v9881_v43 = vld [vmem:[#allocation2 + $0x2c] sm:$0x1] }
 0x56b   : > { %v9819_v58 = vld [vmem:[#allocation2 + $0x80] sm:$0xf]  ;;  %v5318_v22 = vrot.slane %v9869_v23, 5  ;;  %v6404_v9 = vrot.slane %v5264_v46, 9  ;;  %v5322_v44 = vrot.slane %v9871_v5, 5  ;;  %v4588_v8 = vshrl.u32 %v9861_v41, 16 }
 0x56c   : > { %v4110_v50 = vld [vmem:[#allocation2 + $0x70] sm:$0xf]  ;;  %v6327_v3 = vcombine.low %v4111_v6, %v9819_v58  ;;  %v5266_v34 = vld [vmem:[#allocation2 + $0x20] sm:$0xe]  ;;  %v5267_v1 = vld [vmem:[#allocation2 + $0x28] sm:$0xe] }
 0x56d   : > { %v6326_v27 = vcombine.low %v4109_v11, %v4110_v50  ;;  %v6405_v32 = vrot.slane %v5265_v14, 9  ;;  %v5326_v20 = vrot.slane %v9875_v18, 5  ;;  %v5268_v4 = vld [vmem:[#allocation2 + $0x30] sm:$0xe]  ;;  %v9895_v19 = vcombine.low %v4110_v50, %v4111_v6  ;;  %v9897_v54 = vld [vmem:[#allocation2 + $0x34] sm:$0x1] }
 0x56e   : > { %v9899_v24 = vld [vmem:[#allocation2 + $0x3c] sm:$0x1]  ;;  %v9903_v63 = vsel %vm9557_vm5, %v6403_v39, %v5318_v22  ;;  %v9907_v55 = vsel %vm9557_vm5, %v6404_v9, %v5322_v44  ;;  %v6406_v40 = vrot.slane %v5266_v34, 9  ;;  %v5269_v47 = vld [vmem:[#allocation2 + $0x38] sm:$0xe]  ;;  %v5330_v31 = vrot.slane %v9879_v35, 5 }
 0x56f   : > { %6848 = vmatprep.mubr.msk.bf16.mxu0 %vm679_vm1, %v6326_v27  ;;  %v9909_v16 = vld [vmem:[#allocation2 + $0x44] sm:$0x1]  ;;  %v9911_v30 = vld [vmem:[#allocation2 + $0x4c] sm:$0x1]  ;;  %v9917_v60 = vsel %vm9557_vm5, %v6405_v32, %v5326_v20  ;;  %v5270_v7 = vld [vmem:[#allocation2 + $0x40] sm:$0xe]  ;;  %v10525_v21 = vcombine.low %v9903_v63, %v9907_v55 }
 0x570   : > { %6849 = vmatmul.mubr.msk.bf16.gmra.mrb[16].mxu0 %vm679_vm1, %v6327_v3  ;;  %v9923_v11 = vld [vmem:[#allocation2 + $0x5c] sm:$0x1]  ;;  %v9927_v50 = vcombine.low %v9907_v55, %v9917_v60  ;;  %v6407_v27 = vrot.slane %v5267_v1, 9  ;;  %v5334_v6 = vrot.slane %v9881_v43, 5  ;;  %v6408_v3 = vrot.slane %v5268_v4, 9 }
 0x571   : > { %6854 = vmatprep.mubr.msk.bf16.mxu0 %vm679_vm1, %v6336_v33  ;;  %v5271_v33 = vld [vmem:[#allocation2 + $0x48] sm:$0xe]  ;;  %v6409_v56 = vrot.slane %v5269_v47, 9  ;;  %v5272_v53 = vld [vmem:[#allocation2 + $0x50] sm:$0xe]  ;;  %v9937_v15 = vrot.slane %v4588_v8, 4 }
 0x572   : > { %v5273_v38 = vld [vmem:[#allocation2 + $0x58] sm:$0xe]  ;;  %v4591_v29 = vshll.u32 %v9861_v41, 16  ;;  %v9940_v28 = vld [vmem:[#allocation2 + $0x54] sm:$0x1]  ;;  %v5342_v34 = vrot.slane %v9899_v24, 5 }
 0x573   : > { %v9942_v17 = vld [vmem:[#allocation2 + $0x64] sm:$0x1]  ;;  %v9950_v39 = vld [vmem:[#allocation2 + $0x6c] sm:$0x1]  ;;  %v6410_v22 = vrot.slane %v5270_v7, 9  ;;  %v5346_v44 = vrot.slane %v9909_v16, 5 }
 0x574   : > { %v5274_v9 = vld [vmem:[#allocation2 + $0x60] sm:$0xe]  ;;  %v6411_v1 = vrot.slane %v5271_v33, 9  ;;  %v5350_v8 = vrot.slane %v9911_v30, 5  ;;  %v6412_v32 = vrot.slane %v5272_v53, 9  ;;  %v9965_v4 = vsel %vm9557_vm5, %v6409_v56, %v5342_v34 }
 0x575   : > { %v5275_v20 = vld [vmem:[#allocation2 + $0x68] sm:$0xe]  ;;  %v6413_v47 = vrot.slane %v5273_v38, 9  ;;  %v5276_v56 = vld [vmem:[#allocation2 + $0x70] sm:$0xe]  ;;  %v5366_v59 = vrot.slane %v9950_v39, 5 }
 0x576   : > { %v9981_v33 = vsel %vm9557_vm5, %v6411_v1, %v5350_v8  ;;  %v9983_v53 = vld [vmem:[#allocation15 + $0x10] sm:$0xf]  ;;  %v9985_v38 = vld [vmem:[#allocation2 + $0x7c] sm:$0x1]  ;;  %v6415_v8 = vrot.slane %v5275_v20, 9  ;;  %v4597_v61 = vshll.u32 %v9869_v23, 16 }
 0x577   : > { %10513 = vst [vmem:[#allocation30_spill] sm:$0xff] %v9981_v33  ;;  %v10017_v20 = vld [vmem:[#allocation2 + $0x84] sm:$0x1]  ;;  %v4545_v12 = vld [vmem:[#allocation2 + $0x20] sm:$0xf] }
 0x578   : > { %6855 = vmatmul.mubr.msk.bf16.vlgmr.msra.gmra.mrb[4].mxu0 %vm679_vm1, %v9828_v62  ;;  %v4549_v23 = vld [vmem:[#allocation2 + $0x30] sm:$0xf] }
 0x579   : > { %6871 = vmatpush3.bf16.msra.mxu0 %v4422_v13  ;;  %6858 = vmatprep.mubr.msk.bf16.mxu0 %vm679_vm1, %v9834_v36  ;;  %v9934_v13 = vsel %vm9557_vm5, %v6406_v40, %v5330_v31  ;;  %v5354_v40 = vrot.slane %v9940_v28, 5  ;;  %v5358_v31 = vrot.slane %v9923_v11, 5 }
 0x57a   : > { %7259 = vmatprep.subr.msk.bf16.mxu0 %vm692_vm0, %v4797_v49  ;;  %v5338_v49 = vrot.slane %v9897_v54, 5 }
 0x57b   : > { %v9993_v46 = vsel %vm9557_vm5, %v6412_v32, %v5354_v40  ;;  %v6416_v40 = vrot.slane %v5276_v56, 9  ;;  %v4541_v56 = vld [vmem:[#allocation2 + $0x10] sm:$0xf] }
 0x57c   : > { %v9958_v41 = vsel %vm9557_vm5, %v6408_v3, %v5338_v49  ;;  %v9977_v3 = vsel %vm9557_vm5, %v6410_v22, %v5346_v44  ;;  %v6414_v49 = vrot.slane %v5274_v9, 9  ;;  %10514 = vst [vmem:[#allocation31_spill] sm:$0xff] %v9993_v46  ;;  %v9997_v22 = vsel %vm9557_vm5, %v6413_v47, %v5358_v31  ;;  %v5278_v47 = vld [vmem:[#allocation2 + $0x80] sm:$0xe] }
 0x57d   : > { %v9973_v7 = vcombine.low %v9958_v41, %v9965_v4  ;;  %10512 = vst [vmem:[#allocation29_spill] sm:$0xff] %v9977_v3  ;;  %v9989_v34 = vcombine.low %v9977_v3, %v9981_v33  ;;  %10515 = vst [vmem:[#allocation32_spill] sm:$0xff] %v9997_v22  ;;  %v5362_v44 = vrot.slane %v9942_v17, 5  ;;  %v4593_v9 = vrot.slane %v4591_v29, 5 }
 0x57e   : > { %v10004_v1 = vcombine.low %v9993_v46, %v9997_v22  ;;  %v6434_v52 = vrot.slane %v5278_v47, 9  ;;  %v4580_v47 = vor.u32 %v9873_v57, %v9863_v2 }
 0x57f   : > { %v10012_v32 = vsel %vm9557_vm5, %v6414_v49, %v5362_v44  ;;  %v4602_v49 = vshrl.u32 %v4541_v56, 16 }
 0x580   : > { %6859 = vmatmul.mubr.msk.bf16.gmra.mrb[8].mxu0 %vm679_vm1, %v9843_v51  ;;  %10516 = vst [vmem:[#allocation33_spill] sm:$0xff] %v10012_v32 }
 0x581   : > { %6862 = vmatprep.mubr.msk.bf16.mxu0 %vm679_vm1, %v9846_v48 }
 0x583   : > { %v10531_v55 = vld [vmem:[#allocation31_spill] sm:$0xff] }
 0x588   : > { %6863 = vmatmul.mubr.msk.bf16.gmra.mrb[12].mxu0 %vm679_vm1, %v9854_v37 }
 0x589   : > { %6866 = vmatprep.mubr.msk.bf16.mxu0 %vm679_vm1, %v9856_v45 }
 0x590   : > { %6867 = vmatmul.mubr.msk.bf16.gmra.mrb[16].mxu0 %vm679_vm1, %v9895_v19 }
 0x591   : > { %6872 = vmatprep.mubr.msk.bf16.mxu0 %vm679_vm1, %v9828_v62  ;;  %v9946_v62 = vsel %vm9557_vm5, %v6407_v27, %v5334_v6  ;;  %v5277_v27 = vld [vmem:[#allocation2 + $0x78] sm:$0xe]  ;;  %v9969_v6 = vld [vmem:[#allocation2 + $0x74] sm:$0x1] }
 0x592   : > { %v9954_v14 = vcombine.low %v9934_v13, %v9946_v62  ;;  %v6417_v29 = vrot.slane %v5277_v27, 9 }
 0x598   : > { %6873 = vmatmul.mubr.msk.bf16.vlgmr.msra.gmra.mrb[4].mxu0 %vm679_vm1, %v9834_v36  ;;  %v5370_v36 = vrot.slane %v9969_v6, 5 }
 0x599   : > { %6889 = vmatpush3.bf16.msra.mxu0 %v9888_v25  ;;  %6876 = vmatprep.mubr.msk.bf16.mxu0 %vm679_vm1, %v9843_v51  ;;  %v10021_v25 = vsel %vm9557_vm5, %v6415_v8, %v5366_v59  ;;  %v5374_v51 = vrot.slane %v9985_v38, 5  ;;  %v10520_v59 = vrot.slane %v9877_v0, 5  ;;  %v10521_v8 = vrot.slane %v9865_v10, 9 }
 0x59a   : > { %7260 = vmatprep.subr.msk.bf16.mxu0 %vm692_vm0, %v9983_v53  ;;  %10517 = vst [vmem:[#allocation34_spill] sm:$0xff] %v10021_v25  ;;  %v10030_v27 = vcombine.low %v10012_v32, %v10021_v25  ;;  %v10034_v44 = vsel %vm9557_vm5, %v6416_v40, %v5370_v36  ;;  %v5545_v36 = vrot.slane %v10017_v20, 5  ;;  %v4605_v32 = vshll.u32 %v4541_v56, 16 }
 0x59b   : > { %10518 = vst [vmem:[#allocation35_spill] sm:$0xff] %v10034_v44  ;;  %v10042_v31 = vsel %vm9557_vm5, %v6417_v29, %v5374_v51  ;;  %v10059_v29 = vsel %vm9557_vm5, %v10521_v8, %v10520_v59  ;;  %v4543_v51 = vld [vmem:[#allocation2 + $0x18] sm:$0xf]  ;;  %v4583_v10 = vshll.u32 %v9852_v26, 16  ;;  %v4594_v25 = vor.u32 %v4593_v9, %v9937_v15  ;;  %v4547_v59 = vld [vmem:[#allocation2 + $0x28] sm:$0xf] }
 0x59c   : > { %10519 = vst [vmem:[#allocation36_spill] sm:$0xff] %v10042_v31  ;;  %v10050_v40 = vcombine.low %v10034_v44, %v10042_v31  ;;  %10522 = vst [vmem:[#allocation37_spill] sm:$0xff] %v10059_v29  ;;  %v10065_v44 = vsel %vm9557_vm5, %v6434_v52, %v5545_v36  ;;  %v4616_v2 = vshrl.u32 %v4543_v51, 16  ;;  %v4619_v57 = vshll.u32 %v4543_v51, 16 }
 0x59d   : > { %10523 = vst [vmem:[#allocation38_spill] sm:$0xff] %v10065_v44  ;;  %v4604_v52 = vrot.slane %v4602_v49, 4  ;;  %v4630_v36 = vshrl.u32 %v4545_v12, 16  ;;  %v4633_v26 = vshll.u32 %v4545_v12, 16  ;;  %v4644_v22 = vshrl.u32 %v4547_v59, 16 }
 0x59e   : > { %v4647_v15 = vshll.u32 %v4547_v59, 16  ;;  %v4581_v9 = vrot.slane %v4580_v47, 4  ;;  %v4585_v46 = vrot.slane %v4583_v10, 5  ;;  %v4595_v33 = vrot.slane %v4594_v25, 4  ;;  %v4551_v47 = vld [vmem:[#allocation2 + $0x38] sm:$0xf] }
 0x59f   : > { %v4599_v8 = vrot.slane %v4597_v61, 5  ;;  %v4618_v31 = vrot.slane %v4616_v2, 4  ;;  %v4621_v3 = vrot.slane %v4619_v57, 5  ;;  %v4611_v29 = vshll.u32 %v9871_v5, 16  ;;  %v4113_v57 = vld [vmem:[#allocation2 + $0x88] sm:$0xf] }
 0x5a0   : > { %6877 = vmatmul.mubr.msk.bf16.gmra.mrb[8].mxu0 %vm679_vm1, %v9846_v48  ;;  %v4607_v48 = vrot.slane %v4605_v32, 5  ;;  %v4635_v44 = vrot.slane %v4633_v26, 5  ;;  %v4625_v51 = vshll.u32 %v9875_v18, 16  ;;  %v4646_v49 = vrot.slane %v4644_v22, 4  ;;  %v4555_v18 = vld [vmem:[#allocation2 + $0x48] sm:$0xf] }
 0x5a1   : > { %6880 = vmatprep.mubr.msk.bf16.mxu0 %vm679_vm1, %v9854_v37  ;;  %v4632_v37 = vrot.slane %v4630_v36, 4  ;;  %v4649_v32 = vrot.slane %v4647_v15, 5  ;;  %v4586_v12 = vsel %vm9341_vm15, %v4581_v9, %v4585_v46  ;;  %v10086_v25 = vsel %vm9341_vm15, %v4595_v33, %v4599_v8  ;;  %v4553_v33 = vld [vmem:[#allocation2 + $0x40] sm:$0xf] }
 0x5a2   : > { %v4608_v56 = vor.u32 %v4607_v48, %v4604_v52  ;;  %v4622_v5 = vor.u32 %v4621_v3, %v4618_v31  ;;  %v4658_v10 = vshrl.u32 %v4549_v23, 16  ;;  %v4661_v59 = vshll.u32 %v4549_v23, 16 }
 0x5a3   : > { %v4613_v61 = vrot.slane %v4611_v29, 5  ;;  %v4636_v2 = vor.u32 %v4635_v44, %v4632_v37  ;;  %v4627_v52 = vrot.slane %v4625_v51, 5  ;;  %v4639_v46 = vshll.u32 %v9879_v35, 16 }
 0x5a4   : > { %v4609_v22 = vrot.slane %v4608_v56, 4  ;;  %v4650_v48 = vor.u32 %v4649_v32, %v4646_v49  ;;  %v4672_v8 = vshrl.u32 %v4551_v47, 16  ;;  %v4675_v36 = vshll.u32 %v4551_v47, 16  ;;  %v4557_v47 = vld [vmem:[#allocation2 + $0x50] sm:$0xf] }
 0x5a5   : > { %v4700_v26 = vshrl.u32 %v4555_v18, 16  ;;  %v4623_v3 = vrot.slane %v4622_v5, 4  ;;  %v4653_v31 = vshll.u32 %v9881_v43, 16  ;;  %v4660_v15 = vrot.slane %v4658_v10, 4 }
 0x5a6   : > { %v4663_v9 = vrot.slane %v4661_v59, 5  ;;  %v6352_v29 = vcombine.low %v9819_v58, %v4113_v57  ;;  %v4637_v44 = vrot.slane %v4636_v2, 4  ;;  %v4686_v56 = vshrl.u32 %v4553_v33, 16 }
 0x5a7   : > { %v4689_v37 = vshll.u32 %v4553_v33, 16  ;;  %v10096_v23 = vsel %vm9341_vm15, %v4609_v22, %v4613_v61  ;;  %v4641_v35 = vrot.slane %v4639_v46, 5  ;;  %v4651_v51 = vrot.slane %v4650_v48, 4  ;;  %v4563_v22 = vld [vmem:[#allocation2 + $0x68] sm:$0xf] }
 0x5a8   : > { %6881 = vmatmul.mubr.msk.bf16.gmra.mrb[12].mxu0 %vm679_vm1, %v9856_v45  ;;  %v6361_v45 = vcombine.low %v4586_v12, %v10086_v25  ;;  %v4667_v49 = vshll.u32 %v9897_v54, 16  ;;  %v4674_v32 = vrot.slane %v4672_v8, 4  ;;  %v4677_v12 = vrot.slane %v4675_v36, 5  ;;  %v4561_v33 = vld [vmem:[#allocation2 + $0x60] sm:$0xf] }
 0x5a9   : > { %6884 = vmatprep.mubr.msk.bf16.mxu0 %vm679_vm1, %v9895_v19  ;;  %v4703_v19 = vshll.u32 %v4555_v18, 16  ;;  %v4702_v43 = vrot.slane %v4700_v26, 4  ;;  %v10103_v58 = vsel %vm9341_vm15, %v4623_v3, %v4627_v52  ;;  %v5011_v10 = vsel %vm692_vm0, %v9983_v53, 0 }
 0x5aa   : > { %v4655_v59 = vrot.slane %v4653_v31, 5  ;;  %v4664_v18 = vor.u32 %v4663_v9, %v4660_v15  ;;  %v10109_v54 = vcombine.low %v10096_v23, %v10103_v58  ;;  %v10113_v61 = vsel %vm9341_vm15, %v4637_v44, %v4641_v35 }
 0x5ab   : > { %v4705_v5 = vrot.slane %v4703_v19, 5  ;;  %v4688_v2 = vrot.slane %v4686_v56, 4  ;;  %v4691_v57 = vrot.slane %v4689_v37, 5  ;;  %v4669_v46 = vrot.slane %v4667_v49, 5 }
 0x5ac   : > { %v10117_v52 = vsel %vm9341_vm15, %v4651_v51, %v4655_v59  ;;  %v4714_v53 = vshrl.u32 %v4557_v47, 16  ;;  %v4717_v48 = vshll.u32 %v4557_v47, 16  ;;  %v4678_v8 = vor.u32 %v4677_v12, %v4674_v32  ;;  %v10126_v12 = vld [vmem:[#allocation15 + $0x1c] sm:$0xf] }
 0x5ad   : > { %v4706_v36 = vor.u32 %v4705_v5, %v4702_v43  ;;  %v4756_v26 = vshrl.u32 %v4563_v22, 16  ;;  %v4759_v19 = vshll.u32 %v4563_v22, 16  ;;  %v4665_v3 = vrot.slane %v4664_v18, 4 }
 0x5ae   : > { %v4681_v31 = vshll.u32 %v9899_v24, 16  ;;  %v4709_v44 = vshll.u32 %v9911_v30, 16  ;;  %v4742_v56 = vshrl.u32 %v4561_v33, 16  ;;  %v4745_v37 = vshll.u32 %v4561_v33, 16  ;;  %v4565_v30 = vld [vmem:[#allocation2 + $0x70] sm:$0xf] }
 0x5af   : > { %v10123_v35 = vcombine.low %v10113_v61, %v10117_v52  ;;  %v4695_v51 = vshll.u32 %v9909_v16, 16  ;;  %v4716_v49 = vrot.slane %v4714_v53, 4  ;;  %v4719_v32 = vrot.slane %v4717_v48, 5  ;;  %v4567_v48 = vld [vmem:[#allocation2 + $0x78] sm:$0xf] }
 0x5b0   : > { %6885 = vmatmul.mubr.msk.bf16.gmra.mrb[16].mxu0 %vm679_vm1, %v6352_v29  ;;  %v4692_v29 = vor.u32 %v4691_v57, %v4688_v2  ;;  %v4679_v24 = vrot.slane %v4678_v8, 4  ;;  %v4707_v43 = vrot.slane %v4706_v36, 4  ;;  %v4758_v5 = vrot.slane %v4756_v26, 4 }
 0x5b1   : > { %6890 = vmatprep.mubr.msk.bf16.mxu0 %vm679_vm1, %v6361_v45  ;;  %v4559_v45 = vld [vmem:[#allocation2 + $0x58] sm:$0xf]  ;;  %v4761_v47 = vrot.slane %v4759_v19, 5  ;;  %v10134_v59 = vsel %vm9341_vm15, %v4665_v3, %v4669_v46  ;;  %v4683_v16 = vrot.slane %v4681_v31, 5  ;;  %v4711_v57 = vrot.slane %v4709_v44, 5 }
 0x5b2   : > { %v4728_v15 = vshrl.u32 %v4559_v45, 16  ;;  %v4731_v9 = vshll.u32 %v4559_v45, 16  ;;  %v4693_v2 = vrot.slane %v4692_v29, 4  ;;  %v4744_v45 = vrot.slane %v4742_v56, 4 }
 0x5b3   : > { %v4747_v53 = vrot.slane %v4745_v37, 5  ;;  %v4697_v33 = vrot.slane %v4695_v51, 5  ;;  %v4770_v8 = vshrl.u32 %v4565_v30, 16  ;;  %v4773_v36 = vshll.u32 %v4565_v30, 16 }
 0x5b4   : > { %v4730_v18 = vrot.slane %v4728_v15, 4  ;;  %v4733_v22 = vrot.slane %v4731_v9, 5  ;;  %v10140_v26 = vsel %vm9341_vm15, %v4679_v24, %v4683_v16  ;;  %v10144_v46 = vsel %vm9341_vm15, %v4707_v43, %v4711_v57 }
 0x5b5   : > { %v4723_v19 = vshll.u32 %v9940_v28, 16  ;;  %v4762_v3 = vor.u32 %v4761_v47, %v4758_v5  ;;  %v10149_v31 = vcombine.low %v10134_v59, %v10140_v26  ;;  %v4784_v9 = vshrl.u32 %v4567_v48, 16 }
 0x5b6   : > { %v4734_v15 = vor.u32 %v4733_v22, %v4730_v18  ;;  %v4787_v29 = vshll.u32 %v4567_v48, 16  ;;  %v4698_v44 = vsel %vm9341_vm15, %v4693_v2, %v4697_v33  ;;  %v4737_v56 = vshll.u32 %v9923_v11, 16 }
 0x5b7   : > { %v4748_v37 = vor.u32 %v4747_v53, %v4744_v45  ;;  %v4765_v51 = vshll.u32 %v9950_v39, 16  ;;  %v4775_v24 = vrot.slane %v4773_v36, 5  ;;  %v4751_v43 = vshll.u32 %v9942_v17, 16 }
 0x5b8   : > { %6891 = vmatmul.mubr.msk.bf16.vlgmr.msra.gmra.mrb[4].mxu0 %vm679_vm1, %v10109_v54  ;;  %v4763_v5 = vrot.slane %v4762_v3, 4  ;;  %v4725_v47 = vrot.slane %v4723_v19, 5  ;;  %v4735_v11 = vrot.slane %v4734_v15, 4  ;;  %v4786_v30 = vrot.slane %v4784_v9, 4 }
 0x5b9   : > { %6907 = vmatpush3.bf16.msra.mxu0 %v5011_v10  ;;  %6894 = vmatprep.mubr.msk.bf16.mxu0 %vm679_vm1, %v10123_v35  ;;  %v4720_v10 = vor.u32 %v4719_v32, %v4716_v49  ;;  %v10156_v49 = vcombine.low %v4698_v44, %v10144_v46  ;;  %v4772_v32 = vrot.slane %v4770_v8, 4  ;;  %v4789_v16 = vrot.slane %v4787_v29, 5 }
 0x5ba   : > { %7261 = vmatprep.subr.msk.bf16.mxu0 %vm692_vm0, %v10126_v12  ;;  %v4749_v39 = vrot.slane %v4748_v37, 4  ;;  %v4767_v18 = vrot.slane %v4765_v51, 5  ;;  %v4739_v2 = vrot.slane %v4737_v56, 5  ;;  %v4753_v45 = vrot.slane %v4751_v43, 5  ;;  %v4569_v43 = vld [vmem:[#allocation2 + $0x80] sm:$0xf] }
 0x5bb   : > { %v4721_v28 = vrot.slane %v4720_v10, 4  ;;  %v4776_v57 = vor.u32 %v4775_v24, %v4772_v32  ;;  %v4779_v48 = vshll.u32 %v9969_v6, 16  ;;  %v4790_v33 = vor.u32 %v4789_v16, %v4786_v30  ;;  %v5376_v24 = vld [vmem:[#allocation15 + $0x8] sm:$0xf] }
 0x5bc   : > { %v4768_v53 = vsel %vm9341_vm15, %v4763_v5, %v4767_v18  ;;  %v4740_v17 = vsel %vm9341_vm15, %v4735_v11, %v4739_v2  ;;  %v4754_v8 = vsel %vm9341_vm15, %v4749_v39, %v4753_v45  ;;  %v4793_v3 = vshll.u32 %v9985_v38, 16  ;;  %v4571_v39 = vld [vmem:[#allocation2 + $0x88] sm:$0xf] }
 0x5bd   : > { %v4726_v22 = vsel %vm9341_vm15, %v4721_v28, %v4725_v47  ;;  %v6367_v36 = vcombine.low %v4754_v8, %v4768_v53  ;;  %v4777_v19 = vrot.slane %v4776_v57, 4  ;;  %v4781_v15 = vrot.slane %v4779_v48, 5 }
 0x5be   : > { %v6366_v10 = vcombine.low %v4726_v22, %v4740_v17  ;;  %v4791_v9 = vrot.slane %v4790_v33, 4  ;;  %v4795_v56 = vrot.slane %v4793_v3, 5  ;;  %v6377_v51 = vcombine.low %v10086_v25, %v10096_v23  ;;  %v10533_v3 = vld [vmem:[#allocation32_spill] sm:$0xff] }
 0x5bf   : > { %v4782_v29 = vsel %vm9341_vm15, %v4777_v19, %v4781_v15  ;;  %v6378_v38 = vcombine.low %v10103_v58, %v10113_v61  ;;  %v5147_v28 = vsel %vm692_vm0, %v10126_v12, 0  ;;  %v6379_v32 = vcombine.low %v10117_v52, %v10134_v59  ;;  %v10536_v15 = vld [vmem:[#allocation34_spill] sm:$0xff] }
 0x5c0   : > { %6895 = vmatmul.mubr.msk.bf16.gmra.mrb[8].mxu0 %vm679_vm1, %v10149_v31  ;;  %v4796_v6 = vsel %vm9341_vm15, %v4791_v9, %v4795_v56  ;;  %v4963_v25 = vshrl.u32 %v4569_v43, 16  ;;  %v4966_v23 = vshll.u32 %v4569_v43, 16  ;;  %v6380_v5 = vcombine.low %v10140_v26, %v4698_v44  ;;  %v10537_v9 = vld [vmem:[#allocation35_spill] sm:$0xff] }
 0x5c1   : > { %6898 = vmatprep.mubr.msk.bf16.mxu0 %vm679_vm1, %v10156_v49  ;;  %v6368_v37 = vcombine.low %v4782_v29, %v4796_v6  ;;  %v6381_v58 = vcombine.low %v10144_v46, %v4726_v22  ;;  %v4972_v59 = vshll.u32 %v10017_v20, 16  ;;  %v6382_v47 = vcombine.low %v4740_v17, %v4754_v8  ;;  %v5547_v20 = vld [vmem:[#allocation15 + $0x14] sm:$0xf]  ;;  %v10528_v8 = vld [vmem:[#allocation29_spill] sm:$0xff] }
 0x5c2   : > { %v4965_v61 = vrot.slane %v4963_v25, 4  ;;  %v4968_v12 = vrot.slane %v4966_v23, 5  ;;  %v6383_v11 = vcombine.low %v4768_v53, %v4782_v29  ;;  %v5426_v44 = vsel %vm692_vm0, %v5376_v24, 0  ;;  %v10540_v29 = vld [vmem:[#allocation38_spill] sm:$0xff] }
 0x5c3   : > { %v4974_v16 = vrot.slane %v4972_v59, 5  ;;  %v5127_v18 = vshrl.u32 %v4571_v39, 16  ;;  %v5130_v22 = vshll.u32 %v4571_v39, 16  ;;  %v5136_v45 = vshll.u32 %v9877_v0, 16  ;;  %v5703_v0 = vld [vmem:[#allocation15 + $0x20] sm:$0xf] }
 0x5c4   : > { %v4969_v52 = vor.u32 %v4968_v12, %v4965_v61  ;;  %v5582_v48 = vsel %vm692_vm0, %v5547_v20, 0  ;;  %v10526_v33 = vcombine.low %v9917_v60, %v9934_v13  ;;  %v10534_v60 = vld [vmem:[#allocation33_spill] sm:$0xff] }
 0x5c5   : > { %v5129_v2 = vrot.slane %v5127_v18, 4  ;;  %v5132_v57 = vrot.slane %v5130_v22, 5  ;;  %v5138_v53 = vrot.slane %v5136_v45, 5  ;;  %v10535_v13 = vcombine.low %v10533_v3, %v10534_v60 }
 0x5c6   : > { %v4970_v30 = vrot.slane %v4969_v52, 4 }
 0x5c8   : > { %6899 = vmatmul.mubr.msk.bf16.gmra.mrb[12].mxu0 %vm679_vm1, %v6366_v10  ;;  %v4975_v26 = vsel %vm9341_vm15, %v4970_v30, %v4974_v16 }
 0x5c9   : > { %6902 = vmatprep.mubr.msk.bf16.mxu0 %vm679_vm1, %v6367_v36  ;;  %v6384_v46 = vcombine.low %v4796_v6, %v4975_v26  ;;  %v10292_v6 = vld [vmem:[#allocation18] ss:$0 sm:$0xff] }
 0x5d0   : > { %6903 = vmatmul.mubr.msk.bf16.gmra.mrb[16].mxu0 %vm679_vm1, %v6368_v37 }
 0x5d1   : > { %6908 = vmatprep.mubr.msk.bf16.mxu0 %vm679_vm1, %v6377_v51 }
 0x5d8   : > { %6909 = vmatmul.mubr.msk.bf16.vlgmr.msra.gmra.mrb[4].mxu0 %vm679_vm1, %v6378_v38 }
 0x5d9   : > { %6925 = vmatpush3.bf16.msra.mxu0 %v5147_v28  ;;  %6912 = vmatprep.mubr.msk.bf16.mxu0 %vm679_vm1, %v6379_v32 }
 0x5da   : > { %7262 = vmatprep.subr.msk.bf16.mxu0 %vm692_vm0, %v5376_v24 }
 0x5e0   : > { %6913 = vmatmul.mubr.msk.bf16.gmra.mrb[8].mxu0 %vm679_vm1, %v6380_v5 }
 0x5e1   : > { %6916 = vmatprep.mubr.msk.bf16.mxu0 %vm679_vm1, %v6381_v58 }
 0x5e8   : > { %6917 = vmatmul.mubr.msk.bf16.gmra.mrb[12].mxu0 %vm679_vm1, %v6382_v47 }
 0x5e9   : > { %6920 = vmatprep.mubr.msk.bf16.mxu0 %vm679_vm1, %v6383_v11 }
 0x5f0   : > { %6921 = vmatmul.mubr.msk.bf16.gmra.mrb[16].mxu0 %vm679_vm1, %v6384_v46 }
 0x5f1   : > { %6926 = vmatprep.mubr.msk.bf16.mxu0 %vm679_vm1, %v10109_v54  ;;  %v5133_v54 = vor.u32 %v5132_v57, %v5129_v2 }
 0x5f8   : > { %6927 = vmatmul.mubr.msk.bf16.vlgmr.msra.gmra.mrb[4].mxu0 %vm679_vm1, %v10123_v35  ;;  %v5134_v35 = vrot.slane %v5133_v54, 4 }
 0x5f9   : > { %6943 = vmatpush3.bf16.msra.mxu0 %v5426_v44  ;;  %6930 = vmatprep.mubr.msk.bf16.mxu0 %vm679_vm1, %v10149_v31 }
 0x5fa   : > { %7263 = vmatprep.subr.msk.bf16.mxu0 %vm692_vm0, %v5547_v20  ;;  %v5139_v31 = vsel %vm9341_vm15, %v5134_v35, %v5138_v53 }
 0x5fb   : > { %v6393_v17 = vcombine.low %v4975_v26, %v5139_v31 }
 0x600   : > { %6931 = vmatmul.mubr.msk.bf16.gmra.mrb[8].mxu0 %vm679_vm1, %v10156_v49  ;;  %v10524_v49 = vcombine.low %v9885_v42, %v9903_v63  ;;  %v5710_v42 = vsel %vm692_vm0, %v5703_v0, 0  ;;  %v10530_v63 = vld [vmem:[#allocation30_spill] sm:$0xff] }
 0x601   : > { %6934 = vmatprep.mubr.msk.bf16.mxu0 %vm679_vm1, %v6366_v10  ;;  %v10527_v10 = vcombine.low %v9946_v62, %v9958_v41  ;;  %v10532_v19 = vcombine.low %v10530_v63, %v10531_v55  ;;  %v10538_v62 = vcombine.low %v10536_v15, %v10537_v9  ;;  %v10539_v41 = vld [vmem:[#allocation36_spill] sm:$0xff] }
 0x608   : > { %6935 = vmatmul.mubr.msk.bf16.gmra.mrb[12].mxu0 %vm679_vm1, %v6367_v36  ;;  %v10529_v36 = vcombine.low %v9965_v4, %v10528_v8  ;;  %v10541_v4 = vcombine.low %v10539_v41, %v10540_v29 }
 0x609   : > { %6938 = vmatprep.mubr.msk.bf16.mxu0 %vm679_vm1, %v6368_v37 }
 0x610   : > { %6939 = vmatmul.mubr.msk.bf16.gmra.mrb[16].mxu0 %vm679_vm1, %v6393_v17 }
 0x611   : > { %6944 = vmatprep.mubr.msk.bf16.mxu0 %vm679_vm1, %v10524_v49 }
 0x618   : > { %6945 = vmatmul.mubr.msk.bf16.vlgmr.msra.gmra.mrb[4].mxu0 %vm679_vm1, %v9927_v50 }
 0x619   : > { %6961 = vmatpush3.bf16.msra.mxu0 %v5582_v48  ;;  %6948 = vmatprep.mubr.msk.bf16.mxu0 %vm679_vm1, %v9954_v14 }
 0x61a   : > { %7264 = vmatprep.subr.msk.bf16.mxu0 %vm692_vm0, %v5703_v0 }
 0x620   : > { %6949 = vmatmul.mubr.msk.bf16.gmra.mrb[8].mxu0 %vm679_vm1, %v9973_v7 }
 0x621   : > { %6952 = vmatprep.mubr.msk.bf16.mxu0 %vm679_vm1, %v9989_v34 }
 0x628   : > { %6953 = vmatmul.mubr.msk.bf16.gmra.mrb[12].mxu0 %vm679_vm1, %v10004_v1 }
 0x629   : > { %6956 = vmatprep.mubr.msk.bf16.mxu0 %vm679_vm1, %v10030_v27 }
 0x630   : > { %6957 = vmatmul.mubr.msk.bf16.gmra.mrb[16].mxu0 %vm679_vm1, %v10050_v40 }
 0x631   : > { %6962 = vmatprep.mubr.msk.bf16.mxu0 %vm679_vm1, %v10525_v21 }
 0x638   : > { %6963 = vmatmul.mubr.msk.bf16.vlgmr.msra.gmra.mrb[4].mxu0 %vm679_vm1, %v10526_v33 }
 0x639   : > { %6979 = vmatpush3.bf16.msra.mxu0 %v5710_v42  ;;  %6966 = vmatprep.mubr.msk.bf16.mxu0 %vm679_vm1, %v10527_v10 }
 0x640   : > { %6967 = vmatmul.mubr.msk.bf16.gmra.mrb[8].mxu0 %vm679_vm1, %v10529_v36 }
 0x641   : > { %6970 = vmatprep.mubr.msk.bf16.mxu0 %vm679_vm1, %v10532_v19 }
 0x648   : > { %6971 = vmatmul.mubr.msk.bf16.gmra.mrb[12].mxu0 %vm679_vm1, %v10535_v13 }
 0x649   : > { %6974 = vmatprep.mubr.msk.bf16.mxu0 %vm679_vm1, %v10538_v62 }
 0x650   : > { %6975 = vmatmul.mubr.msk.bf16.gmra.mrb[16].mxu0 %vm679_vm1, %v10541_v4 }
 0x651   : > { %6980 = vmatprep.mubr.msk.bf16.mxu0 %vm679_vm1, %v9927_v50  ;;  %v10542_v50 = vld [vmem:[#allocation37_spill] sm:$0xff] }
 0x652   : > { %v10543_v56 = vcombine.low %v10540_v29, %v10542_v50 }
 0x658   : > { %6981 = vmatmul.mubr.msk.bf16.vlgmr.msra.gmra.mrb[4].mxu0 %vm679_vm1, %v9954_v14  ;;  %v10290_v14 = vld [vmem:[#allocation17] ss:$0 sm:$0xff] }
 0x659   : > { %6984 = vmatprep.mubr.msk.bf16.mxu0 %vm679_vm1, %v9973_v7 }
 0x660   : > { %6985 = vmatmul.mubr.msk.bf16.gmra.mrb[8].mxu0 %vm679_vm1, %v9989_v34 }
 0x661   : > { %6988 = vmatprep.mubr.msk.bf16.mxu0 %vm679_vm1, %v10004_v1 }
 0x668   : > { %6989 = vmatmul.mubr.msk.bf16.gmra.mrb[12].mxu0 %vm679_vm1, %v10030_v27 }
 0x669   : > { %6992 = vmatprep.mubr.msk.bf16.mxu0 %vm679_vm1, %v10050_v40 }
 0x670   : > { %6993 = vmatmul.mubr.msk.bf16.gmra.mrb[16].mxu0 %vm679_vm1, %v10543_v56 }
 0x72b   : > { %v6982_v7 = vpop.f32.mrb[4].mxu0 }
 0x72c   : > { %v5834_v34 = vmul.f32 %v6982_v7, %v10290_v14  ;;  %v5746_v37 = vpop.f32.mrb[5].mxu0 }
 0x72d   : > { %v5832_v1 = vmul.f32 %v10290_v14, %v5746_v37  ;;  %v6983_v27 = vpop.f32.mrb[6].mxu0 }
 0x72e   : > { %v5857_v51 = vadd.f32 %v10292_v6, %v5834_v34  ;;  %v5835_v40 = vmul.f32 %v6983_v27, %v10290_v14  ;;  %v5749_v38 = vpop.f32.mrb[7].mxu0 }
 0x72f   : > { %v5855_v28 = vadd.f32 %v10292_v6, %v5832_v1  ;;  %v5833_v32 = vmul.f32 %v10290_v14, %v5749_v38 }
 0x730   : > { %v5873_v24 = vmax.f32 %v5857_v51, 0.0  ;;  %v5858_v43 = vadd.f32 %v10292_v6, %v5835_v40 }
 0x731   : > { %v5871_v25 = vmax.f32 %v5855_v28, 0.0  ;;  %v5856_v23 = vadd.f32 %v10292_v6, %v5833_v32 }
 0x732   : > { %v5889_v5 = vpack.c.bf16 %v5873_v24, %v5873_v24  ;;  %v5874_v58 = vmax.f32 %v5858_v43, 0.0 }
 0x733   : > { %v5887_v61 = vpack.c.bf16 %v5871_v25, %v5871_v25  ;;  %v5872_v12 = vmax.f32 %v5856_v23, 0.0  ;;  %v6986_v52 = vpop.f32.mrb[8].mxu0 }
 0x734   : > { %5906 = vst.msk [vmem:[%s10304_s30 + $0x8] sm:$0xf] %vm3996_vm8, %v5889_v5  ;;  %v5890_v59 = vpack.c.bf16 %v5874_v58, %v5874_v58  ;;  %v5838_v47 = vmul.f32 %v6986_v52, %v10290_v14  ;;  %v5762_v11 = vpop.f32.mrb[9].mxu0 }
 0x735   : > { %5904 = vst.msk [vmem:[%s10304_s30] sm:$0xf] %vm3996_vm8, %v5887_v61  ;;  %v5888_v30 = vpack.c.bf16 %v5872_v12, %v5872_v12  ;;  %v5836_v16 = vmul.f32 %v10290_v14, %v5762_v11  ;;  %v6987_v26 = vpop.f32.mrb[10].mxu0 }
 0x736   : > { %5907 = vst.msk [vmem:[%s10304_s30 + $0xc] sm:$0xf] %vm3996_vm8, %v5890_v59  ;;  %v5861_v46 = vadd.f32 %v10292_v6, %v5838_v47  ;;  %v5839_v44 = vmul.f32 %v6987_v26, %v10290_v14  ;;  %v5765_v20 = vpop.f32.mrb[11].mxu0 }
 0x737   : > { %5905 = vst.msk [vmem:[%s10304_s30 + $0x4] sm:$0xf] %vm3996_vm8, %v5888_v30  ;;  %v5859_v39 = vadd.f32 %v10292_v6, %v5836_v16  ;;  %v5837_v18 = vmul.f32 %v10290_v14, %v5765_v20 }
 0x738   : > { %v5877_v22 = vmax.f32 %v5861_v46, 0.0  ;;  %v5862_v2 = vadd.f32 %v10292_v6, %v5839_v44 }
 0x739   : > { %v5875_v57 = vmax.f32 %v5859_v39, 0.0  ;;  %v5860_v54 = vadd.f32 %v10292_v6, %v5837_v18 }
 0x73a   : > { %v5893_v45 = vpack.c.bf16 %v5877_v22, %v5877_v22  ;;  %v5878_v35 = vmax.f32 %v5862_v2, 0.0 }
 0x73b   : > { %v5891_v53 = vpack.c.bf16 %v5875_v57, %v5875_v57  ;;  %v5876_v31 = vmax.f32 %v5860_v54, 0.0  ;;  %v6990_v17 = vpop.f32.mrb[12].mxu0 }
 0x73c   : > { %5910 = vst.msk [vmem:[%s10304_s30 + $0x18] sm:$0xf] %vm3996_vm8, %v5893_v45  ;;  %v5894_v49 = vpack.c.bf16 %v5878_v35, %v5878_v35  ;;  %v5842_v48 = vmul.f32 %v6990_v17, %v10290_v14  ;;  %v5778_v0 = vpop.f32.mrb[13].mxu0 }
 0x73d   : > { %5908 = vst.msk [vmem:[%s10304_s30 + $0x10] sm:$0xf] %vm3996_vm8, %v5891_v53  ;;  %v5892_v21 = vpack.c.bf16 %v5876_v31, %v5876_v31  ;;  %v5840_v42 = vmul.f32 %v10290_v14, %v5778_v0  ;;  %v6991_v33 = vpop.f32.mrb[14].mxu0 }
 0x73e   : > { %5911 = vst.msk [vmem:[%s10304_s30 + $0x1c] sm:$0xf] %vm3996_vm8, %v5894_v49  ;;  %v5865_v10 = vadd.f32 %v10292_v6, %v5842_v48  ;;  %v5843_v8 = vmul.f32 %v6991_v33, %v10290_v14  ;;  %v5781_v36 = vpop.f32.mrb[15].mxu0 }
 0x73f   : > { %5909 = vst.msk [vmem:[%s10304_s30 + $0x14] sm:$0xf] %vm3996_vm8, %v5892_v21  ;;  %v5863_v63 = vadd.f32 %v10292_v6, %v5840_v42  ;;  %v5841_v55 = vmul.f32 %v10290_v14, %v5781_v36 }
 0x740   : > { %v5881_v19 = vmax.f32 %v5865_v10, 0.0  ;;  %v5866_v3 = vadd.f32 %v10292_v6, %v5843_v8 }
 0x741   : > { %v5879_v60 = vmax.f32 %v5863_v63, 0.0  ;;  %v5864_v13 = vadd.f32 %v10292_v6, %v5841_v55 }
 0x742   : > { %v5897_v15 = vpack.c.bf16 %v5881_v19, %v5881_v19  ;;  %v5882_v9 = vmax.f32 %v5866_v3, 0.0 }
 0x743   : > { %v5895_v62 = vpack.c.bf16 %v5879_v60, %v5879_v60  ;;  %v5880_v41 = vmax.f32 %v5864_v13, 0.0  ;;  %v6994_v29 = vpop.f32.mrb[16].mxu0 }
 0x744   : > { %5914 = vst.msk [vmem:[%s10304_s30 + $0x28] sm:$0xf] %vm3996_vm8, %v5897_v15  ;;  %v5898_v4 = vpack.c.bf16 %v5882_v9, %v5882_v9  ;;  %v5846_v50 = vmul.f32 %v6994_v29, %v10290_v14  ;;  %v5794_v56 = vpop.f32.mrb[17].mxu0 }
 0x745   : > { %5912 = vst.msk [vmem:[%s10304_s30 + $0x20] sm:$0xf] %vm3996_vm8, %v5895_v62  ;;  %v5896_v7 = vpack.c.bf16 %v5880_v41, %v5880_v41  ;;  %v5844_v34 = vmul.f32 %v10290_v14, %v5794_v56  ;;  %v6995_v37 = vpop.f32.mrb[18].mxu0 }
 0x746   : > { %5915 = vst.msk [vmem:[%s10304_s30 + $0x2c] sm:$0xf] %vm3996_vm8, %v5898_v4  ;;  %v5869_v1 = vadd.f32 %v10292_v6, %v5846_v50  ;;  %v5847_v27 = vmul.f32 %v6995_v37, %v10290_v14  ;;  %v5797_v51 = vpop.f32.mrb[19].mxu0 }
 0x747   : > { %5913 = vst.msk [vmem:[%s10304_s30 + $0x24] sm:$0xf] %vm3996_vm8, %v5896_v7  ;;  %v5867_v40 = vadd.f32 %v10292_v6, %v5844_v34  ;;  %v5845_v38 = vmul.f32 %v10290_v14, %v5797_v51 }
 0x748   : > { %v5885_v28 = vmax.f32 %v5869_v1, 0.0  ;;  %v5870_v32 = vadd.f32 %v10292_v6, %v5847_v27 }
 0x749   : > { %v5883_v24 = vmax.f32 %v5867_v40, 0.0  ;;  %v5868_v43 = vadd.f32 %v10292_v6, %v5845_v38 }
 0x74a   : > { %v5901_v25 = vpack.c.bf16 %v5885_v28, %v5885_v28  ;;  %v5886_v23 = vmax.f32 %v5870_v32, 0.0 }
 0x74b   : > { %v5899_v5 = vpack.c.bf16 %v5883_v24, %v5883_v24  ;;  %v5884_v58 = vmax.f32 %v5868_v43, 0.0 }
 0x74c   : > { %5918 = vst.msk [vmem:[%s10304_s30 + $0x38] sm:$0xf] %vm3996_vm8, %v5901_v25  ;;  %v5902_v61 = vpack.c.bf16 %v5886_v23, %v5886_v23 }
 0x74d   : > { %5916 = vst.msk [vmem:[%s10304_s30 + $0x30] sm:$0xf] %vm3996_vm8, %v5899_v5  ;;  %v5900_v14 = vpack.c.bf16 %v5884_v58, %v5884_v58 }
 0x74e   : > { %5919 = vst.msk [vmem:[%s10304_s30 + $0x3c] sm:$0xf] %vm3996_vm8, %v5902_v61 }
 0x74f   : > { %5917 = vst.msk [vmem:[%s10304_s30 + $0x34] sm:$0xf] %vm3996_vm8, %v5900_v14 }
 0x750   : > { %7740 = shalt.err (!%p7737_p7)
}
 0x751   : > { %s7741_s17 = scalar_lea.hbm %s10361_s28, 1024  ;;  %s7745_s20 = scalar_lea.hbm %s10424_s10, 2048 }
 0x752   : > { %p7742_p4 = scmp.ne.s32.totalorder %s10361_s28, %s7741_s17  ;;  %p7746_p3 = scmp.lt.u32.totalorder %s10361_s28, %s10424_s10 }
 0x753   : > { %p7747_p13 = scmp.lt.u32.totalorder %s7745_s20, %s7741_s17  ;;  %p7749_p10 = scmp.lt.u32.totalorder %s7741_s17, %s10361_s28 }
 0x754   : > { %p7743_p1 = pnand %p7742_p4, %p10544_p11 }
 0x755   : > { %p7748_p0 = por %p7747_p13, %p7746_p3 }
 0x756   : > { %p7744_p6 = pneg %p7743_p1 }
 0x757   : > { %p7750_p12 = por %p7749_p10, %p7748_p0 }
 0x759   : > { %p7751_p8 = pnand %p7750_p12, %p7744_p6 }
 0x75b   : > { %7754 = shalt.err (!%p7751_p8)
}
 0x75c   : > { %s7836_s26 = smov 64  }
 0x75d   : > { %7301 = dma.vmem_to_hbm [thread:$0]  (%p10544_p11), %s10365_s21, 1024, %s10361_s28, %s5921_s19, %s7836_s26, %s7836_s26, %s7832_s22  }
 0x75e PF: > { %s5949_s30 = sand.u32 1, %s7805_s13   ;;  %p10545_p2 = scmp.ne.s32.totalorder %s10466_s29, 0 }
 0x75f   : > { %p10546_p9 = scmp.ge.s32.totalorder %s7817_s16, 2  ;;  %s5950_s24 = scalar_lea.sflag [#allocation5], %s5949_s30 }
 0x761   : > { %p7336_p5 = pnand %p10546_p9, %p10545_p2 }
 0x763   : > { %7800 = dma.done.wait (!%p7336_p5), %s5950_s24, 1024  }
 0x764   : > { %7802 = vsyncadd (!%p7336_p5), %s5950_s24, 4294966272  ;;  %p30_p7 = scmp.ge.s32.totalorder %s8105_s25, 4   ;;  %s10547_s13 = smov %s7809_s14 }
 0x765   : > { %s10548_s14 = smov %s7813_s15  ;;  %s10549_s15 = smov %s8116_s23 }
 0x766   : > { %s10550_s16 = smov %s8105_s25  ;;  %32 = sbr.rel (!%p30_p7) target bundleno = 20 (0x14), region = 152 }
 0x76d   :  { %5955 = vsyncpa [#allocation4], 1 }
 0x76e   :  { %5957 = vsyncpa [#allocation4 + $0x1], 1 }
 0x76f   :  { %5958 = vsyncpa [#allocation7], 1 }
 0x770   :  { %5960 = vsyncpa [#allocation7 + $0x1], 1 }
 0x771   :  { %5961 = vsyncpa [#allocation10], 1 }
 0x772   :  { %5962 = vsyncpa [#allocation13], 1 }
 0x773   :  { %5963 = vsyncpa [#allocation16], 1 }
 0x774   :  { %5964 = vsyncpa [#allocation19], 1 }
 0x775   :  { %5965 = vsyncpa [#allocation5], 1 }
 0x776   :  { %5967 = vsyncpa [#allocation5 + $0x1], 1 }

</bundles_post_ra>
